<compile_context>
chip_gen: v6e
topology: v6e:2x2x1
jax: 0.10.0
libtpu: 0.0.40
codegen_flags: <defaults>
</compile_context>

<pallas_src>
import jax
import jax.numpy as jnp
from jax.experimental import pallas as pl
from jax.experimental.pallas import tpu as pltpu

# ----------------------- config (mirrors `args`) -----------------------
EMB_DIM = 32          # args.embedding_dim
HID_DIM = 32          # args.hidden_dim
VOCAB = 32
NUM_TAGS = 16
NUM_LANGS = 4
C_PAD, T_PAD, O_PAD = 0, 0, 0
# args.multitask_learning = False, args.char_att = 'bah', eval-mode dropout.

assert EMB_DIM == HID_DIM, "weight slab packing assumes E == H"


def _ceil128(n):
    return ((n + 127) // 128) * 128


_H = HID_DIM
# ---- w32 slab (row dim = E == H) column offsets, each block 128-aligned ----
OFF_ENC_IH = 0                                      # [fwd_wih | bwd_wih] (E, 8H)
OFF_ENC_FHH = OFF_ENC_IH + _ceil128(8 * _H)
OFF_ENC_BHH = OFF_ENC_FHH + _ceil128(4 * _H)
OFF_SA_QKV = OFF_ENC_BHH + _ceil128(4 * _H)         # [wq | wk | wv] (E, 3H)
OFF_DEC_IH = OFF_SA_QKV + _ceil128(3 * _H)
OFF_DEC_HH = OFF_DEC_IH + _ceil128(4 * _H)
OFF_QBOTH = OFF_DEC_HH + _ceil128(4 * _H)           # [ca_wq | ta_wq] (H, 2H)
OFF_KBOTH = OFF_QBOTH + _ceil128(2 * _H)            # [ca_wk | ta_wk] (H, 2H)
W32_COLS = OFF_KBOTH + _ceil128(2 * _H)

# ---- w128 slab (row dim = 4H) column offsets ----
OFF_CLS_W1 = 0                                      # (4H, 4H)
OFF_CLS_W2 = OFF_CLS_W1 + _ceil128(4 * _H)          # (4H, V)
OFF_SH_W = OFF_CLS_W2 + _ceil128(VOCAB)             # (2H, H), zero-padded rows
W128_COLS = OFF_SH_W + _ceil128(_H)

# ---- bias slab (1 row) column offsets ----
B_ENC = 0                                           # [fwd_b | bwd_b] (1, 8H)
B_SAQKV = B_ENC + _ceil128(8 * _H)                  # [bq | bk | bv]
B_SH = B_SAQKV + _ceil128(3 * _H)
B_DEC = B_SH + _ceil128(_H)
B_QB = B_DEC + _ceil128(4 * _H)                     # [ca_bq | ta_bq]
B_KB = B_QB + _ceil128(2 * _H)                      # [ca_bk | ta_bk]
B_CAV = B_KB + _ceil128(2 * _H)
B_TAV = B_CAV + _ceil128(_H)
B_CLS1 = B_TAV + _ceil128(_H)
B_CLS2 = B_CLS1 + _ceil128(4 * _H)
BIAS_COLS = B_CLS2 + _ceil128(VOCAB)

OUT_LANES = 128       # [preds (V) | att_c (Ls) | att_t (T) | zero pad]
STAGE_LANES = 256     # [h | c | ctx_c | ctx_t (4H) | att_c | att_t | zero pad]


def _vmem():
    return pl.BlockSpec(memory_space=pltpu.MemorySpace.VMEM)


# ===================== fused Pallas kernel =====================

def inflector_kernel(lemma_e_ref, tags_e_ref, lemma_mask_ref, tags_mask_ref,
                     dec_in_ref, w32_ref, w128_ref, bias_ref,
                     out_ref, he_ref, stage_ref):
    f32 = jnp.float32
    B, Ls, E = lemma_e_ref.shape
    T = tags_e_ref.shape[1]
    Gd = dec_in_ref.shape[1]
    H = HID_DIM
    V = VOCAB

    # -------- loop-invariant weight / bias views (static slab slices) --------
    w_enc_ih = w32_ref[:, OFF_ENC_IH:OFF_ENC_IH + 8 * H]
    w_enc_fhh = w32_ref[:, OFF_ENC_FHH:OFF_ENC_FHH + 4 * H]
    w_enc_bhh = w32_ref[:, OFF_ENC_BHH:OFF_ENC_BHH + 4 * H]
    w_sa_qkv = w32_ref[:, OFF_SA_QKV:OFF_SA_QKV + 3 * H]
    w_dec_ih = w32_ref[:, OFF_DEC_IH:OFF_DEC_IH + 4 * H]
    w_dec_hh = w32_ref[:, OFF_DEC_HH:OFF_DEC_HH + 4 * H]
    w_q_both = w32_ref[:, OFF_QBOTH:OFF_QBOTH + 2 * H]
    w_k_both = w32_ref[:, OFF_KBOTH:OFF_KBOTH + 2 * H]
    sh_w = w128_ref[0:2 * H, OFF_SH_W:OFF_SH_W + H]          # unsplit (2H, H)
    cls_w1 = w128_ref[:, OFF_CLS_W1:OFF_CLS_W1 + 4 * H]      # unsplit (4H, 4H)
    cls_w2 = w128_ref[:, OFF_CLS_W2:OFF_CLS_W2 + V]

    b_enc = bias_ref[0:1, B_ENC:B_ENC + 8 * H]
    b_saqkv = bias_ref[0:1, B_SAQKV:B_SAQKV + 3 * H]
    b_sh = bias_ref[0:1, B_SH:B_SH + H]
    b_dec = bias_ref[0:1, B_DEC:B_DEC + 4 * H]
    b_qboth = bias_ref[0:1, B_QB:B_QB + 2 * H]
    b_kboth = bias_ref[0:1, B_KB:B_KB + 2 * H]
    v_ca = bias_ref[0:1, B_CAV:B_CAV + H]
    v_ta = bias_ref[0:1, B_TAV:B_TAV + H]
    b_cls1 = bias_ref[0:1, B_CLS1:B_CLS1 + 4 * H]
    b_cls2 = bias_ref[0:1, B_CLS2:B_CLS2 + V]

    def lstm_cell(gates, c):
        ig = jax.nn.sigmoid(gates[:, 0 * H:1 * H])
        fg = jax.nn.sigmoid(gates[:, 1 * H:2 * H])
        gg = jnp.tanh(gates[:, 2 * H:3 * H])
        og = jax.nn.sigmoid(gates[:, 3 * H:4 * H])
        c_new = fg * c + ig * gg
        return og * jnp.tanh(c_new), c_new

    # ============================ encoder ============================
    # Hoisted input projection for BOTH directions: one (B*Ls,E)@(E,8H) matmul.
    le2 = lemma_e_ref[...].reshape(B * Ls, E)
    xenc = (jnp.dot(le2, w_enc_ih, preferred_element_type=f32) + b_enc
            ).reshape(B, Ls, 8 * H)

    # Interleaved forward/backward recurrences (two independent chains).
    hf = jnp.zeros((B, H), f32); cf = jnp.zeros((B, H), f32)
    hb = jnp.zeros((B, H), f32); cb = jnp.zeros((B, H), f32)
    for s in range(Ls):
        tb = Ls - 1 - s
        gf = xenc[:, s, 0:4 * H] + jnp.dot(hf, w_enc_fhh,
                                           preferred_element_type=f32)
        gb = xenc[:, tb, 4 * H:8 * H] + jnp.dot(hb, w_enc_bhh,
                                                preferred_element_type=f32)
        hf, cf = lstm_cell(gf, cf)
        hb, cb = lstm_cell(gb, cb)
        he_ref[:, s, 0:H] = hf
        he_ref[:, tb, H:2 * H] = hb

    # scale_hidden on the lane-concat [h_fwd | h_bwd] with the unsplit weight.
    he = he_ref[...].reshape(B * Ls, 2 * H)
    lemma_keys = (jnp.dot(he, sh_w, preferred_element_type=f32) + b_sh
                  ).reshape(B, Ls, H)

    # Tag self-attention head: merged q/k/v projection (one (B*T,E)@(E,3H)).
    te2 = tags_e_ref[...].reshape(B * T, E)
    qkv = jnp.dot(te2, w_sa_qkv, preferred_element_type=f32) + b_saqkv
    q = qkv[:, 0:H].reshape(B, T, H)
    k = qkv[:, H:2 * H].reshape(B, T, H)
    v = qkv[:, 2 * H:3 * H].reshape(B, T, H)
    tmask = tags_mask_ref[...]
    scores = jnp.einsum('bqh,bkh->bqk', q, k,
                        preferred_element_type=f32) / jnp.sqrt(jnp.float32(H))
    scores = scores + (1.0 - tmask)[:, None, :] * (-1e9)
    m = jnp.max(scores, axis=-1, keepdims=True)
    e = jnp.exp(scores - m)
    att = e / jnp.sum(e, axis=-1, keepdims=True)
    tag_keys = jnp.einsum('bqk,bkh->bqh', att, v, preferred_element_type=f32)

    # ============================ decoder ============================
    lbias = (1.0 - lemma_mask_ref[...]) * (-1e9)              # (B, Ls)
    tbias = (1.0 - tmask) * (-1e9)                            # (B, T)

    # Hoisted decoder input projection (one (B*Gd,E)@(E,4H) matmul).
    xin2 = dec_in_ref[...].reshape(B * Gd, E)
    xp = (jnp.dot(xin2, w_dec_ih, preferred_element_type=f32) + b_dec
          ).reshape(B, Gd, 4 * H)

    # Hoisted Bahdanau key projections, char+tag merged into ONE matmul.
    keys_rows = jnp.concatenate([lemma_keys.reshape(B * Ls, H),
                                 tag_keys.reshape(B * T, H)], axis=0)
    kp = jnp.dot(keys_rows, w_k_both, preferred_element_type=f32) + b_kboth
    lk = kp[0:B * Ls, 0:H].reshape(B, Ls, H)
    tk = kp[B * Ls:B * Ls + B * T, H:2 * H].reshape(B, T, H)

    def bahdanau(qp, keys_proj, keys, bias, v_vec):
        e_ = jnp.tanh(qp[:, None, :] + keys_proj)             # (B, L, H)
        sc = jnp.sum(e_ * v_vec, axis=-1) + bias              # (B, L)
        mm = jnp.max(sc, axis=-1, keepdims=True)
        ex = jnp.exp(sc - mm)
        a = ex / jnp.sum(ex, axis=-1, keepdims=True)
        ctx = jnp.sum(a[:, :, None] * keys, axis=1)           # (B, H)
        return ctx, a

    pad_w = STAGE_LANES - 4 * H - Ls - T
    zpad = jnp.zeros((B, pad_w), f32) if pad_w > 0 else None

    h = jnp.zeros((B, H), f32)
    c = jnp.zeros((B, H), f32)
    for t in range(Gd):
        gates = xp[:, t, :] + jnp.dot(h, w_dec_hh, preferred_element_type=f32)
        h, c = lstm_cell(gates, c)
        # Merged attention query projection: one (B,H)@(H,2H) per step.
        q_both = jnp.dot(h, w_q_both, preferred_element_type=f32) + b_qboth
        ctx_c, att_c = bahdanau(q_both[:, 0:H], lk, lemma_keys, lbias, v_ca)
        ctx_t, att_t = bahdanau(q_both[:, H:2 * H], tk, tag_keys, tbias, v_ta)
        pieces = [h, c, ctx_c, ctx_t, att_c, att_t]
        if zpad is not None:
            pieces.append(zpad)
        # Single lane-dense (B, 256) store per step (no masked 32/8/6-lane vst).
        stage_ref[:, t, :] = jnp.concatenate(pieces, axis=-1)

    # char_classifier over all steps at once with the unsplit K=4H=128 weight.
    S = stage_ref[...].reshape(B * Gd, STAGE_LANES)
    feats = S[:, 0:4 * H]
    h1 = jnp.maximum(jnp.dot(feats, cls_w1, preferred_element_type=f32)
                     + b_cls1, 0.0)
    preds = jnp.dot(h1, cls_w2, preferred_element_type=f32) + b_cls2  # (B*Gd,V)

    attc = S[:, 4 * H:4 * H + Ls]
    attt = S[:, 4 * H + Ls:4 * H + Ls + T]
    opad_w = OUT_LANES - V - Ls - T
    out_pieces = [preds, attc, attt]
    if opad_w > 0:
        out_pieces.append(jnp.zeros((B * Gd, opad_w), f32))
    out_ref[...] = jnp.concatenate(out_pieces, axis=-1
                                   ).reshape(B, Gd, OUT_LANES)


# ===================== Pallas wrapper =====================

def fused_inflector_call(lemma_e, tags_e, lemma_mask, tags_mask, dec_in,
                         packed):
    B, Ls, _ = lemma_e.shape
    T = tags_e.shape[1]
    Gd = dec_in.shape[1]
    H = HID_DIM
    V = VOCAB
    assert V + Ls + T <= OUT_LANES
    assert 4 * H + Ls + T <= STAGE_LANES

    args = (lemma_e, tags_e, lemma_mask, tags_mask, dec_in,
            packed['w32'], packed['w128'], packed['bias'])
    out = pl.pallas_call(
        inflector_kernel,
        out_shape=jax.ShapeDtypeStruct((B, Gd, OUT_LANES), jnp.float32),
        in_specs=[_vmem() for _ in args],
        out_specs=_vmem(),
        scratch_shapes=[pltpu.VMEM((B, Ls, 2 * H), jnp.float32),
                        pltpu.VMEM((B, Gd, STAGE_LANES), jnp.float32)],
    )(*args)
    preds = out[:, :, 0:V]                       # (B, Gd, V)
    atts_c = out[:, :, V:V + Ls]                 # (B, Gd, Ls)
    atts_t = out[:, :, V + Ls:V + Ls + T]        # (B, Gd, T)
    return preds, atts_c, atts_t


# ===================== parameters =====================

def init_params(key):
    keys = iter(jax.random.split(key, 48))

    def nrm(shape, scale=0.1):
        return (scale * jax.random.normal(next(keys), shape)).astype(jnp.float32)

    p = {}
    p['lang_emb'] = nrm((NUM_LANGS, EMB_DIM))
    p['char_emb'] = nrm((VOCAB, EMB_DIM)).at[C_PAD].set(0.0)     # padding_idx
    p['tag_emb'] = nrm((NUM_TAGS, EMB_DIM)).at[T_PAD].set(0.0)   # padding_idx
    # bidirectional lemma_encoder LSTM (gate order i,f,g,o); b = b_ih + b_hh
    for d in ('f', 'b'):
        p[f'enc_{d}_wih'] = nrm((EMB_DIM, 4 * HID_DIM))
        p[f'enc_{d}_whh'] = nrm((HID_DIM, 4 * HID_DIM))
        p[f'enc_{d}_b'] = nrm((1, 4 * HID_DIM))
    # SelfAttentionHead(E, H) for tags
    p['sa_wq'], p['sa_bq'] = nrm((EMB_DIM, HID_DIM)), nrm((1, HID_DIM))
    p['sa_wk'], p['sa_bk'] = nrm((EMB_DIM, HID_DIM)), nrm((1, HID_DIM))
    p['sa_wv'], p['sa_bv'] = nrm((EMB_DIM, HID_DIM)), nrm((1, HID_DIM))
    # inflection_decoder LSTMCell
    p['dec_wih'] = nrm((EMB_DIM, 4 * HID_DIM))
    p['dec_whh'] = nrm((HID_DIM, 4 * HID_DIM))
    p['dec_b'] = nrm((1, 4 * HID_DIM))
    # scale_hidden Linear(2H, H)
    p['sh_w'], p['sh_b'] = nrm((2 * HID_DIM, HID_DIM)), nrm((1, HID_DIM))
    # char_attention (Bahdanau, args.char_att == 'bah') and tag_attention
    for a in ('ca', 'ta'):
        p[f'{a}_wq'], p[f'{a}_bq'] = nrm((HID_DIM, HID_DIM)), nrm((1, HID_DIM))
        p[f'{a}_wk'], p[f'{a}_bk'] = nrm((HID_DIM, HID_DIM)), nrm((1, HID_DIM))
        p[f'{a}_v'] = nrm((1, HID_DIM))
    # char_classifier Linear(4H,4H) -> ReLU -> Linear(4H, vocab)
    p['cls_w1'], p['cls_b1'] = nrm((4 * HID_DIM, 4 * HID_DIM)), nrm((1, 4 * HID_DIM))
    p['cls_w2'], p['cls_b2'] = nrm((4 * HID_DIM, VOCAB)), nrm((1, VOCAB))
    return p


def pack_params(p):
    """Pack all kernel weights into 3 slabs -> 3 input DMAs instead of ~35."""
    def place(slab, col, mat):
        return slab.at[:mat.shape[0], col:col + mat.shape[1]].set(mat)

    w32 = jnp.zeros((EMB_DIM, W32_COLS), jnp.float32)
    w32 = place(w32, OFF_ENC_IH,
                jnp.concatenate([p['enc_f_wih'], p['enc_b_wih']], axis=1))
    w32 = place(w32, OFF_ENC_FHH, p['enc_f_whh'])
    w32 = place(w32, OFF_ENC_BHH, p['enc_b_whh'])
    w32 = place(w32, OFF_SA_QKV,
                jnp.concatenate([p['sa_wq'], p['sa_wk'], p['sa_wv']], axis=1))
    w32 = place(w32, OFF_DEC_IH, p['dec_wih'])
    w32 = place(w32, OFF_DEC_HH, p['dec_whh'])
    w32 = place(w32, OFF_QBOTH,
                jnp.concatenate([p['ca_wq'], p['ta_wq']], axis=1))
    w32 = place(w32, OFF_KBOTH,
                jnp.concatenate([p['ca_wk'], p['ta_wk']], axis=1))

    w128 = jnp.zeros((4 * HID_DIM, W128_COLS), jnp.float32)
    w128 = place(w128, OFF_CLS_W1, p['cls_w1'])
    w128 = place(w128, OFF_CLS_W2, p['cls_w2'])
    w128 = place(w128, OFF_SH_W, p['sh_w'])        # rows 2H:4H stay zero

    bias = jnp.zeros((1, BIAS_COLS), jnp.float32)
    bias = place(bias, B_ENC,
                 jnp.concatenate([p['enc_f_b'], p['enc_b_b']], axis=1))
    bias = place(bias, B_SAQKV,
                 jnp.concatenate([p['sa_bq'], p['sa_bk'], p['sa_bv']], axis=1))
    bias = place(bias, B_SH, p['sh_b'])
    bias = place(bias, B_DEC, p['dec_b'])
    bias = place(bias, B_QB,
                 jnp.concatenate([p['ca_bq'], p['ta_bq']], axis=1))
    bias = place(bias, B_KB,
                 jnp.concatenate([p['ca_bk'], p['ta_bk']], axis=1))
    bias = place(bias, B_CAV, p['ca_v'])
    bias = place(bias, B_TAV, p['ta_v'])
    bias = place(bias, B_CLS1, p['cls_b1'])
    bias = place(bias, B_CLS2, p['cls_b2'])

    return {'w32': w32, 'w128': w128, 'bias': bias,
            'char_emb': p['char_emb'], 'lang_emb': p['lang_emb'],
            'tag_emb': p['tag_emb']}


# ===================== model forward =====================

@jax.jit
def inflector_forward(packed, lemma, lemma_mask, tags, tags_mask, gold):
    Gd = gold.shape[1] - 1

    # ---------- encode_inputs (embedding gathers stay in XLA) ----------
    lemma_chars_e = packed['char_emb'][lemma[:, 1:]]           # (B, Ls-1, E)
    lang_e = packed['lang_emb'][lemma[:, 0]]                   # (B, E)
    lemma_e = jnp.concatenate([lang_e[:, None, :], lemma_chars_e], axis=1)
    tags_e = packed['tag_emb'][tags]                           # (B, T, E)

    # ---------- decoder inputs (teacher forcing: sc_e == 1.0) ----------
    # NOTE: matches the original code, which indexes char2emb with lemma[:,0]
    # (the language-id column) for the start token.
    start_x = packed['char_emb'][lemma[:, 0]]                  # (B, E)
    gold_e = packed['char_emb'][gold[:, 1:]]                   # (B, Gd, E)
    dec_in = jnp.concatenate([start_x[:, None, :], gold_e[:, :Gd - 1, :]],
                             axis=1)                           # (B, Gd, E)

    # ---------- single fused Pallas call ----------
    preds, atts_c, atts_t = fused_inflector_call(
        lemma_e, tags_e, lemma_mask, tags_mask, dec_in, packed)

    # ---------- get_norms ----------
    pred_ids = jnp.argmax(preds, axis=-1)                      # (B, Gd)
    word_norms = jnp.sqrt(
        jnp.sum(packed['char_emb'][pred_ids] ** 2, axis=-1)).sum(axis=1)

    opsy_pred = 0   # args.multitask_learning == False
    opsx_pred = 0
    return preds, opsy_pred, opsx_pred, word_norms, atts_c, atts_t


# ===================== main =====================

if __name__ == "__main__":
    B, LS, T, G = 2, 8, 6, 7

    root = jax.random.PRNGKey(0)
    kp, k1, k2, k3, k4 = jax.random.split(root, 5)

    params = init_params(kp)
    packed = pack_params(params)          # packed once, outside the jit

    lang_ids = jax.random.randint(k1, (B, 1), 0, NUM_LANGS)
    char_ids = jax.random.randint(k2, (B, LS - 1), 1, VOCAB)
    lemma = jnp.concatenate([lang_ids, char_ids], axis=1).astype(jnp.int32)
    lemma_mask = jnp.ones((B, LS), jnp.float32).at[1, -2:].set(0.0)

    tags = jax.random.randint(k3, (B, T), 1, NUM_TAGS).astype(jnp.int32)
    tags_mask = jnp.ones((B, T), jnp.float32).at[0, -1].set(0.0)

    gold = jax.random.randint(k4, (B, G), 1, VOCAB).astype(jnp.int32)

    preds, opsy, opsx, word_norms, atts_c, atts_t = inflector_forward(
        packed, lemma, lemma_mask, tags, tags_mask, gold)

    jax.block_until_ready(preds)
    jax.block_until_ready(word_norms)
    jax.block_until_ready(atts_c)
    jax.block_until_ready(atts_t)
    word_norms_list = [float(x) for x in word_norms]   # mirrors .tolist()
    assert preds.shape == (B, G - 1, VOCAB)
    assert atts_c.shape == (B, G - 1, LS) and atts_t.shape == (B, G - 1, T)
    assert all(x == x for x in word_norms_list)        # no NaNs
    print("KERNEL_OK")
</pallas_src>

<mosaic_0001>
module attributes {stable_mosaic.version = 11 : i64} {
  func.func @inflector_kernel(%arg0: memref<2x8x32xf32, #tpu.memory_space<vmem>>, %arg1: memref<2x6x32xf32, #tpu.memory_space<vmem>>, %arg2: memref<2x8xf32, #tpu.memory_space<vmem>>, %arg3: memref<2x6xf32, #tpu.memory_space<vmem>>, %arg4: memref<2x6x32xf32, #tpu.memory_space<vmem>>, %arg5: memref<32x1152xf32, #tpu.memory_space<vmem>>, %arg6: memref<128x384xf32, #tpu.memory_space<vmem>>, %arg7: memref<1x1408xf32, #tpu.memory_space<vmem>>, %arg8: memref<2x6x128xf32, #tpu.memory_space<vmem>>, %arg9: memref<2x8x64xf32, #tpu.memory_space<vmem>>, %arg10: memref<2x6x256xf32, #tpu.memory_space<vmem>>) attributes {dimension_semantics = [], scalar_prefetch = 0 : i64, scratch_operands = 2 : i64, tpu.core_type = #tpu.core_type<tc>} {
    %c0 = arith.constant 0 : index
    %c0_0 = arith.constant 0 : index
    %0 = vector.load %arg5[%c0, %c0_0] : memref<32x1152xf32, #tpu.memory_space<vmem>>, vector<32x256xf32>
    %c0_1 = arith.constant 0 : index
    %c256 = arith.constant 256 : index
    %1 = vector.load %arg5[%c0_1, %c256] : memref<32x1152xf32, #tpu.memory_space<vmem>>, vector<32x128xf32>
    %c0_2 = arith.constant 0 : index
    %c384 = arith.constant 384 : index
    %2 = vector.load %arg5[%c0_2, %c384] : memref<32x1152xf32, #tpu.memory_space<vmem>>, vector<32x128xf32>
    %c0_3 = arith.constant 0 : index
    %c512 = arith.constant 512 : index
    %3 = vector.load %arg5[%c0_3, %c512] : memref<32x1152xf32, #tpu.memory_space<vmem>>, vector<32x96xf32>
    %c0_4 = arith.constant 0 : index
    %c640 = arith.constant 640 : index
    %4 = vector.load %arg5[%c0_4, %c640] : memref<32x1152xf32, #tpu.memory_space<vmem>>, vector<32x128xf32>
    %c0_5 = arith.constant 0 : index
    %c768 = arith.constant 768 : index
    %5 = vector.load %arg5[%c0_5, %c768] : memref<32x1152xf32, #tpu.memory_space<vmem>>, vector<32x128xf32>
    %c0_6 = arith.constant 0 : index
    %c896 = arith.constant 896 : index
    %6 = vector.load %arg5[%c0_6, %c896] : memref<32x1152xf32, #tpu.memory_space<vmem>>, vector<32x64xf32>
    %c0_7 = arith.constant 0 : index
    %c1024 = arith.constant 1024 : index
    %7 = vector.load %arg5[%c0_7, %c1024] : memref<32x1152xf32, #tpu.memory_space<vmem>>, vector<32x64xf32>
    %c0_8 = arith.constant 0 : index
    %c256_9 = arith.constant 256 : index
    %8 = vector.load %arg6[%c0_8, %c256_9] : memref<128x384xf32, #tpu.memory_space<vmem>>, vector<64x32xf32>
    %c0_10 = arith.constant 0 : index
    %c0_11 = arith.constant 0 : index
    %9 = vector.load %arg6[%c0_10, %c0_11] : memref<128x384xf32, #tpu.memory_space<vmem>>, vector<128x128xf32>
    %c0_12 = arith.constant 0 : index
    %c128 = arith.constant 128 : index
    %10 = vector.load %arg6[%c0_12, %c128] : memref<128x384xf32, #tpu.memory_space<vmem>>, vector<128x32xf32>
    %c0_13 = arith.constant 0 : index
    %c0_14 = arith.constant 0 : index
    %11 = vector.load %arg7[%c0_13, %c0_14] : memref<1x1408xf32, #tpu.memory_space<vmem>>, vector<1x256xf32>
    %c0_15 = arith.constant 0 : index
    %c256_16 = arith.constant 256 : index
    %12 = vector.load %arg7[%c0_15, %c256_16] : memref<1x1408xf32, #tpu.memory_space<vmem>>, vector<1x96xf32>
    %c0_17 = arith.constant 0 : index
    %c384_18 = arith.constant 384 : index
    %13 = vector.load %arg7[%c0_17, %c384_18] : memref<1x1408xf32, #tpu.memory_space<vmem>>, vector<1x32xf32>
    %c0_19 = arith.constant 0 : index
    %c512_20 = arith.constant 512 : index
    %14 = vector.load %arg7[%c0_19, %c512_20] : memref<1x1408xf32, #tpu.memory_space<vmem>>, vector<1x128xf32>
    %c0_21 = arith.constant 0 : index
    %c640_22 = arith.constant 640 : index
    %15 = vector.load %arg7[%c0_21, %c640_22] : memref<1x1408xf32, #tpu.memory_space<vmem>>, vector<1x64xf32>
    %c0_23 = arith.constant 0 : index
    %c768_24 = arith.constant 768 : index
    %16 = vector.load %arg7[%c0_23, %c768_24] : memref<1x1408xf32, #tpu.memory_space<vmem>>, vector<1x64xf32>
    %c0_25 = arith.constant 0 : index
    %c896_26 = arith.constant 896 : index
    %17 = vector.load %arg7[%c0_25, %c896_26] : memref<1x1408xf32, #tpu.memory_space<vmem>>, vector<1x32xf32>
    %c0_27 = arith.constant 0 : index
    %c1024_28 = arith.constant 1024 : index
    %18 = vector.load %arg7[%c0_27, %c1024_28] : memref<1x1408xf32, #tpu.memory_space<vmem>>, vector<1x32xf32>
    %c0_29 = arith.constant 0 : index
    %c1152 = arith.constant 1152 : index
    %19 = vector.load %arg7[%c0_29, %c1152] : memref<1x1408xf32, #tpu.memory_space<vmem>>, vector<1x128xf32>
    %c0_30 = arith.constant 0 : index
    %c1280 = arith.constant 1280 : index
    %20 = vector.load %arg7[%c0_30, %c1280] : memref<1x1408xf32, #tpu.memory_space<vmem>>, vector<1x32xf32>
    %c0_31 = arith.constant 0 : index
    %c0_32 = arith.constant 0 : index
    %c0_33 = arith.constant 0 : index
    %21 = vector.load %arg0[%c0_31, %c0_32, %c0_33] : memref<2x8x32xf32, #tpu.memory_space<vmem>>, vector<2x8x32xf32>
    %22 = vector.shape_cast %21 : vector<2x8x32xf32> to vector<16x32xf32>
    %cst = arith.constant dense<0.000000e+00> : vector<16x256xf32>
    %23 = tpu.matmul %22, %0, %cst {dimension_numbers = #tpu.dot_dimension_numbers<[1], [0], [0], [1], [0, 0, 1, 1], [], []>} : vector<16x32xf32>, vector<32x256xf32>, vector<16x256xf32> -> vector<16x256xf32>
    %24 = vector.broadcast %11 : vector<1x256xf32> to vector<16x256xf32>
    %25 = arith.addf %23, %24 : vector<16x256xf32>
    %26 = vector.shape_cast %25 : vector<16x256xf32> to vector<2x8x256xf32>
    %cst_34 = arith.constant 0.000000e+00 : f32
    %27 = vector.broadcast %cst_34 : f32 to vector<2x32xf32>
    %cst_35 = arith.constant 0.000000e+00 : f32
    %28 = vector.broadcast %cst_35 : f32 to vector<2x32xf32>
    %cst_36 = arith.constant 0.000000e+00 : f32
    %29 = vector.broadcast %cst_36 : f32 to vector<2x32xf32>
    %cst_37 = arith.constant 0.000000e+00 : f32
    %30 = vector.broadcast %cst_37 : f32 to vector<2x32xf32>
    %31 = vector.extract_strided_slice %26 {offsets = [0, 0, 0], sizes = [2, 1, 128], strides = [1, 1, 1]} : vector<2x8x256xf32> to vector<2x1x128xf32>
    %32 = vector.shape_cast %31 : vector<2x1x128xf32> to vector<2x128xf32>
    %cst_38 = arith.constant dense<0.000000e+00> : vector<2x128xf32>
    %33 = tpu.matmul %27, %1, %cst_38 {dimension_numbers = #tpu.dot_dimension_numbers<[1], [0], [0], [1], [0, 0, 1, 1], [], []>} : vector<2x32xf32>, vector<32x128xf32>, vector<2x128xf32> -> vector<2x128xf32>
    %34 = arith.addf %32, %33 : vector<2x128xf32>
    %35 = vector.extract_strided_slice %26 {offsets = [0, 7, 128], sizes = [2, 1, 128], strides = [1, 1, 1]} : vector<2x8x256xf32> to vector<2x1x128xf32>
    %36 = vector.shape_cast %35 : vector<2x1x128xf32> to vector<2x128xf32>
    %cst_39 = arith.constant dense<0.000000e+00> : vector<2x128xf32>
    %37 = tpu.matmul %29, %2, %cst_39 {dimension_numbers = #tpu.dot_dimension_numbers<[1], [0], [0], [1], [0, 0, 1, 1], [], []>} : vector<2x32xf32>, vector<32x128xf32>, vector<2x128xf32> -> vector<2x128xf32>
    %38 = arith.addf %36, %37 : vector<2x128xf32>
    %39 = vector.extract_strided_slice %34 {offsets = [0, 0], sizes = [2, 32], strides = [1, 1]} : vector<2x128xf32> to vector<2x32xf32>
    %40 = arith.negf %39 : vector<2x32xf32>
    %41 = math.exp %40 : vector<2x32xf32>
    %cst_40 = arith.constant 1.000000e+00 : f32
    %42 = vector.broadcast %cst_40 : f32 to vector<2x32xf32>
    %43 = arith.addf %42, %41 : vector<2x32xf32>
    %44 = arith.divf %42, %43 : vector<2x32xf32>
    %45 = vector.extract_strided_slice %34 {offsets = [0, 32], sizes = [2, 32], strides = [1, 1]} : vector<2x128xf32> to vector<2x32xf32>
    %46 = arith.negf %45 : vector<2x32xf32>
    %47 = math.exp %46 : vector<2x32xf32>
    %cst_41 = arith.constant 1.000000e+00 : f32
    %48 = vector.broadcast %cst_41 : f32 to vector<2x32xf32>
    %49 = arith.addf %48, %47 : vector<2x32xf32>
    %50 = arith.divf %48, %49 : vector<2x32xf32>
    %51 = vector.extract_strided_slice %34 {offsets = [0, 64], sizes = [2, 32], strides = [1, 1]} : vector<2x128xf32> to vector<2x32xf32>
    %52 = math.tanh %51 : vector<2x32xf32>
    %53 = vector.extract_strided_slice %34 {offsets = [0, 96], sizes = [2, 32], strides = [1, 1]} : vector<2x128xf32> to vector<2x32xf32>
    %54 = arith.negf %53 : vector<2x32xf32>
    %55 = math.exp %54 : vector<2x32xf32>
    %cst_42 = arith.constant 1.000000e+00 : f32
    %56 = vector.broadcast %cst_42 : f32 to vector<2x32xf32>
    %57 = arith.addf %56, %55 : vector<2x32xf32>
    %58 = arith.divf %56, %57 : vector<2x32xf32>
    %59 = arith.mulf %50, %28 : vector<2x32xf32>
    %60 = arith.mulf %44, %52 : vector<2x32xf32>
    %61 = arith.addf %59, %60 : vector<2x32xf32>
    %62 = math.tanh %61 : vector<2x32xf32>
    %63 = arith.mulf %58, %62 : vector<2x32xf32>
    %64 = vector.extract_strided_slice %38 {offsets = [0, 0], sizes = [2, 32], strides = [1, 1]} : vector<2x128xf32> to vector<2x32xf32>
    %65 = arith.negf %64 : vector<2x32xf32>
    %66 = math.exp %65 : vector<2x32xf32>
    %cst_43 = arith.constant 1.000000e+00 : f32
    %67 = vector.broadcast %cst_43 : f32 to vector<2x32xf32>
    %68 = arith.addf %67, %66 : vector<2x32xf32>
    %69 = arith.divf %67, %68 : vector<2x32xf32>
    %70 = vector.extract_strided_slice %38 {offsets = [0, 32], sizes = [2, 32], strides = [1, 1]} : vector<2x128xf32> to vector<2x32xf32>
    %71 = arith.negf %70 : vector<2x32xf32>
    %72 = math.exp %71 : vector<2x32xf32>
    %cst_44 = arith.constant 1.000000e+00 : f32
    %73 = vector.broadcast %cst_44 : f32 to vector<2x32xf32>
    %74 = arith.addf %73, %72 : vector<2x32xf32>
    %75 = arith.divf %73, %74 : vector<2x32xf32>
    %76 = vector.extract_strided_slice %38 {offsets = [0, 64], sizes = [2, 32], strides = [1, 1]} : vector<2x128xf32> to vector<2x32xf32>
    %77 = math.tanh %76 : vector<2x32xf32>
    %78 = vector.extract_strided_slice %38 {offsets = [0, 96], sizes = [2, 32], strides = [1, 1]} : vector<2x128xf32> to vector<2x32xf32>
    %79 = arith.negf %78 : vector<2x32xf32>
    %80 = math.exp %79 : vector<2x32xf32>
    %cst_45 = arith.constant 1.000000e+00 : f32
    %81 = vector.broadcast %cst_45 : f32 to vector<2x32xf32>
    %82 = arith.addf %81, %80 : vector<2x32xf32>
    %83 = arith.divf %81, %82 : vector<2x32xf32>
    %84 = arith.mulf %75, %30 : vector<2x32xf32>
    %85 = arith.mulf %69, %77 : vector<2x32xf32>
    %86 = arith.addf %84, %85 : vector<2x32xf32>
    %87 = math.tanh %86 : vector<2x32xf32>
    %88 = arith.mulf %83, %87 : vector<2x32xf32>
    %c0_46 = arith.constant 0 : index
    %c0_47 = arith.constant 0 : index
    %c0_48 = arith.constant 0 : index
    %89 = vector.load %arg9[%c0_46, %c0_47, %c0_48] : memref<2x8x64xf32, #tpu.memory_space<vmem>>, vector<2x1x32xf32>
    %90 = vector.shape_cast %89 : vector<2x1x32xf32> to vector<2x32xf32>
    %91 = vector.shape_cast %63 : vector<2x32xf32> to vector<2x1x32xf32>
    tpu.vector_store %arg9[%c0_46, %c0_47, %c0_48], %91 {strides = array<i32>} : memref<2x8x64xf32, #tpu.memory_space<vmem>>, vector<2x1x32xf32>,
    %c0_49 = arith.constant 0 : index
    %c7 = arith.constant 7 : index
    %c32 = arith.constant 32 : index
    %92 = vector.load %arg9[%c0_49, %c7, %c32] : memref<2x8x64xf32, #tpu.memory_space<vmem>>, vector<2x1x32xf32>
    %93 = vector.shape_cast %92 : vector<2x1x32xf32> to vector<2x32xf32>
    %94 = vector.shape_cast %88 : vector<2x32xf32> to vector<2x1x32xf32>
    tpu.vector_store %arg9[%c0_49, %c7, %c32], %94 {strides = array<i32>} : memref<2x8x64xf32, #tpu.memory_space<vmem>>, vector<2x1x32xf32>,
    %95 = vector.extract_strided_slice %26 {offsets = [0, 1, 0], sizes = [2, 1, 128], strides = [1, 1, 1]} : vector<2x8x256xf32> to vector<2x1x128xf32>
    %96 = vector.shape_cast %95 : vector<2x1x128xf32> to vector<2x128xf32>
    %cst_50 = arith.constant dense<0.000000e+00> : vector<2x128xf32>
    %97 = tpu.matmul %63, %1, %cst_50 {dimension_numbers = #tpu.dot_dimension_numbers<[1], [0], [0], [1], [0, 0, 1, 1], [], []>} : vector<2x32xf32>, vector<32x128xf32>, vector<2x128xf32> -> vector<2x128xf32>
    %98 = arith.addf %96, %97 : vector<2x128xf32>
    %99 = vector.extract_strided_slice %26 {offsets = [0, 6, 128], sizes = [2, 1, 128], strides = [1, 1, 1]} : vector<2x8x256xf32> to vector<2x1x128xf32>
    %100 = vector.shape_cast %99 : vector<2x1x128xf32> to vector<2x128xf32>
    %cst_51 = arith.constant dense<0.000000e+00> : vector<2x128xf32>
    %101 = tpu.matmul %88, %2, %cst_51 {dimension_numbers = #tpu.dot_dimension_numbers<[1], [0], [0], [1], [0, 0, 1, 1], [], []>} : vector<2x32xf32>, vector<32x128xf32>, vector<2x128xf32> -> vector<2x128xf32>
    %102 = arith.addf %100, %101 : vector<2x128xf32>
    %103 = vector.extract_strided_slice %98 {offsets = [0, 0], sizes = [2, 32], strides = [1, 1]} : vector<2x128xf32> to vector<2x32xf32>
    %104 = arith.negf %103 : vector<2x32xf32>
    %105 = math.exp %104 : vector<2x32xf32>
    %cst_52 = arith.constant 1.000000e+00 : f32
    %106 = vector.broadcast %cst_52 : f32 to vector<2x32xf32>
    %107 = arith.addf %106, %105 : vector<2x32xf32>
    %108 = arith.divf %106, %107 : vector<2x32xf32>
    %109 = vector.extract_strided_slice %98 {offsets = [0, 32], sizes = [2, 32], strides = [1, 1]} : vector<2x128xf32> to vector<2x32xf32>
    %110 = arith.negf %109 : vector<2x32xf32>
    %111 = math.exp %110 : vector<2x32xf32>
    %cst_53 = arith.constant 1.000000e+00 : f32
    %112 = vector.broadcast %cst_53 : f32 to vector<2x32xf32>
    %113 = arith.addf %112, %111 : vector<2x32xf32>
    %114 = arith.divf %112, %113 : vector<2x32xf32>
    %115 = vector.extract_strided_slice %98 {offsets = [0, 64], sizes = [2, 32], strides = [1, 1]} : vector<2x128xf32> to vector<2x32xf32>
    %116 = math.tanh %115 : vector<2x32xf32>
    %117 = vector.extract_strided_slice %98 {offsets = [0, 96], sizes = [2, 32], strides = [1, 1]} : vector<2x128xf32> to vector<2x32xf32>
    %118 = arith.negf %117 : vector<2x32xf32>
    %119 = math.exp %118 : vector<2x32xf32>
    %cst_54 = arith.constant 1.000000e+00 : f32
    %120 = vector.broadcast %cst_54 : f32 to vector<2x32xf32>
    %121 = arith.addf %120, %119 : vector<2x32xf32>
    %122 = arith.divf %120, %121 : vector<2x32xf32>
    %123 = arith.mulf %114, %61 : vector<2x32xf32>
    %124 = arith.mulf %108, %116 : vector<2x32xf32>
    %125 = arith.addf %123, %124 : vector<2x32xf32>
    %126 = math.tanh %125 : vector<2x32xf32>
    %127 = arith.mulf %122, %126 : vector<2x32xf32>
    %128 = vector.extract_strided_slice %102 {offsets = [0, 0], sizes = [2, 32], strides = [1, 1]} : vector<2x128xf32> to vector<2x32xf32>
    %129 = arith.negf %128 : vector<2x32xf32>
    %130 = math.exp %129 : vector<2x32xf32>
    %cst_55 = arith.constant 1.000000e+00 : f32
    %131 = vector.broadcast %cst_55 : f32 to vector<2x32xf32>
    %132 = arith.addf %131, %130 : vector<2x32xf32>
    %133 = arith.divf %131, %132 : vector<2x32xf32>
    %134 = vector.extract_strided_slice %102 {offsets = [0, 32], sizes = [2, 32], strides = [1, 1]} : vector<2x128xf32> to vector<2x32xf32>
    %135 = arith.negf %134 : vector<2x32xf32>
    %136 = math.exp %135 : vector<2x32xf32>
    %cst_56 = arith.constant 1.000000e+00 : f32
    %137 = vector.broadcast %cst_56 : f32 to vector<2x32xf32>
    %138 = arith.addf %137, %136 : vector<2x32xf32>
    %139 = arith.divf %137, %138 : vector<2x32xf32>
    %140 = vector.extract_strided_slice %102 {offsets = [0, 64], sizes = [2, 32], strides = [1, 1]} : vector<2x128xf32> to vector<2x32xf32>
    %141 = math.tanh %140 : vector<2x32xf32>
    %142 = vector.extract_strided_slice %102 {offsets = [0, 96], sizes = [2, 32], strides = [1, 1]} : vector<2x128xf32> to vector<2x32xf32>
    %143 = arith.negf %142 : vector<2x32xf32>
    %144 = math.exp %143 : vector<2x32xf32>
    %cst_57 = arith.constant 1.000000e+00 : f32
    %145 = vector.broadcast %cst_57 : f32 to vector<2x32xf32>
    %146 = arith.addf %145, %144 : vector<2x32xf32>
    %147 = arith.divf %145, %146 : vector<2x32xf32>
    %148 = arith.mulf %139, %86 : vector<2x32xf32>
    %149 = arith.mulf %133, %141 : vector<2x32xf32>
    %150 = arith.addf %148, %149 : vector<2x32xf32>
    %151 = math.tanh %150 : vector<2x32xf32>
    %152 = arith.mulf %147, %151 : vector<2x32xf32>
    %c0_58 = arith.constant 0 : index
    %c1 = arith.constant 1 : index
    %c0_59 = arith.constant 0 : index
    %153 = vector.load %arg9[%c0_58, %c1, %c0_59] : memref<2x8x64xf32, #tpu.memory_space<vmem>>, vector<2x1x32xf32>
    %154 = vector.shape_cast %153 : vector<2x1x32xf32> to vector<2x32xf32>
    %155 = vector.shape_cast %127 : vector<2x32xf32> to vector<2x1x32xf32>
    tpu.vector_store %arg9[%c0_58, %c1, %c0_59], %155 {strides = array<i32>} : memref<2x8x64xf32, #tpu.memory_space<vmem>>, vector<2x1x32xf32>,
    %c0_60 = arith.constant 0 : index
    %c6 = arith.constant 6 : index
    %c32_61 = arith.constant 32 : index
    %156 = vector.load %arg9[%c0_60, %c6, %c32_61] : memref<2x8x64xf32, #tpu.memory_space<vmem>>, vector<2x1x32xf32>
    %157 = vector.shape_cast %156 : vector<2x1x32xf32> to vector<2x32xf32>
    %158 = vector.shape_cast %152 : vector<2x32xf32> to vector<2x1x32xf32>
    tpu.vector_store %arg9[%c0_60, %c6, %c32_61], %158 {strides = array<i32>} : memref<2x8x64xf32, #tpu.memory_space<vmem>>, vector<2x1x32xf32>,
    %159 = vector.extract_strided_slice %26 {offsets = [0, 2, 0], sizes = [2, 1, 128], strides = [1, 1, 1]} : vector<2x8x256xf32> to vector<2x1x128xf32>
    %160 = vector.shape_cast %159 : vector<2x1x128xf32> to vector<2x128xf32>
    %cst_62 = arith.constant dense<0.000000e+00> : vector<2x128xf32>
    %161 = tpu.matmul %127, %1, %cst_62 {dimension_numbers = #tpu.dot_dimension_numbers<[1], [0], [0], [1], [0, 0, 1, 1], [], []>} : vector<2x32xf32>, vector<32x128xf32>, vector<2x128xf32> -> vector<2x128xf32>
    %162 = arith.addf %160, %161 : vector<2x128xf32>
    %163 = vector.extract_strided_slice %26 {offsets = [0, 5, 128], sizes = [2, 1, 128], strides = [1, 1, 1]} : vector<2x8x256xf32> to vector<2x1x128xf32>
    %164 = vector.shape_cast %163 : vector<2x1x128xf32> to vector<2x128xf32>
    %cst_63 = arith.constant dense<0.000000e+00> : vector<2x128xf32>
    %165 = tpu.matmul %152, %2, %cst_63 {dimension_numbers = #tpu.dot_dimension_numbers<[1], [0], [0], [1], [0, 0, 1, 1], [], []>} : vector<2x32xf32>, vector<32x128xf32>, vector<2x128xf32> -> vector<2x128xf32>
    %166 = arith.addf %164, %165 : vector<2x128xf32>
    %167 = vector.extract_strided_slice %162 {offsets = [0, 0], sizes = [2, 32], strides = [1, 1]} : vector<2x128xf32> to vector<2x32xf32>
    %168 = arith.negf %167 : vector<2x32xf32>
    %169 = math.exp %168 : vector<2x32xf32>
    %cst_64 = arith.constant 1.000000e+00 : f32
    %170 = vector.broadcast %cst_64 : f32 to vector<2x32xf32>
    %171 = arith.addf %170, %169 : vector<2x32xf32>
    %172 = arith.divf %170, %171 : vector<2x32xf32>
    %173 = vector.extract_strided_slice %162 {offsets = [0, 32], sizes = [2, 32], strides = [1, 1]} : vector<2x128xf32> to vector<2x32xf32>
    %174 = arith.negf %173 : vector<2x32xf32>
    %175 = math.exp %174 : vector<2x32xf32>
    %cst_65 = arith.constant 1.000000e+00 : f32
    %176 = vector.broadcast %cst_65 : f32 to vector<2x32xf32>
    %177 = arith.addf %176, %175 : vector<2x32xf32>
    %178 = arith.divf %176, %177 : vector<2x32xf32>
    %179 = vector.extract_strided_slice %162 {offsets = [0, 64], sizes = [2, 32], strides = [1, 1]} : vector<2x128xf32> to vector<2x32xf32>
    %180 = math.tanh %179 : vector<2x32xf32>
    %181 = vector.extract_strided_slice %162 {offsets = [0, 96], sizes = [2, 32], strides = [1, 1]} : vector<2x128xf32> to vector<2x32xf32>
    %182 = arith.negf %181 : vector<2x32xf32>
    %183 = math.exp %182 : vector<2x32xf32>
    %cst_66 = arith.constant 1.000000e+00 : f32
    %184 = vector.broadcast %cst_66 : f32 to vector<2x32xf32>
    %185 = arith.addf %184, %183 : vector<2x32xf32>
    %186 = arith.divf %184, %185 : vector<2x32xf32>
    %187 = arith.mulf %178, %125 : vector<2x32xf32>
    %188 = arith.mulf %172, %180 : vector<2x32xf32>
    %189 = arith.addf %187, %188 : vector<2x32xf32>
    %190 = math.tanh %189 : vector<2x32xf32>
    %191 = arith.mulf %186, %190 : vector<2x32xf32>
    %192 = vector.extract_strided_slice %166 {offsets = [0, 0], sizes = [2, 32], strides = [1, 1]} : vector<2x128xf32> to vector<2x32xf32>
    %193 = arith.negf %192 : vector<2x32xf32>
    %194 = math.exp %193 : vector<2x32xf32>
    %cst_67 = arith.constant 1.000000e+00 : f32
    %195 = vector.broadcast %cst_67 : f32 to vector<2x32xf32>
    %196 = arith.addf %195, %194 : vector<2x32xf32>
    %197 = arith.divf %195, %196 : vector<2x32xf32>
    %198 = vector.extract_strided_slice %166 {offsets = [0, 32], sizes = [2, 32], strides = [1, 1]} : vector<2x128xf32> to vector<2x32xf32>
    %199 = arith.negf %198 : vector<2x32xf32>
    %200 = math.exp %199 : vector<2x32xf32>
    %cst_68 = arith.constant 1.000000e+00 : f32
    %201 = vector.broadcast %cst_68 : f32 to vector<2x32xf32>
    %202 = arith.addf %201, %200 : vector<2x32xf32>
    %203 = arith.divf %201, %202 : vector<2x32xf32>
    %204 = vector.extract_strided_slice %166 {offsets = [0, 64], sizes = [2, 32], strides = [1, 1]} : vector<2x128xf32> to vector<2x32xf32>
    %205 = math.tanh %204 : vector<2x32xf32>
    %206 = vector.extract_strided_slice %166 {offsets = [0, 96], sizes = [2, 32], strides = [1, 1]} : vector<2x128xf32> to vector<2x32xf32>
    %207 = arith.negf %206 : vector<2x32xf32>
    %208 = math.exp %207 : vector<2x32xf32>
    %cst_69 = arith.constant 1.000000e+00 : f32
    %209 = vector.broadcast %cst_69 : f32 to vector<2x32xf32>
    %210 = arith.addf %209, %208 : vector<2x32xf32>
    %211 = arith.divf %209, %210 : vector<2x32xf32>
    %212 = arith.mulf %203, %150 : vector<2x32xf32>
    %213 = arith.mulf %197, %205 : vector<2x32xf32>
    %214 = arith.addf %212, %213 : vector<2x32xf32>
    %215 = math.tanh %214 : vector<2x32xf32>
    %216 = arith.mulf %211, %215 : vector<2x32xf32>
    %c0_70 = arith.constant 0 : index
    %c2 = arith.constant 2 : index
    %c0_71 = arith.constant 0 : index
    %217 = vector.load %arg9[%c0_70, %c2, %c0_71] : memref<2x8x64xf32, #tpu.memory_space<vmem>>, vector<2x1x32xf32>
    %218 = vector.shape_cast %217 : vector<2x1x32xf32> to vector<2x32xf32>
    %219 = vector.shape_cast %191 : vector<2x32xf32> to vector<2x1x32xf32>
    tpu.vector_store %arg9[%c0_70, %c2, %c0_71], %219 {strides = array<i32>} : memref<2x8x64xf32, #tpu.memory_space<vmem>>, vector<2x1x32xf32>,
    %c0_72 = arith.constant 0 : index
    %c5 = arith.constant 5 : index
    %c32_73 = arith.constant 32 : index
    %220 = vector.load %arg9[%c0_72, %c5, %c32_73] : memref<2x8x64xf32, #tpu.memory_space<vmem>>, vector<2x1x32xf32>
    %221 = vector.shape_cast %220 : vector<2x1x32xf32> to vector<2x32xf32>
    %222 = vector.shape_cast %216 : vector<2x32xf32> to vector<2x1x32xf32>
    tpu.vector_store %arg9[%c0_72, %c5, %c32_73], %222 {strides = array<i32>} : memref<2x8x64xf32, #tpu.memory_space<vmem>>, vector<2x1x32xf32>,
    %223 = vector.extract_strided_slice %26 {offsets = [0, 3, 0], sizes = [2, 1, 128], strides = [1, 1, 1]} : vector<2x8x256xf32> to vector<2x1x128xf32>
    %224 = vector.shape_cast %223 : vector<2x1x128xf32> to vector<2x128xf32>
    %cst_74 = arith.constant dense<0.000000e+00> : vector<2x128xf32>
    %225 = tpu.matmul %191, %1, %cst_74 {dimension_numbers = #tpu.dot_dimension_numbers<[1], [0], [0], [1], [0, 0, 1, 1], [], []>} : vector<2x32xf32>, vector<32x128xf32>, vector<2x128xf32> -> vector<2x128xf32>
    %226 = arith.addf %224, %225 : vector<2x128xf32>
    %227 = vector.extract_strided_slice %26 {offsets = [0, 4, 128], sizes = [2, 1, 128], strides = [1, 1, 1]} : vector<2x8x256xf32> to vector<2x1x128xf32>
    %228 = vector.shape_cast %227 : vector<2x1x128xf32> to vector<2x128xf32>
    %cst_75 = arith.constant dense<0.000000e+00> : vector<2x128xf32>
    %229 = tpu.matmul %216, %2, %cst_75 {dimension_numbers = #tpu.dot_dimension_numbers<[1], [0], [0], [1], [0, 0, 1, 1], [], []>} : vector<2x32xf32>, vector<32x128xf32>, vector<2x128xf32> -> vector<2x128xf32>
    %230 = arith.addf %228, %229 : vector<2x128xf32>
    %231 = vector.extract_strided_slice %226 {offsets = [0, 0], sizes = [2, 32], strides = [1, 1]} : vector<2x128xf32> to vector<2x32xf32>
    %232 = arith.negf %231 : vector<2x32xf32>
    %233 = math.exp %232 : vector<2x32xf32>
    %cst_76 = arith.constant 1.000000e+00 : f32
    %234 = vector.broadcast %cst_76 : f32 to vector<2x32xf32>
    %235 = arith.addf %234, %233 : vector<2x32xf32>
    %236 = arith.divf %234, %235 : vector<2x32xf32>
    %237 = vector.extract_strided_slice %226 {offsets = [0, 32], sizes = [2, 32], strides = [1, 1]} : vector<2x128xf32> to vector<2x32xf32>
    %238 = arith.negf %237 : vector<2x32xf32>
    %239 = math.exp %238 : vector<2x32xf32>
    %cst_77 = arith.constant 1.000000e+00 : f32
    %240 = vector.broadcast %cst_77 : f32 to vector<2x32xf32>
    %241 = arith.addf %240, %239 : vector<2x32xf32>
    %242 = arith.divf %240, %241 : vector<2x32xf32>
    %243 = vector.extract_strided_slice %226 {offsets = [0, 64], sizes = [2, 32], strides = [1, 1]} : vector<2x128xf32> to vector<2x32xf32>
    %244 = math.tanh %243 : vector<2x32xf32>
    %245 = vector.extract_strided_slice %226 {offsets = [0, 96], sizes = [2, 32], strides = [1, 1]} : vector<2x128xf32> to vector<2x32xf32>
    %246 = arith.negf %245 : vector<2x32xf32>
    %247 = math.exp %246 : vector<2x32xf32>
    %cst_78 = arith.constant 1.000000e+00 : f32
    %248 = vector.broadcast %cst_78 : f32 to vector<2x32xf32>
    %249 = arith.addf %248, %247 : vector<2x32xf32>
    %250 = arith.divf %248, %249 : vector<2x32xf32>
    %251 = arith.mulf %242, %189 : vector<2x32xf32>
    %252 = arith.mulf %236, %244 : vector<2x32xf32>
    %253 = arith.addf %251, %252 : vector<2x32xf32>
    %254 = math.tanh %253 : vector<2x32xf32>
    %255 = arith.mulf %250, %254 : vector<2x32xf32>
    %256 = vector.extract_strided_slice %230 {offsets = [0, 0], sizes = [2, 32], strides = [1, 1]} : vector<2x128xf32> to vector<2x32xf32>
    %257 = arith.negf %256 : vector<2x32xf32>
    %258 = math.exp %257 : vector<2x32xf32>
    %cst_79 = arith.constant 1.000000e+00 : f32
    %259 = vector.broadcast %cst_79 : f32 to vector<2x32xf32>
    %260 = arith.addf %259, %258 : vector<2x32xf32>
    %261 = arith.divf %259, %260 : vector<2x32xf32>
    %262 = vector.extract_strided_slice %230 {offsets = [0, 32], sizes = [2, 32], strides = [1, 1]} : vector<2x128xf32> to vector<2x32xf32>
    %263 = arith.negf %262 : vector<2x32xf32>
    %264 = math.exp %263 : vector<2x32xf32>
    %cst_80 = arith.constant 1.000000e+00 : f32
    %265 = vector.broadcast %cst_80 : f32 to vector<2x32xf32>
    %266 = arith.addf %265, %264 : vector<2x32xf32>
    %267 = arith.divf %265, %266 : vector<2x32xf32>
    %268 = vector.extract_strided_slice %230 {offsets = [0, 64], sizes = [2, 32], strides = [1, 1]} : vector<2x128xf32> to vector<2x32xf32>
    %269 = math.tanh %268 : vector<2x32xf32>
    %270 = vector.extract_strided_slice %230 {offsets = [0, 96], sizes = [2, 32], strides = [1, 1]} : vector<2x128xf32> to vector<2x32xf32>
    %271 = arith.negf %270 : vector<2x32xf32>
    %272 = math.exp %271 : vector<2x32xf32>
    %cst_81 = arith.constant 1.000000e+00 : f32
    %273 = vector.broadcast %cst_81 : f32 to vector<2x32xf32>
    %274 = arith.addf %273, %272 : vector<2x32xf32>
    %275 = arith.divf %273, %274 : vector<2x32xf32>
    %276 = arith.mulf %267, %214 : vector<2x32xf32>
    %277 = arith.mulf %261, %269 : vector<2x32xf32>
    %278 = arith.addf %276, %277 : vector<2x32xf32>
    %279 = math.tanh %278 : vector<2x32xf32>
    %280 = arith.mulf %275, %279 : vector<2x32xf32>
    %c0_82 = arith.constant 0 : index
    %c3 = arith.constant 3 : index
    %c0_83 = arith.constant 0 : index
    %281 = vector.load %arg9[%c0_82, %c3, %c0_83] : memref<2x8x64xf32, #tpu.memory_space<vmem>>, vector<2x1x32xf32>
    %282 = vector.shape_cast %281 : vector<2x1x32xf32> to vector<2x32xf32>
    %283 = vector.shape_cast %255 : vector<2x32xf32> to vector<2x1x32xf32>
    tpu.vector_store %arg9[%c0_82, %c3, %c0_83], %283 {strides = array<i32>} : memref<2x8x64xf32, #tpu.memory_space<vmem>>, vector<2x1x32xf32>,
    %c0_84 = arith.constant 0 : index
    %c4 = arith.constant 4 : index
    %c32_85 = arith.constant 32 : index
    %284 = vector.load %arg9[%c0_84, %c4, %c32_85] : memref<2x8x64xf32, #tpu.memory_space<vmem>>, vector<2x1x32xf32>
    %285 = vector.shape_cast %284 : vector<2x1x32xf32> to vector<2x32xf32>
    %286 = vector.shape_cast %280 : vector<2x32xf32> to vector<2x1x32xf32>
    tpu.vector_store %arg9[%c0_84, %c4, %c32_85], %286 {strides = array<i32>} : memref<2x8x64xf32, #tpu.memory_space<vmem>>, vector<2x1x32xf32>,
    %287 = vector.extract_strided_slice %26 {offsets = [0, 4, 0], sizes = [2, 1, 128], strides = [1, 1, 1]} : vector<2x8x256xf32> to vector<2x1x128xf32>
    %288 = vector.shape_cast %287 : vector<2x1x128xf32> to vector<2x128xf32>
    %cst_86 = arith.constant dense<0.000000e+00> : vector<2x128xf32>
    %289 = tpu.matmul %255, %1, %cst_86 {dimension_numbers = #tpu.dot_dimension_numbers<[1], [0], [0], [1], [0, 0, 1, 1], [], []>} : vector<2x32xf32>, vector<32x128xf32>, vector<2x128xf32> -> vector<2x128xf32>
    %290 = arith.addf %288, %289 : vector<2x128xf32>
    %291 = vector.extract_strided_slice %26 {offsets = [0, 3, 128], sizes = [2, 1, 128], strides = [1, 1, 1]} : vector<2x8x256xf32> to vector<2x1x128xf32>
    %292 = vector.shape_cast %291 : vector<2x1x128xf32> to vector<2x128xf32>
    %cst_87 = arith.constant dense<0.000000e+00> : vector<2x128xf32>
    %293 = tpu.matmul %280, %2, %cst_87 {dimension_numbers = #tpu.dot_dimension_numbers<[1], [0], [0], [1], [0, 0, 1, 1], [], []>} : vector<2x32xf32>, vector<32x128xf32>, vector<2x128xf32> -> vector<2x128xf32>
    %294 = arith.addf %292, %293 : vector<2x128xf32>
    %295 = vector.extract_strided_slice %290 {offsets = [0, 0], sizes = [2, 32], strides = [1, 1]} : vector<2x128xf32> to vector<2x32xf32>
    %296 = arith.negf %295 : vector<2x32xf32>
    %297 = math.exp %296 : vector<2x32xf32>
    %cst_88 = arith.constant 1.000000e+00 : f32
    %298 = vector.broadcast %cst_88 : f32 to vector<2x32xf32>
    %299 = arith.addf %298, %297 : vector<2x32xf32>
    %300 = arith.divf %298, %299 : vector<2x32xf32>
    %301 = vector.extract_strided_slice %290 {offsets = [0, 32], sizes = [2, 32], strides = [1, 1]} : vector<2x128xf32> to vector<2x32xf32>
    %302 = arith.negf %301 : vector<2x32xf32>
    %303 = math.exp %302 : vector<2x32xf32>
    %cst_89 = arith.constant 1.000000e+00 : f32
    %304 = vector.broadcast %cst_89 : f32 to vector<2x32xf32>
    %305 = arith.addf %304, %303 : vector<2x32xf32>
    %306 = arith.divf %304, %305 : vector<2x32xf32>
    %307 = vector.extract_strided_slice %290 {offsets = [0, 64], sizes = [2, 32], strides = [1, 1]} : vector<2x128xf32> to vector<2x32xf32>
    %308 = math.tanh %307 : vector<2x32xf32>
    %309 = vector.extract_strided_slice %290 {offsets = [0, 96], sizes = [2, 32], strides = [1, 1]} : vector<2x128xf32> to vector<2x32xf32>
    %310 = arith.negf %309 : vector<2x32xf32>
    %311 = math.exp %310 : vector<2x32xf32>
    %cst_90 = arith.constant 1.000000e+00 : f32
    %312 = vector.broadcast %cst_90 : f32 to vector<2x32xf32>
    %313 = arith.addf %312, %311 : vector<2x32xf32>
    %314 = arith.divf %312, %313 : vector<2x32xf32>
    %315 = arith.mulf %306, %253 : vector<2x32xf32>
    %316 = arith.mulf %300, %308 : vector<2x32xf32>
    %317 = arith.addf %315, %316 : vector<2x32xf32>
    %318 = math.tanh %317 : vector<2x32xf32>
    %319 = arith.mulf %314, %318 : vector<2x32xf32>
    %320 = vector.extract_strided_slice %294 {offsets = [0, 0], sizes = [2, 32], strides = [1, 1]} : vector<2x128xf32> to vector<2x32xf32>
    %321 = arith.negf %320 : vector<2x32xf32>
    %322 = math.exp %321 : vector<2x32xf32>
    %cst_91 = arith.constant 1.000000e+00 : f32
    %323 = vector.broadcast %cst_91 : f32 to vector<2x32xf32>
    %324 = arith.addf %323, %322 : vector<2x32xf32>
    %325 = arith.divf %323, %324 : vector<2x32xf32>
    %326 = vector.extract_strided_slice %294 {offsets = [0, 32], sizes = [2, 32], strides = [1, 1]} : vector<2x128xf32> to vector<2x32xf32>
    %327 = arith.negf %326 : vector<2x32xf32>
    %328 = math.exp %327 : vector<2x32xf32>
    %cst_92 = arith.constant 1.000000e+00 : f32
    %329 = vector.broadcast %cst_92 : f32 to vector<2x32xf32>
    %330 = arith.addf %329, %328 : vector<2x32xf32>
    %331 = arith.divf %329, %330 : vector<2x32xf32>
    %332 = vector.extract_strided_slice %294 {offsets = [0, 64], sizes = [2, 32], strides = [1, 1]} : vector<2x128xf32> to vector<2x32xf32>
    %333 = math.tanh %332 : vector<2x32xf32>
    %334 = vector.extract_strided_slice %294 {offsets = [0, 96], sizes = [2, 32], strides = [1, 1]} : vector<2x128xf32> to vector<2x32xf32>
    %335 = arith.negf %334 : vector<2x32xf32>
    %336 = math.exp %335 : vector<2x32xf32>
    %cst_93 = arith.constant 1.000000e+00 : f32
    %337 = vector.broadcast %cst_93 : f32 to vector<2x32xf32>
    %338 = arith.addf %337, %336 : vector<2x32xf32>
    %339 = arith.divf %337, %338 : vector<2x32xf32>
    %340 = arith.mulf %331, %278 : vector<2x32xf32>
    %341 = arith.mulf %325, %333 : vector<2x32xf32>
    %342 = arith.addf %340, %341 : vector<2x32xf32>
    %343 = math.tanh %342 : vector<2x32xf32>
    %344 = arith.mulf %339, %343 : vector<2x32xf32>
    %c0_94 = arith.constant 0 : index
    %c4_95 = arith.constant 4 : index
    %c0_96 = arith.constant 0 : index
    %345 = vector.load %arg9[%c0_94, %c4_95, %c0_96] : memref<2x8x64xf32, #tpu.memory_space<vmem>>, vector<2x1x32xf32>
    %346 = vector.shape_cast %345 : vector<2x1x32xf32> to vector<2x32xf32>
    %347 = vector.shape_cast %319 : vector<2x32xf32> to vector<2x1x32xf32>
    tpu.vector_store %arg9[%c0_94, %c4_95, %c0_96], %347 {strides = array<i32>} : memref<2x8x64xf32, #tpu.memory_space<vmem>>, vector<2x1x32xf32>,
    %c0_97 = arith.constant 0 : index
    %c3_98 = arith.constant 3 : index
    %c32_99 = arith.constant 32 : index
    %348 = vector.load %arg9[%c0_97, %c3_98, %c32_99] : memref<2x8x64xf32, #tpu.memory_space<vmem>>, vector<2x1x32xf32>
    %349 = vector.shape_cast %348 : vector<2x1x32xf32> to vector<2x32xf32>
    %350 = vector.shape_cast %344 : vector<2x32xf32> to vector<2x1x32xf32>
    tpu.vector_store %arg9[%c0_97, %c3_98, %c32_99], %350 {strides = array<i32>} : memref<2x8x64xf32, #tpu.memory_space<vmem>>, vector<2x1x32xf32>,
    %351 = vector.extract_strided_slice %26 {offsets = [0, 5, 0], sizes = [2, 1, 128], strides = [1, 1, 1]} : vector<2x8x256xf32> to vector<2x1x128xf32>
    %352 = vector.shape_cast %351 : vector<2x1x128xf32> to vector<2x128xf32>
    %cst_100 = arith.constant dense<0.000000e+00> : vector<2x128xf32>
    %353 = tpu.matmul %319, %1, %cst_100 {dimension_numbers = #tpu.dot_dimension_numbers<[1], [0], [0], [1], [0, 0, 1, 1], [], []>} : vector<2x32xf32>, vector<32x128xf32>, vector<2x128xf32> -> vector<2x128xf32>
    %354 = arith.addf %352, %353 : vector<2x128xf32>
    %355 = vector.extract_strided_slice %26 {offsets = [0, 2, 128], sizes = [2, 1, 128], strides = [1, 1, 1]} : vector<2x8x256xf32> to vector<2x1x128xf32>
    %356 = vector.shape_cast %355 : vector<2x1x128xf32> to vector<2x128xf32>
    %cst_101 = arith.constant dense<0.000000e+00> : vector<2x128xf32>
    %357 = tpu.matmul %344, %2, %cst_101 {dimension_numbers = #tpu.dot_dimension_numbers<[1], [0], [0], [1], [0, 0, 1, 1], [], []>} : vector<2x32xf32>, vector<32x128xf32>, vector<2x128xf32> -> vector<2x128xf32>
    %358 = arith.addf %356, %357 : vector<2x128xf32>
    %359 = vector.extract_strided_slice %354 {offsets = [0, 0], sizes = [2, 32], strides = [1, 1]} : vector<2x128xf32> to vector<2x32xf32>
    %360 = arith.negf %359 : vector<2x32xf32>
    %361 = math.exp %360 : vector<2x32xf32>
    %cst_102 = arith.constant 1.000000e+00 : f32
    %362 = vector.broadcast %cst_102 : f32 to vector<2x32xf32>
    %363 = arith.addf %362, %361 : vector<2x32xf32>
    %364 = arith.divf %362, %363 : vector<2x32xf32>
    %365 = vector.extract_strided_slice %354 {offsets = [0, 32], sizes = [2, 32], strides = [1, 1]} : vector<2x128xf32> to vector<2x32xf32>
    %366 = arith.negf %365 : vector<2x32xf32>
    %367 = math.exp %366 : vector<2x32xf32>
    %cst_103 = arith.constant 1.000000e+00 : f32
    %368 = vector.broadcast %cst_103 : f32 to vector<2x32xf32>
    %369 = arith.addf %368, %367 : vector<2x32xf32>
    %370 = arith.divf %368, %369 : vector<2x32xf32>
    %371 = vector.extract_strided_slice %354 {offsets = [0, 64], sizes = [2, 32], strides = [1, 1]} : vector<2x128xf32> to vector<2x32xf32>
    %372 = math.tanh %371 : vector<2x32xf32>
    %373 = vector.extract_strided_slice %354 {offsets = [0, 96], sizes = [2, 32], strides = [1, 1]} : vector<2x128xf32> to vector<2x32xf32>
    %374 = arith.negf %373 : vector<2x32xf32>
    %375 = math.exp %374 : vector<2x32xf32>
    %cst_104 = arith.constant 1.000000e+00 : f32
    %376 = vector.broadcast %cst_104 : f32 to vector<2x32xf32>
    %377 = arith.addf %376, %375 : vector<2x32xf32>
    %378 = arith.divf %376, %377 : vector<2x32xf32>
    %379 = arith.mulf %370, %317 : vector<2x32xf32>
    %380 = arith.mulf %364, %372 : vector<2x32xf32>
    %381 = arith.addf %379, %380 : vector<2x32xf32>
    %382 = math.tanh %381 : vector<2x32xf32>
    %383 = arith.mulf %378, %382 : vector<2x32xf32>
    %384 = vector.extract_strided_slice %358 {offsets = [0, 0], sizes = [2, 32], strides = [1, 1]} : vector<2x128xf32> to vector<2x32xf32>
    %385 = arith.negf %384 : vector<2x32xf32>
    %386 = math.exp %385 : vector<2x32xf32>
    %cst_105 = arith.constant 1.000000e+00 : f32
    %387 = vector.broadcast %cst_105 : f32 to vector<2x32xf32>
    %388 = arith.addf %387, %386 : vector<2x32xf32>
    %389 = arith.divf %387, %388 : vector<2x32xf32>
    %390 = vector.extract_strided_slice %358 {offsets = [0, 32], sizes = [2, 32], strides = [1, 1]} : vector<2x128xf32> to vector<2x32xf32>
    %391 = arith.negf %390 : vector<2x32xf32>
    %392 = math.exp %391 : vector<2x32xf32>
    %cst_106 = arith.constant 1.000000e+00 : f32
    %393 = vector.broadcast %cst_106 : f32 to vector<2x32xf32>
    %394 = arith.addf %393, %392 : vector<2x32xf32>
    %395 = arith.divf %393, %394 : vector<2x32xf32>
    %396 = vector.extract_strided_slice %358 {offsets = [0, 64], sizes = [2, 32], strides = [1, 1]} : vector<2x128xf32> to vector<2x32xf32>
    %397 = math.tanh %396 : vector<2x32xf32>
    %398 = vector.extract_strided_slice %358 {offsets = [0, 96], sizes = [2, 32], strides = [1, 1]} : vector<2x128xf32> to vector<2x32xf32>
    %399 = arith.negf %398 : vector<2x32xf32>
    %400 = math.exp %399 : vector<2x32xf32>
    %cst_107 = arith.constant 1.000000e+00 : f32
    %401 = vector.broadcast %cst_107 : f32 to vector<2x32xf32>
    %402 = arith.addf %401, %400 : vector<2x32xf32>
    %403 = arith.divf %401, %402 : vector<2x32xf32>
    %404 = arith.mulf %395, %342 : vector<2x32xf32>
    %405 = arith.mulf %389, %397 : vector<2x32xf32>
    %406 = arith.addf %404, %405 : vector<2x32xf32>
    %407 = math.tanh %406 : vector<2x32xf32>
    %408 = arith.mulf %403, %407 : vector<2x32xf32>
    %c0_108 = arith.constant 0 : index
    %c5_109 = arith.constant 5 : index
    %c0_110 = arith.constant 0 : index
    %409 = vector.load %arg9[%c0_108, %c5_109, %c0_110] : memref<2x8x64xf32, #tpu.memory_space<vmem>>, vector<2x1x32xf32>
    %410 = vector.shape_cast %409 : vector<2x1x32xf32> to vector<2x32xf32>
    %411 = vector.shape_cast %383 : vector<2x32xf32> to vector<2x1x32xf32>
    tpu.vector_store %arg9[%c0_108, %c5_109, %c0_110], %411 {strides = array<i32>} : memref<2x8x64xf32, #tpu.memory_space<vmem>>, vector<2x1x32xf32>,
    %c0_111 = arith.constant 0 : index
    %c2_112 = arith.constant 2 : index
    %c32_113 = arith.constant 32 : index
    %412 = vector.load %arg9[%c0_111, %c2_112, %c32_113] : memref<2x8x64xf32, #tpu.memory_space<vmem>>, vector<2x1x32xf32>
    %413 = vector.shape_cast %412 : vector<2x1x32xf32> to vector<2x32xf32>
    %414 = vector.shape_cast %408 : vector<2x32xf32> to vector<2x1x32xf32>
    tpu.vector_store %arg9[%c0_111, %c2_112, %c32_113], %414 {strides = array<i32>} : memref<2x8x64xf32, #tpu.memory_space<vmem>>, vector<2x1x32xf32>,
    %415 = vector.extract_strided_slice %26 {offsets = [0, 6, 0], sizes = [2, 1, 128], strides = [1, 1, 1]} : vector<2x8x256xf32> to vector<2x1x128xf32>
    %416 = vector.shape_cast %415 : vector<2x1x128xf32> to vector<2x128xf32>
    %cst_114 = arith.constant dense<0.000000e+00> : vector<2x128xf32>
    %417 = tpu.matmul %383, %1, %cst_114 {dimension_numbers = #tpu.dot_dimension_numbers<[1], [0], [0], [1], [0, 0, 1, 1], [], []>} : vector<2x32xf32>, vector<32x128xf32>, vector<2x128xf32> -> vector<2x128xf32>
    %418 = arith.addf %416, %417 : vector<2x128xf32>
    %419 = vector.extract_strided_slice %26 {offsets = [0, 1, 128], sizes = [2, 1, 128], strides = [1, 1, 1]} : vector<2x8x256xf32> to vector<2x1x128xf32>
    %420 = vector.shape_cast %419 : vector<2x1x128xf32> to vector<2x128xf32>
    %cst_115 = arith.constant dense<0.000000e+00> : vector<2x128xf32>
    %421 = tpu.matmul %408, %2, %cst_115 {dimension_numbers = #tpu.dot_dimension_numbers<[1], [0], [0], [1], [0, 0, 1, 1], [], []>} : vector<2x32xf32>, vector<32x128xf32>, vector<2x128xf32> -> vector<2x128xf32>
    %422 = arith.addf %420, %421 : vector<2x128xf32>
    %423 = vector.extract_strided_slice %418 {offsets = [0, 0], sizes = [2, 32], strides = [1, 1]} : vector<2x128xf32> to vector<2x32xf32>
    %424 = arith.negf %423 : vector<2x32xf32>
    %425 = math.exp %424 : vector<2x32xf32>
    %cst_116 = arith.constant 1.000000e+00 : f32
    %426 = vector.broadcast %cst_116 : f32 to vector<2x32xf32>
    %427 = arith.addf %426, %425 : vector<2x32xf32>
    %428 = arith.divf %426, %427 : vector<2x32xf32>
    %429 = vector.extract_strided_slice %418 {offsets = [0, 32], sizes = [2, 32], strides = [1, 1]} : vector<2x128xf32> to vector<2x32xf32>
    %430 = arith.negf %429 : vector<2x32xf32>
    %431 = math.exp %430 : vector<2x32xf32>
    %cst_117 = arith.constant 1.000000e+00 : f32
    %432 = vector.broadcast %cst_117 : f32 to vector<2x32xf32>
    %433 = arith.addf %432, %431 : vector<2x32xf32>
    %434 = arith.divf %432, %433 : vector<2x32xf32>
    %435 = vector.extract_strided_slice %418 {offsets = [0, 64], sizes = [2, 32], strides = [1, 1]} : vector<2x128xf32> to vector<2x32xf32>
    %436 = math.tanh %435 : vector<2x32xf32>
    %437 = vector.extract_strided_slice %418 {offsets = [0, 96], sizes = [2, 32], strides = [1, 1]} : vector<2x128xf32> to vector<2x32xf32>
    %438 = arith.negf %437 : vector<2x32xf32>
    %439 = math.exp %438 : vector<2x32xf32>
    %cst_118 = arith.constant 1.000000e+00 : f32
    %440 = vector.broadcast %cst_118 : f32 to vector<2x32xf32>
    %441 = arith.addf %440, %439 : vector<2x32xf32>
    %442 = arith.divf %440, %441 : vector<2x32xf32>
    %443 = arith.mulf %434, %381 : vector<2x32xf32>
    %444 = arith.mulf %428, %436 : vector<2x32xf32>
    %445 = arith.addf %443, %444 : vector<2x32xf32>
    %446 = math.tanh %445 : vector<2x32xf32>
    %447 = arith.mulf %442, %446 : vector<2x32xf32>
    %448 = vector.extract_strided_slice %422 {offsets = [0, 0], sizes = [2, 32], strides = [1, 1]} : vector<2x128xf32> to vector<2x32xf32>
    %449 = arith.negf %448 : vector<2x32xf32>
    %450 = math.exp %449 : vector<2x32xf32>
    %cst_119 = arith.constant 1.000000e+00 : f32
    %451 = vector.broadcast %cst_119 : f32 to vector<2x32xf32>
    %452 = arith.addf %451, %450 : vector<2x32xf32>
    %453 = arith.divf %451, %452 : vector<2x32xf32>
    %454 = vector.extract_strided_slice %422 {offsets = [0, 32], sizes = [2, 32], strides = [1, 1]} : vector<2x128xf32> to vector<2x32xf32>
    %455 = arith.negf %454 : vector<2x32xf32>
    %456 = math.exp %455 : vector<2x32xf32>
    %cst_120 = arith.constant 1.000000e+00 : f32
    %457 = vector.broadcast %cst_120 : f32 to vector<2x32xf32>
    %458 = arith.addf %457, %456 : vector<2x32xf32>
    %459 = arith.divf %457, %458 : vector<2x32xf32>
    %460 = vector.extract_strided_slice %422 {offsets = [0, 64], sizes = [2, 32], strides = [1, 1]} : vector<2x128xf32> to vector<2x32xf32>
    %461 = math.tanh %460 : vector<2x32xf32>
    %462 = vector.extract_strided_slice %422 {offsets = [0, 96], sizes = [2, 32], strides = [1, 1]} : vector<2x128xf32> to vector<2x32xf32>
    %463 = arith.negf %462 : vector<2x32xf32>
    %464 = math.exp %463 : vector<2x32xf32>
    %cst_121 = arith.constant 1.000000e+00 : f32
    %465 = vector.broadcast %cst_121 : f32 to vector<2x32xf32>
    %466 = arith.addf %465, %464 : vector<2x32xf32>
    %467 = arith.divf %465, %466 : vector<2x32xf32>
    %468 = arith.mulf %459, %406 : vector<2x32xf32>
    %469 = arith.mulf %453, %461 : vector<2x32xf32>
    %470 = arith.addf %468, %469 : vector<2x32xf32>
    %471 = math.tanh %470 : vector<2x32xf32>
    %472 = arith.mulf %467, %471 : vector<2x32xf32>
    %c0_122 = arith.constant 0 : index
    %c6_123 = arith.constant 6 : index
    %c0_124 = arith.constant 0 : index
    %473 = vector.load %arg9[%c0_122, %c6_123, %c0_124] : memref<2x8x64xf32, #tpu.memory_space<vmem>>, vector<2x1x32xf32>
    %474 = vector.shape_cast %473 : vector<2x1x32xf32> to vector<2x32xf32>
    %475 = vector.shape_cast %447 : vector<2x32xf32> to vector<2x1x32xf32>
    tpu.vector_store %arg9[%c0_122, %c6_123, %c0_124], %475 {strides = array<i32>} : memref<2x8x64xf32, #tpu.memory_space<vmem>>, vector<2x1x32xf32>,
    %c0_125 = arith.constant 0 : index
    %c1_126 = arith.constant 1 : index
    %c32_127 = arith.constant 32 : index
    %476 = vector.load %arg9[%c0_125, %c1_126, %c32_127] : memref<2x8x64xf32, #tpu.memory_space<vmem>>, vector<2x1x32xf32>
    %477 = vector.shape_cast %476 : vector<2x1x32xf32> to vector<2x32xf32>
    %478 = vector.shape_cast %472 : vector<2x32xf32> to vector<2x1x32xf32>
    tpu.vector_store %arg9[%c0_125, %c1_126, %c32_127], %478 {strides = array<i32>} : memref<2x8x64xf32, #tpu.memory_space<vmem>>, vector<2x1x32xf32>,
    %479 = vector.extract_strided_slice %26 {offsets = [0, 7, 0], sizes = [2, 1, 128], strides = [1, 1, 1]} : vector<2x8x256xf32> to vector<2x1x128xf32>
    %480 = vector.shape_cast %479 : vector<2x1x128xf32> to vector<2x128xf32>
    %cst_128 = arith.constant dense<0.000000e+00> : vector<2x128xf32>
    %481 = tpu.matmul %447, %1, %cst_128 {dimension_numbers = #tpu.dot_dimension_numbers<[1], [0], [0], [1], [0, 0, 1, 1], [], []>} : vector<2x32xf32>, vector<32x128xf32>, vector<2x128xf32> -> vector<2x128xf32>
    %482 = arith.addf %480, %481 : vector<2x128xf32>
    %483 = vector.extract_strided_slice %26 {offsets = [0, 0, 128], sizes = [2, 1, 128], strides = [1, 1, 1]} : vector<2x8x256xf32> to vector<2x1x128xf32>
    %484 = vector.shape_cast %483 : vector<2x1x128xf32> to vector<2x128xf32>
    %cst_129 = arith.constant dense<0.000000e+00> : vector<2x128xf32>
    %485 = tpu.matmul %472, %2, %cst_129 {dimension_numbers = #tpu.dot_dimension_numbers<[1], [0], [0], [1], [0, 0, 1, 1], [], []>} : vector<2x32xf32>, vector<32x128xf32>, vector<2x128xf32> -> vector<2x128xf32>
    %486 = arith.addf %484, %485 : vector<2x128xf32>
    %487 = vector.extract_strided_slice %482 {offsets = [0, 0], sizes = [2, 32], strides = [1, 1]} : vector<2x128xf32> to vector<2x32xf32>
    %488 = arith.negf %487 : vector<2x32xf32>
    %489 = math.exp %488 : vector<2x32xf32>
    %cst_130 = arith.constant 1.000000e+00 : f32
    %490 = vector.broadcast %cst_130 : f32 to vector<2x32xf32>
    %491 = arith.addf %490, %489 : vector<2x32xf32>
    %492 = arith.divf %490, %491 : vector<2x32xf32>
    %493 = vector.extract_strided_slice %482 {offsets = [0, 32], sizes = [2, 32], strides = [1, 1]} : vector<2x128xf32> to vector<2x32xf32>
    %494 = arith.negf %493 : vector<2x32xf32>
    %495 = math.exp %494 : vector<2x32xf32>
    %cst_131 = arith.constant 1.000000e+00 : f32
    %496 = vector.broadcast %cst_131 : f32 to vector<2x32xf32>
    %497 = arith.addf %496, %495 : vector<2x32xf32>
    %498 = arith.divf %496, %497 : vector<2x32xf32>
    %499 = vector.extract_strided_slice %482 {offsets = [0, 64], sizes = [2, 32], strides = [1, 1]} : vector<2x128xf32> to vector<2x32xf32>
    %500 = math.tanh %499 : vector<2x32xf32>
    %501 = vector.extract_strided_slice %482 {offsets = [0, 96], sizes = [2, 32], strides = [1, 1]} : vector<2x128xf32> to vector<2x32xf32>
    %502 = arith.negf %501 : vector<2x32xf32>
    %503 = math.exp %502 : vector<2x32xf32>
    %cst_132 = arith.constant 1.000000e+00 : f32
    %504 = vector.broadcast %cst_132 : f32 to vector<2x32xf32>
    %505 = arith.addf %504, %503 : vector<2x32xf32>
    %506 = arith.divf %504, %505 : vector<2x32xf32>
    %507 = arith.mulf %498, %445 : vector<2x32xf32>
    %508 = arith.mulf %492, %500 : vector<2x32xf32>
    %509 = arith.addf %507, %508 : vector<2x32xf32>
    %510 = math.tanh %509 : vector<2x32xf32>
    %511 = arith.mulf %506, %510 : vector<2x32xf32>
    %512 = vector.extract_strided_slice %486 {offsets = [0, 0], sizes = [2, 32], strides = [1, 1]} : vector<2x128xf32> to vector<2x32xf32>
    %513 = arith.negf %512 : vector<2x32xf32>
    %514 = math.exp %513 : vector<2x32xf32>
    %cst_133 = arith.constant 1.000000e+00 : f32
    %515 = vector.broadcast %cst_133 : f32 to vector<2x32xf32>
    %516 = arith.addf %515, %514 : vector<2x32xf32>
    %517 = arith.divf %515, %516 : vector<2x32xf32>
    %518 = vector.extract_strided_slice %486 {offsets = [0, 32], sizes = [2, 32], strides = [1, 1]} : vector<2x128xf32> to vector<2x32xf32>
    %519 = arith.negf %518 : vector<2x32xf32>
    %520 = math.exp %519 : vector<2x32xf32>
    %cst_134 = arith.constant 1.000000e+00 : f32
    %521 = vector.broadcast %cst_134 : f32 to vector<2x32xf32>
    %522 = arith.addf %521, %520 : vector<2x32xf32>
    %523 = arith.divf %521, %522 : vector<2x32xf32>
    %524 = vector.extract_strided_slice %486 {offsets = [0, 64], sizes = [2, 32], strides = [1, 1]} : vector<2x128xf32> to vector<2x32xf32>
    %525 = math.tanh %524 : vector<2x32xf32>
    %526 = vector.extract_strided_slice %486 {offsets = [0, 96], sizes = [2, 32], strides = [1, 1]} : vector<2x128xf32> to vector<2x32xf32>
    %527 = arith.negf %526 : vector<2x32xf32>
    %528 = math.exp %527 : vector<2x32xf32>
    %cst_135 = arith.constant 1.000000e+00 : f32
    %529 = vector.broadcast %cst_135 : f32 to vector<2x32xf32>
    %530 = arith.addf %529, %528 : vector<2x32xf32>
    %531 = arith.divf %529, %530 : vector<2x32xf32>
    %532 = arith.mulf %523, %470 : vector<2x32xf32>
    %533 = arith.mulf %517, %525 : vector<2x32xf32>
    %534 = arith.addf %532, %533 : vector<2x32xf32>
    %535 = math.tanh %534 : vector<2x32xf32>
    %536 = arith.mulf %531, %535 : vector<2x32xf32>
    %c0_136 = arith.constant 0 : index
    %c7_137 = arith.constant 7 : index
    %c0_138 = arith.constant 0 : index
    %537 = vector.load %arg9[%c0_136, %c7_137, %c0_138] : memref<2x8x64xf32, #tpu.memory_space<vmem>>, vector<2x1x32xf32>
    %538 = vector.shape_cast %537 : vector<2x1x32xf32> to vector<2x32xf32>
    %539 = vector.shape_cast %511 : vector<2x32xf32> to vector<2x1x32xf32>
    tpu.vector_store %arg9[%c0_136, %c7_137, %c0_138], %539 {strides = array<i32>} : memref<2x8x64xf32, #tpu.memory_space<vmem>>, vector<2x1x32xf32>,
    %c0_139 = arith.constant 0 : index
    %c0_140 = arith.constant 0 : index
    %c32_141 = arith.constant 32 : index
    %540 = vector.load %arg9[%c0_139, %c0_140, %c32_141] : memref<2x8x64xf32, #tpu.memory_space<vmem>>, vector<2x1x32xf32>
    %541 = vector.shape_cast %540 : vector<2x1x32xf32> to vector<2x32xf32>
    %542 = vector.shape_cast %536 : vector<2x32xf32> to vector<2x1x32xf32>
    tpu.vector_store %arg9[%c0_139, %c0_140, %c32_141], %542 {strides = array<i32>} : memref<2x8x64xf32, #tpu.memory_space<vmem>>, vector<2x1x32xf32>,
    %c0_142 = arith.constant 0 : index
    %c0_143 = arith.constant 0 : index
    %c0_144 = arith.constant 0 : index
    %543 = vector.load %arg9[%c0_142, %c0_143, %c0_144] : memref<2x8x64xf32, #tpu.memory_space<vmem>>, vector<2x8x64xf32>
    %544 = vector.shape_cast %543 : vector<2x8x64xf32> to vector<16x64xf32>
    %cst_145 = arith.constant dense<0.000000e+00> : vector<16x32xf32>
    %545 = tpu.matmul %544, %8, %cst_145 {dimension_numbers = #tpu.dot_dimension_numbers<[1], [0], [0], [1], [0, 0, 1, 1], [], []>} : vector<16x64xf32>, vector<64x32xf32>, vector<16x32xf32> -> vector<16x32xf32>
    %546 = vector.broadcast %13 : vector<1x32xf32> to vector<16x32xf32>
    %547 = arith.addf %545, %546 : vector<16x32xf32>
    %548 = vector.shape_cast %547 : vector<16x32xf32> to vector<2x8x32xf32>
    %c0_146 = arith.constant 0 : index
    %c0_147 = arith.constant 0 : index
    %c0_148 = arith.constant 0 : index
    %549 = vector.load %arg1[%c0_146, %c0_147, %c0_148] : memref<2x6x32xf32, #tpu.memory_space<vmem>>, vector<2x6x32xf32>
    %550 = vector.shape_cast %549 : vector<2x6x32xf32> to vector<12x32xf32>
    %cst_149 = arith.constant dense<0.000000e+00> : vector<12x96xf32>
    %551 = tpu.matmul %550, %3, %cst_149 {dimension_numbers = #tpu.dot_dimension_numbers<[1], [0], [0], [1], [0, 0, 1, 1], [], []>} : vector<12x32xf32>, vector<32x96xf32>, vector<12x96xf32> -> vector<12x96xf32>
    %552 = vector.broadcast %12 : vector<1x96xf32> to vector<12x96xf32>
    %553 = arith.addf %551, %552 : vector<12x96xf32>
    %554 = vector.extract_strided_slice %553 {offsets = [0, 0], sizes = [12, 32], strides = [1, 1]} : vector<12x96xf32> to vector<12x32xf32>
    %555 = vector.shape_cast %554 : vector<12x32xf32> to vector<2x6x32xf32>
    %556 = vector.extract_strided_slice %553 {offsets = [0, 32], sizes = [12, 32], strides = [1, 1]} : vector<12x96xf32> to vector<12x32xf32>
    %557 = vector.shape_cast %556 : vector<12x32xf32> to vector<2x6x32xf32>
    %558 = vector.extract_strided_slice %553 {offsets = [0, 64], sizes = [12, 32], strides = [1, 1]} : vector<12x96xf32> to vector<12x32xf32>
    %559 = vector.shape_cast %558 : vector<12x32xf32> to vector<2x6x32xf32>
    %c0_150 = arith.constant 0 : index
    %c0_151 = arith.constant 0 : index
    %560 = vector.load %arg3[%c0_150, %c0_151] : memref<2x6xf32, #tpu.memory_space<vmem>>, vector<2x6xf32>
    "tpu.trace_start"() <{level = 10 : i32, message = "bqh,bkh->bqk"}> : () -> ()
    %cst_152 = arith.constant dense<0.000000e+00> : vector<2x6x6xf32>
    %561 = tpu.matmul %555, %557, %cst_152 {dimension_numbers = #tpu.dot_dimension_numbers<[2], [2], [1], [1], [0, 0, 0, 1, 1, 1], [0], [0]>} : vector<2x6x32xf32>, vector<2x6x32xf32>, vector<2x6x6xf32> -> vector<2x6x6xf32>
    %cst_153 = arith.constant 3.200000e+01 : f32
    "tpu.trace_stop"() : () -> ()
    %562 = math.sqrt %cst_153 : f32
    %563 = vector.broadcast %562 : f32 to vector<2x6x6xf32>
    %564 = arith.divf %561, %563 : vector<2x6x6xf32>
    %cst_154 = arith.constant 1.000000e+00 : f32
    %565 = vector.broadcast %cst_154 : f32 to vector<2x6xf32>
    %566 = arith.subf %565, %560 : vector<2x6xf32>
    %567 = vector.shape_cast %566 : vector<2x6xf32> to vector<2x1x6xf32>
    %cst_155 = arith.constant -1.000000e+09 : f32
    %568 = vector.broadcast %cst_155 : f32 to vector<2x1x6xf32>
    %569 = arith.mulf %567, %568 : vector<2x1x6xf32>
    %570 = vector.broadcast %569 : vector<2x1x6xf32> to vector<2x6x6xf32>
    %571 = arith.addf %564, %570 : vector<2x6x6xf32>
    %cst_156 = arith.constant dense<0xFF800000> : vector<2x6xf32>
    %572 = vector.multi_reduction <maximumf>, %571, %cst_156 [2] : vector<2x6x6xf32> to vector<2x6xf32>
    %573 = vector.shape_cast %572 : vector<2x6xf32> to vector<2x6x1xf32>
    %574 = vector.broadcast %573 : vector<2x6x1xf32> to vector<2x6x6xf32>
    %575 = arith.subf %571, %574 : vector<2x6x6xf32>
    %576 = math.exp %575 : vector<2x6x6xf32>
    %cst_157 = arith.constant dense<0.000000e+00> : vector<2x6xf32>
    %577 = vector.multi_reduction <add>, %576, %cst_157 [2] : vector<2x6x6xf32> to vector<2x6xf32>
    %578 = vector.shape_cast %577 : vector<2x6xf32> to vector<2x6x1xf32>
    %579 = vector.broadcast %578 : vector<2x6x1xf32> to vector<2x6x6xf32>
    %580 = arith.divf %576, %579 : vector<2x6x6xf32>
    "tpu.trace_start"() <{level = 10 : i32, message = "bqk,bkh->bqh"}> : () -> ()
    %cst_158 = arith.constant dense<0.000000e+00> : vector<2x6x32xf32>
    %581 = tpu.matmul %580, %559, %cst_158 {dimension_numbers = #tpu.dot_dimension_numbers<[2], [1], [1], [2], [0, 0, 0, 1, 1, 2], [0], [0]>} : vector<2x6x6xf32>, vector<2x6x32xf32>, vector<2x6x32xf32> -> vector<2x6x32xf32>
    "tpu.trace_stop"() : () -> ()
    %c0_159 = arith.constant 0 : index
    %c0_160 = arith.constant 0 : index
    %582 = vector.load %arg2[%c0_159, %c0_160] : memref<2x8xf32, #tpu.memory_space<vmem>>, vector<2x8xf32>
    %cst_161 = arith.constant 1.000000e+00 : f32
    %583 = vector.broadcast %cst_161 : f32 to vector<2x8xf32>
    %584 = arith.subf %583, %582 : vector<2x8xf32>
    %cst_162 = arith.constant -1.000000e+09 : f32
    %585 = vector.broadcast %cst_162 : f32 to vector<2x8xf32>
    %586 = arith.mulf %584, %585 : vector<2x8xf32>
    %cst_163 = arith.constant 1.000000e+00 : f32
    %587 = vector.broadcast %cst_163 : f32 to vector<2x6xf32>
    %588 = arith.subf %587, %560 : vector<2x6xf32>
    %cst_164 = arith.constant -1.000000e+09 : f32
    %589 = vector.broadcast %cst_164 : f32 to vector<2x6xf32>
    %590 = arith.mulf %588, %589 : vector<2x6xf32>
    %c0_165 = arith.constant 0 : index
    %c0_166 = arith.constant 0 : index
    %c0_167 = arith.constant 0 : index
    %591 = vector.load %arg4[%c0_165, %c0_166, %c0_167] : memref<2x6x32xf32, #tpu.memory_space<vmem>>, vector<2x6x32xf32>
    %592 = vector.shape_cast %591 : vector<2x6x32xf32> to vector<12x32xf32>
    %cst_168 = arith.constant dense<0.000000e+00> : vector<12x128xf32>
    %593 = tpu.matmul %592, %4, %cst_168 {dimension_numbers = #tpu.dot_dimension_numbers<[1], [0], [0], [1], [0, 0, 1, 1], [], []>} : vector<12x32xf32>, vector<32x128xf32>, vector<12x128xf32> -> vector<12x128xf32>
    %594 = vector.broadcast %14 : vector<1x128xf32> to vector<12x128xf32>
    %595 = arith.addf %593, %594 : vector<12x128xf32>
    %596 = vector.shape_cast %595 : vector<12x128xf32> to vector<2x6x128xf32>
    %597 = vector.shape_cast %548 : vector<2x8x32xf32> to vector<16x32xf32>
    %598 = vector.shape_cast %581 : vector<2x6x32xf32> to vector<12x32xf32>
    %599 = tpu.concatenate %597, %598 in 0 : vector<16x32xf32>, vector<12x32xf32> -> vector<28x32xf32>
    %cst_169 = arith.constant dense<0.000000e+00> : vector<28x64xf32>
    %600 = tpu.matmul %599, %7, %cst_169 {dimension_numbers = #tpu.dot_dimension_numbers<[1], [0], [0], [1], [0, 0, 1, 1], [], []>} : vector<28x32xf32>, vector<32x64xf32>, vector<28x64xf32> -> vector<28x64xf32>
    %601 = vector.broadcast %16 : vector<1x64xf32> to vector<28x64xf32>
    %602 = arith.addf %600, %601 : vector<28x64xf32>
    %603 = vector.extract_strided_slice %602 {offsets = [0, 0], sizes = [16, 32], strides = [1, 1]} : vector<28x64xf32> to vector<16x32xf32>
    %604 = vector.shape_cast %603 : vector<16x32xf32> to vector<2x8x32xf32>
    %605 = vector.extract_strided_slice %602 {offsets = [16, 32], sizes = [12, 32], strides = [1, 1]} : vector<28x64xf32> to vector<12x32xf32>
    %606 = vector.shape_cast %605 : vector<12x32xf32> to vector<2x6x32xf32>
    %cst_170 = arith.constant 0.000000e+00 : f32
    %607 = vector.broadcast %cst_170 : f32 to vector<2x114xf32>
    %cst_171 = arith.constant 0.000000e+00 : f32
    %608 = vector.broadcast %cst_171 : f32 to vector<2x32xf32>
    %cst_172 = arith.constant 0.000000e+00 : f32
    %609 = vector.broadcast %cst_172 : f32 to vector<2x32xf32>
    %610 = vector.extract_strided_slice %596 {offsets = [0, 0, 0], sizes = [2, 1, 128], strides = [1, 1, 1]} : vector<2x6x128xf32> to vector<2x1x128xf32>
    %611 = vector.shape_cast %610 : vector<2x1x128xf32> to vector<2x128xf32>
    %cst_173 = arith.constant dense<0.000000e+00> : vector<2x128xf32>
    %612 = tpu.matmul %608, %5, %cst_173 {dimension_numbers = #tpu.dot_dimension_numbers<[1], [0], [0], [1], [0, 0, 1, 1], [], []>} : vector<2x32xf32>, vector<32x128xf32>, vector<2x128xf32> -> vector<2x128xf32>
    %613 = arith.addf %611, %612 : vector<2x128xf32>
    %614 = vector.extract_strided_slice %613 {offsets = [0, 0], sizes = [2, 32], strides = [1, 1]} : vector<2x128xf32> to vector<2x32xf32>
    %615 = arith.negf %614 : vector<2x32xf32>
    %616 = math.exp %615 : vector<2x32xf32>
    %cst_174 = arith.constant 1.000000e+00 : f32
    %617 = vector.broadcast %cst_174 : f32 to vector<2x32xf32>
    %618 = arith.addf %617, %616 : vector<2x32xf32>
    %619 = arith.divf %617, %618 : vector<2x32xf32>
    %620 = vector.extract_strided_slice %613 {offsets = [0, 32], sizes = [2, 32], strides = [1, 1]} : vector<2x128xf32> to vector<2x32xf32>
    %621 = arith.negf %620 : vector<2x32xf32>
    %622 = math.exp %621 : vector<2x32xf32>
    %cst_175 = arith.constant 1.000000e+00 : f32
    %623 = vector.broadcast %cst_175 : f32 to vector<2x32xf32>
    %624 = arith.addf %623, %622 : vector<2x32xf32>
    %625 = arith.divf %623, %624 : vector<2x32xf32>
    %626 = vector.extract_strided_slice %613 {offsets = [0, 64], sizes = [2, 32], strides = [1, 1]} : vector<2x128xf32> to vector<2x32xf32>
    %627 = math.tanh %626 : vector<2x32xf32>
    %628 = vector.extract_strided_slice %613 {offsets = [0, 96], sizes = [2, 32], strides = [1, 1]} : vector<2x128xf32> to vector<2x32xf32>
    %629 = arith.negf %628 : vector<2x32xf32>
    %630 = math.exp %629 : vector<2x32xf32>
    %cst_176 = arith.constant 1.000000e+00 : f32
    %631 = vector.broadcast %cst_176 : f32 to vector<2x32xf32>
    %632 = arith.addf %631, %630 : vector<2x32xf32>
    %633 = arith.divf %631, %632 : vector<2x32xf32>
    %634 = arith.mulf %625, %609 : vector<2x32xf32>
    %635 = arith.mulf %619, %627 : vector<2x32xf32>
    %636 = arith.addf %634, %635 : vector<2x32xf32>
    %637 = math.tanh %636 : vector<2x32xf32>
    %638 = arith.mulf %633, %637 : vector<2x32xf32>
    %cst_177 = arith.constant dense<0.000000e+00> : vector<2x64xf32>
    %639 = tpu.matmul %638, %6, %cst_177 {dimension_numbers = #tpu.dot_dimension_numbers<[1], [0], [0], [1], [0, 0, 1, 1], [], []>} : vector<2x32xf32>, vector<32x64xf32>, vector<2x64xf32> -> vector<2x64xf32>
    %640 = vector.broadcast %15 : vector<1x64xf32> to vector<2x64xf32>
    %641 = arith.addf %639, %640 : vector<2x64xf32>
    %642 = vector.extract_strided_slice %641 {offsets = [0, 0], sizes = [2, 32], strides = [1, 1]} : vector<2x64xf32> to vector<2x32xf32>
    %643 = vector.shape_cast %642 : vector<2x32xf32> to vector<2x1x32xf32>
    %644 = vector.broadcast %643 : vector<2x1x32xf32> to vector<2x8x32xf32>
    %645 = arith.addf %644, %604 : vector<2x8x32xf32>
    %646 = math.tanh %645 : vector<2x8x32xf32>
    %647 = vector.shape_cast %17 : vector<1x32xf32> to vector<1x1x32xf32>
    %648 = vector.broadcast %647 : vector<1x1x32xf32> to vector<2x8x32xf32>
    %649 = arith.mulf %646, %648 : vector<2x8x32xf32>
    %cst_178 = arith.constant dense<0.000000e+00> : vector<2x8xf32>
    %650 = vector.multi_reduction <add>, %649, %cst_178 [2] : vector<2x8x32xf32> to vector<2x8xf32>
    %651 = arith.addf %650, %586 : vector<2x8xf32>
    %cst_179 = arith.constant dense<0xFF800000> : vector<2xf32>
    %652 = vector.multi_reduction <maximumf>, %651, %cst_179 [1] : vector<2x8xf32> to vector<2xf32>
    %653 = vector.shape_cast %652 : vector<2xf32> to vector<2x1xf32>
    %654 = vector.broadcast %653 : vector<2x1xf32> to vector<2x8xf32>
    %655 = arith.subf %651, %654 : vector<2x8xf32>
    %656 = math.exp %655 : vector<2x8xf32>
    %cst_180 = arith.constant dense<0.000000e+00> : vector<2xf32>
    %657 = vector.multi_reduction <add>, %656, %cst_180 [1] : vector<2x8xf32> to vector<2xf32>
    %658 = vector.shape_cast %657 : vector<2xf32> to vector<2x1xf32>
    %659 = vector.broadcast %658 : vector<2x1xf32> to vector<2x8xf32>
    %660 = arith.divf %656, %659 : vector<2x8xf32>
    %661 = vector.shape_cast %660 : vector<2x8xf32> to vector<2x8x1xf32>
    %662 = vector.broadcast %661 : vector<2x8x1xf32> to vector<2x8x32xf32>
    %663 = arith.mulf %662, %548 : vector<2x8x32xf32>
    %cst_181 = arith.constant dense<0.000000e+00> : vector<2x32xf32>
    %664 = vector.multi_reduction <add>, %663, %cst_181 [1] : vector<2x8x32xf32> to vector<2x32xf32>
    %665 = vector.extract_strided_slice %641 {offsets = [0, 32], sizes = [2, 32], strides = [1, 1]} : vector<2x64xf32> to vector<2x32xf32>
    %666 = vector.shape_cast %665 : vector<2x32xf32> to vector<2x1x32xf32>
    %667 = vector.broadcast %666 : vector<2x1x32xf32> to vector<2x6x32xf32>
    %668 = arith.addf %667, %606 : vector<2x6x32xf32>
    %669 = math.tanh %668 : vector<2x6x32xf32>
    %670 = vector.shape_cast %18 : vector<1x32xf32> to vector<1x1x32xf32>
    %671 = vector.broadcast %670 : vector<1x1x32xf32> to vector<2x6x32xf32>
    %672 = arith.mulf %669, %671 : vector<2x6x32xf32>
    %cst_182 = arith.constant dense<0.000000e+00> : vector<2x6xf32>
    %673 = vector.multi_reduction <add>, %672, %cst_182 [2] : vector<2x6x32xf32> to vector<2x6xf32>
    %674 = arith.addf %673, %590 : vector<2x6xf32>
    %cst_183 = arith.constant dense<0xFF800000> : vector<2xf32>
    %675 = vector.multi_reduction <maximumf>, %674, %cst_183 [1] : vector<2x6xf32> to vector<2xf32>
    %676 = vector.shape_cast %675 : vector<2xf32> to vector<2x1xf32>
    %677 = vector.broadcast %676 : vector<2x1xf32> to vector<2x6xf32>
    %678 = arith.subf %674, %677 : vector<2x6xf32>
    %679 = math.exp %678 : vector<2x6xf32>
    %cst_184 = arith.constant dense<0.000000e+00> : vector<2xf32>
    %680 = vector.multi_reduction <add>, %679, %cst_184 [1] : vector<2x6xf32> to vector<2xf32>
    %681 = vector.shape_cast %680 : vector<2xf32> to vector<2x1xf32>
    %682 = vector.broadcast %681 : vector<2x1xf32> to vector<2x6xf32>
    %683 = arith.divf %679, %682 : vector<2x6xf32>
    %684 = vector.shape_cast %683 : vector<2x6xf32> to vector<2x6x1xf32>
    %685 = vector.broadcast %684 : vector<2x6x1xf32> to vector<2x6x32xf32>
    %686 = arith.mulf %685, %581 : vector<2x6x32xf32>
    %cst_185 = arith.constant dense<0.000000e+00> : vector<2x32xf32>
    %687 = vector.multi_reduction <add>, %686, %cst_185 [1] : vector<2x6x32xf32> to vector<2x32xf32>
    %688 = tpu.concatenate %638, %636, %664, %687, %660, %683, %607 in 1 : vector<2x32xf32>, vector<2x32xf32>, vector<2x32xf32>, vector<2x32xf32>, vector<2x8xf32>, vector<2x6xf32>, vector<2x114xf32> -> vector<2x256xf32>
    %c0_186 = arith.constant 0 : index
    %c0_187 = arith.constant 0 : index
    %c0_188 = arith.constant 0 : index
    %689 = vector.load %arg10[%c0_186, %c0_187, %c0_188] : memref<2x6x256xf32, #tpu.memory_space<vmem>>, vector<2x1x256xf32>
    %690 = vector.shape_cast %689 : vector<2x1x256xf32> to vector<2x256xf32>
    %691 = vector.shape_cast %688 : vector<2x256xf32> to vector<2x1x256xf32>
    tpu.vector_store %arg10[%c0_186, %c0_187, %c0_188], %691 {strides = array<i32>} : memref<2x6x256xf32, #tpu.memory_space<vmem>>, vector<2x1x256xf32>,
    %692 = vector.extract_strided_slice %596 {offsets = [0, 1, 0], sizes = [2, 1, 128], strides = [1, 1, 1]} : vector<2x6x128xf32> to vector<2x1x128xf32>
    %693 = vector.shape_cast %692 : vector<2x1x128xf32> to vector<2x128xf32>
    %cst_189 = arith.constant dense<0.000000e+00> : vector<2x128xf32>
    %694 = tpu.matmul %638, %5, %cst_189 {dimension_numbers = #tpu.dot_dimension_numbers<[1], [0], [0], [1], [0, 0, 1, 1], [], []>} : vector<2x32xf32>, vector<32x128xf32>, vector<2x128xf32> -> vector<2x128xf32>
    %695 = arith.addf %693, %694 : vector<2x128xf32>
    %696 = vector.extract_strided_slice %695 {offsets = [0, 0], sizes = [2, 32], strides = [1, 1]} : vector<2x128xf32> to vector<2x32xf32>
    %697 = arith.negf %696 : vector<2x32xf32>
    %698 = math.exp %697 : vector<2x32xf32>
    %cst_190 = arith.constant 1.000000e+00 : f32
    %699 = vector.broadcast %cst_190 : f32 to vector<2x32xf32>
    %700 = arith.addf %699, %698 : vector<2x32xf32>
    %701 = arith.divf %699, %700 : vector<2x32xf32>
    %702 = vector.extract_strided_slice %695 {offsets = [0, 32], sizes = [2, 32], strides = [1, 1]} : vector<2x128xf32> to vector<2x32xf32>
    %703 = arith.negf %702 : vector<2x32xf32>
    %704 = math.exp %703 : vector<2x32xf32>
    %cst_191 = arith.constant 1.000000e+00 : f32
    %705 = vector.broadcast %cst_191 : f32 to vector<2x32xf32>
    %706 = arith.addf %705, %704 : vector<2x32xf32>
    %707 = arith.divf %705, %706 : vector<2x32xf32>
    %708 = vector.extract_strided_slice %695 {offsets = [0, 64], sizes = [2, 32], strides = [1, 1]} : vector<2x128xf32> to vector<2x32xf32>
    %709 = math.tanh %708 : vector<2x32xf32>
    %710 = vector.extract_strided_slice %695 {offsets = [0, 96], sizes = [2, 32], strides = [1, 1]} : vector<2x128xf32> to vector<2x32xf32>
    %711 = arith.negf %710 : vector<2x32xf32>
    %712 = math.exp %711 : vector<2x32xf32>
    %cst_192 = arith.constant 1.000000e+00 : f32
    %713 = vector.broadcast %cst_192 : f32 to vector<2x32xf32>
    %714 = arith.addf %713, %712 : vector<2x32xf32>
    %715 = arith.divf %713, %714 : vector<2x32xf32>
    %716 = arith.mulf %707, %636 : vector<2x32xf32>
    %717 = arith.mulf %701, %709 : vector<2x32xf32>
    %718 = arith.addf %716, %717 : vector<2x32xf32>
    %719 = math.tanh %718 : vector<2x32xf32>
    %720 = arith.mulf %715, %719 : vector<2x32xf32>
    %cst_193 = arith.constant dense<0.000000e+00> : vector<2x64xf32>
    %721 = tpu.matmul %720, %6, %cst_193 {dimension_numbers = #tpu.dot_dimension_numbers<[1], [0], [0], [1], [0, 0, 1, 1], [], []>} : vector<2x32xf32>, vector<32x64xf32>, vector<2x64xf32> -> vector<2x64xf32>
    %722 = vector.broadcast %15 : vector<1x64xf32> to vector<2x64xf32>
    %723 = arith.addf %721, %722 : vector<2x64xf32>
    %724 = vector.extract_strided_slice %723 {offsets = [0, 0], sizes = [2, 32], strides = [1, 1]} : vector<2x64xf32> to vector<2x32xf32>
    %725 = vector.shape_cast %724 : vector<2x32xf32> to vector<2x1x32xf32>
    %726 = vector.broadcast %725 : vector<2x1x32xf32> to vector<2x8x32xf32>
    %727 = arith.addf %726, %604 : vector<2x8x32xf32>
    %728 = math.tanh %727 : vector<2x8x32xf32>
    %729 = vector.shape_cast %17 : vector<1x32xf32> to vector<1x1x32xf32>
    %730 = vector.broadcast %729 : vector<1x1x32xf32> to vector<2x8x32xf32>
    %731 = arith.mulf %728, %730 : vector<2x8x32xf32>
    %cst_194 = arith.constant dense<0.000000e+00> : vector<2x8xf32>
    %732 = vector.multi_reduction <add>, %731, %cst_194 [2] : vector<2x8x32xf32> to vector<2x8xf32>
    %733 = arith.addf %732, %586 : vector<2x8xf32>
    %cst_195 = arith.constant dense<0xFF800000> : vector<2xf32>
    %734 = vector.multi_reduction <maximumf>, %733, %cst_195 [1] : vector<2x8xf32> to vector<2xf32>
    %735 = vector.shape_cast %734 : vector<2xf32> to vector<2x1xf32>
    %736 = vector.broadcast %735 : vector<2x1xf32> to vector<2x8xf32>
    %737 = arith.subf %733, %736 : vector<2x8xf32>
    %738 = math.exp %737 : vector<2x8xf32>
    %cst_196 = arith.constant dense<0.000000e+00> : vector<2xf32>
    %739 = vector.multi_reduction <add>, %738, %cst_196 [1] : vector<2x8xf32> to vector<2xf32>
    %740 = vector.shape_cast %739 : vector<2xf32> to vector<2x1xf32>
    %741 = vector.broadcast %740 : vector<2x1xf32> to vector<2x8xf32>
    %742 = arith.divf %738, %741 : vector<2x8xf32>
    %743 = vector.shape_cast %742 : vector<2x8xf32> to vector<2x8x1xf32>
    %744 = vector.broadcast %743 : vector<2x8x1xf32> to vector<2x8x32xf32>
    %745 = arith.mulf %744, %548 : vector<2x8x32xf32>
    %cst_197 = arith.constant dense<0.000000e+00> : vector<2x32xf32>
    %746 = vector.multi_reduction <add>, %745, %cst_197 [1] : vector<2x8x32xf32> to vector<2x32xf32>
    %747 = vector.extract_strided_slice %723 {offsets = [0, 32], sizes = [2, 32], strides = [1, 1]} : vector<2x64xf32> to vector<2x32xf32>
    %748 = vector.shape_cast %747 : vector<2x32xf32> to vector<2x1x32xf32>
    %749 = vector.broadcast %748 : vector<2x1x32xf32> to vector<2x6x32xf32>
    %750 = arith.addf %749, %606 : vector<2x6x32xf32>
    %751 = math.tanh %750 : vector<2x6x32xf32>
    %752 = vector.shape_cast %18 : vector<1x32xf32> to vector<1x1x32xf32>
    %753 = vector.broadcast %752 : vector<1x1x32xf32> to vector<2x6x32xf32>
    %754 = arith.mulf %751, %753 : vector<2x6x32xf32>
    %cst_198 = arith.constant dense<0.000000e+00> : vector<2x6xf32>
    %755 = vector.multi_reduction <add>, %754, %cst_198 [2] : vector<2x6x32xf32> to vector<2x6xf32>
    %756 = arith.addf %755, %590 : vector<2x6xf32>
    %cst_199 = arith.constant dense<0xFF800000> : vector<2xf32>
    %757 = vector.multi_reduction <maximumf>, %756, %cst_199 [1] : vector<2x6xf32> to vector<2xf32>
    %758 = vector.shape_cast %757 : vector<2xf32> to vector<2x1xf32>
    %759 = vector.broadcast %758 : vector<2x1xf32> to vector<2x6xf32>
    %760 = arith.subf %756, %759 : vector<2x6xf32>
    %761 = math.exp %760 : vector<2x6xf32>
    %cst_200 = arith.constant dense<0.000000e+00> : vector<2xf32>
    %762 = vector.multi_reduction <add>, %761, %cst_200 [1] : vector<2x6xf32> to vector<2xf32>
    %763 = vector.shape_cast %762 : vector<2xf32> to vector<2x1xf32>
    %764 = vector.broadcast %763 : vector<2x1xf32> to vector<2x6xf32>
    %765 = arith.divf %761, %764 : vector<2x6xf32>
    %766 = vector.shape_cast %765 : vector<2x6xf32> to vector<2x6x1xf32>
    %767 = vector.broadcast %766 : vector<2x6x1xf32> to vector<2x6x32xf32>
    %768 = arith.mulf %767, %581 : vector<2x6x32xf32>
    %cst_201 = arith.constant dense<0.000000e+00> : vector<2x32xf32>
    %769 = vector.multi_reduction <add>, %768, %cst_201 [1] : vector<2x6x32xf32> to vector<2x32xf32>
    %770 = tpu.concatenate %720, %718, %746, %769, %742, %765, %607 in 1 : vector<2x32xf32>, vector<2x32xf32>, vector<2x32xf32>, vector<2x32xf32>, vector<2x8xf32>, vector<2x6xf32>, vector<2x114xf32> -> vector<2x256xf32>
    %c0_202 = arith.constant 0 : index
    %c1_203 = arith.constant 1 : index
    %c0_204 = arith.constant 0 : index
    %771 = vector.load %arg10[%c0_202, %c1_203, %c0_204] : memref<2x6x256xf32, #tpu.memory_space<vmem>>, vector<2x1x256xf32>
    %772 = vector.shape_cast %771 : vector<2x1x256xf32> to vector<2x256xf32>
    %773 = vector.shape_cast %770 : vector<2x256xf32> to vector<2x1x256xf32>
    tpu.vector_store %arg10[%c0_202, %c1_203, %c0_204], %773 {strides = array<i32>} : memref<2x6x256xf32, #tpu.memory_space<vmem>>, vector<2x1x256xf32>,
    %774 = vector.extract_strided_slice %596 {offsets = [0, 2, 0], sizes = [2, 1, 128], strides = [1, 1, 1]} : vector<2x6x128xf32> to vector<2x1x128xf32>
    %775 = vector.shape_cast %774 : vector<2x1x128xf32> to vector<2x128xf32>
    %cst_205 = arith.constant dense<0.000000e+00> : vector<2x128xf32>
    %776 = tpu.matmul %720, %5, %cst_205 {dimension_numbers = #tpu.dot_dimension_numbers<[1], [0], [0], [1], [0, 0, 1, 1], [], []>} : vector<2x32xf32>, vector<32x128xf32>, vector<2x128xf32> -> vector<2x128xf32>
    %777 = arith.addf %775, %776 : vector<2x128xf32>
    %778 = vector.extract_strided_slice %777 {offsets = [0, 0], sizes = [2, 32], strides = [1, 1]} : vector<2x128xf32> to vector<2x32xf32>
    %779 = arith.negf %778 : vector<2x32xf32>
    %780 = math.exp %779 : vector<2x32xf32>
    %cst_206 = arith.constant 1.000000e+00 : f32
    %781 = vector.broadcast %cst_206 : f32 to vector<2x32xf32>
    %782 = arith.addf %781, %780 : vector<2x32xf32>
    %783 = arith.divf %781, %782 : vector<2x32xf32>
    %784 = vector.extract_strided_slice %777 {offsets = [0, 32], sizes = [2, 32], strides = [1, 1]} : vector<2x128xf32> to vector<2x32xf32>
    %785 = arith.negf %784 : vector<2x32xf32>
    %786 = math.exp %785 : vector<2x32xf32>
    %cst_207 = arith.constant 1.000000e+00 : f32
    %787 = vector.broadcast %cst_207 : f32 to vector<2x32xf32>
    %788 = arith.addf %787, %786 : vector<2x32xf32>
    %789 = arith.divf %787, %788 : vector<2x32xf32>
    %790 = vector.extract_strided_slice %777 {offsets = [0, 64], sizes = [2, 32], strides = [1, 1]} : vector<2x128xf32> to vector<2x32xf32>
    %791 = math.tanh %790 : vector<2x32xf32>
    %792 = vector.extract_strided_slice %777 {offsets = [0, 96], sizes = [2, 32], strides = [1, 1]} : vector<2x128xf32> to vector<2x32xf32>
    %793 = arith.negf %792 : vector<2x32xf32>
    %794 = math.exp %793 : vector<2x32xf32>
    %cst_208 = arith.constant 1.000000e+00 : f32
    %795 = vector.broadcast %cst_208 : f32 to vector<2x32xf32>
    %796 = arith.addf %795, %794 : vector<2x32xf32>
    %797 = arith.divf %795, %796 : vector<2x32xf32>
    %798 = arith.mulf %789, %718 : vector<2x32xf32>
    %799 = arith.mulf %783, %791 : vector<2x32xf32>
    %800 = arith.addf %798, %799 : vector<2x32xf32>
    %801 = math.tanh %800 : vector<2x32xf32>
    %802 = arith.mulf %797, %801 : vector<2x32xf32>
    %cst_209 = arith.constant dense<0.000000e+00> : vector<2x64xf32>
    %803 = tpu.matmul %802, %6, %cst_209 {dimension_numbers = #tpu.dot_dimension_numbers<[1], [0], [0], [1], [0, 0, 1, 1], [], []>} : vector<2x32xf32>, vector<32x64xf32>, vector<2x64xf32> -> vector<2x64xf32>
    %804 = vector.broadcast %15 : vector<1x64xf32> to vector<2x64xf32>
    %805 = arith.addf %803, %804 : vector<2x64xf32>
    %806 = vector.extract_strided_slice %805 {offsets = [0, 0], sizes = [2, 32], strides = [1, 1]} : vector<2x64xf32> to vector<2x32xf32>
    %807 = vector.shape_cast %806 : vector<2x32xf32> to vector<2x1x32xf32>
    %808 = vector.broadcast %807 : vector<2x1x32xf32> to vector<2x8x32xf32>
    %809 = arith.addf %808, %604 : vector<2x8x32xf32>
    %810 = math.tanh %809 : vector<2x8x32xf32>
    %811 = vector.shape_cast %17 : vector<1x32xf32> to vector<1x1x32xf32>
    %812 = vector.broadcast %811 : vector<1x1x32xf32> to vector<2x8x32xf32>
    %813 = arith.mulf %810, %812 : vector<2x8x32xf32>
    %cst_210 = arith.constant dense<0.000000e+00> : vector<2x8xf32>
    %814 = vector.multi_reduction <add>, %813, %cst_210 [2] : vector<2x8x32xf32> to vector<2x8xf32>
    %815 = arith.addf %814, %586 : vector<2x8xf32>
    %cst_211 = arith.constant dense<0xFF800000> : vector<2xf32>
    %816 = vector.multi_reduction <maximumf>, %815, %cst_211 [1] : vector<2x8xf32> to vector<2xf32>
    %817 = vector.shape_cast %816 : vector<2xf32> to vector<2x1xf32>
    %818 = vector.broadcast %817 : vector<2x1xf32> to vector<2x8xf32>
    %819 = arith.subf %815, %818 : vector<2x8xf32>
    %820 = math.exp %819 : vector<2x8xf32>
    %cst_212 = arith.constant dense<0.000000e+00> : vector<2xf32>
    %821 = vector.multi_reduction <add>, %820, %cst_212 [1] : vector<2x8xf32> to vector<2xf32>
    %822 = vector.shape_cast %821 : vector<2xf32> to vector<2x1xf32>
    %823 = vector.broadcast %822 : vector<2x1xf32> to vector<2x8xf32>
    %824 = arith.divf %820, %823 : vector<2x8xf32>
    %825 = vector.shape_cast %824 : vector<2x8xf32> to vector<2x8x1xf32>
    %826 = vector.broadcast %825 : vector<2x8x1xf32> to vector<2x8x32xf32>
    %827 = arith.mulf %826, %548 : vector<2x8x32xf32>
    %cst_213 = arith.constant dense<0.000000e+00> : vector<2x32xf32>
    %828 = vector.multi_reduction <add>, %827, %cst_213 [1] : vector<2x8x32xf32> to vector<2x32xf32>
    %829 = vector.extract_strided_slice %805 {offsets = [0, 32], sizes = [2, 32], strides = [1, 1]} : vector<2x64xf32> to vector<2x32xf32>
    %830 = vector.shape_cast %829 : vector<2x32xf32> to vector<2x1x32xf32>
    %831 = vector.broadcast %830 : vector<2x1x32xf32> to vector<2x6x32xf32>
    %832 = arith.addf %831, %606 : vector<2x6x32xf32>
    %833 = math.tanh %832 : vector<2x6x32xf32>
    %834 = vector.shape_cast %18 : vector<1x32xf32> to vector<1x1x32xf32>
    %835 = vector.broadcast %834 : vector<1x1x32xf32> to vector<2x6x32xf32>
    %836 = arith.mulf %833, %835 : vector<2x6x32xf32>
    %cst_214 = arith.constant dense<0.000000e+00> : vector<2x6xf32>
    %837 = vector.multi_reduction <add>, %836, %cst_214 [2] : vector<2x6x32xf32> to vector<2x6xf32>
    %838 = arith.addf %837, %590 : vector<2x6xf32>
    %cst_215 = arith.constant dense<0xFF800000> : vector<2xf32>
    %839 = vector.multi_reduction <maximumf>, %838, %cst_215 [1] : vector<2x6xf32> to vector<2xf32>
    %840 = vector.shape_cast %839 : vector<2xf32> to vector<2x1xf32>
    %841 = vector.broadcast %840 : vector<2x1xf32> to vector<2x6xf32>
    %842 = arith.subf %838, %841 : vector<2x6xf32>
    %843 = math.exp %842 : vector<2x6xf32>
    %cst_216 = arith.constant dense<0.000000e+00> : vector<2xf32>
    %844 = vector.multi_reduction <add>, %843, %cst_216 [1] : vector<2x6xf32> to vector<2xf32>
    %845 = vector.shape_cast %844 : vector<2xf32> to vector<2x1xf32>
    %846 = vector.broadcast %845 : vector<2x1xf32> to vector<2x6xf32>
    %847 = arith.divf %843, %846 : vector<2x6xf32>
    %848 = vector.shape_cast %847 : vector<2x6xf32> to vector<2x6x1xf32>
    %849 = vector.broadcast %848 : vector<2x6x1xf32> to vector<2x6x32xf32>
    %850 = arith.mulf %849, %581 : vector<2x6x32xf32>
    %cst_217 = arith.constant dense<0.000000e+00> : vector<2x32xf32>
    %851 = vector.multi_reduction <add>, %850, %cst_217 [1] : vector<2x6x32xf32> to vector<2x32xf32>
    %852 = tpu.concatenate %802, %800, %828, %851, %824, %847, %607 in 1 : vector<2x32xf32>, vector<2x32xf32>, vector<2x32xf32>, vector<2x32xf32>, vector<2x8xf32>, vector<2x6xf32>, vector<2x114xf32> -> vector<2x256xf32>
    %c0_218 = arith.constant 0 : index
    %c2_219 = arith.constant 2 : index
    %c0_220 = arith.constant 0 : index
    %853 = vector.load %arg10[%c0_218, %c2_219, %c0_220] : memref<2x6x256xf32, #tpu.memory_space<vmem>>, vector<2x1x256xf32>
    %854 = vector.shape_cast %853 : vector<2x1x256xf32> to vector<2x256xf32>
    %855 = vector.shape_cast %852 : vector<2x256xf32> to vector<2x1x256xf32>
    tpu.vector_store %arg10[%c0_218, %c2_219, %c0_220], %855 {strides = array<i32>} : memref<2x6x256xf32, #tpu.memory_space<vmem>>, vector<2x1x256xf32>,
    %856 = vector.extract_strided_slice %596 {offsets = [0, 3, 0], sizes = [2, 1, 128], strides = [1, 1, 1]} : vector<2x6x128xf32> to vector<2x1x128xf32>
    %857 = vector.shape_cast %856 : vector<2x1x128xf32> to vector<2x128xf32>
    %cst_221 = arith.constant dense<0.000000e+00> : vector<2x128xf32>
    %858 = tpu.matmul %802, %5, %cst_221 {dimension_numbers = #tpu.dot_dimension_numbers<[1], [0], [0], [1], [0, 0, 1, 1], [], []>} : vector<2x32xf32>, vector<32x128xf32>, vector<2x128xf32> -> vector<2x128xf32>
    %859 = arith.addf %857, %858 : vector<2x128xf32>
    %860 = vector.extract_strided_slice %859 {offsets = [0, 0], sizes = [2, 32], strides = [1, 1]} : vector<2x128xf32> to vector<2x32xf32>
    %861 = arith.negf %860 : vector<2x32xf32>
    %862 = math.exp %861 : vector<2x32xf32>
    %cst_222 = arith.constant 1.000000e+00 : f32
    %863 = vector.broadcast %cst_222 : f32 to vector<2x32xf32>
    %864 = arith.addf %863, %862 : vector<2x32xf32>
    %865 = arith.divf %863, %864 : vector<2x32xf32>
    %866 = vector.extract_strided_slice %859 {offsets = [0, 32], sizes = [2, 32], strides = [1, 1]} : vector<2x128xf32> to vector<2x32xf32>
    %867 = arith.negf %866 : vector<2x32xf32>
    %868 = math.exp %867 : vector<2x32xf32>
    %cst_223 = arith.constant 1.000000e+00 : f32
    %869 = vector.broadcast %cst_223 : f32 to vector<2x32xf32>
    %870 = arith.addf %869, %868 : vector<2x32xf32>
    %871 = arith.divf %869, %870 : vector<2x32xf32>
    %872 = vector.extract_strided_slice %859 {offsets = [0, 64], sizes = [2, 32], strides = [1, 1]} : vector<2x128xf32> to vector<2x32xf32>
    %873 = math.tanh %872 : vector<2x32xf32>
    %874 = vector.extract_strided_slice %859 {offsets = [0, 96], sizes = [2, 32], strides = [1, 1]} : vector<2x128xf32> to vector<2x32xf32>
    %875 = arith.negf %874 : vector<2x32xf32>
    %876 = math.exp %875 : vector<2x32xf32>
    %cst_224 = arith.constant 1.000000e+00 : f32
    %877 = vector.broadcast %cst_224 : f32 to vector<2x32xf32>
    %878 = arith.addf %877, %876 : vector<2x32xf32>
    %879 = arith.divf %877, %878 : vector<2x32xf32>
    %880 = arith.mulf %871, %800 : vector<2x32xf32>
    %881 = arith.mulf %865, %873 : vector<2x32xf32>
    %882 = arith.addf %880, %881 : vector<2x32xf32>
    %883 = math.tanh %882 : vector<2x32xf32>
    %884 = arith.mulf %879, %883 : vector<2x32xf32>
    %cst_225 = arith.constant dense<0.000000e+00> : vector<2x64xf32>
    %885 = tpu.matmul %884, %6, %cst_225 {dimension_numbers = #tpu.dot_dimension_numbers<[1], [0], [0], [1], [0, 0, 1, 1], [], []>} : vector<2x32xf32>, vector<32x64xf32>, vector<2x64xf32> -> vector<2x64xf32>
    %886 = vector.broadcast %15 : vector<1x64xf32> to vector<2x64xf32>
    %887 = arith.addf %885, %886 : vector<2x64xf32>
    %888 = vector.extract_strided_slice %887 {offsets = [0, 0], sizes = [2, 32], strides = [1, 1]} : vector<2x64xf32> to vector<2x32xf32>
    %889 = vector.shape_cast %888 : vector<2x32xf32> to vector<2x1x32xf32>
    %890 = vector.broadcast %889 : vector<2x1x32xf32> to vector<2x8x32xf32>
    %891 = arith.addf %890, %604 : vector<2x8x32xf32>
    %892 = math.tanh %891 : vector<2x8x32xf32>
    %893 = vector.shape_cast %17 : vector<1x32xf32> to vector<1x1x32xf32>
    %894 = vector.broadcast %893 : vector<1x1x32xf32> to vector<2x8x32xf32>
    %895 = arith.mulf %892, %894 : vector<2x8x32xf32>
    %cst_226 = arith.constant dense<0.000000e+00> : vector<2x8xf32>
    %896 = vector.multi_reduction <add>, %895, %cst_226 [2] : vector<2x8x32xf32> to vector<2x8xf32>
    %897 = arith.addf %896, %586 : vector<2x8xf32>
    %cst_227 = arith.constant dense<0xFF800000> : vector<2xf32>
    %898 = vector.multi_reduction <maximumf>, %897, %cst_227 [1] : vector<2x8xf32> to vector<2xf32>
    %899 = vector.shape_cast %898 : vector<2xf32> to vector<2x1xf32>
    %900 = vector.broadcast %899 : vector<2x1xf32> to vector<2x8xf32>
    %901 = arith.subf %897, %900 : vector<2x8xf32>
    %902 = math.exp %901 : vector<2x8xf32>
    %cst_228 = arith.constant dense<0.000000e+00> : vector<2xf32>
    %903 = vector.multi_reduction <add>, %902, %cst_228 [1] : vector<2x8xf32> to vector<2xf32>
    %904 = vector.shape_cast %903 : vector<2xf32> to vector<2x1xf32>
    %905 = vector.broadcast %904 : vector<2x1xf32> to vector<2x8xf32>
    %906 = arith.divf %902, %905 : vector<2x8xf32>
    %907 = vector.shape_cast %906 : vector<2x8xf32> to vector<2x8x1xf32>
    %908 = vector.broadcast %907 : vector<2x8x1xf32> to vector<2x8x32xf32>
    %909 = arith.mulf %908, %548 : vector<2x8x32xf32>
    %cst_229 = arith.constant dense<0.000000e+00> : vector<2x32xf32>
    %910 = vector.multi_reduction <add>, %909, %cst_229 [1] : vector<2x8x32xf32> to vector<2x32xf32>
    %911 = vector.extract_strided_slice %887 {offsets = [0, 32], sizes = [2, 32], strides = [1, 1]} : vector<2x64xf32> to vector<2x32xf32>
    %912 = vector.shape_cast %911 : vector<2x32xf32> to vector<2x1x32xf32>
    %913 = vector.broadcast %912 : vector<2x1x32xf32> to vector<2x6x32xf32>
    %914 = arith.addf %913, %606 : vector<2x6x32xf32>
    %915 = math.tanh %914 : vector<2x6x32xf32>
    %916 = vector.shape_cast %18 : vector<1x32xf32> to vector<1x1x32xf32>
    %917 = vector.broadcast %916 : vector<1x1x32xf32> to vector<2x6x32xf32>
    %918 = arith.mulf %915, %917 : vector<2x6x32xf32>
    %cst_230 = arith.constant dense<0.000000e+00> : vector<2x6xf32>
    %919 = vector.multi_reduction <add>, %918, %cst_230 [2] : vector<2x6x32xf32> to vector<2x6xf32>
    %920 = arith.addf %919, %590 : vector<2x6xf32>
    %cst_231 = arith.constant dense<0xFF800000> : vector<2xf32>
    %921 = vector.multi_reduction <maximumf>, %920, %cst_231 [1] : vector<2x6xf32> to vector<2xf32>
    %922 = vector.shape_cast %921 : vector<2xf32> to vector<2x1xf32>
    %923 = vector.broadcast %922 : vector<2x1xf32> to vector<2x6xf32>
    %924 = arith.subf %920, %923 : vector<2x6xf32>
    %925 = math.exp %924 : vector<2x6xf32>
    %cst_232 = arith.constant dense<0.000000e+00> : vector<2xf32>
    %926 = vector.multi_reduction <add>, %925, %cst_232 [1] : vector<2x6xf32> to vector<2xf32>
    %927 = vector.shape_cast %926 : vector<2xf32> to vector<2x1xf32>
    %928 = vector.broadcast %927 : vector<2x1xf32> to vector<2x6xf32>
    %929 = arith.divf %925, %928 : vector<2x6xf32>
    %930 = vector.shape_cast %929 : vector<2x6xf32> to vector<2x6x1xf32>
    %931 = vector.broadcast %930 : vector<2x6x1xf32> to vector<2x6x32xf32>
    %932 = arith.mulf %931, %581 : vector<2x6x32xf32>
    %cst_233 = arith.constant dense<0.000000e+00> : vector<2x32xf32>
    %933 = vector.multi_reduction <add>, %932, %cst_233 [1] : vector<2x6x32xf32> to vector<2x32xf32>
    %934 = tpu.concatenate %884, %882, %910, %933, %906, %929, %607 in 1 : vector<2x32xf32>, vector<2x32xf32>, vector<2x32xf32>, vector<2x32xf32>, vector<2x8xf32>, vector<2x6xf32>, vector<2x114xf32> -> vector<2x256xf32>
    %c0_234 = arith.constant 0 : index
    %c3_235 = arith.constant 3 : index
    %c0_236 = arith.constant 0 : index
    %935 = vector.load %arg10[%c0_234, %c3_235, %c0_236] : memref<2x6x256xf32, #tpu.memory_space<vmem>>, vector<2x1x256xf32>
    %936 = vector.shape_cast %935 : vector<2x1x256xf32> to vector<2x256xf32>
    %937 = vector.shape_cast %934 : vector<2x256xf32> to vector<2x1x256xf32>
    tpu.vector_store %arg10[%c0_234, %c3_235, %c0_236], %937 {strides = array<i32>} : memref<2x6x256xf32, #tpu.memory_space<vmem>>, vector<2x1x256xf32>,
    %938 = vector.extract_strided_slice %596 {offsets = [0, 4, 0], sizes = [2, 1, 128], strides = [1, 1, 1]} : vector<2x6x128xf32> to vector<2x1x128xf32>
    %939 = vector.shape_cast %938 : vector<2x1x128xf32> to vector<2x128xf32>
    %cst_237 = arith.constant dense<0.000000e+00> : vector<2x128xf32>
    %940 = tpu.matmul %884, %5, %cst_237 {dimension_numbers = #tpu.dot_dimension_numbers<[1], [0], [0], [1], [0, 0, 1, 1], [], []>} : vector<2x32xf32>, vector<32x128xf32>, vector<2x128xf32> -> vector<2x128xf32>
    %941 = arith.addf %939, %940 : vector<2x128xf32>
    %942 = vector.extract_strided_slice %941 {offsets = [0, 0], sizes = [2, 32], strides = [1, 1]} : vector<2x128xf32> to vector<2x32xf32>
    %943 = arith.negf %942 : vector<2x32xf32>
    %944 = math.exp %943 : vector<2x32xf32>
    %cst_238 = arith.constant 1.000000e+00 : f32
    %945 = vector.broadcast %cst_238 : f32 to vector<2x32xf32>
    %946 = arith.addf %945, %944 : vector<2x32xf32>
    %947 = arith.divf %945, %946 : vector<2x32xf32>
    %948 = vector.extract_strided_slice %941 {offsets = [0, 32], sizes = [2, 32], strides = [1, 1]} : vector<2x128xf32> to vector<2x32xf32>
    %949 = arith.negf %948 : vector<2x32xf32>
    %950 = math.exp %949 : vector<2x32xf32>
    %cst_239 = arith.constant 1.000000e+00 : f32
    %951 = vector.broadcast %cst_239 : f32 to vector<2x32xf32>
    %952 = arith.addf %951, %950 : vector<2x32xf32>
    %953 = arith.divf %951, %952 : vector<2x32xf32>
    %954 = vector.extract_strided_slice %941 {offsets = [0, 64], sizes = [2, 32], strides = [1, 1]} : vector<2x128xf32> to vector<2x32xf32>
    %955 = math.tanh %954 : vector<2x32xf32>
    %956 = vector.extract_strided_slice %941 {offsets = [0, 96], sizes = [2, 32], strides = [1, 1]} : vector<2x128xf32> to vector<2x32xf32>
    %957 = arith.negf %956 : vector<2x32xf32>
    %958 = math.exp %957 : vector<2x32xf32>
    %cst_240 = arith.constant 1.000000e+00 : f32
    %959 = vector.broadcast %cst_240 : f32 to vector<2x32xf32>
    %960 = arith.addf %959, %958 : vector<2x32xf32>
    %961 = arith.divf %959, %960 : vector<2x32xf32>
    %962 = arith.mulf %953, %882 : vector<2x32xf32>
    %963 = arith.mulf %947, %955 : vector<2x32xf32>
    %964 = arith.addf %962, %963 : vector<2x32xf32>
    %965 = math.tanh %964 : vector<2x32xf32>
    %966 = arith.mulf %961, %965 : vector<2x32xf32>
    %cst_241 = arith.constant dense<0.000000e+00> : vector<2x64xf32>
    %967 = tpu.matmul %966, %6, %cst_241 {dimension_numbers = #tpu.dot_dimension_numbers<[1], [0], [0], [1], [0, 0, 1, 1], [], []>} : vector<2x32xf32>, vector<32x64xf32>, vector<2x64xf32> -> vector<2x64xf32>
    %968 = vector.broadcast %15 : vector<1x64xf32> to vector<2x64xf32>
    %969 = arith.addf %967, %968 : vector<2x64xf32>
    %970 = vector.extract_strided_slice %969 {offsets = [0, 0], sizes = [2, 32], strides = [1, 1]} : vector<2x64xf32> to vector<2x32xf32>
    %971 = vector.shape_cast %970 : vector<2x32xf32> to vector<2x1x32xf32>
    %972 = vector.broadcast %971 : vector<2x1x32xf32> to vector<2x8x32xf32>
    %973 = arith.addf %972, %604 : vector<2x8x32xf32>
    %974 = math.tanh %973 : vector<2x8x32xf32>
    %975 = vector.shape_cast %17 : vector<1x32xf32> to vector<1x1x32xf32>
    %976 = vector.broadcast %975 : vector<1x1x32xf32> to vector<2x8x32xf32>
    %977 = arith.mulf %974, %976 : vector<2x8x32xf32>
    %cst_242 = arith.constant dense<0.000000e+00> : vector<2x8xf32>
    %978 = vector.multi_reduction <add>, %977, %cst_242 [2] : vector<2x8x32xf32> to vector<2x8xf32>
    %979 = arith.addf %978, %586 : vector<2x8xf32>
    %cst_243 = arith.constant dense<0xFF800000> : vector<2xf32>
    %980 = vector.multi_reduction <maximumf>, %979, %cst_243 [1] : vector<2x8xf32> to vector<2xf32>
    %981 = vector.shape_cast %980 : vector<2xf32> to vector<2x1xf32>
    %982 = vector.broadcast %981 : vector<2x1xf32> to vector<2x8xf32>
    %983 = arith.subf %979, %982 : vector<2x8xf32>
    %984 = math.exp %983 : vector<2x8xf32>
    %cst_244 = arith.constant dense<0.000000e+00> : vector<2xf32>
    %985 = vector.multi_reduction <add>, %984, %cst_244 [1] : vector<2x8xf32> to vector<2xf32>
    %986 = vector.shape_cast %985 : vector<2xf32> to vector<2x1xf32>
    %987 = vector.broadcast %986 : vector<2x1xf32> to vector<2x8xf32>
    %988 = arith.divf %984, %987 : vector<2x8xf32>
    %989 = vector.shape_cast %988 : vector<2x8xf32> to vector<2x8x1xf32>
    %990 = vector.broadcast %989 : vector<2x8x1xf32> to vector<2x8x32xf32>
    %991 = arith.mulf %990, %548 : vector<2x8x32xf32>
    %cst_245 = arith.constant dense<0.000000e+00> : vector<2x32xf32>
    %992 = vector.multi_reduction <add>, %991, %cst_245 [1] : vector<2x8x32xf32> to vector<2x32xf32>
    %993 = vector.extract_strided_slice %969 {offsets = [0, 32], sizes = [2, 32], strides = [1, 1]} : vector<2x64xf32> to vector<2x32xf32>
    %994 = vector.shape_cast %993 : vector<2x32xf32> to vector<2x1x32xf32>
    %995 = vector.broadcast %994 : vector<2x1x32xf32> to vector<2x6x32xf32>
    %996 = arith.addf %995, %606 : vector<2x6x32xf32>
    %997 = math.tanh %996 : vector<2x6x32xf32>
    %998 = vector.shape_cast %18 : vector<1x32xf32> to vector<1x1x32xf32>
    %999 = vector.broadcast %998 : vector<1x1x32xf32> to vector<2x6x32xf32>
    %1000 = arith.mulf %997, %999 : vector<2x6x32xf32>
    %cst_246 = arith.constant dense<0.000000e+00> : vector<2x6xf32>
    %1001 = vector.multi_reduction <add>, %1000, %cst_246 [2] : vector<2x6x32xf32> to vector<2x6xf32>
    %1002 = arith.addf %1001, %590 : vector<2x6xf32>
    %cst_247 = arith.constant dense<0xFF800000> : vector<2xf32>
    %1003 = vector.multi_reduction <maximumf>, %1002, %cst_247 [1] : vector<2x6xf32> to vector<2xf32>
    %1004 = vector.shape_cast %1003 : vector<2xf32> to vector<2x1xf32>
    %1005 = vector.broadcast %1004 : vector<2x1xf32> to vector<2x6xf32>
    %1006 = arith.subf %1002, %1005 : vector<2x6xf32>
    %1007 = math.exp %1006 : vector<2x6xf32>
    %cst_248 = arith.constant dense<0.000000e+00> : vector<2xf32>
    %1008 = vector.multi_reduction <add>, %1007, %cst_248 [1] : vector<2x6xf32> to vector<2xf32>
    %1009 = vector.shape_cast %1008 : vector<2xf32> to vector<2x1xf32>
    %1010 = vector.broadcast %1009 : vector<2x1xf32> to vector<2x6xf32>
    %1011 = arith.divf %1007, %1010 : vector<2x6xf32>
    %1012 = vector.shape_cast %1011 : vector<2x6xf32> to vector<2x6x1xf32>
    %1013 = vector.broadcast %1012 : vector<2x6x1xf32> to vector<2x6x32xf32>
    %1014 = arith.mulf %1013, %581 : vector<2x6x32xf32>
    %cst_249 = arith.constant dense<0.000000e+00> : vector<2x32xf32>
    %1015 = vector.multi_reduction <add>, %1014, %cst_249 [1] : vector<2x6x32xf32> to vector<2x32xf32>
    %1016 = tpu.concatenate %966, %964, %992, %1015, %988, %1011, %607 in 1 : vector<2x32xf32>, vector<2x32xf32>, vector<2x32xf32>, vector<2x32xf32>, vector<2x8xf32>, vector<2x6xf32>, vector<2x114xf32> -> vector<2x256xf32>
    %c0_250 = arith.constant 0 : index
    %c4_251 = arith.constant 4 : index
    %c0_252 = arith.constant 0 : index
    %1017 = vector.load %arg10[%c0_250, %c4_251, %c0_252] : memref<2x6x256xf32, #tpu.memory_space<vmem>>, vector<2x1x256xf32>
    %1018 = vector.shape_cast %1017 : vector<2x1x256xf32> to vector<2x256xf32>
    %1019 = vector.shape_cast %1016 : vector<2x256xf32> to vector<2x1x256xf32>
    tpu.vector_store %arg10[%c0_250, %c4_251, %c0_252], %1019 {strides = array<i32>} : memref<2x6x256xf32, #tpu.memory_space<vmem>>, vector<2x1x256xf32>,
    %1020 = vector.extract_strided_slice %596 {offsets = [0, 5, 0], sizes = [2, 1, 128], strides = [1, 1, 1]} : vector<2x6x128xf32> to vector<2x1x128xf32>
    %1021 = vector.shape_cast %1020 : vector<2x1x128xf32> to vector<2x128xf32>
    %cst_253 = arith.constant dense<0.000000e+00> : vector<2x128xf32>
    %1022 = tpu.matmul %966, %5, %cst_253 {dimension_numbers = #tpu.dot_dimension_numbers<[1], [0], [0], [1], [0, 0, 1, 1], [], []>} : vector<2x32xf32>, vector<32x128xf32>, vector<2x128xf32> -> vector<2x128xf32>
    %1023 = arith.addf %1021, %1022 : vector<2x128xf32>
    %1024 = vector.extract_strided_slice %1023 {offsets = [0, 0], sizes = [2, 32], strides = [1, 1]} : vector<2x128xf32> to vector<2x32xf32>
    %1025 = arith.negf %1024 : vector<2x32xf32>
    %1026 = math.exp %1025 : vector<2x32xf32>
    %cst_254 = arith.constant 1.000000e+00 : f32
    %1027 = vector.broadcast %cst_254 : f32 to vector<2x32xf32>
    %1028 = arith.addf %1027, %1026 : vector<2x32xf32>
    %1029 = arith.divf %1027, %1028 : vector<2x32xf32>
    %1030 = vector.extract_strided_slice %1023 {offsets = [0, 32], sizes = [2, 32], strides = [1, 1]} : vector<2x128xf32> to vector<2x32xf32>
    %1031 = arith.negf %1030 : vector<2x32xf32>
    %1032 = math.exp %1031 : vector<2x32xf32>
    %cst_255 = arith.constant 1.000000e+00 : f32
    %1033 = vector.broadcast %cst_255 : f32 to vector<2x32xf32>
    %1034 = arith.addf %1033, %1032 : vector<2x32xf32>
    %1035 = arith.divf %1033, %1034 : vector<2x32xf32>
    %1036 = vector.extract_strided_slice %1023 {offsets = [0, 64], sizes = [2, 32], strides = [1, 1]} : vector<2x128xf32> to vector<2x32xf32>
    %1037 = math.tanh %1036 : vector<2x32xf32>
    %1038 = vector.extract_strided_slice %1023 {offsets = [0, 96], sizes = [2, 32], strides = [1, 1]} : vector<2x128xf32> to vector<2x32xf32>
    %1039 = arith.negf %1038 : vector<2x32xf32>
    %1040 = math.exp %1039 : vector<2x32xf32>
    %cst_256 = arith.constant 1.000000e+00 : f32
    %1041 = vector.broadcast %cst_256 : f32 to vector<2x32xf32>
    %1042 = arith.addf %1041, %1040 : vector<2x32xf32>
    %1043 = arith.divf %1041, %1042 : vector<2x32xf32>
    %1044 = arith.mulf %1035, %964 : vector<2x32xf32>
    %1045 = arith.mulf %1029, %1037 : vector<2x32xf32>
    %1046 = arith.addf %1044, %1045 : vector<2x32xf32>
    %1047 = math.tanh %1046 : vector<2x32xf32>
    %1048 = arith.mulf %1043, %1047 : vector<2x32xf32>
    %cst_257 = arith.constant dense<0.000000e+00> : vector<2x64xf32>
    %1049 = tpu.matmul %1048, %6, %cst_257 {dimension_numbers = #tpu.dot_dimension_numbers<[1], [0], [0], [1], [0, 0, 1, 1], [], []>} : vector<2x32xf32>, vector<32x64xf32>, vector<2x64xf32> -> vector<2x64xf32>
    %1050 = vector.broadcast %15 : vector<1x64xf32> to vector<2x64xf32>
    %1051 = arith.addf %1049, %1050 : vector<2x64xf32>
    %1052 = vector.extract_strided_slice %1051 {offsets = [0, 0], sizes = [2, 32], strides = [1, 1]} : vector<2x64xf32> to vector<2x32xf32>
    %1053 = vector.shape_cast %1052 : vector<2x32xf32> to vector<2x1x32xf32>
    %1054 = vector.broadcast %1053 : vector<2x1x32xf32> to vector<2x8x32xf32>
    %1055 = arith.addf %1054, %604 : vector<2x8x32xf32>
    %1056 = math.tanh %1055 : vector<2x8x32xf32>
    %1057 = vector.shape_cast %17 : vector<1x32xf32> to vector<1x1x32xf32>
    %1058 = vector.broadcast %1057 : vector<1x1x32xf32> to vector<2x8x32xf32>
    %1059 = arith.mulf %1056, %1058 : vector<2x8x32xf32>
    %cst_258 = arith.constant dense<0.000000e+00> : vector<2x8xf32>
    %1060 = vector.multi_reduction <add>, %1059, %cst_258 [2] : vector<2x8x32xf32> to vector<2x8xf32>
    %1061 = arith.addf %1060, %586 : vector<2x8xf32>
    %cst_259 = arith.constant dense<0xFF800000> : vector<2xf32>
    %1062 = vector.multi_reduction <maximumf>, %1061, %cst_259 [1] : vector<2x8xf32> to vector<2xf32>
    %1063 = vector.shape_cast %1062 : vector<2xf32> to vector<2x1xf32>
    %1064 = vector.broadcast %1063 : vector<2x1xf32> to vector<2x8xf32>
    %1065 = arith.subf %1061, %1064 : vector<2x8xf32>
    %1066 = math.exp %1065 : vector<2x8xf32>
    %cst_260 = arith.constant dense<0.000000e+00> : vector<2xf32>
    %1067 = vector.multi_reduction <add>, %1066, %cst_260 [1] : vector<2x8xf32> to vector<2xf32>
    %1068 = vector.shape_cast %1067 : vector<2xf32> to vector<2x1xf32>
    %1069 = vector.broadcast %1068 : vector<2x1xf32> to vector<2x8xf32>
    %1070 = arith.divf %1066, %1069 : vector<2x8xf32>
    %1071 = vector.shape_cast %1070 : vector<2x8xf32> to vector<2x8x1xf32>
    %1072 = vector.broadcast %1071 : vector<2x8x1xf32> to vector<2x8x32xf32>
    %1073 = arith.mulf %1072, %548 : vector<2x8x32xf32>
    %cst_261 = arith.constant dense<0.000000e+00> : vector<2x32xf32>
    %1074 = vector.multi_reduction <add>, %1073, %cst_261 [1] : vector<2x8x32xf32> to vector<2x32xf32>
    %1075 = vector.extract_strided_slice %1051 {offsets = [0, 32], sizes = [2, 32], strides = [1, 1]} : vector<2x64xf32> to vector<2x32xf32>
    %1076 = vector.shape_cast %1075 : vector<2x32xf32> to vector<2x1x32xf32>
    %1077 = vector.broadcast %1076 : vector<2x1x32xf32> to vector<2x6x32xf32>
    %1078 = arith.addf %1077, %606 : vector<2x6x32xf32>
    %1079 = math.tanh %1078 : vector<2x6x32xf32>
    %1080 = vector.shape_cast %18 : vector<1x32xf32> to vector<1x1x32xf32>
    %1081 = vector.broadcast %1080 : vector<1x1x32xf32> to vector<2x6x32xf32>
    %1082 = arith.mulf %1079, %1081 : vector<2x6x32xf32>
    %cst_262 = arith.constant dense<0.000000e+00> : vector<2x6xf32>
    %1083 = vector.multi_reduction <add>, %1082, %cst_262 [2] : vector<2x6x32xf32> to vector<2x6xf32>
    %1084 = arith.addf %1083, %590 : vector<2x6xf32>
    %cst_263 = arith.constant dense<0xFF800000> : vector<2xf32>
    %1085 = vector.multi_reduction <maximumf>, %1084, %cst_263 [1] : vector<2x6xf32> to vector<2xf32>
    %1086 = vector.shape_cast %1085 : vector<2xf32> to vector<2x1xf32>
    %1087 = vector.broadcast %1086 : vector<2x1xf32> to vector<2x6xf32>
    %1088 = arith.subf %1084, %1087 : vector<2x6xf32>
    %1089 = math.exp %1088 : vector<2x6xf32>
    %cst_264 = arith.constant dense<0.000000e+00> : vector<2xf32>
    %1090 = vector.multi_reduction <add>, %1089, %cst_264 [1] : vector<2x6xf32> to vector<2xf32>
    %1091 = vector.shape_cast %1090 : vector<2xf32> to vector<2x1xf32>
    %1092 = vector.broadcast %1091 : vector<2x1xf32> to vector<2x6xf32>
    %1093 = arith.divf %1089, %1092 : vector<2x6xf32>
    %1094 = vector.shape_cast %1093 : vector<2x6xf32> to vector<2x6x1xf32>
    %1095 = vector.broadcast %1094 : vector<2x6x1xf32> to vector<2x6x32xf32>
    %1096 = arith.mulf %1095, %581 : vector<2x6x32xf32>
    %cst_265 = arith.constant dense<0.000000e+00> : vector<2x32xf32>
    %1097 = vector.multi_reduction <add>, %1096, %cst_265 [1] : vector<2x6x32xf32> to vector<2x32xf32>
    %1098 = tpu.concatenate %1048, %1046, %1074, %1097, %1070, %1093, %607 in 1 : vector<2x32xf32>, vector<2x32xf32>, vector<2x32xf32>, vector<2x32xf32>, vector<2x8xf32>, vector<2x6xf32>, vector<2x114xf32> -> vector<2x256xf32>
    %c0_266 = arith.constant 0 : index
    %c5_267 = arith.constant 5 : index
    %c0_268 = arith.constant 0 : index
    %1099 = vector.load %arg10[%c0_266, %c5_267, %c0_268] : memref<2x6x256xf32, #tpu.memory_space<vmem>>, vector<2x1x256xf32>
    %1100 = vector.shape_cast %1099 : vector<2x1x256xf32> to vector<2x256xf32>
    %1101 = vector.shape_cast %1098 : vector<2x256xf32> to vector<2x1x256xf32>
    tpu.vector_store %arg10[%c0_266, %c5_267, %c0_268], %1101 {strides = array<i32>} : memref<2x6x256xf32, #tpu.memory_space<vmem>>, vector<2x1x256xf32>,
    %c0_269 = arith.constant 0 : index
    %c0_270 = arith.constant 0 : index
    %c0_271 = arith.constant 0 : index
    %1102 = vector.load %arg10[%c0_269, %c0_270, %c0_271] : memref<2x6x256xf32, #tpu.memory_space<vmem>>, vector<2x6x256xf32>
    %1103 = vector.shape_cast %1102 : vector<2x6x256xf32> to vector<12x256xf32>
    %1104 = vector.extract_strided_slice %1103 {offsets = [0, 0], sizes = [12, 128], strides = [1, 1]} : vector<12x256xf32> to vector<12x128xf32>
    %cst_272 = arith.constant dense<0.000000e+00> : vector<12x128xf32>
    %1105 = tpu.matmul %1104, %9, %cst_272 {dimension_numbers = #tpu.dot_dimension_numbers<[1], [0], [0], [1], [0, 0, 1, 1], [], []>} : vector<12x128xf32>, vector<128x128xf32>, vector<12x128xf32> -> vector<12x128xf32>
    %1106 = vector.broadcast %19 : vector<1x128xf32> to vector<12x128xf32>
    %1107 = arith.addf %1105, %1106 : vector<12x128xf32>
    %cst_273 = arith.constant 0.000000e+00 : f32
    %1108 = vector.broadcast %cst_273 : f32 to vector<12x128xf32>
    %1109 = arith.maximumf %1107, %1108 : vector<12x128xf32>
    %cst_274 = arith.constant dense<0.000000e+00> : vector<12x32xf32>
    %1110 = tpu.matmul %1109, %10, %cst_274 {dimension_numbers = #tpu.dot_dimension_numbers<[1], [0], [0], [1], [0, 0, 1, 1], [], []>} : vector<12x128xf32>, vector<128x32xf32>, vector<12x32xf32> -> vector<12x32xf32>
    %1111 = vector.broadcast %20 : vector<1x32xf32> to vector<12x32xf32>
    %1112 = arith.addf %1110, %1111 : vector<12x32xf32>
    %1113 = vector.extract_strided_slice %1103 {offsets = [0, 128], sizes = [12, 8], strides = [1, 1]} : vector<12x256xf32> to vector<12x8xf32>
    %1114 = vector.extract_strided_slice %1103 {offsets = [0, 136], sizes = [12, 6], strides = [1, 1]} : vector<12x256xf32> to vector<12x6xf32>
    %cst_275 = arith.constant 0.000000e+00 : f32
    %1115 = vector.broadcast %cst_275 : f32 to vector<12x82xf32>
    %1116 = tpu.concatenate %1112, %1113, %1114, %1115 in 1 : vector<12x32xf32>, vector<12x8xf32>, vector<12x6xf32>, vector<12x82xf32> -> vector<12x128xf32>
    %1117 = vector.shape_cast %1116 : vector<12x128xf32> to vector<2x6x128xf32>
    %c0_276 = arith.constant 0 : index
    %c0_277 = arith.constant 0 : index
    %c0_278 = arith.constant 0 : index
    %1118 = vector.load %arg8[%c0_276, %c0_277, %c0_278] : memref<2x6x128xf32, #tpu.memory_space<vmem>>, vector<2x6x128xf32>
    tpu.vector_store %arg8[%c0_276, %c0_277, %c0_278], %1117 {strides = array<i32>} : memref<2x6x128xf32, #tpu.memory_space<vmem>>, vector<2x6x128xf32>,
    return
  }
}

</mosaic_0001>

<bundles_post_ra>
// kernel: inflector_forward.1
= control target key start
LH: loop header
LB: loop body
LE: loop exit
PB: predicated region body
PF: predicated region fallthrough
CT: control target
= control target key end

     0   :  { %13 = vsyncpa [#allocation5], 0  ;;  %s8816_s27 = smov [#allocation4]   ;;  %s11015_s0 = inlined_call_operand.vmem [shape: f32[2,8,32], index: 0, kind: input, shape index: {}]   ;;  %s11016_s1 = inlined_call_operand.vmem [shape: f32[2,6,32], index: 1, kind: input, shape index: {}]   ;;  %s11017_s2 = inlined_call_operand.vmem [shape: f32[2,8], index: 2, kind: input, shape index: {}]   ;;  %s11018_s3 = inlined_call_operand.vmem [shape: f32[2,6], index: 3, kind: input, shape index: {}]   ;;  %s11019_s4 = inlined_call_operand.vmem [shape: f32[2,6,32], index: 4, kind: input, shape index: {}]   ;;  %s11020_s5 = inlined_call_operand.hbm [shape: f32[32,1152], index: 5, kind: input, shape index: {}]   ;;  %s11021_s6 = inlined_call_operand.vmem [shape: f32[128,384], index: 6, kind: input, shape index: {}]   ;;  %s11022_s7 = inlined_call_operand.vmem [shape: f32[1,1408], index: 7, kind: input, shape index: {}]   ;;  %s11023_s8 = inlined_call_operand.vmem [shape: f32[2,6,128], index: 8, kind: output, shape index: {}]  }
   0x1   :  { %s29_s28 = sshll.u32 %s8816_s27, 4  ;;  %s30_s28 = int_to_ptr.vmem [resolvable:$true] %s29_s28 }
   0x2   :  { %s8802_s29 = scalar_lea.vmem %s30_s28, 4608  ;;  %p8807_p1 = scmp.lt.s32.totalorder %s30_s28, %s30_s28 }
   0x3   :  { %p8803_p0 = scmp.ne.s32.totalorder %s30_s28, %s8802_s29  ;;  %p8808_p2 = scmp.lt.s32.totalorder %s8802_s29, %s8802_s29 }
   0x5   :  { %p8809_p3 = por %p8808_p2, %p8807_p1 }
   0x7   :  { %p8810_p4 = pnand %p8809_p3, %p8803_p0 }
   0x9   :  { %8813 = shalt.err (!%p8810_p4)
}
   0xa   :  { %s8817_s30 = smov 1152   ;;  %s8818_s9 = smov 72  }
   0xb   :  { %35 = dma.hbm_to_vmem [thread:$0]  %s11020_s5, 4608, %s30_s28, [#allocation5], %s8817_s30, %s8817_s30, %s8818_s9  }
   0xc   :  { %8814 = dma.done.wait [#allocation5], 4608  }
   0xd   :  { %8815 = vsyncadd [#allocation5], 4294962688  ;;  %v11027_v0 = vmov 0.0   ;;  %vm8820_vm0 = vmmov 0   ;;  %v50_v1 = vld [vmem:[#allocation4 + $0xe0] sm:$0xff]  ;;  %v49_v2 = vld [vmem:[#allocation4 + $0xd8] sm:$0xff]  ;;  %v11025_v19 = vlaneseq }
   0xe   :  { %7801 = vmatprep.subr.mxu1 %v11027_v0  ;;  %213 = vmatprep.mubr.f32.mxu0 %v11027_v0  ;;  %v48_v3 = vld [vmem:[#allocation4 + $0x98] sm:$0xff]  ;;  %v47_v4 = vld [vmem:[#allocation4 + $0x90] sm:$0xff]  ;;  %v8879_v5 = vld [vmem:[#allocation4 + $0xe8] sm:$0xff]  ;;  %vm142_vm1 = vcmask 261120   ;;  %s8821_s16 = smov 64   ;;  %s8822_s17 = smov 32  }
   0xf   :  { %7809 = vmatprep.mubr.msk.f32.mxu1 %vm8820_vm0, %v11027_v0  ;;  %173 = vmatprep.subr.mxu0 %v50_v1  ;;  %v46_v6 = vld [vmem:[#allocation4 + $0x50] sm:$0xff]  ;;  %v8882_v7 = vld [vmem:[#allocation4 + $0xa0] sm:$0xff]  ;;  %v45_v8 = vld [vmem:[#allocation4 + $0x48] sm:$0xff]  ;;  %v8946_v20 = vshrl.u32 %v11025_v19, 7  ;;  %vm501_vm2 = vcmask 1041409   ;;  %s8824_s23 = smov 96  }
  0x10   :  { %174 = vmatpush1.msra.mxu0 %v49_v2  ;;  %7802 = vmatpush3.msra.mxu1 %v8879_v5  ;;  %v8885_v9 = vld [vmem:[#allocation4 + $0x58] sm:$0xff]  ;;  %v44_v10 = vld [vmem:[#allocation4 + $0x8] sm:$0xff]  ;;  %v43_v11 = vld [vmem:[#allocation4] sm:$0xff]  ;;  %vm3074_vm3 = vcmask 46080   ;;  %vm3103_vm4 = vcmask 1045504   ;;  %vm3099_vm5 = vcmask 48128  }
  0x11   :  { %175 = vmatprep.subr.mxu0 %v48_v3  ;;  %7803 = vmatprep.subr.mxu1 %v11027_v0  ;;  %v8889_v12 = vld [vmem:[#allocation4 + $0x10] sm:$0xff]  ;;  %v8901_v15 = vld [vmem:[#allocation4 + $0xa8] sm:$0xff]  ;;  %v130_v16 = vld [vmem:[%s11015_s0 + $0x8] sm:$0xff]  ;;  %11039 = vst [vmem:[#allocation7_spill] sm:$0xff] %v8946_v20  ;;  %v8951_v22 = vsub.s32 1, %v8946_v20  ;;  %vm4780_vm6 = vcmask 1042434  }
  0x12   :  { %176 = vmatpush1.msra.mxu0 %v47_v4  ;;  %7804 = vmatpush3.msra.mxu1 %v8882_v7  ;;  %v129_v13 = vld [vmem:[%s11015_s0] sm:$0xff]  ;;  %v8910_v17 = vld [vmem:[#allocation4 + $0x60] sm:$0xff]  ;;  %v8916_v18 = vld [vmem:[#allocation4 + $0x18] sm:$0xff]  ;;  %vm497_vm7 = vcmask 523527   ;;  %vm794_vm8 = vcmask 522502   ;;  %vm1091_vm9 = vcmask 521477  }
  0x13   :  { %177 = vmatprep.subr.mxu0 %v46_v6  ;;  %7805 = vmatprep.subr.mxu1 %v11027_v0  ;;  %v8896_v14 = vld [vmem:[#allocation4 + $0xf0] sm:$0xff]  ;;  %vm1389_vm10 = vcmask 520452   ;;  %vm486_vm11 = vcmask 253952   ;;  %vm783_vm12 = vcmask 254977   ;;  %vm1080_vm13 = vcmask 256002  }
  0x14   :  { %178 = vmatpush1.msra.mxu0 %v45_v8  ;;  %7806 = vmatpush3.msra.mxu1 %v8885_v9  ;;  %v8958_v25 = vld [vmem:[%s11022_s7] sm:$0x3]  ;;  %vm1378_vm14 = vcmask 257027   ;;  %vm1687_vm15 = vcmask 519427  }
  0x15   :  { %179 = vmatprep.subr.mxu0 %v44_v10  ;;  %7807 = vmatprep.subr.mxu1 %v11027_v0  ;;  %v139_v28 = vrot.slane %v8958_v25, %v8951_v22 }
  0x16   :  { %180 = vmatpush1.msra.mxu0 %v43_v11  ;;  %7808 = vmatpush3.msra.mxu1 %v8889_v12 }
  0x17   :  { %7485 = vmatmul.mubr.msk.f32.vlgmr.msra.gmra.mxu0 %vm142_vm1, %v129_v13  ;;  %7812 = vmatprep.subr.mxu0 %v11027_v0 }
  0x18   :  { %7813 = vmatpush3.msra.mxu0 %v8896_v14  ;;  %219 = vmatprep.mubr.f32.mxu0 %v11027_v0 }
  0x19   :  { %7814 = vmatprep.subr.mxu0 %v11027_v0  ;;  %7810 = vmatmul.mubr.f32.vlgmr.msra.gmra.mxu1 %v11027_v0 }
  0x1a   :  { %7815 = vmatpush3.msra.mxu0 %v8901_v15  ;;  %7823 = vmatprep.subr.mxu1 %v11027_v0 }
  0x1b   :  { %7486 = vmatmul.mubr.msk.f32.gmra.mxu0 %vm142_vm1, %v130_v16  ;;  %7816 = vmatprep.subr.mxu0 %v11027_v0 }
  0x1c   :  { %7817 = vmatpush3.msra.mxu0 %v8910_v17  ;;  %7820 = vmatprep.mubr.msk.f32.mxu0 %vm8820_vm0, %v11027_v0 }
  0x1d   :  { %7818 = vmatprep.subr.mxu0 %v11027_v0  ;;  %7824 = vmatpush3.msra.mxu1 %v8879_v5 }
  0x1e   :  { %7819 = vmatpush3.msra.mxu0 %v8916_v18  ;;  %7825 = vmatprep.subr.mxu1 %v11027_v0 }
  0x1f   :  { %7821 = vmatmul.mubr.f32.vlgmr.msra.gmra.mxu0 %v11027_v0  ;;  %7834 = vmatprep.subr.mxu0 %v11027_v0 }
  0x20   :  { %7835 = vmatpush3.msra.mxu0 %v8896_v14  ;;  %7842 = vmatprep.mubr.msk.f32.mxu0 %vm8820_vm0, %v11027_v0 }
  0x21   :  { %7836 = vmatprep.subr.mxu0 %v11027_v0  ;;  %7826 = vmatpush3.msra.mxu1 %v8882_v7 }
  0x22   :  { %7837 = vmatpush3.msra.mxu0 %v8901_v15  ;;  %7827 = vmatprep.subr.mxu1 %v11027_v0 }
  0x23   :  { %7838 = vmatprep.subr.mxu0 %v11027_v0  ;;  %7828 = vmatpush3.msra.mxu1 %v8885_v9 }
  0x24   :  { %7839 = vmatpush3.msra.mxu0 %v8910_v17  ;;  %7829 = vmatprep.subr.mxu1 %v11027_v0 }
  0x25   :  { %7840 = vmatprep.subr.mxu0 %v11027_v0  ;;  %7830 = vmatpush3.msra.mxu1 %v8889_v12 }
  0x26   :  { %7841 = vmatpush3.msra.mxu0 %v8916_v18  ;;  %7831 = vmatprep.mubr.msk.f32.mxu1 %vm8820_vm0, %v11027_v0 }
  0x27   :  { %7856 = vmatprep.subr.mxu0 %v11027_v0  ;;  %7845 = vmatprep.subr.mxu1 %v11027_v0 }
  0xd7   :  { %v8948_v21 = vpop.f32.mrf.mxu0 }
  0xd9   :  { %v217_v23 = vpop.f32.mrf.mxu0  ;;  %v8953_v24 = vpop.f32.mrf.mxu1 }
  0xda   :  { %v8964_v31 = vadd.f32 %v217_v23, %v139_v28 }
  0xdb   :  { %v8960_v26 = vpop.f32.mrf.mxu0  ;;  %v7811_v27 = vpop.f32.mrf.mxu1 }
  0xdd   :  { %v223_v29 = vpop.f32.mrf.mxu0 }
  0xde   :  { %v8966_v35 = vadd.f32 %v223_v29, %v139_v28 }
  0xdf   :  { %v371_v30 = vpop.f32.mrf.mxu0 }
  0xe0   :  { %v376_v32 = vrot.slane %v371_v30, 1  ;;  %v377_v33 = vrot.slane %v371_v30, 2 }
  0xe1   :  { %v7822_v34 = vpop.f32.mrf.mxu0 }
  0xe2   :  { %v380_v36 = vadd.f32 %v376_v32, %v8964_v31  ;;  %v381_v37 = vadd.f32 %v377_v33, %v8966_v35 }
  0xe4   :  { %8277 = vtanh.f32 %v380_v36  ;;  %v7489_v40 = vmul.f32 -1.442695, %v380_v36  ;;  %v7490_v41 = vmul.f32 -1.442695, %v381_v37 }
  0xe5   :  { %8279 = vtanh.f32 %v381_v37 }
  0xe6   :  { %8281 = vpow2.f32 %v7489_v40 }
  0xe7   :  { %8283 = vpow2.f32 %v7490_v41 }
  0xf1   :  { %v8278_v38 = vpop.eup %8277 }
  0xf2   :  { %448 = vrot.lane.b32.xlu0 %v8278_v38, %s8821_s16  ;;  %v8280_v39 = vpop.eup %8279 }
  0xf3   :  { %v8282_v42 = vpop.eup %8281 }
  0xf4   :  { %v436_v43 = vadd.f32 1.0, %v8282_v42  ;;  %v8284_v44 = vpop.eup %8283 }
  0xf5   :  { %v437_v45 = vadd.f32 1.0, %v8284_v44 }
  0xf6   :  { %450 = vrot.lane.b32.xlu0 %v8280_v39, %s8821_s16  ;;  %8285 = vrcp.f32 %v436_v43 }
  0xf7   :  { %8287 = vrcp.f32 %v437_v45 }
 0x103   :  { %v8286_v46 = vpop.eup %8285 }
 0x104   :  { %v8288_v49 = vpop.eup %8287  ;;  %v444_v52 = vmul.f32 0.0, %v8286_v46 }
 0x105   :  { %v445_v55 = vmul.f32 0.0, %v8288_v49 }
 0x164   :  { %v449_v47 = vpop.permute.xlu0 %448 }
 0x165   :  { %v454_v48 = vmul.f32 %v8286_v46, %v449_v47 }
 0x167   :  { %458 = vrot.lane.b32.xlu1 %v454_v48, %s8822_s17 }
 0x168   :  { %v451_v50 = vpop.permute.xlu0 %450 }
 0x169   :  { %v455_v51 = vmul.f32 %v8288_v49, %v451_v50 }
 0x16b   :  { %460 = vrot.lane.b32.xlu1 %v455_v51, %s8822_s17 }
 0x1d9   :  { %v459_v53 = vpop.permute.xlu1 %458 }
 0x1da   :  { %v8974_v54 = vadd.f32 %v459_v53, %v444_v52 }
 0x1dc   :  { %8289 = vtanh.f32 %v8974_v54  ;;  %v737_v42 = vrot.slane %v8974_v54, 1 }
 0x1dd   :  { %v461_v56 = vpop.permute.xlu1 %460 }
 0x1de   :  { %v465_v57 = vadd.f32 %v461_v56, %v445_v55 }
 0x1e0   :  { %8291 = vtanh.f32 %v465_v57  ;;  %v738_v43 = vrot.slane %v465_v57, 1 }
 0x1e9   :  { %v8290_v58 = vpop.eup %8289 }
 0x1ea   :  { %470 = vrot.lane.b32.xlu0 %v8290_v58, %s8821_s16 }
 0x1ed   :  { %v8292_v59 = vpop.eup %8291 }
 0x1ee   :  { %472 = vrot.lane.b32.xlu1 %v8292_v59, %s8821_s16 }
 0x25c   :  { %v471_v60 = vpop.permute.xlu0 %470 }
 0x25d   :  { %v8979_v61 = vmul.f32 %v8286_v46, %v471_v60 }
 0x25f   :  { %v583_v1 = vrot.slane %v8979_v61, 7 }
 0x260   :  { %v473_v62 = vpop.permute.xlu1 %472 }
 0x261   :  { %v8981_v63 = vmul.f32 %v8288_v49, %v473_v62 }
 0x263   :  { %v584_v2 = vrot.slane %v8981_v63, 6 }
 0x265   :  { %v585_v3 = vsel %vm501_vm2, %v584_v2, %v583_v1 }
 0x266   :  { %586 = vrot.lane.b32.xlu0 %v585_v3, %s8822_s17 }
 0x2d8   :  { %v587_v4 = vpop.permute.xlu0 %586 }
 0x2d9   :  { %7843 = vmatmul.mubr.msk.f32.vlgmr.msra.gmra.mxu0 %vm142_vm1, %v587_v4 }
 0x2da   :  { %7857 = vmatpush3.msra.mxu0 %v8896_v14  ;;  %7864 = vmatprep.mubr.msk.f32.mxu0 %vm8820_vm0, %v11027_v0 }
 0x2db   :  { %7858 = vmatprep.subr.mxu0 %v11027_v0 }
 0x2dc   :  { %7859 = vmatpush3.msra.mxu0 %v8901_v15 }
 0x2dd   :  { %7860 = vmatprep.subr.mxu0 %v11027_v0 }
 0x2de   :  { %7861 = vmatpush3.msra.mxu0 %v8910_v17 }
 0x2df   :  { %7862 = vmatprep.subr.mxu0 %v11027_v0 }
 0x2e0   :  { %7863 = vmatpush3.msra.mxu0 %v8916_v18 }
 0x2e1   :  { %7878 = vmatprep.subr.mxu0 %v11027_v0 }
 0x399   :  { %v656_v6 = vpop.f32.mrf.mxu0 }
 0x39a   :  { %v661_v8 = vrot.slane %v656_v6, 2  ;;  %v662_v10 = vrot.slane %v656_v6, 3 }
 0x39b   :  { %v7844_v11 = vpop.f32.mrf.mxu0 }
 0x39c   :  { %v665_v13 = vadd.f32 %v661_v8, %v8964_v31  ;;  %v666_v16 = vadd.f32 %v662_v10, %v8966_v35 }
 0x39e   :  { %8293 = vtanh.f32 %v665_v13  ;;  %v7495_v28 = vmul.f32 -1.442695, %v665_v13  ;;  %v7496_v29 = vmul.f32 -1.442695, %v666_v16 }
 0x39f   :  { %8295 = vtanh.f32 %v666_v16 }
 0x3a0   :  { %8297 = vpow2.f32 %v7495_v28 }
 0x3a1   :  { %8299 = vpow2.f32 %v7496_v29 }
 0x3ab   :  { %v8294_v23 = vpop.eup %8293 }
 0x3ac   :  { %v8296_v27 = vpop.eup %8295  ;;  %745 = vrot.lane.b32.xlu1 %v8294_v23, %s8821_s16 }
 0x3ad   :  { %747 = vrot.lane.b32.xlu0 %v8296_v27, %s8821_s16  ;;  %v8298_v30 = vpop.eup %8297 }
 0x3ae   :  { %v8300_v32 = vpop.eup %8299  ;;  %v727_v33 = vadd.f32 1.0, %v8298_v30 }
 0x3af   :  { %v728_v34 = vadd.f32 1.0, %v8300_v32 }
 0x3b0   :  { %8301 = vrcp.f32 %v727_v33 }
 0x3b1   :  { %8303 = vrcp.f32 %v728_v34 }
 0x3bd   :  { %v8302_v36 = vpop.eup %8301 }
 0x3be   :  { %v8304_v38 = vpop.eup %8303  ;;  %v741_v44 = vmul.f32 %v8302_v36, %v737_v42 }
 0x3bf   :  { %v742_v45 = vmul.f32 %v8304_v38, %v738_v43 }
 0x41e   :  { %v746_v37 = vpop.permute.xlu1 %745 }
 0x41f   :  { %v748_v39 = vpop.permute.xlu0 %747  ;;  %v751_v40 = vmul.f32 %v8302_v36, %v746_v37 }
 0x420   :  { %v752_v41 = vmul.f32 %v8304_v38, %v748_v39 }
 0x421   :  { %755 = vrot.lane.b32.xlu1 %v751_v40, %s8822_s17 }
 0x422   :  { %757 = vrot.lane.b32.xlu0 %v752_v41, %s8822_s17 }
 0x493   :  { %v756_v46 = vpop.permute.xlu1 %755 }
 0x494   :  { %v758_v47 = vpop.permute.xlu0 %757  ;;  %v761_v48 = vadd.f32 %v756_v46, %v741_v44 }
 0x495   :  { %v762_v49 = vadd.f32 %v758_v47, %v742_v45 }
 0x496   :  { %8305 = vtanh.f32 %v761_v48 }
 0x497   :  { %8307 = vtanh.f32 %v762_v49  ;;  %v1035_v37 = vrot.slane %v762_v49, 1 }
 0x4a3   :  { %v8306_v50 = vpop.eup %8305 }
 0x4a4   :  { %v8308_v51 = vpop.eup %8307  ;;  %767 = vrot.lane.b32.xlu1 %v8306_v50, %s8821_s16 }
 0x4a5   :  { %769 = vrot.lane.b32.xlu0 %v8308_v51, %s8821_s16 }
 0x516   :  { %v768_v52 = vpop.permute.xlu1 %767 }
 0x517   :  { %v770_v53 = vpop.permute.xlu0 %769  ;;  %v9007_v55 = vmul.f32 %v8302_v36, %v768_v52  ;;  %v1034_v36 = vrot.slane %v761_v48, 1 }
 0x518   :  { %v9009_v54 = vmul.f32 %v8304_v38, %v770_v53 }
 0x519   :  { %v880_v56 = vrot.slane %v9007_v55, 6 }
 0x51a   :  { %v881_v57 = vrot.slane %v9009_v54, 5 }
 0x51c   :  { %v882_v58 = vsel %vm501_vm2, %v881_v57, %v880_v56 }
 0x51d   :  { %883 = vrot.lane.b32.xlu1 %v882_v58, %s8822_s17 }
 0x58f   :  { %v884_v59 = vpop.permute.xlu1 %883 }
 0x590   :  { %7865 = vmatmul.mubr.msk.f32.vlgmr.msra.gmra.mxu0 %vm142_vm1, %v884_v59 }
 0x591   :  { %7879 = vmatpush3.msra.mxu0 %v8896_v14  ;;  %7886 = vmatprep.mubr.msk.f32.mxu0 %vm8820_vm0, %v11027_v0 }
 0x592   :  { %7880 = vmatprep.subr.mxu0 %v11027_v0 }
 0x593   :  { %7881 = vmatpush3.msra.mxu0 %v8901_v15 }
 0x594   :  { %7882 = vmatprep.subr.mxu0 %v11027_v0 }
 0x595   :  { %7883 = vmatpush3.msra.mxu0 %v8910_v17 }
 0x596   :  { %7884 = vmatprep.subr.mxu0 %v11027_v0 }
 0x597   :  { %7885 = vmatpush3.msra.mxu0 %v8916_v18 }
 0x598   :  { %7900 = vmatprep.subr.mxu0 %v11027_v0 }
 0x650   :  { %v953_v60 = vpop.f32.mrf.mxu0 }
 0x651   :  { %v958_v62 = vrot.slane %v953_v60, 3  ;;  %v959_v1 = vrot.slane %v953_v60, 4 }
 0x652   :  { %v7866_v2 = vpop.f32.mrf.mxu0 }
 0x653   :  { %v962_v3 = vadd.f32 %v958_v62, %v8964_v31  ;;  %v963_v4 = vadd.f32 %v959_v1, %v8966_v35 }
 0x655   :  { %8309 = vtanh.f32 %v962_v3  ;;  %v7501_v10 = vmul.f32 -1.442695, %v962_v3  ;;  %v7502_v11 = vmul.f32 -1.442695, %v963_v4 }
 0x656   :  { %8311 = vtanh.f32 %v963_v4 }
 0x657   :  { %8313 = vpow2.f32 %v7501_v10 }
 0x658   :  { %8315 = vpow2.f32 %v7502_v11 }
 0x662   :  { %v8310_v6 = vpop.eup %8309 }
 0x663   :  { %v8312_v8 = vpop.eup %8311  ;;  %1042 = vrot.lane.b32.xlu0 %v8310_v6, %s8821_s16 }
 0x664   :  { %1044 = vrot.lane.b32.xlu1 %v8312_v8, %s8821_s16  ;;  %v8314_v13 = vpop.eup %8313 }
 0x665   :  { %v8316_v16 = vpop.eup %8315  ;;  %v1024_v23 = vadd.f32 1.0, %v8314_v13 }
 0x666   :  { %v1025_v27 = vadd.f32 1.0, %v8316_v16 }
 0x667   :  { %8317 = vrcp.f32 %v1024_v23 }
 0x668   :  { %8319 = vrcp.f32 %v1025_v27 }
 0x674   :  { %v8318_v28 = vpop.eup %8317 }
 0x675   :  { %v8320_v30 = vpop.eup %8319  ;;  %v1038_v38 = vmul.f32 %v8318_v28, %v1034_v36 }
 0x676   :  { %v1039_v39 = vmul.f32 %v8320_v30, %v1035_v37 }
 0x6d5   :  { %v1043_v29 = vpop.permute.xlu0 %1042 }
 0x6d6   :  { %v1045_v32 = vpop.permute.xlu1 %1044  ;;  %v1048_v33 = vmul.f32 %v8318_v28, %v1043_v29 }
 0x6d7   :  { %v1049_v34 = vmul.f32 %v8320_v30, %v1045_v32 }
 0x6d8   :  { %1052 = vrot.lane.b32.xlu0 %v1048_v33, %s8822_s17 }
 0x6d9   :  { %1054 = vrot.lane.b32.xlu1 %v1049_v34, %s8822_s17 }
 0x74a   :  { %v1053_v40 = vpop.permute.xlu0 %1052 }
 0x74b   :  { %v1055_v41 = vpop.permute.xlu1 %1054  ;;  %v1058_v42 = vadd.f32 %v1053_v40, %v1038_v38 }
 0x74c   :  { %v1059_v43 = vadd.f32 %v1055_v41, %v1039_v39 }
 0x74d   :  { %8321 = vtanh.f32 %v1058_v42 }
 0x74e   :  { %8323 = vtanh.f32 %v1059_v43  ;;  %v1333_v32 = vrot.slane %v1059_v43, 1 }
 0x75a   :  { %v8322_v44 = vpop.eup %8321 }
 0x75b   :  { %v8324_v45 = vpop.eup %8323  ;;  %1064 = vrot.lane.b32.xlu0 %v8322_v44, %s8821_s16 }
 0x75c   :  { %1066 = vrot.lane.b32.xlu1 %v8324_v45, %s8821_s16 }
 0x7cd   :  { %v1065_v46 = vpop.permute.xlu0 %1064 }
 0x7ce   :  { %v1067_v47 = vpop.permute.xlu1 %1066  ;;  %v9034_v50 = vmul.f32 %v8318_v28, %v1065_v46 }
 0x7cf   :  { %v9036_v48 = vmul.f32 %v8320_v30, %v1067_v47  ;;  %v1332_v30 = vrot.slane %v1058_v42, 1 }
 0x7d0   :  { %v1178_v49 = vrot.slane %v9034_v50, 5 }
 0x7d1   :  { %v1179_v51 = vrot.slane %v9036_v48, 4 }
 0x7d3   :  { %v1180_v52 = vsel %vm501_vm2, %v1179_v51, %v1178_v49 }
 0x7d4   :  { %1181 = vrot.lane.b32.xlu0 %v1180_v52, %s8822_s17 }
 0x846   :  { %v1182_v53 = vpop.permute.xlu0 %1181 }
 0x847   :  { %7887 = vmatmul.mubr.msk.f32.vlgmr.msra.gmra.mxu0 %vm142_vm1, %v1182_v53 }
 0x848   :  { %7901 = vmatpush3.msra.mxu0 %v8896_v14  ;;  %7908 = vmatprep.mubr.msk.f32.mxu0 %vm8820_vm0, %v11027_v0 }
 0x849   :  { %7902 = vmatprep.subr.mxu0 %v11027_v0 }
 0x84a   :  { %7903 = vmatpush3.msra.mxu0 %v8901_v15 }
 0x84b   :  { %7904 = vmatprep.subr.mxu0 %v11027_v0 }
 0x84c   :  { %7905 = vmatpush3.msra.mxu0 %v8910_v17 }
 0x84d   :  { %7906 = vmatprep.subr.mxu0 %v11027_v0 }
 0x84e   :  { %7907 = vmatpush3.msra.mxu0 %v8916_v18 }
 0x84f   :  { %7922 = vmatprep.subr.mxu0 %v11027_v0 }
 0x907   :  { %v1251_v56 = vpop.f32.mrf.mxu0 }
 0x908   :  { %v1256_v57 = vrot.slane %v1251_v56, 4  ;;  %v1257_v58 = vrot.slane %v1251_v56, 5 }
 0x909   :  { %v7888_v59 = vpop.f32.mrf.mxu0 }
 0x90a   :  { %v1260_v60 = vadd.f32 %v1256_v57, %v8964_v31  ;;  %v1261_v62 = vadd.f32 %v1257_v58, %v8966_v35 }
 0x90c   :  { %8325 = vtanh.f32 %v1260_v60  ;;  %v7507_v3 = vmul.f32 -1.442695, %v1260_v60  ;;  %v7508_v4 = vmul.f32 -1.442695, %v1261_v62 }
 0x90d   :  { %8327 = vtanh.f32 %v1261_v62 }
 0x90e   :  { %8329 = vpow2.f32 %v7507_v3 }
 0x90f   :  { %8331 = vpow2.f32 %v7508_v4 }
 0x919   :  { %v8326_v1 = vpop.eup %8325 }
 0x91a   :  { %v8328_v2 = vpop.eup %8327  ;;  %1340 = vrot.lane.b32.xlu1 %v8326_v1, %s8821_s16 }
 0x91b   :  { %1342 = vrot.lane.b32.xlu0 %v8328_v2, %s8821_s16  ;;  %v8330_v6 = vpop.eup %8329 }
 0x91c   :  { %v8332_v8 = vpop.eup %8331  ;;  %v1322_v10 = vadd.f32 1.0, %v8330_v6 }
 0x91d   :  { %v1323_v11 = vadd.f32 1.0, %v8332_v8 }
 0x91e   :  { %8333 = vrcp.f32 %v1322_v10 }
 0x91f   :  { %8335 = vrcp.f32 %v1323_v11 }
 0x92b   :  { %v8334_v13 = vpop.eup %8333 }
 0x92c   :  { %v8336_v23 = vpop.eup %8335  ;;  %v1336_v33 = vmul.f32 %v8334_v13, %v1332_v30 }
 0x92d   :  { %v1337_v34 = vmul.f32 %v8336_v23, %v1333_v32 }
 0x98c   :  { %v1341_v16 = vpop.permute.xlu1 %1340 }
 0x98d   :  { %v1343_v27 = vpop.permute.xlu0 %1342  ;;  %v1346_v28 = vmul.f32 %v8334_v13, %v1341_v16 }
 0x98e   :  { %v1347_v29 = vmul.f32 %v8336_v23, %v1343_v27 }
 0x98f   :  { %1350 = vrot.lane.b32.xlu1 %v1346_v28, %s8822_s17 }
 0x990   :  { %1352 = vrot.lane.b32.xlu0 %v1347_v29, %s8822_s17 }
 0xa01   :  { %v1351_v36 = vpop.permute.xlu1 %1350 }
 0xa02   :  { %v1353_v37 = vpop.permute.xlu0 %1352  ;;  %v1356_v38 = vadd.f32 %v1351_v36, %v1336_v33 }
 0xa03   :  { %v1357_v39 = vadd.f32 %v1353_v37, %v1337_v34 }
 0xa04   :  { %8337 = vtanh.f32 %v1356_v38  ;;  %v1630_v28 = vrot.slane %v1356_v38, 1 }
 0xa05   :  { %8339 = vtanh.f32 %v1357_v39  ;;  %v1631_v29 = vrot.slane %v1357_v39, 1 }
 0xa11   :  { %v8338_v40 = vpop.eup %8337 }
 0xa12   :  { %v8340_v41 = vpop.eup %8339  ;;  %1362 = vrot.lane.b32.xlu1 %v8338_v40, %s8821_s16 }
 0xa13   :  { %1364 = vrot.lane.b32.xlu0 %v8340_v41, %s8821_s16 }
 0xa84   :  { %v1363_v44 = vpop.permute.xlu1 %1362 }
 0xa85   :  { %v1365_v45 = vpop.permute.xlu0 %1364  ;;  %v9061_v46 = vmul.f32 %v8334_v13, %v1363_v44 }
 0xa86   :  { %v9063_v42 = vmul.f32 %v8336_v23, %v1365_v45 }
 0xa87   :  { %v1476_v43 = vrot.slane %v9061_v46, 4 }
 0xa88   :  { %v1477_v47 = vrot.slane %v9063_v42, 3 }
 0xa8a   :  { %v1478_v49 = vsel %vm501_vm2, %v1477_v47, %v1476_v43 }
 0xa8b   :  { %1479 = vrot.lane.b32.xlu1 %v1478_v49, %s8822_s17 }
 0xafd   :  { %v1480_v51 = vpop.permute.xlu1 %1479 }
 0xafe   :  { %7909 = vmatmul.mubr.msk.f32.vlgmr.msra.gmra.mxu0 %vm142_vm1, %v1480_v51 }
 0xaff   :  { %7923 = vmatpush3.msra.mxu0 %v8896_v14  ;;  %7930 = vmatprep.mubr.msk.f32.mxu0 %vm8820_vm0, %v11027_v0 }
 0xb00   :  { %7924 = vmatprep.subr.mxu0 %v11027_v0 }
 0xb01   :  { %7925 = vmatpush3.msra.mxu0 %v8901_v15 }
 0xb02   :  { %7926 = vmatprep.subr.mxu0 %v11027_v0 }
 0xb03   :  { %7927 = vmatpush3.msra.mxu0 %v8910_v17 }
 0xb04   :  { %7928 = vmatprep.subr.mxu0 %v11027_v0 }
 0xb05   :  { %7929 = vmatpush3.msra.mxu0 %v8916_v18 }
 0xb06   :  { %7944 = vmatprep.subr.mxu0 %v11027_v0 }
 0xbbe   :  { %v1549_v52 = vpop.f32.mrf.mxu0 }
 0xbbf   :  { %v1554_v53 = vrot.slane %v1549_v52, 5  ;;  %v1555_v56 = vrot.slane %v1549_v52, 6  ;;  %v9114_v52 = vsub.s32 0, %v8946_v20 }
 0xbc0   :  { %v7910_v57 = vpop.f32.mrf.mxu0 }
 0xbc1   :  { %v1558_v58 = vadd.f32 %v1554_v53, %v8964_v31  ;;  %v1559_v59 = vadd.f32 %v1555_v56, %v8966_v35  ;;  %v135_v53 = vrot.slane %v8958_v25, %v9114_v52  ;;  %v300_v57 = vrot.slane %v8953_v24, 1 }
 0xbc3   :  { %8341 = vtanh.f32 %v1558_v58  ;;  %v7513_v1 = vmul.f32 -1.442695, %v1558_v58  ;;  %v7514_v2 = vmul.f32 -1.442695, %v1559_v59  ;;  %v9120_v58 = vadd.f32 %v8960_v26, %v135_v53 }
 0xbc4   :  { %8343 = vtanh.f32 %v1559_v59 }
 0xbc5   :  { %8345 = vpow2.f32 %v7513_v1 }
 0xbc6   :  { %8347 = vpow2.f32 %v7514_v2 }
 0xbd0   :  { %v8342_v60 = vpop.eup %8341 }
 0xbd1   :  { %v8344_v62 = vpop.eup %8343  ;;  %1638 = vrot.lane.b32.xlu0 %v8342_v60, %s8821_s16 }
 0xbd2   :  { %1640 = vrot.lane.b32.xlu1 %v8344_v62, %s8821_s16  ;;  %v8346_v3 = vpop.eup %8345  ;;  %v9123_v62 = vadd.f32 %v8948_v21, %v135_v53 }
 0xbd3   :  { %v8348_v4 = vpop.eup %8347  ;;  %v1620_v6 = vadd.f32 1.0, %v8346_v3 }
 0xbd4   :  { %v1621_v8 = vadd.f32 1.0, %v8348_v4  ;;  %v304_v4 = vadd.f32 %v300_v57, %v9120_v58  ;;  %v303_v25 = vadd.f32 %v8953_v24, %v9123_v62 }
 0xbd5   :  { %8349 = vrcp.f32 %v1620_v6 }
 0xbd6   :  { %8351 = vrcp.f32 %v1621_v8  ;;  %v7487_v24 = vmul.f32 -1.442695, %v303_v25 }
 0xbe2   :  { %v8350_v10 = vpop.eup %8349 }
 0xbe3   :  { %v8352_v13 = vpop.eup %8351  ;;  %v1634_v30 = vmul.f32 %v8350_v10, %v1630_v28 }
 0xbe4   :  { %v1635_v32 = vmul.f32 %v8352_v13, %v1631_v29 }
 0xc43   :  { %v1639_v11 = vpop.permute.xlu0 %1638 }
 0xc44   :  { %v1641_v16 = vpop.permute.xlu1 %1640  ;;  %v1644_v23 = vmul.f32 %v8350_v10, %v1639_v11 }
 0xc45   :  { %v1645_v27 = vmul.f32 %v8352_v13, %v1641_v16 }
 0xc46   :  { %1648 = vrot.lane.b32.xlu0 %v1644_v23, %s8822_s17 }
 0xc47   :  { %1650 = vrot.lane.b32.xlu1 %v1645_v27, %s8822_s17 }
 0xcb8   :  { %v1649_v33 = vpop.permute.xlu0 %1648 }
 0xcb9   :  { %v1651_v34 = vpop.permute.xlu1 %1650  ;;  %v9086_v36 = vadd.f32 %v1649_v33, %v1634_v30 }
 0xcba   :  { %v9088_v37 = vadd.f32 %v1651_v34, %v1635_v32 }
 0xcbb   :  { %8353 = vtanh.f32 %v9086_v36 }
 0xcbc   :  { %8355 = vtanh.f32 %v9088_v37 }
 0xcc8   :  { %v8354_v40 = vpop.eup %8353 }
 0xcc9   :  { %v8356_v41 = vpop.eup %8355  ;;  %1660 = vrot.lane.b32.xlu0 %v8354_v40, %s8821_s16 }
 0xcca   :  { %1662 = vrot.lane.b32.xlu1 %v8356_v41, %s8821_s16 }
 0xd3b   :  { %v1661_v38 = vpop.permute.xlu0 %1660 }
 0xd3c   :  { %v1663_v39 = vpop.permute.xlu1 %1662  ;;  %v9094_v44 = vmul.f32 %v8350_v10, %v1661_v38 }
 0xd3d   :  { %v9096_v45 = vmul.f32 %v8352_v13, %v1663_v39  ;;  %v7488_v13 = vmul.f32 -1.442695, %v304_v4 }
 0xd3e   :  { %v1774_v43 = vrot.slane %v9094_v44, 3 }
 0xd3f   :  { %v1775_v47 = vrot.slane %v9096_v45, 2 }
 0xd41   :  { %v1776_v49 = vsel %vm501_vm2, %v1775_v47, %v1774_v43 }
 0xd42   :  { %1777 = vrot.lane.b32.xlu0 %v1776_v49, %s8822_s17 }
 0xdb4   :  { %v1778_v51 = vpop.permute.xlu0 %1777 }
 0xdb5   :  { %7931 = vmatmul.mubr.msk.f32.vlgmr.msra.gmra.mxu0 %vm142_vm1, %v1778_v51 }
 0xdb6   :  { %7945 = vmatpush3.msra.mxu0 %v8896_v14  ;;  %7952 = vmatprep.mubr.msk.f32.mxu0 %vm8820_vm0, %v11027_v0 }
 0xdb7   :  { %7946 = vmatprep.subr.mxu0 %v11027_v0 }
 0xdb8   :  { %7947 = vmatpush3.msra.mxu0 %v8901_v15 }
 0xdb9   :  { %7948 = vmatprep.subr.mxu0 %v11027_v0 }
 0xdba   :  { %7949 = vmatpush3.msra.mxu0 %v8910_v17 }
 0xdbb   :  { %7950 = vmatprep.subr.mxu0 %v11027_v0 }
 0xdbc   :  { %7951 = vmatpush3.msra.mxu0 %v8916_v18 }
 0xdbd   :  { %7966 = vmatprep.subr.mxu0 %v11027_v0 }
 0xe75   :  { %v1847_v56 = vpop.f32.mrf.mxu0 }
 0xe76   :  { %v1852_v59 = vrot.slane %v1847_v56, 6  ;;  %v1853_v60 = vrot.slane %v1847_v56, 7 }
 0xe77   :  { %v7932_v1 = vpop.f32.mrf.mxu0 }
 0xe78   :  { %v1856_v2 = vadd.f32 %v1852_v59, %v8964_v31  ;;  %v1857_v3 = vadd.f32 %v1853_v60, %v8966_v35  ;;  %v1928_v59 = vrot.slane %v9086_v36, 1  ;;  %v1929_v60 = vrot.slane %v9088_v37, 1 }
 0xe7a   :  { %8357 = vtanh.f32 %v1856_v2  ;;  %v7519_v10 = vmul.f32 -1.442695, %v1856_v2  ;;  %v7520_v11 = vmul.f32 -1.442695, %v1857_v3 }
 0xe7b   :  { %8359 = vtanh.f32 %v1857_v3 }
 0xe7c   :  { %8361 = vtanh.f32 %v304_v4 }
 0xe7d   :  { %8363 = vtanh.f32 %v303_v25 }
 0xe7e   :  { %8365 = vpow2.f32 %v7519_v10 }
 0xe7f   :  { %8367 = vpow2.f32 %v7520_v11 }
 0xe80   :  { %8369 = vpow2.f32 %v7488_v13 }
 0xe81   :  { %8371 = vpow2.f32 %v7487_v24 }
 0xe87   :  { %v8358_v26 = vpop.eup %8357 }
 0xe88   :  { %v8360_v6 = vpop.eup %8359  ;;  %1936 = vrot.lane.b32.xlu1 %v8358_v26, %s8821_s16 }
 0xe89   :  { %1938 = vrot.lane.b32.xlu0 %v8360_v6, %s8821_s16  ;;  %v8362_v21 = vpop.eup %8361 }
 0xe8a   :  { %v8364_v8 = vpop.eup %8363 }
 0xe8b   :  { %v8366_v16 = vpop.eup %8365 }
 0xe8c   :  { %402 = vrot.lane.b32.xlu1 %v8362_v21, %s8821_s16  ;;  %v8368_v23 = vpop.eup %8367  ;;  %v1918_v27 = vadd.f32 1.0, %v8366_v16 }
 0xe8d   :  { %400 = vrot.lane.b32.xlu0 %v8364_v8, %s8821_s16  ;;  %v8370_v28 = vpop.eup %8369  ;;  %v1919_v29 = vadd.f32 1.0, %v8368_v23 }
 0xe8e   :  { %v8372_v30 = vpop.eup %8371  ;;  %8373 = vrcp.f32 %v1918_v27  ;;  %v389_v32 = vadd.f32 1.0, %v8370_v28 }
 0xe8f   :  { %v388_v33 = vadd.f32 1.0, %v8372_v30  ;;  %8375 = vrcp.f32 %v1919_v29 }
 0xe90   :  { %8377 = vrcp.f32 %v389_v32 }
 0xe91   :  { %8379 = vrcp.f32 %v388_v33 }
 0xe9b   :  { %v8374_v34 = vpop.eup %8373 }
 0xe9c   :  { %v8376_v41 = vpop.eup %8375  ;;  %v1932_v1 = vmul.f32 %v8374_v34, %v1928_v59 }
 0xe9d   :  { %v8378_v47 = vpop.eup %8377  ;;  %v1933_v3 = vmul.f32 %v8376_v41, %v1929_v60 }
 0xe9e   :  { %v8380_v51 = vpop.eup %8379  ;;  %v397_v6 = vmul.f32 0.0, %v8378_v47 }
 0xe9f   :  { %v396_v8 = vmul.f32 0.0, %v8380_v51 }
 0xefa   :  { %v1937_v40 = vpop.permute.xlu1 %1936 }
 0xefb   :  { %v1939_v38 = vpop.permute.xlu0 %1938  ;;  %v1942_v39 = vmul.f32 %v8374_v34, %v1937_v40 }
 0xefc   :  { %v1943_v43 = vmul.f32 %v8376_v41, %v1939_v38 }
 0xefd   :  { %1946 = vrot.lane.b32.xlu1 %v1942_v39, %s8822_s17 }
 0xefe   :  { %1948 = vrot.lane.b32.xlu0 %v1943_v43, %s8822_s17  ;;  %v403_v49 = vpop.permute.xlu1 %402 }
 0xeff   :  { %v407_v53 = vmul.f32 %v8378_v47, %v403_v49  ;;  %v401_v56 = vpop.permute.xlu0 %400 }
 0xf00   :  { %v406_v57 = vmul.f32 %v8380_v51, %v401_v56 }
 0xf01   :  { %412 = vrot.lane.b32.xlu1 %v407_v53, %s8822_s17 }
 0xf02   :  { %410 = vrot.lane.b32.xlu0 %v406_v57, %s8822_s17 }
 0xf6f   :  { %v1947_v2 = vpop.permute.xlu1 %1946 }
 0xf70   :  { %v9140_v4 = vadd.f32 %v1947_v2, %v1932_v1  ;;  %v1949_v25 = vpop.permute.xlu0 %1948 }
 0xf71   :  { %v9142_v26 = vadd.f32 %v1949_v25, %v1933_v3 }
 0xf72   :  { %8381 = vtanh.f32 %v9140_v4 }
 0xf73   :  { %8383 = vtanh.f32 %v9142_v26  ;;  %v413_v21 = vpop.permute.xlu1 %412 }
 0xf74   :  { %v9146_v10 = vadd.f32 %v413_v21, %v397_v6  ;;  %v411_v36 = vpop.permute.xlu0 %410 }
 0xf75   :  { %v9148_v11 = vadd.f32 %v411_v36, %v396_v8 }
 0xf76   :  { %8385 = vtanh.f32 %v9146_v10 }
 0xf77   :  { %8387 = vtanh.f32 %v9148_v11 }
 0xf7f   :  { %v8382_v37 = vpop.eup %8381 }
 0xf80   :  { %v8384_v13 = vpop.eup %8383  ;;  %1958 = vrot.lane.b32.xlu1 %v8382_v37, %s8821_s16 }
 0xf81   :  { %1960 = vrot.lane.b32.xlu0 %v8384_v13, %s8821_s16 }
 0xf83   :  { %v8386_v24 = vpop.eup %8385 }
 0xf84   :  { %v8388_v16 = vpop.eup %8387  ;;  %424 = vrot.lane.b32.xlu1 %v8386_v24, %s8821_s16 }
 0xf85   :  { %422 = vrot.lane.b32.xlu0 %v8388_v16, %s8821_s16 }
 0xff2   :  { %v1959_v23 = vpop.permute.xlu1 %1958 }
 0xff3   :  { %v9156_v27 = vmul.f32 %v8374_v34, %v1959_v23  ;;  %v1961_v28 = vpop.permute.xlu0 %1960 }
 0xff4   :  { %v9158_v29 = vmul.f32 %v8376_v41, %v1961_v28 }
 0xff5   :  { %v2072_v30 = vrot.slane %v9156_v27, 2 }
 0xff6   :  { %v2073_v32 = vrot.slane %v9158_v29, 1  ;;  %v425_v33 = vpop.permute.xlu1 %424 }
 0xff7   :  { %v9162_v40 = vmul.f32 %v8378_v47, %v425_v33  ;;  %v423_v38 = vpop.permute.xlu0 %422 }
 0xff8   :  { %v2074_v39 = vsel %vm501_vm2, %v2073_v32, %v2072_v30  ;;  %v9166_v49 = vmul.f32 %v8380_v51, %v423_v38 }
 0xff9   :  { %v500_v43 = vrot.slane %v9162_v40, 7  ;;  %2075 = vrot.lane.b32.xlu1 %v2074_v39, %s8822_s17 }
 0xffb   :  { %v502_v34 = vsel %vm501_vm2, %v500_v43, %v9166_v49 }
 0xffc   :  { %503 = vrot.lane.b32.xlu0 %v502_v34, %s8822_s17 }
0x106b   :  { %v2076_v41 = vpop.permute.xlu1 %2075 }
0x106c   :  { %7953 = vmatmul.mubr.msk.f32.vlgmr.msra.gmra.mxu0 %vm142_vm1, %v2076_v41 }
0x106d   :  { %7967 = vmatpush3.msra.mxu0 %v8896_v14  ;;  %7974 = vmatprep.mubr.msk.f32.mxu0 %vm8820_vm0, %v11027_v0 }
0x106e   :  { %v504_v47 = vpop.permute.xlu0 %503  ;;  %7968 = vmatprep.subr.mxu0 %v11027_v0 }
0x106f   :  { %7832 = vmatmul.mubr.msk.f32.vlgmr.msra.gmra.mxu1 %vm142_vm1, %v504_v47  ;;  %7969 = vmatpush3.msra.mxu0 %v8901_v15 }
0x1070   :  { %7970 = vmatprep.subr.mxu0 %v11027_v0  ;;  %7846 = vmatpush3.msra.mxu1 %v8879_v5 }
0x1071   :  { %7971 = vmatpush3.msra.mxu0 %v8910_v17  ;;  %7847 = vmatprep.subr.mxu1 %v11027_v0 }
0x1072   :  { %7972 = vmatprep.subr.mxu0 %v11027_v0  ;;  %7848 = vmatpush3.msra.mxu1 %v8882_v7 }
0x1073   :  { %7973 = vmatpush3.msra.mxu0 %v8916_v18  ;;  %7849 = vmatprep.subr.mxu1 %v11027_v0 }
0x1074   :  { %7850 = vmatpush3.msra.mxu1 %v8885_v9  ;;  %7853 = vmatprep.mubr.msk.f32.mxu1 %vm8820_vm0, %v11027_v0 }
0x1075   :  { %7851 = vmatprep.subr.mxu1 %v11027_v0 }
0x1076   :  { %7852 = vmatpush3.msra.mxu1 %v8889_v12 }
0x1077   :  { %7867 = vmatprep.subr.mxu1 %v11027_v0 }
0x112c   :  { %v2145_v5 = vpop.f32.mrf.mxu0 }
0x112d   :  { %v2150_v14 = vrot.slane %v2145_v5, 7  ;;  %v2154_v15 = vadd.f32 %v2145_v5, %v8966_v35 }
0x112e   :  { %v7954_v7 = vpop.f32.mrf.mxu0 }
0x112f   :  { %v2153_v17 = vadd.f32 %v2150_v14, %v8964_v31  ;;  %8389 = vtanh.f32 %v2154_v15  ;;  %v573_v18 = vpop.f32.mrf.mxu1  ;;  %v7526_v1 = vmul.f32 -1.442695, %v2154_v15  ;;  %v2226_v14 = vrot.slane %v9142_v26, 1 }
0x1130   :  { %v578_v51 = vrot.slane %v573_v18, 7  ;;  %v582_v56 = vadd.f32 %v573_v18, %v9120_v58  ;;  %v2225_v7 = vrot.slane %v9140_v4, 1 }
0x1131   :  { %v7833_v9 = vpop.f32.mrf.mxu1  ;;  %8391 = vtanh.f32 %v2153_v17  ;;  %v7525_v2 = vmul.f32 -1.442695, %v2153_v17 }
0x1132   :  { %v581_v53 = vadd.f32 %v578_v51, %v9123_v62  ;;  %v7494_v25 = vmul.f32 -1.442695, %v582_v56 }
0x1134   :  { %8393 = vtanh.f32 %v581_v53  ;;  %v7493_v3 = vmul.f32 -1.442695, %v581_v53  ;;  %v683_v53 = vrot.slane %v9148_v11, 7  ;;  %v62_v11 = vld [vmem:[#allocation4 + $0xf8] sm:$0xff] }
0x1135   :  { %8395 = vtanh.f32 %v582_v56  ;;  %7996 = vmatprep.subr.mxu0 %v62_v11 }
0x1136   :  { %8397 = vpow2.f32 %v7526_v1 }
0x1137   :  { %8399 = vpow2.f32 %v7525_v2 }
0x1138   :  { %8401 = vpow2.f32 %v7493_v3 }
0x1139   :  { %8403 = vpow2.f32 %v7494_v25 }
0x113c   :  { %v8390_v12 = vpop.eup %8389 }
0x113d   :  { %2235 = vrot.lane.b32.xlu0 %v8390_v12, %s8821_s16  ;;  %v684_v12 = vrot.slane %v9146_v10, 7 }
0x113e   :  { %v8392_v57 = vpop.eup %8391 }
0x113f   :  { %2233 = vrot.lane.b32.xlu1 %v8392_v57, %s8821_s16 }
0x1141   :  { %v8394_v59 = vpop.eup %8393 }
0x1142   :  { %v8396_v60 = vpop.eup %8395 }
0x1143   :  { %691 = vrot.lane.b32.xlu1 %v8394_v59, %s8821_s16  ;;  %693 = vrot.lane.b32.xlu0 %v8396_v60, %s8821_s16  ;;  %v8398_v6 = vpop.eup %8397 }
0x1144   :  { %v8400_v21 = vpop.eup %8399  ;;  %v2216_v8 = vadd.f32 1.0, %v8398_v6 }
0x1145   :  { %v2215_v36 = vadd.f32 1.0, %v8400_v21  ;;  %v8402_v37 = vpop.eup %8401 }
0x1146   :  { %8405 = vrcp.f32 %v2216_v8  ;;  %v8404_v13 = vpop.eup %8403  ;;  %v673_v24 = vadd.f32 1.0, %v8402_v37 }
0x1147   :  { %8407 = vrcp.f32 %v2215_v36  ;;  %v674_v16 = vadd.f32 1.0, %v8404_v13 }
0x1148   :  { %8409 = vrcp.f32 %v673_v24 }
0x1149   :  { %8411 = vrcp.f32 %v674_v16 }
0x1153   :  { %v8406_v23 = vpop.eup %8405 }
0x1154   :  { %v8408_v32 = vpop.eup %8407  ;;  %v2230_v15 = vmul.f32 %v8406_v23, %v2226_v14 }
0x1155   :  { %v8410_v39 = vpop.eup %8409  ;;  %v2229_v51 = vmul.f32 %v8408_v32, %v2225_v7 }
0x1156   :  { %v8412_v34 = vpop.eup %8411  ;;  %v687_v57 = vmul.f32 %v8410_v39, %v683_v53 }
0x1157   :  { %v688_v26 = vmul.f32 %v8412_v34, %v684_v12 }
0x11af   :  { %v2236_v28 = vpop.permute.xlu0 %2235 }
0x11b0   :  { %v2240_v30 = vmul.f32 %v8406_v23, %v2236_v28 }
0x11b1   :  { %v2234_v33 = vpop.permute.xlu1 %2233 }
0x11b2   :  { %2245 = vrot.lane.b32.xlu0 %v2240_v30, %s8822_s17  ;;  %v2239_v38 = vmul.f32 %v8408_v32, %v2234_v33 }
0x11b4   :  { %2243 = vrot.lane.b32.xlu1 %v2239_v38, %s8822_s17 }
0x11b5   :  { %v692_v43 = vpop.permute.xlu1 %691  ;;  %v694_v41 = vpop.permute.xlu0 %693 }
0x11b6   :  { %v697_v47 = vmul.f32 %v8410_v39, %v692_v43  ;;  %v698_v5 = vmul.f32 %v8412_v34, %v694_v41  ;;  %v2671_v41 = vld [vmem:[%s11016_s1] sm:$0x3f] }
0x11b8   :  { %701 = vrot.lane.b32.xlu1 %v697_v47, %s8822_s17  ;;  %703 = vrot.lane.b32.xlu0 %v698_v5, %s8822_s17  ;;  %v2675_v47 = vcombine.high %v2671_v41, %v2671_v41  ;;  %v2672_v5 = vld [vmem:[%s11016_s1 + $0x8] sm:$0x3f] }
0x1224   :  { %v2246_v17 = vpop.permute.xlu0 %2245 }
0x1225   :  { %v9207_v18 = vadd.f32 %v2246_v17, %v2230_v15 }
0x1226   :  { %v2244_v9 = vpop.permute.xlu1 %2243 }
0x1227   :  { %8413 = vtanh.f32 %v9207_v18  ;;  %v9211_v56 = vadd.f32 %v2244_v9, %v2229_v51  ;;  %v2691_v9 = vcombine.high %v2672_v5, %v2672_v5 }
0x1229   :  { %8415 = vtanh.f32 %v9211_v56 }
0x122a   :  { %v702_v59 = vpop.permute.xlu1 %701  ;;  %v704_v60 = vpop.permute.xlu0 %703 }
0x122b   :  { %v9215_v4 = vadd.f32 %v702_v59, %v687_v57  ;;  %v9217_v1 = vadd.f32 %v704_v60, %v688_v26 }
0x122d   :  { %8417 = vtanh.f32 %v9215_v4 }
0x122e   :  { %8419 = vtanh.f32 %v9217_v1 }
0x1234   :  { %v8414_v2 = vpop.eup %8413 }
0x1235   :  { %2257 = vrot.lane.b32.xlu0 %v8414_v2, %s8821_s16  ;;  %v61_v2 = vld [vmem:[#allocation4 + $0xb0] sm:$0xff] }
0x1236   :  { %v8416_v10 = vpop.eup %8415 }
0x1237   :  { %2255 = vrot.lane.b32.xlu1 %v8416_v10, %s8821_s16 }
0x123a   :  { %v8418_v3 = vpop.eup %8417 }
0x123b   :  { %v8420_v25 = vpop.eup %8419  ;;  %713 = vrot.lane.b32.xlu1 %v8418_v3, %s8821_s16  ;;  %v60_v3 = vld [vmem:[#allocation4 + $0x68] sm:$0xff] }
0x123c   :  { %715 = vrot.lane.b32.xlu0 %v8420_v25, %s8821_s16 }
0x12a7   :  { %v2258_v6 = vpop.permute.xlu0 %2257 }
0x12a8   :  { %v9227_v36 = vmul.f32 %v8406_v23, %v2258_v6  ;;  %v8823_v23 = vmov 1983009808   ;;  %v59_v6 = vld [vmem:[#allocation4 + $0x20] sm:$0xff] }
0x12a9   :  { %v2256_v21 = vpop.permute.xlu1 %2255  ;;  %v2677_v38 = vunpack.c.l.s4 %v8823_v23 }
0x12aa   :  { %v9225_v8 = vmul.f32 %v8408_v32, %v2256_v21 }
0x12ab   :  { %v2678_v43 = vunpack.c.0.s8 %v2677_v38 }
0x12ac   :  { %v2369_v37 = vrot.slane %v9225_v8, 1 }
0x12ad   :  { %v714_v13 = vpop.permute.xlu1 %713 }
0x12ae   :  { %v716_v24 = vpop.permute.xlu0 %715  ;;  %v9230_v16 = vmul.f32 %v8410_v39, %v714_v13  ;;  %v2370_v28 = vsel %vm501_vm2, %v9227_v36, %v2369_v37  ;;  %v9242_v39 = vsub.s32 %v2678_v43, %v8946_v20  ;;  %v9260_v37 = vld [vmem:[#allocation4 + $0xe8] sm:$0xff]  ;;  %v9272_v13 = vld [vmem:[#allocation4 + $0x58] sm:$0xff] }
0x12af   :  { %2371 = vrot.lane.b32.xlu1 %v2370_v28, %s8822_s17  ;;  %v9235_v30 = vmul.f32 %v8412_v34, %v716_v24  ;;  %v9278_v24 = vld [vmem:[#allocation4 + $0x10] sm:$0xff] }
0x12b0   :  { %v797_v33 = vrot.slane %v9230_v16, 1  ;;  %v2682_v34 = vrot.slane %v2671_v41, %v9242_v39  ;;  %v2689_v14 = vrot.slane %v2675_v47, %v9242_v39  ;;  %v2698_v7 = vrot.slane %v2672_v5, %v9242_v39  ;;  %v7536_v41 = vld [vmem:[%s11022_s7 + $0x2] ss:$0 sm:$0xff] }
0x12b1   :  { %v2705_v26 = vrot.slane %v2691_v9, %v9242_v39 }
0x12b2   :  { %v798_v32 = vsel %vm501_vm2, %v9235_v30, %v797_v33  ;;  %v2690_v15 = vcombine.high %v2682_v34, %v2682_v34  ;;  %v2714_v51 = vcombine.low %v2689_v14, %v2698_v7  ;;  %v2706_v57 = vcombine.high %v2698_v7, %v2698_v7 }
0x12b3   :  { %799 = vrot.lane.b32.xlu0 %v798_v32, %s8822_s17 }
0x12b4   :  { %v2713_v17 = vcombine.low %v2682_v34, %v2690_v15  ;;  %v2728_v12 = vrot.slane %v2714_v51, %v9242_v39  ;;  %v2730_v10 = vcombine.low %v2706_v57, %v2705_v26 }
0x12b6   :  { %v2721_v53 = vrot.slane %v2713_v17, %v9242_v39  ;;  %v2737_v21 = vrot.slane %v2730_v10, %v9242_v39 }
0x12b8   :  { %v2729_v59 = vcombine.low %v2721_v53, %v2728_v12 }
0x1321   :  { %v2372_v60 = vpop.permute.xlu1 %2371 }
0x1322   :  { %7975 = vmatmul.mubr.msk.f32.vlgmr.msra.gmra.mxu0 %vm142_vm1, %v2372_v60 }
0x1323   :  { %7997 = vmatpush3.msra.mxu0 %v62_v11  ;;  %8004 = vmatprep.mubr.msk.f32.mxu0 %vm142_vm1, %v2729_v59  ;;  %v9264_v11 = vld [vmem:[#allocation4 + $0xa0] sm:$0xff] }
0x1324   :  { %7998 = vmatprep.subr.mxu0 %v61_v2 }
0x1325   :  { %7999 = vmatpush3.msra.mxu0 %v61_v2  ;;  %v800_v25 = vpop.permute.xlu0 %799 }
0x1326   :  { %8000 = vmatprep.subr.mxu0 %v60_v3  ;;  %7854 = vmatmul.mubr.msk.f32.vlgmr.msra.gmra.mxu1 %vm142_vm1, %v800_v25 }
0x1327   :  { %8001 = vmatpush3.msra.mxu0 %v60_v3  ;;  %7868 = vmatpush3.msra.mxu1 %v9260_v37 }
0x1328   :  { %8002 = vmatprep.subr.mxu0 %v59_v6  ;;  %7869 = vmatprep.subr.mxu1 %v11027_v0 }
0x1329   :  { %8003 = vmatpush3.msra.mxu0 %v59_v6  ;;  %7870 = vmatpush3.msra.mxu1 %v9264_v11 }
0x132a   :  { %8005 = vmatmul.mubr.msk.f32.vlgmr.msra.gmra.mxu0 %vm142_vm1, %v2737_v21  ;;  %8007 = vmatprep.subr.mxu0 %v11027_v0 }
0x132b   :  { %8009 = vmatprep.mubr.msk.f32.mxu0 %vm8820_vm0, %v11027_v0  ;;  %7871 = vmatprep.subr.mxu1 %v11027_v0 }
0x132c   :  { %7872 = vmatpush3.msra.mxu1 %v9272_v13  ;;  %7875 = vmatprep.mubr.msk.f32.mxu1 %vm8820_vm0, %v11027_v0 }
0x132d   :  { %7873 = vmatprep.subr.mxu1 %v11027_v0 }
0x132e   :  { %7874 = vmatpush3.msra.mxu1 %v9278_v24 }
0x132f   :  { %7889 = vmatprep.subr.mxu1 %v11027_v0 }
0x13e2   :  { %v9282_v28 = vpop.f32.mrf.mxu0 }
0x13e4   :  { %v7976_v33 = vpop.f32.mrf.mxu0 }
0x13e6   :  { %v869_v32 = vpop.f32.mrf.mxu1 }
0x13e7   :  { %v874_v23 = vrot.slane %v869_v32, 6  ;;  %v875_v38 = vrot.slane %v869_v32, 7 }
0x13e8   :  { %v7855_v43 = vpop.f32.mrf.mxu1 }
0x13e9   :  { %v878_v47 = vadd.f32 %v874_v23, %v9123_v62  ;;  %v879_v5 = vadd.f32 %v875_v38, %v9120_v58 }
0x13ea   :  { %v8006_v34 = vpop.f32.mrf.mxu0 }
0x13eb   :  { %8421 = vtanh.f32 %v878_v47  ;;  %v2814_v14 = vadd.f32 %v8006_v34, %v7536_v41  ;;  %v7499_v23 = vmul.f32 -1.442695, %v878_v47  ;;  %v7500_v38 = vmul.f32 -1.442695, %v879_v5 }
0x13ec   :  { %v2808_v15 = vpop.f32.mrf.mxu0  ;;  %8423 = vtanh.f32 %v879_v5 }
0x13ed   :  { %v2809_v7 = vadd.f32 %v7536_v41, %v2808_v15  ;;  %v2842_v17 = vrot.slane %v2814_v14, %v9242_v39  ;;  %8425 = vpow2.f32 %v7499_v23 }
0x13ee   :  { %8427 = vpow2.f32 %v7500_v38 }
0x13ef   :  { %v2819_v51 = vcombine.high %v2809_v7, %v2809_v7  ;;  %v2826_v9 = vrot.slane %v2809_v7, %v9242_v39  ;;  %v2843_v57 = vcombine.high %v2842_v17, %v2842_v17 }
0x13f1   :  { %v2833_v53 = vrot.slane %v2819_v51, %v9242_v39  ;;  %v2834_v12 = vcombine.high %v2826_v9, %v2826_v9  ;;  %v2951_v3 = vrot.slane %v2843_v57, %v9242_v39 }
0x13f3   :  { %v2835_v26 = vcombine.high %v2833_v53, %v2833_v53  ;;  %v2845_v59 = vcombine.low %v2826_v9, %v2834_v12  ;;  %v2859_v10 = vrot.slane %v2833_v53, %v9242_v39  ;;  %v980_v53 = vrot.slane %v9215_v4, 7 }
0x13f4   :  { %v8825_v4 = vmov 1966171168  }
0x13f5   :  { %v2937_v60 = vcombine.low %v2835_v26, %v2842_v17  ;;  %v2852_v2 = vrot.slane %v2845_v59, %v9242_v39  ;;  %v981_v26 = vrot.slane %v9217_v1, 7  ;;  %v9325_v1 = vld [vmem:[%s11018_s3] sm:$0x3] }
0x13f6   :  { %11041 = vst [vmem:[#allocation9_spill] sm:$0xff] %v9325_v1  ;;  %v11024_v23 = vsub.f32 1.0, %v9325_v1 }
0x13f7   :  { %v9295_v25 = vcombine.low %v2852_v2, %v2859_v10  ;;  %v2944_v6 = vrot.slane %v2937_v60, %v9242_v39 }
0x13f8   :  { %v8422_v21 = vpop.eup %8421 }
0x13f9   :  { %2861 = vrot.lane.b32.xlu1 %v9295_v25, %s8824_s23  ;;  %988 = vrot.lane.b32.xlu0 %v8422_v21, %s8821_s16  ;;  %v9301_v33 = vcombine.low %v2944_v6, %v2951_v3  ;;  %v8424_v32 = vpop.eup %8423  ;;  %v3035_v21 = vunpack.c.l.s4 %v8825_v4 }
0x13fa   :  { %v8426_v43 = vpop.eup %8425 }
0x13fb   :  { %11040 = vst [vmem:[#allocation8_spill] sm:$0xff] %v9301_v33  ;;  %v970_v41 = vadd.f32 1.0, %v8426_v43  ;;  %v8428_v34 = vpop.eup %8427 }
0x13fc   :  { %v971_v14 = vadd.f32 1.0, %v8428_v34 }
0x13fd   :  { %990 = vrot.lane.b32.xlu1 %v8424_v32, %s8821_s16  ;;  %8429 = vrcp.f32 %v970_v41  ;;  %v3036_v32 = vunpack.c.0.s8 %v3035_v21 }
0x13fe   :  { %8431 = vrcp.f32 %v971_v14 }
0x13ff   :  { %v9329_v38 = vsub.s32 %v3036_v32, %v8946_v20 }
0x1401   :  { %11042 = vst [vmem:[#allocation10_spill] sm:$0xff] %v9329_v38  ;;  %v9334_v43 = vrot.slane %v11024_v23, %v9329_v38 }
0x1403   :  { %11043 = vst [vmem:[#allocation11_spill] sm:$0xff] %v9334_v43  ;;  %v3048_v41 = vrot.slane %v9334_v43, %v9329_v38 }
0x1405   :  { %v3058_v34 = vmul.f32 -1e+09, %v3048_v41 }
0x1407   :  { %v3065_v14 = vrot.slane %v3058_v34, %v9114_v52 }
0x140a   :  { %v8430_v15 = vpop.eup %8429 }
0x140b   :  { %v8432_v47 = vpop.eup %8431  ;;  %v984_v12 = vmul.f32 %v8430_v15, %v980_v53 }
0x140c   :  { %v985_v60 = vmul.f32 %v8432_v47, %v981_v26 }
0x146b   :  { %v2862_v7 = vpop.permute.xlu1 %2861  ;;  %v989_v17 = vpop.permute.xlu0 %988 }
0x146c   :  { %8008 = vmatpush3.xpose.msk.msra.mxu0 %vm142_vm1, %v2862_v7  ;;  %v994_v51 = vmul.f32 %v8430_v15, %v989_v17 }
0x146d   :  { %8017 = vmatprep.subr.mxu0 %v11027_v0 }
0x146e   :  { %998 = vrot.lane.b32.xlu0 %v994_v51, %s8822_s17 }
0x146f   :  { %8010 = vmatmul.mubr.msk.f32.vlgmr.msra.gmra.mxu0 %vm142_vm1, %v9295_v25  ;;  %v991_v5 = vpop.permute.xlu1 %990 }
0x1470   :  { %v995_v9 = vmul.f32 %v8432_v47, %v991_v5  ;;  %8019 = vmatprep.mubr.msk.f32.mxu0 %vm8820_vm0, %v11027_v0 }
0x1472   :  { %1000 = vrot.lane.b32.xlu1 %v995_v9, %s8822_s17 }
0x14e0   :  { %v999_v57 = vpop.permute.xlu0 %998 }
0x14e1   :  { %v9314_v59 = vadd.f32 %v999_v57, %v984_v12 }
0x14e3   :  { %8433 = vtanh.f32 %v9314_v59 }
0x14e4   :  { %v1001_v2 = vpop.permute.xlu1 %1000 }
0x14e5   :  { %v9317_v10 = vadd.f32 %v1001_v2, %v985_v60 }
0x14e7   :  { %8435 = vtanh.f32 %v9317_v10  ;;  %v1279_v23 = vrot.slane %v9317_v10, 7 }
0x14f0   :  { %v8434_v3 = vpop.eup %8433 }
0x14f1   :  { %1010 = vrot.lane.b32.xlu0 %v8434_v3, %s8821_s16 }
0x14f4   :  { %v8436_v6 = vpop.eup %8435 }
0x14f5   :  { %1012 = vrot.lane.b32.xlu1 %v8436_v6, %s8821_s16 }
0x152f   :  { %v2933_v7 = vpop.f32.mrf.mxu0 }
0x1530   :  { %v3030_v17 = vmul.f32 0.17677669, %v2933_v7  ;;  %v3258_v7 = vld [vmem:[%s11019_s4 + $0x8] sm:$0x3f] }
0x1531   :  { %v8011_v51 = vpop.f32.mrf.mxu0 }
0x1532   :  { %v3072_v5 = vadd.f32 %v3065_v14, %v3030_v17 }
0x1534   :  { %v3075_v9 = vsel %vm3074_vm3, %v3072_v5, -inf }
0x1535   :  { %3076 = vmax.xlane.f32.xlu1 %v3075_v9  ;;  %v66_v9 = vld [vmem:[#allocation4 + $0x100] sm:$0xff] }
0x1563   :  { %v1011_v53 = vpop.permute.xlu0 %1010 }
0x1564   :  { %v9340_v12 = vmul.f32 %v8430_v15, %v1011_v53 }
0x1566   :  { %v1094_v60 = vrot.slane %v9340_v12, 2 }
0x1567   :  { %v1013_v57 = vpop.permute.xlu1 %1012 }
0x1568   :  { %v9342_v26 = vmul.f32 %v8432_v47, %v1013_v57  ;;  %v3257_v47 = vld [vmem:[%s11019_s4] sm:$0x3f] }
0x1569   :  { %v3261_v34 = vcombine.high %v3257_v47, %v3257_v47  ;;  %v3268_v14 = vrot.slane %v3257_v47, %v9242_v39 }
0x156a   :  { %v1095_v2 = vrot.slane %v9342_v26, 1 }
0x156b   :  { %v3275_v51 = vrot.slane %v3261_v34, %v9242_v39  ;;  %v65_v34 = vld [vmem:[#allocation4 + $0xb8] sm:$0xff] }
0x156c   :  { %v1096_v3 = vsel %vm501_vm2, %v1095_v2, %v1094_v60  ;;  %v3277_v2 = vcombine.high %v3258_v7, %v3258_v7 }
0x156d   :  { %1097 = vrot.lane.b32.xlu0 %v1096_v3, %s8822_s17 }
0x15be   :  { %v3077_v6 = vpop.xlane.xlu1 %3076 }
0x15bf   :  { %v3081_v4 = vsub.f32 %v3072_v5, %v3077_v6  ;;  %v3276_v5 = vcombine.high %v3268_v14, %v3268_v14 }
0x15c1   :  { %v3083_v21 = vmul.f32 1.442695, %v3081_v4  ;;  %v3299_v57 = vcombine.low %v3268_v14, %v3276_v5  ;;  %v63_v14 = vld [vmem:[#allocation4 + $0x28] sm:$0xff]  ;;  %v9388_v5 = vld [vmem:[#allocation4 + $0x78] sm:$0xff] }
0x15c3   :  { %8437 = vpow2.f32 %v3083_v21  ;;  %v3307_v3 = vrot.slane %v3299_v57, %v9242_v39  ;;  %v3291_v21 = vrot.slane %v3277_v2, %v9242_v39 }
0x15d0   :  { %v8438_v32 = vpop.eup %8437 }
0x15d1   :  { %v3087_v41 = vsel %vm3074_vm3, %v8438_v32, 0.0 }
0x15d2   :  { %3088 = vadd.xlane.f32.xlu0 %v3087_v41 }
0x15df   :  { %v1098_v15 = vpop.permute.xlu0 %1097 }
0x15e0   :  { %7876 = vmatmul.mubr.msk.f32.vlgmr.msra.gmra.mxu1 %vm142_vm1, %v1098_v15 }
0x15e1   :  { %7890 = vmatpush3.msra.mxu1 %v9260_v37  ;;  %7897 = vmatprep.mubr.msk.f32.mxu1 %vm8820_vm0, %v11027_v0 }
0x15e2   :  { %7891 = vmatprep.subr.mxu1 %v11027_v0 }
0x15e3   :  { %7892 = vmatpush3.msra.mxu1 %v9264_v11 }
0x15e4   :  { %7893 = vmatprep.subr.mxu1 %v11027_v0 }
0x15e5   :  { %7894 = vmatpush3.msra.mxu1 %v9272_v13 }
0x15e6   :  { %7895 = vmatprep.subr.mxu1 %v11027_v0 }
0x15e7   :  { %7896 = vmatpush3.msra.mxu1 %v9278_v24 }
0x15e8   :  { %3097 = vrot.lane.b32.xlu0 %v9295_v25, %s8821_s16  ;;  %7911 = vmatprep.subr.mxu1 %v11027_v0  ;;  %v3284_v25 = vrot.slane %v3258_v7, %v9242_v39 }
0x15ea   :  { %v3300_v60 = vcombine.low %v3275_v51, %v3284_v25  ;;  %v3292_v4 = vcombine.high %v3284_v25, %v3284_v25  ;;  %v9378_v51 = vld [vmem:[#allocation4 + $0x108] sm:$0xff]  ;;  %v9392_v25 = vld [vmem:[#allocation4 + $0x30] sm:$0xff] }
0x15ec   :  { %v3314_v6 = vrot.slane %v3300_v60, %v9242_v39 }
0x15ee   :  { %v3315_v15 = vcombine.low %v3307_v3, %v3314_v6 }
0x165b   :  { %v3089_v17 = vpop.xlane.xlu0 %3088 }
0x165c   :  { %8439 = vrcp.f32 %v3089_v17  ;;  %v3316_v17 = vcombine.low %v3292_v4, %v3291_v21 }
0x165e   :  { %v3323_v7 = vrot.slane %v3316_v17, %v9242_v39 }
0x165f   :  { %v3098_v53 = vpop.permute.xlu0 %3097 }
0x1660   :  { %8018 = vmatpush3.msk.msra.mxu0 %vm3103_vm4, %v3098_v53  ;;  %v64_v53 = vld [vmem:[#allocation4 + $0x70] sm:$0xff] }
0x1661   :  { %8027 = vmatprep.subr.mxu0 %v66_v9 }
0x1669   :  { %v8440_v41 = vpop.eup %8439 }
0x166a   :  { %v3094_v47 = vmul.f32 %v8440_v41, %v8438_v32  ;;  %v9382_v32 = vld [vmem:[#allocation4 + $0xc0] sm:$0xff] }
0x166c   :  { %8020 = vmatmul.mubr.msk.f32.vlgmr.msra.gmra.mxu0 %vm3099_vm5, %v3094_v47 }
0x166d   :  { %8028 = vmatpush3.msra.mxu0 %v66_v9  ;;  %8035 = vmatprep.mubr.msk.f32.mxu0 %vm142_vm1, %v3315_v15 }
0x166e   :  { %8029 = vmatprep.subr.mxu0 %v65_v34 }
0x166f   :  { %8030 = vmatpush3.msra.mxu0 %v65_v34 }
0x1670   :  { %8031 = vmatprep.subr.mxu0 %v64_v53 }
0x1671   :  { %8032 = vmatpush3.msra.mxu0 %v64_v53 }
0x1672   :  { %8033 = vmatprep.subr.mxu0 %v63_v14 }
0x1673   :  { %8034 = vmatpush3.msra.mxu0 %v63_v14 }
0x1674   :  { %8052 = vmatprep.subr.mxu0 %v11027_v0  ;;  %8036 = vmatmul.mubr.msk.f32.vlgmr.msra.gmra.mxu0 %vm142_vm1, %v3323_v7 }
0x1675   :  { %8053 = vmatpush3.msra.mxu0 %v9378_v51  ;;  %8060 = vmatprep.mubr.msk.f32.mxu0 %vm8820_vm0, %v11027_v0 }
0x1676   :  { %8054 = vmatprep.subr.mxu0 %v11027_v0 }
0x1677   :  { %8055 = vmatpush3.msra.mxu0 %v9382_v32 }
0x1678   :  { %8056 = vmatprep.subr.mxu0 %v11027_v0 }
0x1679   :  { %8057 = vmatpush3.msra.mxu0 %v9388_v5 }
0x167a   :  { %8058 = vmatprep.subr.mxu0 %v11027_v0 }
0x167b   :  { %8059 = vmatpush3.msra.mxu0 %v9392_v25 }
0x167c   :  { %8061 = vmatmul.mubr.f32.vlgmr.msra.gmra.mxu0 %v11027_v0  ;;  %8074 = vmatprep.subr.mxu0 %v11027_v0 }
0x167d   :  { %8075 = vmatpush3.msra.mxu0 %v9378_v51  ;;  %8082 = vmatprep.mubr.msk.f32.mxu0 %vm8820_vm0, %v11027_v0 }
0x167e   :  { %8076 = vmatprep.subr.mxu0 %v11027_v0 }
0x167f   :  { %8077 = vmatpush3.msra.mxu0 %v9382_v32 }
0x1680   :  { %8078 = vmatprep.subr.mxu0 %v11027_v0 }
0x1681   :  { %8079 = vmatpush3.msra.mxu0 %v9388_v5 }
0x1682   :  { %8080 = vmatprep.subr.mxu0 %v11027_v0 }
0x1683   :  { %8081 = vmatpush3.msra.mxu0 %v9392_v25 }
0x1684   :  { %8096 = vmatprep.subr.mxu0 %v11027_v0 }
0x16a0   :  { %v1167_v9 = vpop.f32.mrf.mxu1 }
0x16a1   :  { %v1172_v57 = vrot.slane %v1167_v9, 5  ;;  %v1173_v60 = vrot.slane %v1167_v9, 6 }
0x16a2   :  { %v7877_v2 = vpop.f32.mrf.mxu1 }
0x16a3   :  { %v1176_v3 = vadd.f32 %v1172_v57, %v9123_v62  ;;  %v1177_v6 = vadd.f32 %v1173_v60, %v9120_v58 }
0x16a5   :  { %8441 = vtanh.f32 %v1176_v3  ;;  %v7505_v41 = vmul.f32 -1.442695, %v1176_v3  ;;  %v7506_v15 = vmul.f32 -1.442695, %v1177_v6 }
0x16a6   :  { %8443 = vtanh.f32 %v1177_v6 }
0x16a7   :  { %8445 = vpow2.f32 %v7505_v41 }
0x16a8   :  { %8447 = vpow2.f32 %v7506_v15 }
0x16b2   :  { %v8442_v4 = vpop.eup %8441 }
0x16b3   :  { %1286 = vrot.lane.b32.xlu1 %v8442_v4, %s8821_s16  ;;  %v8444_v21 = vpop.eup %8443 }
0x16b4   :  { %v8446_v47 = vpop.eup %8445 }
0x16b5   :  { %v1268_v34 = vadd.f32 1.0, %v8446_v47  ;;  %v8448_v17 = vpop.eup %8447 }
0x16b6   :  { %v1269_v53 = vadd.f32 1.0, %v8448_v17 }
0x16b7   :  { %1288 = vrot.lane.b32.xlu1 %v8444_v21, %s8821_s16  ;;  %8449 = vrcp.f32 %v1268_v34  ;;  %v7547_v21 = vld [vmem:[%s11022_s7 + $0x4] ss:$0 sm:$0xff] }
0x16b8   :  { %8451 = vrcp.f32 %v1269_v53 }
0x16c4   :  { %v8450_v14 = vpop.eup %8449 }
0x16c5   :  { %v8452_v57 = vpop.eup %8451 }
0x1725   :  { %v1287_v7 = vpop.permute.xlu1 %1286 }
0x1726   :  { %v1292_v9 = vmul.f32 %v8450_v14, %v1287_v7  ;;  %v1278_v7 = vrot.slane %v9314_v59, 7 }
0x1728   :  { %1296 = vrot.lane.b32.xlu0 %v1292_v9, %s8822_s17 }
0x1729   :  { %v1289_v60 = vpop.permute.xlu1 %1288 }
0x172a   :  { %v1293_v2 = vmul.f32 %v8452_v57, %v1289_v60 }
0x172c   :  { %v9414_v4 = vpop.f32.mrf.mxu0  ;;  %1298 = vrot.lane.b32.xlu1 %v1293_v2, %s8822_s17 }
0x172d   :  { %11044 = vst [vmem:[#allocation12_spill] sm:$0xff] %v9414_v4 }
0x172e   :  { %v8021_v3 = vpop.f32.mrf.mxu0 }
0x172f   :  { %v1282_v3 = vmul.f32 %v8450_v14, %v1278_v7 }
0x1734   :  { %v8037_v6 = vpop.f32.mrf.mxu0 }
0x1735   :  { %v9420_v41 = vadd.f32 %v8037_v6, %v7547_v21 }
0x1736   :  { %v3394_v15 = vpop.f32.mrf.mxu0 }
0x1737   :  { %v3395_v17 = vadd.f32 %v7547_v21, %v3394_v15 }
0x1739   :  { %v3405_v53 = vcombine.high %v3395_v17, %v3395_v17  ;;  %v9424_v9 = vrot.slane %v3395_v17, %v9242_v39 }
0x173b   :  { %v9427_v60 = vrot.slane %v3405_v53, %v9242_v39 }
0x173c   :  { %v3689_v47 = vpop.f32.mrf.mxu0 }
0x173d   :  { %v3700_v2 = vrot.slane %v3689_v47, %v9242_v39  ;;  %v9435_v21 = vcombine.high %v9427_v60, %v9427_v60 }
0x173e   :  { %v8062_v34 = vpop.f32.mrf.mxu0 }
0x173f   :  { %v3701_v15 = vrot.slane %v3700_v2, 1  ;;  %v3704_v59 = vadd.f32 %v3700_v2, %v9424_v9  ;;  %v1283_v34 = vmul.f32 %v8452_v57, %v1279_v23 }
0x1741   :  { %v3705_v53 = vadd.f32 %v3701_v15, %v9435_v21  ;;  %v7555_v23 = vmul.f32 -1.442695, %v3704_v59 }
0x179a   :  { %v1297_v6 = vpop.permute.xlu0 %1296 }
0x179b   :  { %v9431_v19 = vadd.f32 %v1297_v6, %v1282_v3  ;;  %v7556_v6 = vmul.f32 -1.442695, %v3705_v53 }
0x179d   :  { %8453 = vtanh.f32 %v9431_v19 }
0x179e   :  { %v1299_v17 = vpop.permute.xlu1 %1298  ;;  %8455 = vtanh.f32 %v3704_v59 }
0x179f   :  { %v9440_v47 = vadd.f32 %v1299_v17, %v1283_v34 }
0x17a1   :  { %8457 = vtanh.f32 %v9440_v47 }
0x17a2   :  { %8459 = vtanh.f32 %v3705_v53 }
0x17a3   :  { %8461 = vpow2.f32 %v7555_v23 }
0x17a4   :  { %8463 = vpow2.f32 %v7556_v6 }
0x17aa   :  { %v8454_v10 = vpop.eup %8453 }
0x17ab   :  { %1308 = vrot.lane.b32.xlu0 %v8454_v10, %s8821_s16  ;;  %v8456_v7 = vpop.eup %8455 }
0x17ae   :  { %v8458_v3 = vpop.eup %8457 }
0x17af   :  { %1310 = vrot.lane.b32.xlu1 %v8458_v3, %s8821_s16  ;;  %3724 = vrot.lane.b32.xlu0 %v8456_v7, %s8821_s16  ;;  %v8460_v2 = vpop.eup %8459 }
0x17b0   :  { %v8462_v15 = vpop.eup %8461 }
0x17b1   :  { %v3712_v34 = vadd.f32 1.0, %v8462_v15  ;;  %v8464_v17 = vpop.eup %8463 }
0x17b2   :  { %v3713_v0 = vadd.f32 1.0, %v8464_v17 }
0x17b3   :  { %3726 = vrot.lane.b32.xlu1 %v8460_v2, %s8821_s16  ;;  %8465 = vrcp.f32 %v3712_v34 }
0x17b4   :  { %8467 = vrcp.f32 %v3713_v0 }
0x17c0   :  { %v8466_v20 = vpop.eup %8465 }
0x17c1   :  { %v8468_v0 = vpop.eup %8467  ;;  %v3720_v6 = vmul.f32 0.0, %v8466_v20 }
0x17c2   :  { %v3721_v34 = vmul.f32 0.0, %v8468_v0 }
0x181d   :  { %v1309_v10 = vpop.permute.xlu0 %1308 }
0x181e   :  { %v9447_v1 = vmul.f32 %v8450_v14, %v1309_v10 }
0x1820   :  { %v1392_v59 = vrot.slane %v9447_v1, 3 }
0x1821   :  { %v1311_v3 = vpop.permute.xlu1 %1310  ;;  %v3725_v4 = vpop.permute.xlu0 %3724 }
0x1822   :  { %v9449_v7 = vmul.f32 %v8452_v57, %v1311_v3  ;;  %v3730_v38 = vmul.f32 %v8466_v20, %v3725_v4 }
0x1824   :  { %v1393_v53 = vrot.slane %v9449_v7, 2  ;;  %3734 = vrot.lane.b32.xlu1 %v3730_v38, %s8822_s17  ;;  %v11045_v38 = vmov 0.0  }
0x1825   :  { %v3727_v2 = vpop.permute.xlu1 %3726 }
0x1826   :  { %v1394_v23 = vsel %vm501_vm2, %v1393_v53, %v1392_v59  ;;  %v3731_v14 = vmul.f32 %v8468_v0, %v3727_v2 }
0x1827   :  { %1395 = vrot.lane.b32.xlu0 %v1394_v23, %s8822_s17 }
0x182b   :  { %3736 = vrot.lane.b32.xlu0 %v3731_v14, %s8822_s17 }
0x1896   :  { %v3735_v15 = vpop.permute.xlu1 %3734 }
0x1897   :  { %v9457_v57 = vadd.f32 %v3735_v15, %v3720_v6 }
0x1899   :  { %8469 = vtanh.f32 %v9457_v57  ;;  %v1396_v4 = vpop.permute.xlu0 %1395  ;;  %v4207_v3 = vrot.slane %v9457_v57, %v9114_v52 }
0x189a   :  { %7898 = vmatmul.mubr.msk.f32.vlgmr.msra.gmra.mxu1 %vm142_vm1, %v1396_v4 }
0x189b   :  { %7912 = vmatpush3.msra.mxu1 %v9260_v37  ;;  %7919 = vmatprep.mubr.msk.f32.mxu1 %vm8820_vm0, %v11045_v38 }
0x189c   :  { %7913 = vmatprep.subr.mxu1 %v11045_v38 }
0x189d   :  { %v3737_v17 = vpop.permute.xlu0 %3736  ;;  %7914 = vmatpush3.msra.mxu1 %v9264_v11 }
0x189e   :  { %v9466_v10 = vadd.f32 %v3737_v17, %v3721_v34  ;;  %7915 = vmatprep.subr.mxu1 %v11045_v38 }
0x189f   :  { %7916 = vmatpush3.msra.mxu1 %v9272_v13 }
0x18a0   :  { %8471 = vtanh.f32 %v9466_v10  ;;  %v4211_v59 = vrot.slane %v9466_v10, %v9114_v52  ;;  %7917 = vmatprep.subr.mxu1 %v11045_v38 }
0x18a1   :  { %7918 = vmatpush3.msra.mxu1 %v9278_v24 }
0x18a2   :  { %7933 = vmatprep.subr.mxu1 %v11045_v38  ;;  %v9479_v53 = vsel %vm501_vm2, %v4211_v59, %v4207_v3 }
0x18a3   :  { %11046 = vst [vmem:[#allocation13_spill] sm:$0xff] %v9479_v53 }
0x18a6   :  { %v8470_v2 = vpop.eup %8469 }
0x18a7   :  { %3746 = vrot.lane.b32.xlu1 %v8470_v2, %s8821_s16 }
0x18ad   :  { %v8472_v23 = vpop.eup %8471 }
0x18ae   :  { %3748 = vrot.lane.b32.xlu0 %v8472_v23, %s8821_s16 }
0x1919   :  { %v3747_v14 = vpop.permute.xlu1 %3746 }
0x191a   :  { %v3752_v6 = vmul.f32 %v8466_v20, %v3747_v14 }
0x191c   :  { %v3765_v34 = vrot.slane %v3752_v6, %v9114_v52 }
0x1920   :  { %v3749_v15 = vpop.permute.xlu0 %3748 }
0x1921   :  { %v3753_v4 = vmul.f32 %v8468_v0, %v3749_v15 }
0x1923   :  { %v3769_v17 = vrot.slane %v3753_v4, %v9114_v52 }
0x1925   :  { %v3770_v43 = vsel %vm501_vm2, %v3769_v17, %v3765_v34 }
0x1926   :  { %3771 = vrot.lane.b32.xlu1 %v3770_v43, %s8822_s17 }
0x195a   :  { %v1465_v3 = vpop.f32.mrf.mxu1 }
0x195b   :  { %v1470_v59 = vrot.slane %v1465_v3, 4  ;;  %v1471_v53 = vrot.slane %v1465_v3, 5 }
0x195c   :  { %v7899_v33 = vpop.f32.mrf.mxu1 }
0x195d   :  { %v1474_v2 = vadd.f32 %v1470_v59, %v9123_v62  ;;  %v1475_v23 = vadd.f32 %v1471_v53, %v9120_v58 }
0x195f   :  { %8473 = vtanh.f32 %v1474_v2  ;;  %v7511_v33 = vmul.f32 -1.442695, %v1474_v2  ;;  %v7512_v43 = vmul.f32 -1.442695, %v1475_v23  ;;  %v1576_v2 = vrot.slane %v9431_v19, 7 }
0x1960   :  { %8475 = vtanh.f32 %v1475_v23  ;;  %v1577_v23 = vrot.slane %v9440_v47, 7 }
0x1961   :  { %8477 = vpow2.f32 %v7511_v33 }
0x1962   :  { %8479 = vpow2.f32 %v7512_v43 }
0x196c   :  { %v8474_v20 = vpop.eup %8473 }
0x196d   :  { %v8476_v0 = vpop.eup %8475  ;;  %1584 = vrot.lane.b32.xlu0 %v8474_v20, %s8821_s16 }
0x196e   :  { %1586 = vrot.lane.b32.xlu1 %v8476_v0, %s8821_s16  ;;  %v8478_v53 = vpop.eup %8477 }
0x196f   :  { %v8480_v6 = vpop.eup %8479  ;;  %v1566_v15 = vadd.f32 1.0, %v8478_v53 }
0x1970   :  { %v1567_v4 = vadd.f32 1.0, %v8480_v6 }
0x1971   :  { %8481 = vrcp.f32 %v1566_v15 }
0x1972   :  { %8483 = vrcp.f32 %v1567_v4 }
0x197e   :  { %v8482_v34 = vpop.eup %8481 }
0x197f   :  { %v8484_v3 = vpop.eup %8483  ;;  %v1580_v33 = vmul.f32 %v8482_v34, %v1576_v2 }
0x1980   :  { %v1581_v43 = vmul.f32 %v8484_v3, %v1577_v23 }
0x1998   :  { %v9491_v14 = vpop.permute.xlu1 %3771 }
0x1999   :  { %11047 = vst [vmem:[#allocation14_spill] sm:$0xff] %v9491_v14  ;;  %8083 = vmatmul.mubr.msk.f32.vlgmr.msra.gmra.mxu0 %vm142_vm1, %v9491_v14 }
0x199a   :  { %8097 = vmatpush3.msra.mxu0 %v9378_v51  ;;  %8104 = vmatprep.mubr.msk.f32.mxu0 %vm8820_vm0, %v11045_v38 }
0x199b   :  { %8098 = vmatprep.subr.mxu0 %v11045_v38 }
0x199c   :  { %8099 = vmatpush3.msra.mxu0 %v9382_v32 }
0x199d   :  { %8100 = vmatprep.subr.mxu0 %v11045_v38 }
0x199e   :  { %8101 = vmatpush3.msra.mxu0 %v9388_v5 }
0x199f   :  { %8102 = vmatprep.subr.mxu0 %v11045_v38 }
0x19a0   :  { %8103 = vmatpush3.msra.mxu0 %v9392_v25 }
0x19a1   :  { %8118 = vmatprep.subr.mxu0 %v11045_v38 }
0x19df   :  { %v1585_v17 = vpop.permute.xlu0 %1584 }
0x19e0   :  { %v1587_v59 = vpop.permute.xlu1 %1586  ;;  %v1590_v20 = vmul.f32 %v8482_v34, %v1585_v17 }
0x19e1   :  { %v1591_v0 = vmul.f32 %v8484_v3, %v1587_v59 }
0x19e2   :  { %1594 = vrot.lane.b32.xlu0 %v1590_v20, %s8822_s17 }
0x19e3   :  { %1596 = vrot.lane.b32.xlu1 %v1591_v0, %s8822_s17 }
0x1a54   :  { %v1595_v53 = vpop.permute.xlu0 %1594 }
0x1a55   :  { %v1597_v6 = vpop.permute.xlu1 %1596  ;;  %v9509_v15 = vadd.f32 %v1595_v53, %v1580_v33 }
0x1a56   :  { %v9511_v4 = vadd.f32 %v1597_v6, %v1581_v43 }
0x1a57   :  { %8485 = vtanh.f32 %v9509_v15 }
0x1a58   :  { %8487 = vtanh.f32 %v9511_v4 }
0x1a59   :  { %v4357_v17 = vpop.f32.mrf.mxu0 }
0x1a5a   :  { %v4368_v59 = vrot.slane %v4357_v17, %v9242_v39 }
0x1a5b   :  { %v8084_v20 = vpop.f32.mrf.mxu0 }
0x1a5c   :  { %v4369_v0 = vrot.slane %v4368_v59, 7  ;;  %v4373_v19 = vadd.f32 %v4368_v59, %v9435_v21 }
0x1a5e   :  { %v4372_v47 = vadd.f32 %v4369_v0, %v9424_v9  ;;  %8489 = vtanh.f32 %v4373_v19  ;;  %v7563_v53 = vmul.f32 -1.442695, %v4373_v19 }
0x1a60   :  { %8491 = vtanh.f32 %v4372_v47  ;;  %v7562_v6 = vmul.f32 -1.442695, %v4372_v47 }
0x1a61   :  { %8493 = vpow2.f32 %v7563_v53 }
0x1a62   :  { %8495 = vpow2.f32 %v7562_v6 }
0x1a64   :  { %v8486_v2 = vpop.eup %8485 }
0x1a65   :  { %v8488_v23 = vpop.eup %8487  ;;  %1606 = vrot.lane.b32.xlu0 %v8486_v2, %s8821_s16 }
0x1a66   :  { %1608 = vrot.lane.b32.xlu1 %v8488_v23, %s8821_s16 }
0x1a6b   :  { %v8490_v33 = vpop.eup %8489 }
0x1a6c   :  { %4398 = vrot.lane.b32.xlu1 %v8490_v33, %s8821_s16 }
0x1a6d   :  { %v8492_v43 = vpop.eup %8491 }
0x1a6e   :  { %4396 = vrot.lane.b32.xlu0 %v8492_v43, %s8821_s16  ;;  %v8494_v21 = vpop.eup %8493 }
0x1a6f   :  { %v8496_v17 = vpop.eup %8495  ;;  %v4381_v59 = vadd.f32 1.0, %v8494_v21 }
0x1a70   :  { %v4380_v20 = vadd.f32 1.0, %v8496_v17 }
0x1a71   :  { %8497 = vrcp.f32 %v4381_v59 }
0x1a72   :  { %8499 = vrcp.f32 %v4380_v20 }
0x1a7e   :  { %v8498_v47 = vpop.eup %8497 }
0x1a7f   :  { %v8500_v21 = vpop.eup %8499 }
0x1ad7   :  { %v1607_v0 = vpop.permute.xlu0 %1606 }
0x1ad8   :  { %v1609_v2 = vpop.permute.xlu1 %1608  ;;  %v9522_v14 = vmul.f32 %v8482_v34, %v1607_v0  ;;  %v4388_v0 = vrot.slane %v9457_v57, 7 }
0x1ad9   :  { %v9524_v23 = vmul.f32 %v8484_v3, %v1609_v2  ;;  %v4389_v3 = vrot.slane %v9466_v10, 7 }
0x1ada   :  { %v1690_v33 = vrot.slane %v9522_v14, 4 }
0x1adb   :  { %v1691_v43 = vrot.slane %v9524_v23, 3  ;;  %v4393_v20 = vmul.f32 %v8498_v47, %v4389_v3 }
0x1add   :  { %v1692_v19 = vsel %vm501_vm2, %v1691_v43, %v1690_v33  ;;  %v4392_v43 = vmul.f32 %v8500_v21, %v4388_v0 }
0x1ade   :  { %1693 = vrot.lane.b32.xlu0 %v1692_v19, %s8822_s17  ;;  %v4399_v53 = vpop.permute.xlu1 %4398 }
0x1adf   :  { %v4403_v6 = vmul.f32 %v8498_v47, %v4399_v53 }
0x1ae0   :  { %v4397_v17 = vpop.permute.xlu0 %4396 }
0x1ae1   :  { %v4402_v59 = vmul.f32 %v8500_v21, %v4397_v17 }
0x1ae2   :  { %4408 = vrot.lane.b32.xlu0 %v4403_v6, %s8822_s17 }
0x1ae3   :  { %4406 = vrot.lane.b32.xlu1 %v4402_v59, %s8822_s17 }
0x1b50   :  { %v1694_v34 = vpop.permute.xlu0 %1693 }
0x1b51   :  { %7920 = vmatmul.mubr.msk.f32.vlgmr.msra.gmra.mxu1 %vm142_vm1, %v1694_v34 }
0x1b52   :  { %7934 = vmatpush3.msra.mxu1 %v9260_v37  ;;  %7941 = vmatprep.mubr.msk.f32.mxu1 %vm8820_vm0, %v11045_v38 }
0x1b53   :  { %7935 = vmatprep.subr.mxu1 %v11045_v38 }
0x1b54   :  { %v4409_v2 = vpop.permute.xlu0 %4408  ;;  %7936 = vmatpush3.msra.mxu1 %v9264_v11 }
0x1b55   :  { %v9540_v33 = vadd.f32 %v4409_v2, %v4393_v20  ;;  %7937 = vmatprep.subr.mxu1 %v11045_v38  ;;  %v4407_v19 = vpop.permute.xlu1 %4406 }
0x1b56   :  { %7938 = vmatpush3.msra.mxu1 %v9272_v13  ;;  %v9545_v37 = vadd.f32 %v4407_v19, %v4392_v43 }
0x1b57   :  { %8501 = vtanh.f32 %v9540_v33  ;;  %7939 = vmatprep.subr.mxu1 %v11045_v38  ;;  %v4794_v11 = vrot.slane %v9540_v33, %v8951_v22 }
0x1b58   :  { %7940 = vmatpush3.msra.mxu1 %v9278_v24  ;;  %8503 = vtanh.f32 %v9545_v37  ;;  %v4790_v57 = vrot.slane %v9545_v37, %v8951_v22 }
0x1b59   :  { %7955 = vmatprep.subr.mxu1 %v11045_v38 }
0x1b5a   :  { %v9556_v13 = vsel %vm4780_vm6, %v4794_v11, %v4790_v57 }
0x1b5b   :  { %11048 = vst [vmem:[#allocation15_spill] sm:$0xff] %v9556_v13 }
0x1b64   :  { %v8502_v10 = vpop.eup %8501 }
0x1b65   :  { %4420 = vrot.lane.b32.xlu0 %v8502_v10, %s8821_s16  ;;  %v8504_v53 = vpop.eup %8503 }
0x1b66   :  { %4418 = vrot.lane.b32.xlu1 %v8504_v53, %s8821_s16 }
0x1bd7   :  { %v4421_v24 = vpop.permute.xlu0 %4420 }
0x1bd8   :  { %v4425_v6 = vmul.f32 %v8498_v47, %v4421_v24  ;;  %v4419_v17 = vpop.permute.xlu1 %4418 }
0x1bd9   :  { %v4424_v59 = vmul.f32 %v8500_v21, %v4419_v17 }
0x1bda   :  { %v4435_v34 = vrot.slane %v4425_v6, %v8951_v22 }
0x1bdb   :  { %v4431_v3 = vrot.slane %v4424_v59, %v8951_v22 }
0x1bdd   :  { %v4436_v20 = vsel %vm501_vm2, %v4435_v34, %v4431_v3  ;;  %v9564_v0 = vsel %vm4780_vm6, %v4435_v34, %v4431_v3 }
0x1bde   :  { %11049 = vst [vmem:[#allocation16_spill] sm:$0xff] %v9564_v0  ;;  %4437 = vrot.lane.b32.xlu1 %v4436_v20, %s8822_s17 }
0x1c11   :  { %v1763_v2 = vpop.f32.mrf.mxu1 }
0x1c12   :  { %v1768_v43 = vrot.slane %v1763_v2, 3  ;;  %v1769_v19 = vrot.slane %v1763_v2, 4 }
0x1c13   :  { %v7921_v11 = vpop.f32.mrf.mxu1 }
0x1c14   :  { %v1772_v57 = vadd.f32 %v1768_v43, %v9123_v62  ;;  %v1773_v47 = vadd.f32 %v1769_v19, %v9120_v58 }
0x1c16   :  { %8505 = vtanh.f32 %v1772_v57  ;;  %v7517_v24 = vmul.f32 -1.442695, %v1772_v57  ;;  %v7518_v6 = vmul.f32 -1.442695, %v1773_v47  ;;  %v1874_v57 = vrot.slane %v9509_v15, 7 }
0x1c17   :  { %8507 = vtanh.f32 %v1773_v47  ;;  %v1875_v47 = vrot.slane %v9511_v4, 7 }
0x1c18   :  { %8509 = vpow2.f32 %v7517_v24 }
0x1c19   :  { %8511 = vpow2.f32 %v7518_v6 }
0x1c23   :  { %v8506_v21 = vpop.eup %8505 }
0x1c24   :  { %v8508_v10 = vpop.eup %8507  ;;  %1882 = vrot.lane.b32.xlu0 %v8506_v21, %s8821_s16 }
0x1c25   :  { %1884 = vrot.lane.b32.xlu1 %v8508_v10, %s8821_s16  ;;  %v8510_v17 = vpop.eup %8509 }
0x1c26   :  { %v8512_v59 = vpop.eup %8511  ;;  %v1864_v34 = vadd.f32 1.0, %v8510_v17 }
0x1c27   :  { %v1865_v3 = vadd.f32 1.0, %v8512_v59 }
0x1c28   :  { %8513 = vrcp.f32 %v1864_v34 }
0x1c29   :  { %8515 = vrcp.f32 %v1865_v3 }
0x1c35   :  { %v8514_v20 = vpop.eup %8513 }
0x1c36   :  { %v8516_v43 = vpop.eup %8515  ;;  %v1878_v10 = vmul.f32 %v8514_v20, %v1874_v57 }
0x1c37   :  { %v1879_v24 = vmul.f32 %v8516_v43, %v1875_v47 }
0x1c50   :  { %v9571_v53 = vpop.permute.xlu1 %4437 }
0x1c51   :  { %8105 = vmatmul.mubr.msk.f32.vlgmr.msra.gmra.mxu0 %vm142_vm1, %v9571_v53 }
0x1c52   :  { %8119 = vmatpush3.msra.mxu0 %v9378_v51  ;;  %8126 = vmatprep.mubr.msk.f32.mxu0 %vm8820_vm0, %v11045_v38 }
0x1c53   :  { %8120 = vmatprep.subr.mxu0 %v11045_v38 }
0x1c54   :  { %8121 = vmatpush3.msra.mxu0 %v9382_v32 }
0x1c55   :  { %8122 = vmatprep.subr.mxu0 %v11045_v38 }
0x1c56   :  { %8123 = vmatpush3.msra.mxu0 %v9388_v5 }
0x1c57   :  { %8124 = vmatprep.subr.mxu0 %v11045_v38 }
0x1c58   :  { %8125 = vmatpush3.msra.mxu0 %v9392_v25 }
0x1c59   :  { %8140 = vmatprep.subr.mxu0 %v11045_v38 }
0x1c96   :  { %v1883_v2 = vpop.permute.xlu0 %1882 }
0x1c97   :  { %v1885_v19 = vpop.permute.xlu1 %1884  ;;  %v1888_v11 = vmul.f32 %v8514_v20, %v1883_v2  ;;  %v9597_v2 = vcombine.high %v9424_v9, %v9424_v9 }
0x1c98   :  { %v1889_v21 = vmul.f32 %v8516_v43, %v1885_v19  ;;  %v9602_v19 = vrot.slane %v9420_v41, %v9242_v39 }
0x1c99   :  { %1892 = vrot.lane.b32.xlu0 %v1888_v11, %s8822_s17 }
0x1c9a   :  { %1894 = vrot.lane.b32.xlu1 %v1889_v21, %s8822_s17 }
0x1d0b   :  { %v1893_v6 = vpop.permute.xlu0 %1892 }
0x1d0c   :  { %v1895_v17 = vpop.permute.xlu1 %1894  ;;  %v9589_v59 = vadd.f32 %v1893_v6, %v1878_v10 }
0x1d0d   :  { %v9591_v34 = vadd.f32 %v1895_v17, %v1879_v24 }
0x1d0e   :  { %8517 = vtanh.f32 %v9589_v59 }
0x1d0f   :  { %8519 = vtanh.f32 %v9591_v34 }
0x1d11   :  { %v4934_v3 = vpop.f32.mrf.mxu0 }
0x1d12   :  { %v4945_v15 = vrot.slane %v4934_v3, %v9242_v39 }
0x1d13   :  { %v8106_v4 = vpop.f32.mrf.mxu0 }
0x1d14   :  { %v4946_v11 = vrot.slane %v4945_v15, 1  ;;  %v4949_v21 = vadd.f32 %v4945_v15, %v9597_v2 }
0x1d16   :  { %v4950_v57 = vadd.f32 %v4946_v11, %v9602_v19  ;;  %8521 = vtanh.f32 %v4949_v21  ;;  %v7566_v41 = vmul.f32 -1.442695, %v4949_v21 }
0x1d18   :  { %8523 = vtanh.f32 %v4950_v57  ;;  %v7567_v6 = vmul.f32 -1.442695, %v4950_v57 }
0x1d19   :  { %8525 = vpow2.f32 %v7566_v41 }
0x1d1a   :  { %8527 = vpow2.f32 %v7567_v6 }
0x1d1b   :  { %v8518_v47 = vpop.eup %8517 }
0x1d1c   :  { %v8520_v10 = vpop.eup %8519  ;;  %1904 = vrot.lane.b32.xlu0 %v8518_v47, %s8821_s16 }
0x1d1d   :  { %1906 = vrot.lane.b32.xlu1 %v8520_v10, %s8821_s16 }
0x1d23   :  { %v8522_v9 = vpop.eup %8521 }
0x1d24   :  { %4975 = vrot.lane.b32.xlu0 %v8522_v9, %s8821_s16 }
0x1d25   :  { %v8524_v24 = vpop.eup %8523 }
0x1d26   :  { %4977 = vrot.lane.b32.xlu1 %v8524_v24, %s8821_s16  ;;  %v8526_v17 = vpop.eup %8525 }
0x1d27   :  { %v8528_v3 = vpop.eup %8527  ;;  %v4957_v15 = vadd.f32 1.0, %v8526_v17 }
0x1d28   :  { %v4958_v4 = vadd.f32 1.0, %v8528_v3 }
0x1d29   :  { %8529 = vrcp.f32 %v4957_v15 }
0x1d2a   :  { %8531 = vrcp.f32 %v4958_v4  ;;  %v8785_v4 = vld [vmem:[#allocation4 + $0xe8] sm:$0xff] }
0x1d36   :  { %v8530_v57 = vpop.eup %8529 }
0x1d37   :  { %v8532_v17 = vpop.eup %8531 }
0x1d8e   :  { %v1905_v11 = vpop.permute.xlu0 %1904 }
0x1d8f   :  { %v1907_v47 = vpop.permute.xlu1 %1906  ;;  %v9610_v13 = vmul.f32 %v8514_v20, %v1905_v11 }
0x1d90   :  { %v9612_v10 = vmul.f32 %v8516_v43, %v1907_v47  ;;  %v7568_v43 = vrot.slane %v9545_v37, 9  ;;  %v8786_v47 = vld [vmem:[#allocation4 + $0xa0] sm:$0xff] }
0x1d91   :  { %v1988_v9 = vrot.slane %v9610_v13, 5 }
0x1d92   :  { %v1989_v24 = vrot.slane %v9612_v10, 4  ;;  %v4971_v11 = vmul.f32 %v8530_v57, %v7568_v43 }
0x1d94   :  { %v1990_v21 = vsel %vm501_vm2, %v1989_v24, %v1988_v9  ;;  %v7569_v24 = vrot.slane %v9540_v33, 9 }
0x1d95   :  { %1991 = vrot.lane.b32.xlu0 %v1990_v21, %s8822_s17 }
0x1d96   :  { %v4976_v41 = vpop.permute.xlu0 %4975  ;;  %v4972_v37 = vmul.f32 %v8532_v17, %v7569_v24 }
0x1d97   :  { %v4981_v6 = vmul.f32 %v8530_v57, %v4976_v41  ;;  %v8787_v41 = vld [vmem:[#allocation4 + $0x58] sm:$0xff] }
0x1d98   :  { %v4978_v3 = vpop.permute.xlu1 %4977 }
0x1d99   :  { %4985 = vrot.lane.b32.xlu1 %v4981_v6, %s8822_s17  ;;  %v4982_v15 = vmul.f32 %v8532_v17, %v4978_v3  ;;  %v8788_v3 = vld [vmem:[#allocation4 + $0x10] sm:$0xff] }
0x1d9b   :  { %4987 = vrot.lane.b32.xlu0 %v4982_v15, %s8822_s17 }
0x1e07   :  { %v1992_v20 = vpop.permute.xlu0 %1991 }
0x1e08   :  { %7942 = vmatmul.mubr.msk.f32.vlgmr.msra.gmra.mxu1 %vm142_vm1, %v1992_v20 }
0x1e09   :  { %7956 = vmatpush3.msra.mxu1 %v8785_v4  ;;  %7963 = vmatprep.mubr.msk.f32.mxu1 %vm8820_vm0, %v11045_v38 }
0x1e0a   :  { %7957 = vmatprep.subr.mxu1 %v11045_v38 }
0x1e0b   :  { %7958 = vmatpush3.msra.mxu1 %v8786_v47  ;;  %v4986_v9 = vpop.permute.xlu1 %4985 }
0x1e0c   :  { %7959 = vmatprep.subr.mxu1 %v11045_v38  ;;  %v9627_v21 = vadd.f32 %v4986_v9, %v4971_v11 }
0x1e0d   :  { %7960 = vmatpush3.msra.mxu1 %v8787_v41  ;;  %v4988_v6 = vpop.permute.xlu0 %4987 }
0x1e0e   :  { %7961 = vmatprep.subr.mxu1 %v11045_v38  ;;  %8533 = vtanh.f32 %v9627_v21  ;;  %v9631_v15 = vadd.f32 %v4988_v6, %v4972_v37  ;;  %v5365_v20 = vrot.slane %v9627_v21, %v9114_v52 }
0x1e0f   :  { %7962 = vmatpush3.msra.mxu1 %v8788_v3 }
0x1e10   :  { %8535 = vtanh.f32 %v9631_v15  ;;  %v5369_v33 = vrot.slane %v9631_v15, %v9114_v52 }
0x1e12   :  { %v9639_v43 = vsel %vm501_vm2, %v5369_v33, %v5365_v20 }
0x1e13   :  { %11050 = vst [vmem:[#allocation17_spill] sm:$0xff] %v9639_v43 }
0x1e1b   :  { %v8534_v4 = vpop.eup %8533 }
0x1e1c   :  { %4997 = vrot.lane.b32.xlu1 %v8534_v4, %s8821_s16 }
0x1e1d   :  { %v8536_v11 = vpop.eup %8535 }
0x1e1e   :  { %4999 = vrot.lane.b32.xlu0 %v8536_v11, %s8821_s16 }
0x1e8e   :  { %v4998_v47 = vpop.permute.xlu1 %4997 }
0x1e8f   :  { %v5003_v9 = vmul.f32 %v8530_v57, %v4998_v47 }
0x1e90   :  { %v5000_v24 = vpop.permute.xlu0 %4999 }
0x1e91   :  { %v5004_v41 = vmul.f32 %v8532_v17, %v5000_v24  ;;  %v5010_v37 = vrot.slane %v5003_v9, %v9114_v52 }
0x1e93   :  { %v5014_v6 = vrot.slane %v5004_v41, %v9114_v52 }
0x1e95   :  { %v5015_v3 = vsel %vm501_vm2, %v5014_v6, %v5010_v37 }
0x1e96   :  { %5016 = vrot.lane.b32.xlu1 %v5015_v3, %s8822_s17 }
0x1ec8   :  { %v2061_v20 = vpop.f32.mrf.mxu1 }
0x1ec9   :  { %v2066_v33 = vrot.slane %v2061_v20, 2  ;;  %v2067_v43 = vrot.slane %v2061_v20, 3 }
0x1eca   :  { %v7943_v0 = vpop.f32.mrf.mxu1 }
0x1ecb   :  { %v2070_v4 = vadd.f32 %v2066_v33, %v9123_v62  ;;  %v2071_v11 = vadd.f32 %v2067_v43, %v9120_v58  ;;  %v2172_v33 = vrot.slane %v9591_v34, 7 }
0x1ecd   :  { %8537 = vtanh.f32 %v2070_v4  ;;  %v7523_v0 = vmul.f32 -1.442695, %v2070_v4  ;;  %v7524_v43 = vmul.f32 -1.442695, %v2071_v11 }
0x1ece   :  { %8539 = vtanh.f32 %v2071_v11 }
0x1ecf   :  { %8541 = vpow2.f32 %v7523_v0 }
0x1ed0   :  { %8543 = vpow2.f32 %v7524_v43 }
0x1eda   :  { %v8538_v57 = vpop.eup %8537 }
0x1edb   :  { %v8540_v17 = vpop.eup %8539  ;;  %2179 = vrot.lane.b32.xlu0 %v8538_v57, %s8821_s16 }
0x1edc   :  { %2181 = vrot.lane.b32.xlu1 %v8540_v17, %s8821_s16 }
0x1f08   :  { %v9651_v47 = vpop.permute.xlu1 %5016 }
0x1f09   :  { %8127 = vmatmul.mubr.msk.f32.vlgmr.msra.gmra.mxu0 %vm142_vm1, %v9651_v47 }
0x1f0a   :  { %8141 = vmatpush3.msra.mxu0 %v9378_v51  ;;  %8148 = vmatprep.mubr.msk.f32.mxu0 %vm8820_vm0, %v11045_v38  ;;  %v8542_v51 = vpop.eup %8541 }
0x1f0b   :  { %8142 = vmatprep.subr.mxu0 %v11045_v38  ;;  %v8544_v9 = vpop.eup %8543  ;;  %v2161_v24 = vadd.f32 1.0, %v8542_v51 }
0x1f0c   :  { %8143 = vmatpush3.msra.mxu0 %v9382_v32  ;;  %v2162_v41 = vadd.f32 1.0, %v8544_v9 }
0x1f0d   :  { %8144 = vmatprep.subr.mxu0 %v11045_v38  ;;  %8545 = vrcp.f32 %v2161_v24 }
0x1f0e   :  { %8145 = vmatpush3.msra.mxu0 %v9388_v5  ;;  %8547 = vrcp.f32 %v2162_v41 }
0x1f0f   :  { %8146 = vmatprep.subr.mxu0 %v11045_v38 }
0x1f10   :  { %8147 = vmatpush3.msra.mxu0 %v9392_v25  ;;  %v2171_v25 = vrot.slane %v9589_v59, 7 }
0x1f11   :  { %8162 = vmatprep.subr.mxu0 %v11045_v38 }
0x1f1a   :  { %v8546_v32 = vpop.eup %8545 }
0x1f1b   :  { %v8548_v6 = vpop.eup %8547  ;;  %v2175_v4 = vmul.f32 %v8546_v32, %v2171_v25 }
0x1f1c   :  { %v2176_v11 = vmul.f32 %v8548_v6, %v2172_v33 }
0x1f4d   :  { %v2180_v37 = vpop.permute.xlu0 %2179 }
0x1f4e   :  { %v2182_v5 = vpop.permute.xlu1 %2181  ;;  %v2185_v3 = vmul.f32 %v8546_v32, %v2180_v37 }
0x1f4f   :  { %v2186_v20 = vmul.f32 %v8548_v6, %v2182_v5 }
0x1f50   :  { %2189 = vrot.lane.b32.xlu0 %v2185_v3, %s8822_s17 }
0x1f51   :  { %2191 = vrot.lane.b32.xlu1 %v2186_v20, %s8822_s17 }
0x1fc2   :  { %v2190_v57 = vpop.permute.xlu0 %2189 }
0x1fc3   :  { %v2192_v17 = vpop.permute.xlu1 %2191  ;;  %v9669_v0 = vadd.f32 %v2190_v57, %v2175_v4 }
0x1fc4   :  { %v9671_v43 = vadd.f32 %v2192_v17, %v2176_v11 }
0x1fc5   :  { %8549 = vtanh.f32 %v9669_v0 }
0x1fc6   :  { %8551 = vtanh.f32 %v9671_v43 }
0x1fc9   :  { %v5508_v51 = vpop.f32.mrf.mxu0 }
0x1fca   :  { %v5519_v9 = vrot.slane %v5508_v51, %v9242_v39 }
0x1fcb   :  { %v8128_v24 = vpop.f32.mrf.mxu0 }
0x1fcc   :  { %v5520_v41 = vrot.slane %v5519_v9, 7  ;;  %v5524_v59 = vadd.f32 %v5519_v9, %v9602_v19 }
0x1fce   :  { %v5523_v34 = vadd.f32 %v5520_v41, %v9597_v2  ;;  %8553 = vtanh.f32 %v5524_v59  ;;  %v7573_v25 = vmul.f32 -1.442695, %v5524_v59 }
0x1fd0   :  { %8555 = vtanh.f32 %v5523_v34  ;;  %v7572_v33 = vmul.f32 -1.442695, %v5523_v34 }
0x1fd1   :  { %8557 = vpow2.f32 %v7573_v25 }
0x1fd2   :  { %v8550_v37 = vpop.eup %8549  ;;  %8559 = vpow2.f32 %v7572_v33 }
0x1fd3   :  { %v8552_v5 = vpop.eup %8551  ;;  %2201 = vrot.lane.b32.xlu0 %v8550_v37, %s8821_s16 }
0x1fd4   :  { %2203 = vrot.lane.b32.xlu1 %v8552_v5, %s8821_s16 }
0x1fdb   :  { %v8554_v3 = vpop.eup %8553 }
0x1fdc   :  { %5549 = vrot.lane.b32.xlu1 %v8554_v3, %s8821_s16 }
0x1fdd   :  { %v8556_v20 = vpop.eup %8555 }
0x1fde   :  { %5547 = vrot.lane.b32.xlu0 %v8556_v20, %s8821_s16  ;;  %v8558_v4 = vpop.eup %8557 }
0x1fdf   :  { %v8560_v2 = vpop.eup %8559  ;;  %v5532_v11 = vadd.f32 1.0, %v8558_v4 }
0x1fe0   :  { %v5531_v57 = vadd.f32 1.0, %v8560_v2 }
0x1fe1   :  { %8561 = vrcp.f32 %v5532_v11  ;;  %v5539_v11 = vrot.slane %v9627_v21, 7 }
0x1fe2   :  { %8563 = vrcp.f32 %v5531_v57 }
0x1fee   :  { %v8562_v34 = vpop.eup %8561 }
0x1fef   :  { %v8564_v20 = vpop.eup %8563 }
0x2045   :  { %v2202_v17 = vpop.permute.xlu0 %2201 }
0x2046   :  { %v2204_v51 = vpop.permute.xlu1 %2203  ;;  %v9682_v9 = vmul.f32 %v8546_v32, %v2202_v17  ;;  %v5543_v17 = vmul.f32 %v8564_v20, %v5539_v11 }
0x2047   :  { %v9684_v24 = vmul.f32 %v8548_v6, %v2204_v51  ;;  %v5540_v6 = vrot.slane %v9631_v15, 7 }
0x2048   :  { %v2285_v41 = vrot.slane %v9682_v9, 6 }
0x2049   :  { %v2286_v37 = vrot.slane %v9684_v24, 5  ;;  %v5544_v4 = vmul.f32 %v8562_v34, %v5540_v6 }
0x204b   :  { %v2287_v59 = vsel %vm501_vm2, %v2286_v37, %v2285_v41 }
0x204c   :  { %2288 = vrot.lane.b32.xlu0 %v2287_v59, %s8822_s17 }
0x204e   :  { %v5550_v5 = vpop.permute.xlu1 %5549 }
0x204f   :  { %v5554_v3 = vmul.f32 %v8562_v34, %v5550_v5 }
0x2050   :  { %v5548_v25 = vpop.permute.xlu0 %5547 }
0x2051   :  { %5559 = vrot.lane.b32.xlu0 %v5554_v3, %s8822_s17  ;;  %v5553_v33 = vmul.f32 %v8564_v20, %v5548_v25  ;;  %v2446_v3 = vrot.slane %v9282_v28, 1  ;;  %v2449_v25 = vadd.f32 %v9282_v28, %v8964_v31 }
0x2053   :  { %5557 = vrot.lane.b32.xlu1 %v5553_v33, %s8822_s17  ;;  %v2450_v33 = vadd.f32 %v2446_v3, %v8966_v35 }
0x20be   :  { %v2289_v32 = vpop.permute.xlu0 %2288 }
0x20bf   :  { %7964 = vmatmul.mubr.msk.f32.vlgmr.msra.gmra.mxu1 %vm142_vm1, %v2289_v32 }
0x20c3   :  { %v5560_v2 = vpop.permute.xlu0 %5559 }
0x20c4   :  { %v9695_v57 = vadd.f32 %v5560_v2, %v5544_v4 }
0x20c5   :  { %v5558_v51 = vpop.permute.xlu1 %5557 }
0x20c6   :  { %8565 = vtanh.f32 %v9695_v57  ;;  %v9698_v41 = vadd.f32 %v5558_v51, %v5543_v17  ;;  %v5944_v37 = vrot.slane %v9695_v57, %v8951_v22 }
0x20c8   :  { %8567 = vtanh.f32 %v9698_v41  ;;  %v5940_v15 = vrot.slane %v9698_v41, %v8951_v22 }
0x20c9   :  { %8569 = vtanh.f32 %v2449_v25 }
0x20ca   :  { %v9706_v59 = vsel %vm4780_vm6, %v5944_v37, %v5940_v15  ;;  %8571 = vtanh.f32 %v2450_v33 }
0x20d3   :  { %v8566_v21 = vpop.eup %8565 }
0x20d4   :  { %5571 = vrot.lane.b32.xlu0 %v8566_v21, %s8821_s16 }
0x20d5   :  { %v8568_v5 = vpop.eup %8567 }
0x20d6   :  { %5569 = vrot.lane.b32.xlu1 %v8568_v5, %s8821_s16  ;;  %v8570_v31 = vpop.eup %8569 }
0x20d7   :  { %v8572_v35 = vpop.eup %8571 }
0x2146   :  { %v5572_v32 = vpop.permute.xlu0 %5571 }
0x2147   :  { %v5576_v6 = vmul.f32 %v8562_v34, %v5572_v32 }
0x2148   :  { %v5570_v4 = vpop.permute.xlu1 %5569 }
0x2149   :  { %v5575_v2 = vmul.f32 %v8564_v20, %v5570_v4  ;;  %v5586_v11 = vrot.slane %v5576_v6, %v8951_v22  ;;  %v7531_v6 = vmul.f32 -1.442695, %v2449_v25  ;;  %v7532_v4 = vmul.f32 -1.442695, %v2450_v33 }
0x214b   :  { %v5582_v17 = vrot.slane %v5575_v2, %v8951_v22 }
0x214d   :  { %v5587_v51 = vsel %vm501_vm2, %v5586_v11, %v5582_v17  ;;  %v9718_v37 = vsel %vm4780_vm6, %v5586_v11, %v5582_v17 }
0x214e   :  { %5588 = vrot.lane.b32.xlu1 %v5587_v51, %s8822_s17 }
0x2152   :  { %2529 = vrot.lane.b32.xlu1 %v8570_v31, %s8821_s16  ;;  %v8790_v31 = vld [vmem:[#allocation4 + $0xc0] sm:$0xff] }
0x2156   :  { %2531 = vrot.lane.b32.xlu1 %v8572_v35, %s8821_s16 }
0x217f   :  { %v2358_v28 = vpop.f32.mrf.mxu1 }
0x2180   :  { %v2363_v34 = vrot.slane %v2358_v28, 1  ;;  %v2364_v20 = vrot.slane %v2358_v28, 2  ;;  %v8791_v28 = vld [vmem:[#allocation4 + $0x78] sm:$0xff] }
0x2181   :  { %v7965_v15 = vpop.f32.mrf.mxu1 }
0x2182   :  { %v2367_v21 = vadd.f32 %v2363_v34, %v9123_v62  ;;  %v2368_v5 = vadd.f32 %v2364_v20, %v9120_v58  ;;  %v8789_v58 = vld [vmem:[#allocation4 + $0x108] sm:$0xff]  ;;  %v8792_v15 = vld [vmem:[#allocation4 + $0x30] sm:$0xff] }
0x2184   :  { %8573 = vtanh.f32 %v2367_v21 }
0x2185   :  { %8575 = vtanh.f32 %v2368_v5 }
0x2186   :  { %8577 = vpow2.f32 %v7531_v6  ;;  %v7530_v6 = vmul.f32 -1.442695, %v2368_v5  ;;  %v2521_v5 = vrot.slane %v9211_v56, 1  ;;  %v2468_v56 = vrot.slane %v9671_v43, 7 }
0x2187   :  { %8579 = vpow2.f32 %v7532_v4 }
0x2191   :  { %v8574_v3 = vpop.eup %8573 }
0x2192   :  { %2475 = vrot.lane.b32.xlu0 %v8574_v3, %s8821_s16  ;;  %v8576_v32 = vpop.eup %8575 }
0x2193   :  { %v8578_v2 = vpop.eup %8577 }
0x2194   :  { %v2511_v11 = vadd.f32 1.0, %v8578_v2  ;;  %v8580_v17 = vpop.eup %8579 }
0x2195   :  { %v2512_v51 = vadd.f32 1.0, %v8580_v17 }
0x2196   :  { %2477 = vrot.lane.b32.xlu0 %v8576_v32, %s8821_s16  ;;  %8581 = vrcp.f32 %v2511_v11  ;;  %v7529_v32 = vmul.f32 -1.442695, %v2367_v21 }
0x2197   :  { %8583 = vrcp.f32 %v2512_v51 }
0x2198   :  { %8585 = vpow2.f32 %v7529_v32 }
0x2199   :  { %8587 = vpow2.f32 %v7530_v6 }
0x21a3   :  { %v9734_v25 = vpop.eup %8581 }
0x21a4   :  { %v9740_v34 = vpop.eup %8583 }
0x21a5   :  { %v8586_v4 = vpop.eup %8585 }
0x21a6   :  { %v2457_v2 = vadd.f32 1.0, %v8586_v4  ;;  %v8588_v11 = vpop.eup %8587 }
0x21a7   :  { %v2458_v17 = vadd.f32 1.0, %v8588_v11 }
0x21a8   :  { %8589 = vrcp.f32 %v2457_v2 }
0x21a9   :  { %8591 = vrcp.f32 %v2458_v17 }
0x21b5   :  { %v9744_v51 = vpop.eup %8589 }
0x21c0   :  { %v9727_v62 = vpop.permute.xlu1 %5588 }
0x21c1   :  { %8149 = vmatmul.mubr.msk.f32.vlgmr.msra.gmra.mxu0 %vm142_vm1, %v9727_v62 }
0x21c2   :  { %8163 = vmatpush3.msra.mxu0 %v8789_v58  ;;  %8170 = vmatprep.mubr.msk.f32.mxu0 %vm8820_vm0, %v11045_v38 }
0x21c3   :  { %8164 = vmatprep.subr.mxu0 %v11045_v38 }
0x21c4   :  { %v2530_v33 = vpop.permute.xlu1 %2529  ;;  %8165 = vmatpush3.msra.mxu0 %v8790_v31  ;;  %v9748_v31 = vpop.eup %8591 }
0x21c5   :  { %v2535_v35 = vmul.f32 %v9734_v25, %v2530_v33  ;;  %8166 = vmatprep.subr.mxu0 %v11045_v38 }
0x21c6   :  { %8167 = vmatpush3.msra.mxu0 %v8791_v28  ;;  %v2525_v28 = vmul.f32 %v9734_v25, %v2521_v5 }
0x21c7   :  { %2539 = vrot.lane.b32.xlu1 %v2535_v35, %s8822_s17  ;;  %8168 = vmatprep.subr.mxu0 %v11045_v38 }
0x21c8   :  { %v2532_v20 = vpop.permute.xlu1 %2531  ;;  %8169 = vmatpush3.msra.mxu0 %v8792_v15  ;;  %v2522_v15 = vrot.slane %v9207_v18, 1 }
0x21c9   :  { %v2536_v3 = vmul.f32 %v9740_v34, %v2532_v20 }
0x21ca   :  { %v2526_v32 = vmul.f32 %v9740_v34, %v2522_v15 }
0x21cb   :  { %2541 = vrot.lane.b32.xlu1 %v2536_v3, %s8822_s17 }
0x2204   :  { %v2476_v58 = vpop.permute.xlu0 %2475 }
0x2205   :  { %v2481_v33 = vmul.f32 %v9744_v51, %v2476_v58 }
0x2207   :  { %2485 = vrot.lane.b32.xlu0 %v2481_v33, %s8822_s17 }
0x2208   :  { %v2478_v35 = vpop.permute.xlu0 %2477 }
0x2209   :  { %v2482_v21 = vmul.f32 %v9748_v31, %v2478_v35 }
0x220b   :  { %2487 = vrot.lane.b32.xlu0 %v2482_v21, %s8822_s17 }
0x2239   :  { %v2540_v20 = vpop.permute.xlu1 %2539 }
0x223a   :  { %v2545_v3 = vadd.f32 %v2540_v20, %v2525_v28  ;;  %v82_v28 = vld [vmem:[%s11021_s6 + $0x58] sm:$0xff] }
0x223c   :  { %8593 = vtanh.f32 %v2545_v3  ;;  %v80_v3 = vld [vmem:[%s11021_s6 + $0x28] sm:$0xff] }
0x223d   :  { %v2542_v6 = vpop.permute.xlu1 %2541 }
0x223e   :  { %v2546_v4 = vadd.f32 %v2542_v6, %v2526_v32 }
0x2240   :  { %8595 = vtanh.f32 %v2546_v4  ;;  %v79_v4 = vld [vmem:[%s11021_s6 + $0x10] sm:$0xff] }
0x2249   :  { %v8594_v2 = vpop.eup %8593 }
0x224a   :  { %2551 = vrot.lane.b32.xlu1 %v8594_v2, %s8821_s16 }
0x224d   :  { %v8596_v11 = vpop.eup %8595 }
0x224e   :  { %2553 = vrot.lane.b32.xlu1 %v8596_v11, %s8821_s16 }
0x2252   :  { %491 = vrot.lane.b32.xlu1 %v8979_v61, %s8821_s16  ;;  %v2467_v61 = vrot.slane %v9669_v0, 7 }
0x2254   :  { %v2471_v18 = vmul.f32 %v9744_v51, %v2467_v61 }
0x2256   :  { %788 = vrot.lane.b32.xlu1 %v9007_v55, %s8821_s16 }
0x225a   :  { %1085 = vrot.lane.b32.xlu1 %v9034_v50, %s8821_s16 }
0x225e   :  { %1383 = vrot.lane.b32.xlu1 %v9061_v46, %s8821_s16  ;;  %v2472_v46 = vmul.f32 %v9748_v31, %v2468_v56 }
0x2262   :  { %493 = vrot.lane.b32.xlu1 %v8981_v63, %s8821_s16 }
0x2266   :  { %790 = vrot.lane.b32.xlu1 %v9009_v54, %s8821_s16 }
0x226a   :  { %1087 = vrot.lane.b32.xlu1 %v9036_v48, %s8821_s16  ;;  %v9779_v48 = vcombine.high %v9602_v19, %v9602_v19 }
0x2279   :  { %v2486_v55 = vpop.permute.xlu0 %2485 }
0x227a   :  { %v2491_v50 = vadd.f32 %v2486_v55, %v2471_v18 }
0x227c   :  { %8597 = vtanh.f32 %v2491_v50 }
0x227d   :  { %v2488_v17 = vpop.permute.xlu0 %2487 }
0x227e   :  { %v2492_v58 = vadd.f32 %v2488_v17, %v2472_v46 }
0x2280   :  { %8599 = vtanh.f32 %v2492_v58 }
0x2281   :  { %v6084_v63 = vpop.f32.mrf.mxu0 }
0x2282   :  { %v6095_v54 = vrot.slane %v6084_v63, %v9242_v39 }
0x2283   :  { %v8150_v33 = vpop.f32.mrf.mxu0 }
0x2284   :  { %v6096_v0 = vrot.slane %v6095_v54, 1  ;;  %v6099_v19 = vadd.f32 %v6095_v54, %v9427_v60 }
0x2286   :  { %v6100_v21 = vadd.f32 %v6096_v0, %v9779_v48 }
0x2288   :  { %8601 = vtanh.f32 %v6100_v21 }
0x2289   :  { %v8598_v35 = vpop.eup %8597  ;;  %8603 = vtanh.f32 %v6099_v19 }
0x228a   :  { %2497 = vrot.lane.b32.xlu0 %v8598_v35, %s8821_s16 }
0x228d   :  { %v8600_v43 = vpop.eup %8599 }
0x228e   :  { %2499 = vrot.lane.b32.xlu0 %v8600_v43, %s8821_s16 }
0x2292   :  { %480 = vrot.lane.b32.xlu0 %v9166_v49, %s8822_s17 }
0x2295   :  { %v8602_v5 = vpop.eup %8601 }
0x2296   :  { %777 = vrot.lane.b32.xlu0 %v9230_v16, %s8822_s17  ;;  %6127 = vrot.lane.b32.xlu1 %v8602_v5, %s8821_s16 }
0x229a   :  { %1074 = vrot.lane.b32.xlu0 %v9340_v12, %s8822_s17  ;;  %1385 = vrot.lane.b32.xlu1 %v9063_v42, %s8821_s16  ;;  %v8604_v42 = vpop.eup %8603 }
0x229e   :  { %1372 = vrot.lane.b32.xlu0 %v9447_v1, %s8822_s17  ;;  %1681 = vrot.lane.b32.xlu1 %v9094_v44, %s8821_s16 }
0x22a2   :  { %482 = vrot.lane.b32.xlu0 %v9162_v40, %s8822_s17  ;;  %1979 = vrot.lane.b32.xlu1 %v9156_v27, %s8821_s16 }
0x22a6   :  { %779 = vrot.lane.b32.xlu0 %v9235_v30, %s8822_s17  ;;  %2276 = vrot.lane.b32.xlu1 %v9225_v8, %s8821_s16 }
0x22aa   :  { %1076 = vrot.lane.b32.xlu0 %v9342_v26, %s8822_s17  ;;  %v7577_v26 = vmul.f32 -1.442695, %v6100_v21 }
0x22ac   :  { %8605 = vpow2.f32 %v7577_v26 }
0x22ae   :  { %6125 = vrot.lane.b32.xlu0 %v8604_v42, %s8821_s16 }
0x22b2   :  { %1374 = vrot.lane.b32.xlu0 %v9449_v7, %s8822_s17  ;;  %v85_v7 = vld [vmem:[%s11021_s6 + $0xa0] sm:$0xff] }
0x22b6   :  { %1670 = vrot.lane.b32.xlu0 %v9522_v14, %s8822_s17  ;;  %v84_v14 = vld [vmem:[%s11021_s6 + $0x88] sm:$0xff] }
0x22b9   :  { %v8606_v20 = vpop.eup %8605 }
0x22ba   :  { %1968 = vrot.lane.b32.xlu0 %v9610_v13, %s8822_s17  ;;  %v7576_v13 = vmul.f32 -1.442695, %v6099_v19  ;;  %v6108_v32 = vadd.f32 1.0, %v8606_v20 }
0x22bc   :  { %v2552_v44 = vpop.permute.xlu1 %2551  ;;  %8607 = vpow2.f32 %v7576_v13 }
0x22bd   :  { %v2557_v27 = vmul.f32 %v9734_v25, %v2552_v44  ;;  %8609 = vrcp.f32 %v6108_v32 }
0x22be   :  { %2265 = vrot.lane.b32.xlu0 %v9682_v9, %s8822_s17 }
0x22bf   :  { %2572 = vrot.lane.b32.xlu1 %v2557_v27, %s8821_s16 }
0x22c0   :  { %v2554_v40 = vpop.permute.xlu1 %2553 }
0x22c1   :  { %v2558_v30 = vmul.f32 %v9740_v34, %v2554_v40  ;;  %v83_v34 = vld [vmem:[%s11021_s6 + $0x70] sm:$0xff] }
0x22c3   :  { %1683 = vrot.lane.b32.xlu1 %v9096_v45, %s8821_s16 }
0x22c4   :  { %v492_v49 = vpop.permute.xlu1 %491 }
0x22c5   :  { %498 = vst.msk [vmem:[#allocation2] sm:$0x80] %vm497_vm7, %v492_v49 }
0x22c7   :  { %1981 = vrot.lane.b32.xlu1 %v9158_v29, %s8821_s16 }
0x22c8   :  { %v789_v8 = vpop.permute.xlu1 %788 }
0x22c9   :  { %795 = vst.msk [vmem:[#allocation2] sm:$0x40] %vm794_vm8, %v789_v8 }
0x22cb   :  { %2278 = vrot.lane.b32.xlu1 %v9227_v36, %s8821_s16  ;;  %v86_v36 = vld [vmem:[%s11021_s6 + $0xb8] sm:$0xff] }
0x22cc   :  { %v1086_v16 = vpop.permute.xlu1 %1085  ;;  %7977 = vmatprep.subr.mxu1 %v86_v36 }
0x22cd   :  { %1092 = vst.msk [vmem:[#allocation2] sm:$0x20] %vm1091_vm9, %v1086_v16  ;;  %7978 = vmatpush3.msra.mxu1 %v86_v36  ;;  %v7579_v36 = vrot.slane %v9695_v57, 9  ;;  %v7578_v57 = vrot.slane %v9698_v41, 9 }
0x22ce   :  { %7979 = vmatprep.subr.mxu1 %v85_v7 }
0x22cf   :  { %2574 = vrot.lane.b32.xlu1 %v2558_v30, %s8821_s16  ;;  %7980 = vmatpush3.msra.mxu1 %v85_v7 }
0x22d0   :  { %v1384_v45 = vpop.permute.xlu1 %1383  ;;  %7981 = vmatprep.subr.mxu1 %v84_v14 }
0x22d1   :  { %1390 = vst.msk [vmem:[#allocation2] sm:$0x10] %vm1389_vm10, %v1384_v45  ;;  %7982 = vmatpush3.msra.mxu1 %v84_v14 }
0x22d2   :  { %7983 = vmatprep.subr.mxu1 %v83_v34 }
0x22d3   :  { %7984 = vmatpush3.msra.mxu1 %v83_v34 }
0x22d4   :  { %v494_v1 = vpop.permute.xlu1 %493  ;;  %7985 = vmatprep.subr.mxu1 %v82_v28 }
0x22d5   :  { %499 = vst.msk [vmem:[#allocation2 + $0x8] sm:$0x80] %vm497_vm7, %v494_v1  ;;  %7986 = vmatpush3.msra.mxu1 %v82_v28  ;;  %vm1985_vm7 = vcmask 518402  }
0x22d8   :  { %v791_v29 = vpop.permute.xlu1 %790 }
0x22d9   :  { %796 = vst.msk [vmem:[#allocation2 + $0x8] sm:$0x40] %vm794_vm8, %v791_v29  ;;  %vm2282_vm8 = vcmask 517377  }
0x22dc   :  { %v1088_v12 = vpop.permute.xlu1 %1087 }
0x22dd   :  { %1093 = vst.msk [vmem:[#allocation2 + $0x8] sm:$0x20] %vm1091_vm9, %v1088_v12  ;;  %vm1676_vm9 = vcmask 258052  }
0x22fc   :  { %v2498_v9 = vpop.permute.xlu0 %2497 }
0x22fd   :  { %v2503_v25 = vmul.f32 %v9744_v51, %v2498_v9  ;;  %v81_v51 = vld [vmem:[%s11021_s6 + $0x40] sm:$0xff] }
0x22fe   :  { %7987 = vmatprep.subr.mxu1 %v81_v51 }
0x22ff   :  { %2561 = vrot.lane.b32.xlu0 %v2503_v25, %s8822_s17  ;;  %7988 = vmatpush3.msra.mxu1 %v81_v51 }
0x2300   :  { %v2500_v15 = vpop.permute.xlu0 %2499  ;;  %7989 = vmatprep.subr.mxu1 %v80_v3 }
0x2301   :  { %7990 = vmatpush3.msra.mxu1 %v80_v3  ;;  %v2504_v18 = vmul.f32 %v9748_v31, %v2500_v15 }
0x2302   :  { %7991 = vmatprep.subr.mxu1 %v79_v4 }
0x2303   :  { %1672 = vrot.lane.b32.xlu0 %v9524_v23, %s8822_s17  ;;  %7992 = vmatpush3.msra.mxu1 %v79_v4  ;;  %v8608_v23 = vpop.eup %8607 }
0x2304   :  { %v481_v6 = vpop.permute.xlu0 %480  ;;  %8012 = vmatprep.subr.mxu1 %v11045_v38  ;;  %v9874_v50 = vpop.eup %8609 }
0x2305   :  { %487 = vst.msk [vmem:[#allocation2] sm:$0x1] %vm486_vm11, %v481_v6  ;;  %v6122_v7 = vmul.f32 %v9874_v50, %v7579_v36  ;;  %v9961_v36 = vld [vmem:[#allocation4 + $0x110] sm:$0xff] }
0x2307   :  { %1970 = vrot.lane.b32.xlu0 %v9612_v10, %s8822_s17  ;;  %v6107_v10 = vadd.f32 1.0, %v8608_v23 }
0x2308   :  { %v778_v2 = vpop.permute.xlu0 %777  ;;  %v6128_v11 = vpop.permute.xlu1 %6127 }
0x2309   :  { %784 = vst.msk [vmem:[#allocation2] sm:$0x2] %vm783_vm12, %v778_v2  ;;  %8611 = vrcp.f32 %v6107_v10  ;;  %v6132_v17 = vmul.f32 %v9874_v50, %v6128_v11 }
0x230b   :  { %2267 = vrot.lane.b32.xlu0 %v9684_v24, %s8822_s17  ;;  %v11051_v24 = vld [vmem:[#allocation8_spill] sm:$0xff] }
0x230c   :  { %v1075_v61 = vpop.permute.xlu0 %1074  ;;  %v1386_v55 = vpop.permute.xlu1 %1385 }
0x230d   :  { %1081 = vst.msk [vmem:[#allocation2] sm:$0x4] %vm1080_vm13, %v1075_v61 }
0x230e   :  { %1391 = vst.msk [vmem:[#allocation2 + $0x8] sm:$0x10] %vm1389_vm10, %v1386_v55  ;;  %vm1974_vm10 = vcmask 259077   ;;  %v11053_v55 = vld [vmem:[#allocation10_spill] sm:$0xff] }
0x230f   :  { %2563 = vrot.lane.b32.xlu0 %v2504_v18, %s8822_s17  ;;  %v11052_v18 = vld [vmem:[#allocation11_spill] sm:$0xff] }
0x2310   :  { %v1373_v56 = vpop.permute.xlu0 %1372  ;;  %v1682_v31 = vpop.permute.xlu1 %1681  ;;  %v3041_v10 = vcombine.high %v11052_v18, %v11052_v18 }
0x2311   :  { %1379 = vst.msk [vmem:[#allocation2] sm:$0x8] %vm1378_vm14, %v1373_v56 }
0x2312   :  { %1688 = vst.msk [vmem:[#allocation2] sm:$0x8] %vm1687_vm15, %v1682_v31  ;;  %v3055_v56 = vrot.slane %v3041_v10, %v11053_v55 }
0x2313   :  { %2953 = vrot.lane.b32.xlu0 %v11051_v24, %s8824_s23 }
0x2314   :  { %v483_v46 = vpop.permute.xlu0 %482  ;;  %v1980_v58 = vpop.permute.xlu1 %1979  ;;  %v3059_v31 = vmul.f32 -1e+09, %v3055_v56 }
0x2315   :  { %488 = vst.msk [vmem:[#allocation2 + $0x8] sm:$0x1] %vm486_vm11, %v483_v46  ;;  %vm2271_vm11 = vcmask 260102  }
0x2316   :  { %1986 = vst.msk [vmem:[#allocation2] sm:$0x4] %vm1985_vm7, %v1980_v58  ;;  %v9884_v0 = vpop.eup %8611 }
0x2317   :  { %6137 = vrot.lane.b32.xlu0 %v6132_v17, %s8822_s17  ;;  %v6121_v25 = vmul.f32 %v9884_v0, %v7578_v57  ;;  %v11054_v57 = vld [vmem:[#allocation12_spill] sm:$0xff] }
0x2318   :  { %v780_v63 = vpop.permute.xlu0 %779  ;;  %v2277_v54 = vpop.permute.xlu1 %2276 }
0x2319   :  { %785 = vst.msk [vmem:[#allocation2 + $0x8] sm:$0x2] %vm783_vm12, %v780_v63  ;;  %vm2578_vm12 = vcmask 516352  }
0x231a   :  { %2283 = vst.msk [vmem:[#allocation2] sm:$0x2] %vm2282_vm8, %v2277_v54 }
0x231c   :  { %v1077_v33 = vpop.permute.xlu0 %1076 }
0x231d   :  { %1082 = vst.msk [vmem:[#allocation2 + $0x8] sm:$0x4] %vm1080_vm13, %v1077_v33  ;;  %vm2567_vm13 = vcmask 261127  }
0x2320   :  { %v6126_v35 = vpop.permute.xlu0 %6125 }
0x2321   :  { %v6131_v21 = vmul.f32 %v9884_v0, %v6126_v35 }
0x2323   :  { %6135 = vrot.lane.b32.xlu1 %v6131_v21, %s8822_s17 }
0x2324   :  { %v1375_v43 = vpop.permute.xlu0 %1374 }
0x2325   :  { %1380 = vst.msk [vmem:[#allocation2 + $0x8] sm:$0x8] %vm1378_vm14, %v1375_v43  ;;  %vm2589_vm14 = vcmask 523264  }
0x2328   :  { %v1671_v5 = vpop.permute.xlu0 %1670 }
0x2329   :  { %1677 = vst.msk [vmem:[#allocation2] sm:$0x10] %vm1676_vm9, %v1671_v5 }
0x232c   :  { %v1969_v19 = vpop.permute.xlu0 %1968 }
0x232d   :  { %1975 = vst.msk [vmem:[#allocation2] sm:$0x20] %vm1974_vm10, %v1969_v19 }
0x2330   :  { %v2266_v42 = vpop.permute.xlu0 %2265 }
0x2331   :  { %2272 = vst.msk [vmem:[#allocation2] sm:$0x40] %vm2271_vm11, %v2266_v42  ;;  %v2573_v44 = vpop.permute.xlu1 %2572 }
0x2332   :  { %2579 = vst.msk [vmem:[#allocation2] sm:$0x1] %vm2578_vm12, %v2573_v44 }
0x2335   :  { %v1684_v27 = vpop.permute.xlu1 %1683 }
0x2336   :  { %1689 = vst.msk [vmem:[#allocation2 + $0x8] sm:$0x8] %vm1687_vm15, %v1684_v27  ;;  %v78_v27 = vld [vmem:[#allocation4 + $0x118] sm:$0xff]  ;;  %vm4249_vm15 = vcmask 785408  }
0x2339   :  { %v1982_v40 = vpop.permute.xlu1 %1981 }
0x233a   :  { %1987 = vst.msk [vmem:[#allocation2 + $0x8] sm:$0x4] %vm1985_vm7, %v1982_v40  ;;  %vm4253_vm7 = vcmask 113664  }
0x233d   :  { %v2279_v49 = vpop.permute.xlu1 %2278 }
0x233e   :  { %2284 = vst.msk [vmem:[#allocation2 + $0x8] sm:$0x2] %vm2282_vm8, %v2279_v49 }
0x2341   :  { %v2575_v8 = vpop.permute.xlu1 %2574 }
0x2342   :  { %2580 = vst.msk [vmem:[#allocation2 + $0x8] sm:$0x1] %vm2578_vm12, %v2575_v8 }
0x2371   :  { %v2562_v16 = vpop.permute.xlu0 %2561 }
0x2372   :  { %2568 = vst.msk [vmem:[#allocation2] sm:$0x80] %vm2567_vm13, %v2562_v16  ;;  %v7533_v16 = vld [vmem:[%s11022_s7 + $0x3] ss:$0 sm:$0xff] }
0x2375   :  { %v1673_v30 = vpop.permute.xlu0 %1672 }
0x2376   :  { %1678 = vst.msk [vmem:[#allocation2 + $0x8] sm:$0x10] %vm1676_vm9, %v1673_v30 }
0x2379   :  { %v1971_v45 = vpop.permute.xlu0 %1970  ;;  %v2581_v1 = vld [vmem:[#allocation2] sm:$0xff] }
0x237a   :  { %1976 = vst.msk [vmem:[#allocation2 + $0x8] sm:$0x20] %vm1974_vm10, %v1971_v45  ;;  %7993 = vmatprep.mubr.msk.f32.mxu1 %vm2589_vm14, %v2581_v1  ;;  %v77_v1 = vld [vmem:[#allocation4 + $0xd0] sm:$0xff] }
0x237d   :  { %v2268_v29 = vpop.permute.xlu0 %2267 }
0x237e   :  { %2273 = vst.msk [vmem:[#allocation2 + $0x8] sm:$0x40] %vm2271_vm11, %v2268_v29  ;;  %v76_v29 = vld [vmem:[#allocation4 + $0x88] sm:$0xff] }
0x2381   :  { %v2564_v12 = vpop.permute.xlu0 %2563 }
0x2382   :  { %2569 = vst.msk [vmem:[#allocation2 + $0x8] sm:$0x80] %vm2567_vm13, %v2564_v12  ;;  %v75_v12 = vld [vmem:[#allocation4 + $0x40] sm:$0xff] }
0x2385   :  { %v2954_v26 = vpop.permute.xlu0 %2953 }
0x2389   :  { %v6138_v14 = vpop.permute.xlu0 %6137  ;;  %v2582_v13 = vld [vmem:[#allocation2 + $0x8] sm:$0xff] }
0x238a   :  { %v9901_v9 = vadd.f32 %v6138_v14, %v6122_v7  ;;  %7994 = vmatmul.mubr.msk.f32.vlgmr.msra.gmra.mxu1 %vm2589_vm14, %v2582_v13  ;;  %v9965_v7 = vld [vmem:[#allocation4 + $0xc8] sm:$0xff]  ;;  %v9969_v14 = vld [vmem:[#allocation4 + $0x80] sm:$0xff]  ;;  %v9972_v13 = vld [vmem:[#allocation4 + $0x38] sm:$0xff] }
0x238b   :  { %8013 = vmatpush3.xpose.msk.msra.mxu1 %vm142_vm1, %v2954_v26  ;;  %8014 = vmatprep.mubr.msk.f32.mxu1 %vm8820_vm0, %v11045_v38 }
0x238c   :  { %8613 = vtanh.f32 %v9901_v9  ;;  %8022 = vmatprep.subr.mxu1 %v11045_v38  ;;  %v6519_v20 = vrot.slane %v9901_v9, %v9114_v52 }
0x238e   :  { %8015 = vmatmul.mubr.msk.f32.vlgmr.msra.gmra.mxu1 %vm142_vm1, %v11051_v24 }
0x238f   :  { %8024 = vmatprep.mubr.msk.f32.mxu1 %vm8820_vm0, %v11045_v38 }
0x2395   :  { %v6136_v34 = vpop.permute.xlu1 %6135 }
0x2396   :  { %v9915_v28 = vadd.f32 %v6136_v34, %v6121_v25  ;;  %v3445_v25 = vrot.slane %v11054_v57, %v9242_v39  ;;  %v3438_v34 = vcombine.high %v11054_v57, %v11054_v57 }
0x2398   :  { %8615 = vtanh.f32 %v9915_v28  ;;  %v6515_v15 = vrot.slane %v9915_v28, %v9114_v52 }
0x2399   :  { %v8614_v51 = vpop.eup %8613 }
0x239a   :  { %6149 = vrot.lane.b32.xlu0 %v8614_v51, %s8821_s16  ;;  %v9924_v3 = vsel %vm501_vm2, %v6519_v20, %v6515_v15  ;;  %v3453_v20 = vcombine.high %v3445_v25, %v3445_v25  ;;  %v3452_v51 = vrot.slane %v3438_v34, %v9242_v39 }
0x23a5   :  { %v8616_v41 = vpop.eup %8615 }
0x23a6   :  { %6147 = vrot.lane.b32.xlu1 %v8616_v41, %s8821_s16 }
0x240c   :  { %v6150_v32 = vpop.permute.xlu0 %6149 }
0x240d   :  { %v6154_v6 = vmul.f32 %v9874_v50, %v6150_v32  ;;  %v3069_v50 = vrot.slane %v3059_v31, %v9114_v52  ;;  %v3470_v32 = vcombine.low %v3445_v25, %v3453_v20 }
0x240f   :  { %v6164_v23 = vrot.slane %v6154_v6, %v9114_v52 }
0x2418   :  { %v6148_v4 = vpop.permute.xlu1 %6147 }
0x2419   :  { %v6153_v2 = vmul.f32 %v9884_v0, %v6148_v4 }
0x241b   :  { %v6160_v11 = vrot.slane %v6153_v2, %v9114_v52 }
0x241d   :  { %v6165_v61 = vsel %vm501_vm2, %v6164_v23, %v6160_v11 }
0x241e   :  { %6166 = vrot.lane.b32.xlu1 %v6165_v61, %s8822_s17  ;;  %v3478_v61 = vrot.slane %v3470_v32, %v9242_v39 }
0x244a   :  { %v7995_v46 = vpop.f32.mrf.mxu1 }
0x244b   :  { %v9956_v26 = vadd.f32 %v7995_v46, %v7533_v16  ;;  %v11055_v46 = vld [vmem:[#allocation14_spill] sm:$0xff] }
0x244c   :  { %v2662_v17 = vpop.f32.mrf.mxu1 }
0x244d   :  { %v9951_v45 = vadd.f32 %v7533_v16, %v2662_v17 }
0x244e   :  { %v3025_v58 = vpop.f32.mrf.mxu1 }
0x244f   :  { %v3031_v63 = vmul.f32 0.17677669, %v3025_v58 }
0x2450   :  { %v8016_v54 = vpop.f32.mrf.mxu1 }
0x2451   :  { %v3073_v33 = vadd.f32 %v3069_v50, %v3031_v63  ;;  %v7550_v54 = vld [vmem:[%s11022_s7 + $0x6] ss:$0 sm:$0xff] }
0x2453   :  { %v3078_v0 = vsel %vm3074_vm3, %v3073_v33, -inf }
0x2454   :  { %3079 = vmax.xlane.f32.xlu0 %v3078_v0 }
0x246a   :  { %3176 = vrot.lane.b32.xlu0 %v11051_v24, %s8821_s16 }
0x2490   :  { %v9940_v35 = vpop.permute.xlu1 %6166 }
0x2491   :  { %8171 = vmatmul.mubr.msk.f32.vlgmr.msra.gmra.mxu0 %vm142_vm1, %v9940_v35 }
0x24dd   :  { %v3080_v21 = vpop.xlane.xlu0 %3079 }
0x24de   :  { %v3082_v43 = vsub.f32 %v3073_v33, %v3080_v21  ;;  %v10065_v21 = vld [vmem:[%s11022_s7 + $0x5] ss:$0 sm:$0xff] }
0x24e0   :  { %v3085_v5 = vmul.f32 1.442695, %v3082_v43 }
0x24e1   :  { %v3177_v19 = vpop.permute.xlu0 %3176 }
0x24e2   :  { %8617 = vpow2.f32 %v3085_v5  ;;  %8023 = vmatpush3.msk.msra.mxu1 %vm3103_vm4, %v3177_v19  ;;  %vm4118_vm4 = vcmask 41984  }
0x24e3   :  { %8038 = vmatprep.subr.mxu1 %v78_v27 }
0x24ef   :  { %v8618_v42 = vpop.eup %8617 }
0x24f0   :  { %v3090_v44 = vsel %vm3074_vm3, %v8618_v42, 0.0  ;;  %vm4074_vm3 = vcmask 259072  }
0x24f1   :  { %3091 = vadd.xlane.f32.xlu1 %v3090_v44 }
0x2551   :  { %v9946_v40 = vpop.f32.mrf.mxu0 }
0x2553   :  { %v8172_v24 = vpop.f32.mrf.mxu0 }
0x257a   :  { %v3092_v49 = vpop.xlane.xlu1 %3091 }
0x257b   :  { %8619 = vrcp.f32 %v3092_v49 }
0x2588   :  { %v8620_v8 = vpop.eup %8619 }
0x2589   :  { %v3096_v30 = vmul.f32 %v8620_v8, %v8618_v42 }
0x258b   :  { %8025 = vmatmul.mubr.msk.f32.vlgmr.msra.gmra.mxu1 %vm3099_vm5, %v3096_v30  ;;  %vm4251_vm5 = vcmask 64512  }
0x258c   :  { %8039 = vmatpush3.msra.mxu1 %v78_v27  ;;  %8046 = vmatprep.mubr.msk.f32.mxu1 %vm142_vm1, %v9951_v45 }
0x258d   :  { %8040 = vmatprep.subr.mxu1 %v77_v1 }
0x258e   :  { %8041 = vmatpush3.msra.mxu1 %v77_v1 }
0x258f   :  { %8042 = vmatprep.subr.mxu1 %v76_v29 }
0x2590   :  { %8043 = vmatpush3.msra.mxu1 %v76_v29 }
0x2591   :  { %8044 = vmatprep.subr.mxu1 %v75_v12 }
0x2592   :  { %8045 = vmatpush3.msra.mxu1 %v75_v12 }
0x2593   :  { %8047 = vmatmul.mubr.msk.f32.vlgmr.msra.gmra.mxu1 %vm142_vm1, %v9956_v26  ;;  %8063 = vmatprep.subr.mxu1 %v11045_v38 }
0x2594   :  { %8064 = vmatpush3.msra.mxu1 %v9961_v36 }
0x2595   :  { %8065 = vmatprep.subr.mxu1 %v11045_v38 }
0x2596   :  { %8066 = vmatpush3.msra.mxu1 %v9965_v7 }
0x2597   :  { %8067 = vmatprep.subr.mxu1 %v11045_v38 }
0x2598   :  { %8068 = vmatpush3.msra.mxu1 %v9969_v14 }
0x2599   :  { %8069 = vmatprep.subr.mxu1 %v11045_v38 }
0x259a   :  { %8070 = vmatpush3.msra.mxu1 %v9972_v13 }
0x259b   :  { %8085 = vmatprep.subr.mxu1 %v11045_v38 }
0x264b   :  { %v9981_v15 = vpop.f32.mrf.mxu1 }
0x264c   :  { %v3461_v41 = vrot.slane %v9981_v15, %v9242_v39  ;;  %v3454_v6 = vcombine.high %v9981_v15, %v9981_v15 }
0x264d   :  { %v8026_v4 = vpop.f32.mrf.mxu1 }
0x264e   :  { %v3471_v2 = vcombine.low %v3452_v51, %v3461_v41  ;;  %v3468_v23 = vrot.slane %v3454_v6, %v9242_v39  ;;  %v3469_v11 = vcombine.high %v3461_v41, %v3461_v41 }
0x2650   :  { %v3485_v18 = vrot.slane %v3471_v2, %v9242_v39  ;;  %v3487_v10 = vcombine.low %v3469_v11, %v3468_v23  ;;  %v10100_v23 = vld [vmem:[%s11022_s7 + $0x7] ss:$0 sm:$0xff] }
0x2652   :  { %v3486_v56 = vcombine.low %v3478_v61, %v3485_v18  ;;  %v3494_v31 = vrot.slane %v3487_v10, %v9242_v39 }
0x2653   :  { %v8048_v58 = vpop.f32.mrf.mxu1 }
0x2654   :  { %8049 = vmatprep.mubr.msk.f32.mxu1 %vm142_vm1, %v3486_v56 }
0x2655   :  { %8050 = vmatmul.mubr.msk.f32.gmra.mxu1 %vm142_vm1, %v3494_v31  ;;  %v3577_v63 = vpop.f32.mrf.mxu1 }
0x2656   :  { %8071 = vmatprep.mubr.msk.f32.mxu1 %vm8820_vm0, %v11045_v38 }
0x2659   :  { %8072 = vmatmul.mubr.msk.f32.vlgmr.msra.gmra.mxu1 %vm142_vm1, %v11055_v46 }
0x265a   :  { %8086 = vmatpush3.msra.mxu1 %v9961_v36  ;;  %8093 = vmatprep.mubr.msk.f32.mxu1 %vm8820_vm0, %v11045_v38 }
0x265b   :  { %8087 = vmatprep.subr.mxu1 %v11045_v38 }
0x265c   :  { %8088 = vmatpush3.msra.mxu1 %v9965_v7 }
0x265d   :  { %8089 = vmatprep.subr.mxu1 %v11045_v38 }
0x265e   :  { %8090 = vmatpush3.msra.mxu1 %v9969_v14 }
0x265f   :  { %8091 = vmatprep.subr.mxu1 %v11045_v38 }
0x2660   :  { %8092 = vmatpush3.msra.mxu1 %v9972_v13 }
0x2661   :  { %8094 = vmatmul.mubr.msk.f32.vlgmr.msra.gmra.mxu1 %vm142_vm1, %v9571_v53  ;;  %8107 = vmatprep.subr.mxu1 %v11045_v38  ;;  %v3253_v53 = vld [vmem:[%s11017_s2] sm:$0x3] }
0x2662   :  { %8108 = vmatpush3.msra.mxu1 %v9961_v36  ;;  %8115 = vmatprep.mubr.msk.f32.mxu1 %vm8820_vm0, %v11045_v38 }
0x2663   :  { %8109 = vmatprep.subr.mxu1 %v11045_v38 }
0x2664   :  { %8110 = vmatpush3.msra.mxu1 %v9965_v7 }
0x2665   :  { %8111 = vmatprep.subr.mxu1 %v11045_v38 }
0x2666   :  { %8112 = vmatpush3.msra.mxu1 %v9969_v14 }
0x2667   :  { %8113 = vmatprep.subr.mxu1 %v11045_v38 }
0x2668   :  { %8114 = vmatpush3.msra.mxu1 %v9972_v13 }
0x2669   :  { %8116 = vmatmul.mubr.msk.f32.vlgmr.msra.gmra.mxu1 %vm142_vm1, %v9651_v47  ;;  %8129 = vmatprep.subr.mxu1 %v11045_v38 }
0x266a   :  { %8130 = vmatpush3.msra.mxu1 %v9961_v36  ;;  %8137 = vmatprep.mubr.msk.f32.mxu1 %vm8820_vm0, %v11045_v38 }
0x266b   :  { %8131 = vmatprep.subr.mxu1 %v11045_v38 }
0x266c   :  { %8132 = vmatpush3.msra.mxu1 %v9965_v7 }
0x266d   :  { %8133 = vmatprep.subr.mxu1 %v11045_v38 }
0x266e   :  { %8134 = vmatpush3.msra.mxu1 %v9969_v14 }
0x266f   :  { %8135 = vmatprep.subr.mxu1 %v11045_v38 }
0x2670   :  { %8136 = vmatpush3.msra.mxu1 %v9972_v13 }
0x2671   :  { %8138 = vmatmul.mubr.msk.f32.vlgmr.msra.gmra.mxu1 %vm142_vm1, %v9727_v62  ;;  %8151 = vmatprep.subr.mxu1 %v11045_v38  ;;  %v3254_v62 = vsub.f32 1.0, %v3253_v53 }
0x2672   :  { %8152 = vmatpush3.msra.mxu1 %v9961_v36  ;;  %8159 = vmatprep.mubr.msk.f32.mxu1 %vm8820_vm0, %v11045_v38 }
0x2673   :  { %8153 = vmatprep.subr.mxu1 %v11045_v38  ;;  %v3255_v17 = vmul.f32 -1e+09, %v3254_v62 }
0x2674   :  { %8154 = vmatpush3.msra.mxu1 %v9965_v7 }
0x2675   :  { %8155 = vmatprep.subr.mxu1 %v11045_v38  ;;  %v3907_v50 = vrot.slane %v3255_v17, %v8951_v22 }
0x2676   :  { %8156 = vmatpush3.msra.mxu1 %v9969_v14 }
0x2677   :  { %8157 = vmatprep.subr.mxu1 %v11045_v38  ;;  %3909 = vbcast.lane.b32.xlu0 %v3907_v50, 256 }
0x2678   :  { %8158 = vmatpush3.msra.mxu1 %v9972_v13 }
0x2679   :  { %8160 = vmatmul.mubr.msk.f32.vlgmr.msra.gmra.mxu1 %vm142_vm1, %v9940_v35  ;;  %8173 = vmatprep.subr.mxu1 %v11045_v38 }
0x267a   :  { %8174 = vmatpush3.msra.mxu1 %v9961_v36  ;;  %8181 = vmatprep.mubr.msk.f32.mxu1 %vm8820_vm0, %v11045_v38  ;;  %v10081_v36 = vadd.f32 %v7550_v54, %v3577_v63  ;;  %v8826_v63 = vmov 0   ;;  %vm3935_vm0 = vcmask 58368  }
0x267b   :  { %8175 = vmatprep.subr.mxu1 %v11045_v38  ;;  %8266 = vset.pattern.permute.xlu1 %v8826_v63 }
0x267c   :  { %8176 = vmatpush3.msra.mxu1 %v9965_v7  ;;  %8265 = vset.pattern.permute.xlu0 %v8826_v63 }
0x267d   :  { %8177 = vmatprep.subr.mxu1 %v11045_v38 }
0x267e   :  { %8178 = vmatpush3.msra.mxu1 %v9969_v14 }
0x267f   :  { %8179 = vmatprep.subr.mxu1 %v11045_v38 }
0x2680   :  { %8180 = vmatpush3.msra.mxu1 %v9972_v13  ;;  %v10086_v13 = vadd.f32 %v8048_v58, %v7550_v54 }
0x2715   :  { %v8051_v33 = vpop.f32.mrf.mxu1 }
0x2716   :  { %v3593_v0 = vadd.f32 %v8051_v33, %v7550_v54 }
0x2717   :  { %v3587_v38 = vpop.f32.mrf.mxu1 }
0x2718   :  { %v10067_v43 = vadd.f32 %v7550_v54, %v3587_v38  ;;  %v3621_v19 = vrot.slane %v3593_v0, %v9242_v39  ;;  %v3900_v54 = vrot.slane %v3255_v17, %v9114_v52  ;;  %v10111_v0 = vpop.permute.xlu0 %3909 }
0x2719   :  { %v3841_v5 = vpop.f32.mrf.mxu1 }
0x271a   :  { %v3598_v42 = vcombine.high %v10067_v43, %v10067_v43  ;;  %v3842_v44 = vadd.f32 %v10065_v21, %v3841_v5  ;;  %v3622_v8 = vcombine.high %v3621_v19, %v3621_v19 }
0x271b   :  { %v8073_v27 = vpop.f32.mrf.mxu1 }
0x271c   :  { %v10074_v24 = vrot.slane %v3598_v42, %v9242_v39  ;;  %v3852_v49 = vrot.slane %v3842_v44, %v11053_v55  ;;  %v4048_v25 = vrot.slane %v3622_v8, %v9242_v39  ;;  %v11056_v44 = vlaneseq }
0x271e   :  { %v3614_v16 = vcombine.high %v10074_v24, %v10074_v24  ;;  %v3853_v30 = vcombine.high %v3852_v49, %v3852_v49  ;;  %v3860_v1 = vrot.slane %v3852_v49, %v11053_v55  ;;  %v10118_v27 = vand.u32 127, %v11056_v44  ;;  %v11057_v49 = vld [vmem:[#allocation7_spill] sm:$0xff] }
0x271f   :  { %vm10270_vm8 = vcmp.lt.s32.totalorder %v11056_v44, 256 }
0x2720   :  { %v4034_v29 = vcombine.low %v3614_v16, %v3621_v19  ;;  %v3867_v12 = vrot.slane %v3853_v30, %v11053_v55  ;;  %v3871_v7 = vrot.slane %v3860_v1, %v9114_v52  ;;  %v10122_v8 = vsub.s32 %v10118_v27, %v11057_v49 }
0x2721   :  { %v10084_v14 = vpop.f32.mrf.mxu1 }
0x2722   :  { %v4041_v34 = vrot.slane %v4034_v29, %v9242_v39  ;;  %v3875_v20 = vrot.slane %v3867_v12, %v9114_v52  ;;  %v3878_v51 = vadd.f32 %v3871_v7, %v10081_v36 }
0x2723   :  { %v8095_v41 = vpop.f32.mrf.mxu1 }
0x2724   :  { %v10092_v32 = vcombine.low %v4041_v34, %v4048_v25  ;;  %v3879_v6 = vadd.f32 %v3875_v20, %v10086_v13  ;;  %8621 = vtanh.f32 %v3878_v51  ;;  %v7560_v25 = vld [vmem:[%s11022_s7 + $0x8] ss:$0 sm:$0xff]  ;;  %v3605_v34 = vrot.slane %v10067_v43, %v9242_v39 }
0x2726   :  { %8623 = vtanh.f32 %v3879_v6  ;;  %v3613_v51 = vcombine.high %v3605_v34, %v3605_v34 }
0x2728   :  { %v4018_v41 = vcombine.low %v3605_v34, %v3613_v51 }
0x2729   :  { %v10095_v4 = vpop.f32.mrf.mxu1 }
0x272a   :  { %v4025_v6 = vrot.slane %v4018_v41, %v9242_v39 }
0x272b   :  { %v8117_v2 = vpop.f32.mrf.mxu1 }
0x272c   :  { %v4032_v2 = vrot.slane %v10074_v24, %v9242_v39 }
0x2731   :  { %v10102_v11 = vpop.f32.mrf.mxu1  ;;  %v8622_v61 = vpop.eup %8621 }
0x2732   :  { %v3888_v56 = vmul.f32 %v8622_v61, %v10100_v23  ;;  %v10137_v61 = vcombine.low %v4025_v6, %v4032_v2 }
0x2733   :  { %v8624_v18 = vpop.eup %8623  ;;  %v8139_v10 = vpop.f32.mrf.mxu1 }
0x2734   :  { %v3890_v31 = vsel %vm142_vm1, %v3888_v56, 0.0  ;;  %v3889_v53 = vmul.f32 %v8624_v18, %v10100_v23  ;;  %v4052_v18 = vadd.f32 %v10137_v61, %v3871_v7  ;;  %v4053_v10 = vadd.f32 %v10092_v32, %v3875_v20 }
0x2735   :  { %3891 = vadd.xlane.f32.xlu1 %v3890_v31 }
0x2736   :  { %v3893_v50 = vsel %vm142_vm1, %v3889_v53, 0.0  ;;  %8625 = vtanh.f32 %v4052_v18  ;;  %v6669_v53 = vrot.slane %v9946_v40, %v9242_v39 }
0x2737   :  { %8627 = vtanh.f32 %v4053_v10 }
0x2738   :  { %v6674_v40 = vadd.f32 %v6669_v53, %v9779_v48 }
0x2739   :  { %v10107_v62 = vpop.f32.mrf.mxu1  ;;  %3894 = vadd.xlane.f32.xlu1 %v3893_v50 }
0x273a   :  { %v7583_v48 = vmul.f32 -1.442695, %v6674_v40 }
0x273b   :  { %v8161_v58 = vpop.f32.mrf.mxu1 }
0x2743   :  { %v8626_v63 = vpop.eup %8625 }
0x274a   :  { %3902 = vbcast.lane.b32.xlu1 %v3900_v54, 256 }
0x27be   :  { %v3892_v33 = vpop.xlane.xlu1 %3891 }
0x27c2   :  { %v3895_v38 = vpop.xlane.xlu1 %3894 }
0x27c3   :  { %v3914_v5 = vadd.f32 %v10111_v0, %v3895_v38  ;;  %v8628_v38 = vpop.eup %8627 }
0x27c5   :  { %3921 = vperm.xlu1 %8266, %v3914_v5  }
0x27c6   :  { %v10114_v19 = vpop.permute.xlu1 %3902 }
0x27c7   :  { %v3913_v42 = vadd.f32 %v10114_v19, %v3892_v33  ;;  %v6670_v33 = vrot.slane %v6669_v53, 7 }
0x27c9   :  { %3918 = vperm.xlu0 %8265, %v3913_v42  }
0x2840   :  { %v3922_v17 = vpop.permute.xlu1 %3921 }
0x2841   :  { %v3932_v30 = vrot.slane %v3922_v17, %v10122_v8 }
0x2844   :  { %v3919_v16 = vpop.permute.xlu0 %3918 }
0x2845   :  { %v3928_v1 = vrot.slane %v3919_v16, %v10122_v8  ;;  %v6673_v16 = vadd.f32 %v6670_v33, %v9427_v60 }
0x2847   :  { %v3933_v29 = vsel %vm501_vm2, %v3932_v30, %v3928_v1 }
0x2848   :  { %v3936_v12 = vsel %vm3935_vm0, %v3933_v29, -inf }
0x2849   :  { %3937 = vmax.xlane.f32.xlu0 %v3936_v12  ;;  %v7582_v12 = vmul.f32 -1.442695, %v6673_v16 }
0x285f   :  { %4061 = vrot.lane.b32.xlu0 %v7560_v25, %s8822_s17 }
0x28d2   :  { %v3938_v56 = vpop.xlane.xlu0 %3937 }
0x28d3   :  { %v3943_v31 = vrot.slane %v3938_v56, %v9114_v52  ;;  %v3947_v43 = vrot.slane %v3938_v56, %v8951_v22 }
0x28d5   :  { %v3950_v50 = vsub.f32 %v3913_v42, %v3943_v31  ;;  %v3951_v58 = vsub.f32 %v3914_v5, %v3947_v43 }
0x28d6   :  { %v10145_v24 = vpop.permute.xlu0 %4061 }
0x28d7   :  { %v3952_v54 = vmul.f32 1.442695, %v3950_v50  ;;  %v4064_v7 = vmul.f32 %v8626_v63, %v10145_v24  ;;  %v3954_v20 = vmul.f32 1.442695, %v3951_v58  ;;  %v4065_v17 = vmul.f32 %v8628_v38, %v10145_v24 }
0x28d9   :  { %8629 = vpow2.f32 %v3952_v54  ;;  %4068 = vrot.lane.b32.xlu0 %v4064_v7, %s8824_s23 }
0x28da   :  { %8631 = vpow2.f32 %v3954_v20 }
0x28db   :  { %8633 = vtanh.f32 %v6673_v16  ;;  %v6689_v16 = vrot.slane %v9915_v28, 7 }
0x28dc   :  { %8635 = vtanh.f32 %v6674_v40 }
0x28dd   :  { %4070 = vrot.lane.b32.xlu0 %v4065_v17, %s8824_s23  ;;  %8637 = vpow2.f32 %v7582_v12 }
0x28de   :  { %8639 = vpow2.f32 %v7583_v48 }
0x28e6   :  { %v8630_v5 = vpop.eup %8629 }
0x28e7   :  { %3959 = vperm.xlu1 %8266, %v8630_v5   ;;  %v8632_v42 = vpop.eup %8631 }
0x28e8   :  { %v8634_v30 = vpop.eup %8633 }
0x28e9   :  { %v8636_v1 = vpop.eup %8635 }
0x28ea   :  { %v8638_v34 = vpop.eup %8637 }
0x28eb   :  { %3962 = vperm.xlu1 %8266, %v8632_v42   ;;  %v6681_v2 = vadd.f32 1.0, %v8638_v34  ;;  %v8640_v18 = vpop.eup %8639 }
0x28ec   :  { %v6682_v31 = vadd.f32 1.0, %v8640_v18 }
0x28ed   :  { %8641 = vrcp.f32 %v6681_v2 }
0x28ee   :  { %8643 = vrcp.f32 %v6682_v31 }
0x28ef   :  { %6697 = vrot.lane.b32.xlu1 %v8634_v30, %s8821_s16 }
0x28f3   :  { %6699 = vrot.lane.b32.xlu1 %v8636_v1, %s8821_s16  ;;  %v6690_v1 = vrot.slane %v9901_v9, 7 }
0x28fa   :  { %v8642_v53 = vpop.eup %8641 }
0x28fb   :  { %v8644_v63 = vpop.eup %8643  ;;  %v6693_v30 = vmul.f32 %v8642_v53, %v6689_v16 }
0x294b   :  { %v4069_v29 = vpop.permute.xlu0 %4068 }
0x294c   :  { %v4075_v60 = vsel %vm4074_vm3, %v4069_v29, 0.0 }
0x294d   :  { %4076 = vadd.xlane.f32.xlu0 %v4075_v60  ;;  %v6694_v60 = vmul.f32 %v8644_v63, %v6690_v1 }
0x294f   :  { %v4071_v7 = vpop.permute.xlu0 %4070 }
0x2950   :  { %v4078_v33 = vsel %vm4074_vm3, %v4071_v7, 0.0 }
0x2962   :  { %v3960_v25 = vpop.permute.xlu1 %3959 }
0x2963   :  { %v3967_v41 = vrot.slane %v3960_v25, %v10122_v8 }
0x2966   :  { %v3963_v51 = vpop.permute.xlu1 %3962 }
0x2967   :  { %v3971_v6 = vrot.slane %v3963_v51, %v10122_v8 }
0x2969   :  { %v3972_v10 = vsel %vm501_vm2, %v3971_v6, %v3967_v41  ;;  %v11058_v6 = vld [vmem:[#allocation9_spill] sm:$0xff] }
0x296a   :  { %v3974_v56 = vsel %vm3935_vm0, %v3972_v10, 0.0  ;;  %v6698_v43 = vpop.permute.xlu1 %6697  ;;  %v11059_v28 = vsub.f32 1.0, %v11058_v6 }
0x296b   :  { %3975 = vadd.xlane.f32.xlu1 %v3974_v56  ;;  %v6703_v50 = vmul.f32 %v8642_v53, %v6698_v43 }
0x296c   :  { %v3256_v2 = vmul.f32 -1e+09, %v11059_v28 }
0x296e   :  { %v6700_v58 = vpop.permute.xlu1 %6699  ;;  %v4085_v56 = vrot.slane %v3256_v2, %v9114_v52  ;;  %v4092_v31 = vrot.slane %v3256_v2, %v8951_v22 }
0x296f   :  { %v6704_v54 = vmul.f32 %v8644_v63, %v6700_v58 }
0x297c   :  { %6707 = vrot.lane.b32.xlu1 %v6703_v50, %s8822_s17 }
0x2980   :  { %6709 = vrot.lane.b32.xlu1 %v6704_v54, %s8822_s17 }
0x29a4   :  { %4079 = vadd.xlane.f32.xlu1 %v4078_v33 }
0x29d6   :  { %v4077_v58 = vpop.xlane.xlu0 %4076 }
0x29f4   :  { %v3976_v20 = vpop.xlane.xlu1 %3975 }
0x29f5   :  { %v3981_v38 = vrot.slane %v3976_v20, %v9114_v52  ;;  %v3985_v17 = vrot.slane %v3976_v20, %v8951_v22 }
0x29f7   :  { %8645 = vrcp.f32 %v3981_v38 }
0x29f8   :  { %8647 = vrcp.f32 %v3985_v17  ;;  %v6708_v40 = vpop.permute.xlu1 %6707 }
0x29f9   :  { %v6713_v29 = vadd.f32 %v6708_v40, %v6693_v30 }
0x29fb   :  { %v7090_v25 = vrot.slane %v6713_v29, %v8951_v22  ;;  %8649 = vtanh.f32 %v6713_v29 }
0x29fc   :  { %v6710_v12 = vpop.permute.xlu1 %6709 }
0x29fd   :  { %v6714_v48 = vadd.f32 %v6710_v12, %v6694_v60 }
0x29ff   :  { %v7094_v34 = vrot.slane %v6714_v48, %v8951_v22  ;;  %8651 = vtanh.f32 %v6714_v48 }
0x2a01   :  { %v10170_v51 = vsel %vm4780_vm6, %v7094_v34, %v7090_v25 }
0x2a04   :  { %v8646_v41 = vpop.eup %8645 }
0x2a05   :  { %v8648_v18 = vpop.eup %8647  ;;  %v3989_v10 = vmul.f32 %v8646_v41, %v8630_v5 }
0x2a06   :  { %v3991_v9 = vmul.f32 %v8648_v18, %v8632_v42 }
0x2a07   :  { %3994 = vperm.xlu0 %8265, %v3989_v10  }
0x2a08   :  { %3999 = vperm.xlu1 %8266, %v3991_v9   ;;  %v8650_v43 = vpop.eup %8649 }
0x2a0b   :  { %4087 = vbcast.lane.b32.xlu0 %v4085_v56, 256 }
0x2a0c   :  { %4094 = vbcast.lane.b32.xlu1 %v4092_v31, 256  ;;  %v8652_v50 = vpop.eup %8651 }
0x2a10   :  { %6719 = vrot.lane.b32.xlu1 %v8650_v43, %s8821_s16 }
0x2a14   :  { %6721 = vrot.lane.b32.xlu1 %v8652_v50, %s8821_s16 }
0x2a2d   :  { %v4080_v54 = vpop.xlane.xlu1 %4079 }
0x2a82   :  { %v10178_v7 = vpop.permute.xlu0 %3994 }
0x2a83   :  { %v10180_v5 = vpop.permute.xlu1 %3999 }
0x2a86   :  { %v10182_v42 = vpop.permute.xlu0 %4087 }
0x2a87   :  { %v10184_v33 = vpop.permute.xlu1 %4094  ;;  %v4098_v20 = vadd.f32 %v10182_v42, %v4077_v58 }
0x2a88   :  { %v4099_v17 = vadd.f32 %v10184_v33, %v4080_v54 }
0x2a89   :  { %4103 = vperm.xlu0 %8265, %v4098_v20  }
0x2a8b   :  { %v6720_v38 = vpop.permute.xlu1 %6719 }
0x2a8c   :  { %v6725_v16 = vmul.f32 %v8642_v53, %v6720_v38 }
0x2a8d   :  { %4106 = vperm.xlu0 %8265, %v4099_v17  }
0x2a8e   :  { %v6732_v1 = vrot.slane %v6725_v16, %v8951_v22 }
0x2a8f   :  { %v6722_v40 = vpop.permute.xlu1 %6721 }
0x2a90   :  { %v6726_v30 = vmul.f32 %v8644_v63, %v6722_v40 }
0x2a92   :  { %v6736_v29 = vrot.slane %v6726_v30, %v8951_v22 }
0x2a94   :  { %v10191_v60 = vsel %vm4780_vm6, %v6736_v29, %v6732_v1  ;;  %v6737_v30 = vsel %vm501_vm2, %v6736_v29, %v6732_v1  ;;  %v4003_v1 = vmul.f32 %v10180_v5, %v9956_v26  ;;  %v4002_v29 = vmul.f32 %v10178_v7, %v9951_v45 }
0x2b04   :  { %v4104_v12 = vpop.permute.xlu0 %4103 }
0x2b05   :  { %v4111_v25 = vrot.slane %v4104_v12, %v10122_v8 }
0x2b08   :  { %v4107_v48 = vpop.permute.xlu0 %4106 }
0x2b09   :  { %v4115_v34 = vrot.slane %v4107_v48, %v10122_v8 }
0x2b0b   :  { %v4116_v41 = vsel %vm501_vm2, %v4115_v34, %v4111_v25 }
0x2b0c   :  { %v4119_v53 = vsel %vm4118_vm4, %v4116_v41, -inf }
0x2b0d   :  { %4120 = vmax.xlane.f32.xlu0 %v4119_v53  ;;  %v4011_v53 = vsel %vm142_vm1, %v4003_v1, 0.0 }
0x2b96   :  { %v4121_v63 = vpop.xlane.xlu0 %4120 }
0x2b97   :  { %v4126_v6 = vrot.slane %v4121_v63, %v9114_v52  ;;  %v4130_v28 = vrot.slane %v4121_v63, %v8951_v22  ;;  %v4004_v63 = vsel %vm142_vm1, %v4002_v29, 0.0 }
0x2b99   :  { %v4133_v2 = vsub.f32 %v4098_v20, %v4126_v6  ;;  %v4134_v18 = vsub.f32 %v4099_v17, %v4130_v28  ;;  %v4508_v20 = vadd.f32 %v10065_v21, %v10084_v14 }
0x2b9b   :  { %v4135_v10 = vmul.f32 1.442695, %v4133_v2  ;;  %v4137_v9 = vmul.f32 1.442695, %v4134_v18  ;;  %v10206_v17 = vrot.slane %v4508_v20, %v11053_v55  ;;  %v4012_v18 = vrot.slane %v4011_v53, 4 }
0x2b9d   :  { %8653 = vpow2.f32 %v4135_v10  ;;  %v4519_v40 = vcombine.high %v10206_v17, %v10206_v17  ;;  %v4005_v10 = vrot.slane %v4004_v63, 4 }
0x2b9e   :  { %8655 = vpow2.f32 %v4137_v9 }
0x2b9f   :  { %v4533_v12 = vrot.slane %v4519_v40, %v11053_v55 }
0x2ba1   :  { %v10214_v48 = vrot.slane %v4533_v12, %v9114_v52 }
0x2ba3   :  { %v4545_v25 = vadd.f32 %v10214_v48, %v10086_v13 }
0x2ba5   :  { %8657 = vtanh.f32 %v4545_v25 }
0x2baa   :  { %v8654_v56 = vpop.eup %8653 }
0x2bab   :  { %4142 = vperm.xlu1 %8266, %v8654_v56   ;;  %v8656_v31 = vpop.eup %8655 }
0x2baf   :  { %4145 = vperm.xlu1 %8266, %v8656_v31  }
0x2bb2   :  { %v8658_v14 = vpop.eup %8657 }
0x2bb3   :  { %v4549_v34 = vmul.f32 %v8658_v14, %v10100_v23 }
0x2bb5   :  { %v4553_v41 = vsel %vm142_vm1, %v4549_v34, 0.0 }
0x2c26   :  { %v4143_v43 = vpop.permute.xlu1 %4142 }
0x2c27   :  { %v4150_v58 = vrot.slane %v4143_v43, %v10122_v8  ;;  %v4013_v43 = vadd.f32 %v4012_v18, %v4011_v53 }
0x2c2a   :  { %v4146_v50 = vpop.permute.xlu1 %4145 }
0x2c2b   :  { %v4154_v54 = vrot.slane %v4146_v50, %v10122_v8  ;;  %v4006_v50 = vadd.f32 %v4005_v10, %v4004_v63 }
0x2c2d   :  { %v4155_v38 = vsel %vm501_vm2, %v4154_v54, %v4150_v58  ;;  %v4014_v58 = vrot.slane %v4013_v43, 2  ;;  %v4007_v54 = vrot.slane %v4006_v50, 2 }
0x2c2e   :  { %v4157_v16 = vsel %vm4118_vm4, %v4155_v38, 0.0 }
0x2c2f   :  { %4158 = vadd.xlane.f32.xlu1 %v4157_v16  ;;  %v4015_v38 = vadd.f32 %v4014_v58, %v4013_v43  ;;  %v4008_v16 = vadd.f32 %v4007_v54, %v4006_v50 }
0x2c31   :  { %v4009_v12 = vrot.slane %v4008_v16, 1  ;;  %v4016_v25 = vrot.slane %v4015_v38, 1 }
0x2c33   :  { %v4010_v34 = vadd.f32 %v4009_v12, %v4008_v16  ;;  %v4526_v12 = vrot.slane %v10206_v17, %v11053_v55  ;;  %v4236_v17 = vadd.s32 4294967288, %v10118_v27 }
0x2c40   :  { %6738 = vrot.lane.b32.xlu1 %v6737_v30, %s8822_s17 }
0x2c64   :  { %4554 = vadd.xlane.f32.xlu1 %v4553_v41  ;;  %v4017_v41 = vadd.f32 %v4016_v25, %v4015_v38 }
0x2c66   :  { %v4216_v1 = vsel %vm501_vm2, %v4017_v41, %v4010_v34 }
0x2cb8   :  { %v4159_v6 = vpop.xlane.xlu1 %4158 }
0x2cb9   :  { %v4164_v28 = vrot.slane %v4159_v6, %v9114_v52  ;;  %v4168_v2 = vrot.slane %v4159_v6, %v8951_v22 }
0x2cbb   :  { %8659 = vrcp.f32 %v4164_v28 }
0x2cbc   :  { %v6739_v9 = vpop.permute.xlu1 %6738  ;;  %8661 = vrcp.f32 %v4168_v2 }
0x2cbd   :  { %8182 = vmatmul.mubr.msk.f32.vlgmr.msra.gmra.mxu1 %vm142_vm1, %v6739_v9 }
0x2cc8   :  { %v8660_v20 = vpop.eup %8659 }
0x2cc9   :  { %v4172_v40 = vmul.f32 %v8660_v20, %v8654_v56  ;;  %v8662_v30 = vpop.eup %8661 }
0x2cca   :  { %v4174_v14 = vmul.f32 %v8662_v30, %v8656_v31 }
0x2ccb   :  { %4177 = vperm.xlu0 %8265, %v4172_v40  }
0x2ccf   :  { %4182 = vperm.xlu0 %8265, %v4174_v14   ;;  %v4537_v14 = vrot.slane %v4526_v12, %v9114_v52 }
0x2cd1   :  { %v4544_v34 = vadd.f32 %v4537_v14, %v10081_v36 }
0x2cd3   :  { %4217 = vrot.lane.b32.xlu0 %v4216_v1, %s8821_s16  ;;  %8663 = vtanh.f32 %v4544_v34 }
0x2ce0   :  { %v8664_v41 = vpop.eup %8663 }
0x2ce1   :  { %v4548_v1 = vmul.f32 %v8664_v41, %v10100_v23 }
0x2ced   :  { %v4555_v29 = vpop.xlane.xlu1 %4554 }
0x2cee   :  { %v10232_v53 = vadd.f32 %v4555_v29, %v10111_v0  ;;  %v4550_v29 = vsel %vm142_vm1, %v4548_v1, 0.0 }
0x2cf0   :  { %4564 = vperm.xlu1 %8266, %v10232_v53  }
0x2d46   :  { %v4178_v63 = vpop.permute.xlu0 %4177 }
0x2d47   :  { %v4185_v56 = vmul.f32 %v4178_v63, %v11054_v57 }
0x2d49   :  { %v4187_v6 = vsel %vm4074_vm3, %v4185_v56, 0.0 }
0x2d4a   :  { %v4188_v28 = vrot.slane %v4187_v6, 4  ;;  %v4183_v31 = vpop.permute.xlu0 %4182 }
0x2d4b   :  { %v4186_v2 = vmul.f32 %v4183_v31, %v9981_v15 }
0x2d4c   :  { %v4189_v18 = vadd.f32 %v4188_v28, %v4187_v6  ;;  %v10251_v28 = vsub.s32 %v4236_v17, %v11057_v49  ;;  %v11060_v49 = vld [vmem:[#allocation13_spill] sm:$0xff]  ;;  %v4658_v17 = vadd.f32 %v4537_v14, %v10137_v61 }
0x2d4d   :  { %v4194_v10 = vsel %vm4074_vm3, %v4186_v2, 0.0 }
0x2d4e   :  { %v4190_v9 = vrot.slane %v4189_v18, 2  ;;  %v4195_v43 = vrot.slane %v4194_v10, 4  ;;  %v4244_v2 = vrot.slane %v4183_v31, %v10251_v28  ;;  %v4247_v31 = vsel %vm142_vm1, %v11055_v46, %v11060_v49 }
0x2d4f   :  { %8665 = vtanh.f32 %v4658_v17 }
0x2d50   :  { %v4191_v50 = vadd.f32 %v4190_v9, %v4189_v18  ;;  %v4196_v58 = vadd.f32 %v4195_v43, %v4194_v10  ;;  %v4233_v18 = vrot.slane %v10180_v5, %v10122_v8  ;;  %v4229_v10 = vrot.slane %v10178_v7, %v10122_v8 }
0x2d51   :  { %v4240_v9 = vrot.slane %v4178_v63, %v10251_v28 }
0x2d52   :  { %v4197_v54 = vrot.slane %v4196_v58, 2  ;;  %v4192_v16 = vrot.slane %v4191_v50, 1 }
0x2d53   :  { %v4245_v43 = vsel %vm501_vm2, %v4244_v2, %v4240_v9  ;;  %v4659_v2 = vadd.f32 %v10214_v48, %v10092_v32 }
0x2d54   :  { %v4198_v38 = vadd.f32 %v4197_v54, %v4196_v58  ;;  %v4193_v40 = vadd.f32 %v4192_v16, %v4191_v50  ;;  %v4218_v50 = vpop.permute.xlu0 %4217  ;;  %v4234_v58 = vsel %vm501_vm2, %v4233_v18, %v4229_v10 }
0x2d55   :  { %v4252_v27 = vsel %vm4251_vm5, %v4234_v58, %v4245_v43  ;;  %v4248_v5 = vsel %vm2589_vm14, %v4247_v31, %v4218_v50  ;;  %8667 = vtanh.f32 %v4659_v2 }
0x2d56   :  { %v4199_v20 = vrot.slane %v4198_v38, 1  ;;  %v4254_v7 = vsel %vm4253_vm7, %v4252_v27, 0.0 }
0x2d58   :  { %v4200_v30 = vadd.f32 %v4199_v20, %v4198_v38  ;;  %v116_v20 = vld [vmem:[%s11021_s6 + $0x140] sm:$0xff] }
0x2d5a   :  { %v4222_v25 = vsel %vm501_vm2, %v4200_v30, %v4193_v40 }
0x2d5b   :  { %4223 = vrot.lane.b32.xlu0 %v4222_v25, %s8824_s23 }
0x2d5c   :  { %v8666_v18 = vpop.eup %8665 }
0x2d5d   :  { %v4662_v10 = vmul.f32 %v8666_v18, %v10145_v24 }
0x2d62   :  { %v8668_v9 = vpop.eup %8667 }
0x2d63   :  { %v4663_v43 = vmul.f32 %v8668_v9, %v10145_v24 }
0x2d6b   :  { %v4565_v34 = vpop.permute.xlu1 %4564 }
0x2d6c   :  { %v4573_v41 = vrot.slane %v4565_v34, %v10122_v8 }
0x2d7a   :  { %4551 = vadd.xlane.f32.xlu0 %v4550_v29 }
0x2d7d   :  { %v10247_v56 = vpop.f32.mrf.mxu1 }
0x2d7f   :  { %v8183_v6 = vpop.f32.mrf.mxu1 }
0x2dcd   :  { %v4224_v54 = vpop.permute.xlu0 %4223 }
0x2dce   :  { %v4250_v63 = vsel %vm4249_vm15, %v4248_v5, %v4224_v54 }
0x2dcf   :  { %v4257_v38 = vcombine.low %v4250_v63, %v4254_v7 }
0x2dd1   :  { %v4264_v16 = vrot.slane %v4257_v38, %v11053_v55 }
0x2dd3   :  { %v4265_v40 = vcombine.high %v4264_v16, %v4264_v16  ;;  %v4272_v30 = vrot.slane %v4264_v16, %v11053_v55 }
0x2dd5   :  { %v4279_v46 = vrot.slane %v4265_v40, %v11053_v55  ;;  %4286 = vst.msk [vmem:[#allocation3] ss:$8 sm:$0x3] %vm10270_vm8, %v4272_v30 }
0x2dd7   :  { %4289 = vst.msk [vmem:[#allocation3 + $0x10] ss:$8 sm:$0x3] %vm10270_vm8, %v4279_v46 }
0x2e03   :  { %v4552_v12 = vpop.xlane.xlu0 %4551 }
0x2e04   :  { %v4556_v25 = vadd.f32 %v4552_v12, %v10114_v19 }
0x2e06   :  { %4561 = vperm.xlu0 %8265, %v4556_v25  }
0x2e81   :  { %v4562_v44 = vpop.permute.xlu0 %4561 }
0x2e82   :  { %v4569_v1 = vrot.slane %v4562_v44, %v10122_v8 }
0x2e84   :  { %v4574_v29 = vsel %vm501_vm2, %v4573_v41, %v4569_v1 }
0x2e85   :  { %v4576_v6 = vsel %vm3935_vm0, %v4574_v29, -inf }
0x2e86   :  { %4577 = vmax.xlane.f32.xlu0 %v4576_v6 }
0x2e9c   :  { %4666 = vrot.lane.b32.xlu0 %v4662_v10, %s8824_s23 }
0x2ea0   :  { %4668 = vrot.lane.b32.xlu0 %v4663_v43, %s8824_s23 }
0x2f0f   :  { %v4578_v50 = vpop.xlane.xlu0 %4577 }
0x2f10   :  { %v4583_v58 = vrot.slane %v4578_v50, %v9114_v52  ;;  %v4587_v14 = vrot.slane %v4578_v50, %v8951_v22 }
0x2f12   :  { %v4590_v27 = vsub.f32 %v4556_v25, %v4583_v58  ;;  %v4591_v48 = vsub.f32 %v10232_v53, %v4587_v14 }
0x2f13   :  { %v4667_v49 = vpop.permute.xlu0 %4666 }
0x2f14   :  { %v4592_v31 = vmul.f32 1.442695, %v4590_v27  ;;  %v4672_v5 = vsel %vm4074_vm3, %v4667_v49, 0.0  ;;  %v4594_v54 = vmul.f32 1.442695, %v4591_v48 }
0x2f15   :  { %4673 = vadd.xlane.f32.xlu0 %v4672_v5 }
0x2f16   :  { %8669 = vpow2.f32 %v4592_v31 }
0x2f17   :  { %8671 = vpow2.f32 %v4594_v54  ;;  %v4669_v12 = vpop.permute.xlu0 %4668 }
0x2f18   :  { %v4675_v25 = vsel %vm4074_vm3, %v4669_v12, 0.0 }
0x2f23   :  { %v8670_v7 = vpop.eup %8669 }
0x2f24   :  { %4599 = vperm.xlu1 %8266, %v8670_v7   ;;  %v8672_v63 = vpop.eup %8671 }
0x2f28   :  { %4602 = vperm.xlu1 %8266, %v8672_v63  }
0x2f9e   :  { %v4674_v17 = vpop.xlane.xlu0 %4673 }
0x2f9f   :  { %v4600_v38 = vpop.permute.xlu1 %4599  ;;  %v4678_v10 = vadd.f32 %v4674_v17, %v10182_v42 }
0x2fa0   :  { %v4607_v40 = vrot.slane %v4600_v38, %v10122_v8 }
0x2fa3   :  { %v4603_v16 = vpop.permute.xlu1 %4602 }
0x2fa4   :  { %v4611_v30 = vrot.slane %v4603_v16, %v10122_v8 }
0x2fa6   :  { %v4612_v53 = vsel %vm501_vm2, %v4611_v30, %v4607_v40 }
0x2fa7   :  { %v4614_v46 = vsel %vm3935_vm0, %v4612_v53, 0.0 }
0x2fa8   :  { %4615 = vadd.xlane.f32.xlu1 %v4614_v46 }
0x2fac   :  { %4676 = vadd.xlane.f32.xlu1 %v4675_v25 }
0x3031   :  { %v4616_v34 = vpop.xlane.xlu1 %4615 }
0x3032   :  { %v4621_v44 = vrot.slane %v4616_v34, %v9114_v52  ;;  %v4625_v41 = vrot.slane %v4616_v34, %v8951_v22 }
0x3034   :  { %8673 = vrcp.f32 %v4621_v44 }
0x3035   :  { %8675 = vrcp.f32 %v4625_v41  ;;  %v4677_v18 = vpop.xlane.xlu1 %4676 }
0x3036   :  { %v4679_v9 = vadd.f32 %v4677_v18, %v10184_v33  ;;  %v5087_v18 = vadd.f32 %v10065_v21, %v10095_v4 }
0x3041   :  { %v8674_v1 = vpop.eup %8673 }
0x3042   :  { %v8676_v29 = vpop.eup %8675  ;;  %v4629_v6 = vmul.f32 %v8674_v1, %v8670_v7  ;;  %v5659_v1 = vadd.f32 %v10065_v21, %v10102_v11 }
0x3043   :  { %v4631_v2 = vmul.f32 %v8676_v29, %v8672_v63 }
0x3044   :  { %4634 = vperm.xlu0 %8265, %v4629_v6   ;;  %v5669_v29 = vrot.slane %v5659_v1, %v11053_v55 }
0x3045   :  { %4639 = vperm.xlu1 %8266, %v4631_v2  }
0x3046   :  { %v5677_v6 = vrot.slane %v5669_v29, %v11053_v55 }
0x3048   :  { %4683 = vperm.xlu0 %8265, %v4678_v10  }
0x3049   :  { %4686 = vperm.xlu1 %8266, %v4679_v9  }
0x30bf   :  { %v10305_v43 = vpop.permute.xlu0 %4634 }
0x30c0   :  { %v10307_v50 = vpop.permute.xlu1 %4639  ;;  %v4642_v2 = vmul.f32 %v10305_v43, %v9951_v45 }
0x30c1   :  { %v4643_v17 = vmul.f32 %v10307_v50, %v9956_v26 }
0x30c2   :  { %v4644_v11 = vsel %vm142_vm1, %v4642_v2, 0.0  ;;  %v6237_v2 = vadd.f32 %v10065_v21, %v10107_v62 }
0x30c3   :  { %v4684_v58 = vpop.permute.xlu0 %4683 }
0x30c4   :  { %v4687_v14 = vpop.permute.xlu1 %4686  ;;  %v4691_v27 = vrot.slane %v4684_v58, %v10122_v8  ;;  %v4651_v58 = vsel %vm142_vm1, %v4643_v17, 0.0 }
0x30c5   :  { %v4695_v48 = vrot.slane %v4687_v14, %v10122_v8  ;;  %v5097_v14 = vrot.slane %v5087_v18, %v11053_v55 }
0x30c7   :  { %v4696_v49 = vsel %vm501_vm2, %v4695_v48, %v4691_v27 }
0x30c8   :  { %v4698_v31 = vsel %vm4118_vm4, %v4696_v49, -inf  ;;  %v6809_v49 = vadd.f32 %v10065_v21, %v10247_v56 }
0x30c9   :  { %4699 = vmax.xlane.f32.xlu0 %v4698_v31 }
0x3152   :  { %v4700_v5 = vpop.xlane.xlu0 %4699 }
0x3153   :  { %v4705_v54 = vrot.slane %v4700_v5, %v9114_v52  ;;  %v4709_v7 = vrot.slane %v4700_v5, %v8951_v22  ;;  %v4652_v5 = vrot.slane %v4651_v58, 4 }
0x3155   :  { %v4712_v63 = vsub.f32 %v4678_v10, %v4705_v54  ;;  %v4713_v38 = vsub.f32 %v4679_v9, %v4709_v7  ;;  %v5670_v10 = vcombine.high %v5669_v29, %v5669_v29  ;;  %v10330_v9 = vrot.slane %v5677_v6, %v9114_v52 }
0x3156   :  { %v4645_v54 = vrot.slane %v4644_v11, 4  ;;  %v4653_v56 = vadd.f32 %v4652_v5, %v4651_v58 }
0x3157   :  { %v4714_v16 = vmul.f32 1.442695, %v4712_v63  ;;  %v4716_v40 = vmul.f32 1.442695, %v4713_v38  ;;  %v5684_v27 = vrot.slane %v5670_v10, %v11053_v55  ;;  %v5809_v7 = vadd.f32 %v10330_v9, %v10137_v61 }
0x3158   :  { %v5098_v63 = vcombine.high %v5097_v14, %v5097_v14  ;;  %v5105_v38 = vrot.slane %v5097_v14, %v11053_v55  ;;  %v4654_v1 = vrot.slane %v4653_v56, 2 }
0x3159   :  { %8677 = vpow2.f32 %v4714_v16  ;;  %v10344_v16 = vrot.slane %v5684_v27, %v9114_v52 }
0x315a   :  { %8679 = vpow2.f32 %v4716_v40  ;;  %v6819_v40 = vrot.slane %v6809_v49, %v11053_v55  ;;  %v4655_v58 = vadd.f32 %v4654_v1, %v4653_v56 }
0x3166   :  { %v8678_v30 = vpop.eup %8677 }
0x3167   :  { %4721 = vperm.xlu1 %8266, %v8678_v30   ;;  %v8680_v53 = vpop.eup %8679 }
0x316b   :  { %4724 = vperm.xlu1 %8266, %v8680_v53  }
0x31e2   :  { %v4722_v46 = vpop.permute.xlu1 %4721 }
0x31e3   :  { %v4729_v25 = vrot.slane %v4722_v46, %v10122_v8  ;;  %v4646_v46 = vadd.f32 %v4645_v54, %v4644_v11  ;;  %v4656_v54 = vrot.slane %v4655_v58, 1 }
0x31e5   :  { %v4647_v29 = vrot.slane %v4646_v46, 2 }
0x31e6   :  { %v4725_v12 = vpop.permute.xlu1 %4724 }
0x31e7   :  { %v4733_v34 = vrot.slane %v4725_v12, %v10122_v8  ;;  %v5112_v12 = vrot.slane %v5098_v63, %v11053_v55  ;;  %v4648_v11 = vadd.f32 %v4647_v29, %v4646_v46  ;;  %v11063_v46 = vld [vmem:[#allocation16_spill] sm:$0xff] }
0x31e9   :  { %v4734_v44 = vsel %vm501_vm2, %v4733_v34, %v4729_v25  ;;  %v10349_v25 = vrot.slane %v5105_v38, %v9114_v52  ;;  %v5810_v34 = vadd.f32 %v10344_v16, %v10092_v32  ;;  %v5120_v6 = vrot.slane %v5112_v12, %v9114_v52 }
0x31ea   :  { %v4736_v41 = vsel %vm4118_vm4, %v4734_v44, 0.0  ;;  %v6820_v44 = vcombine.high %v6819_v40, %v6819_v40  ;;  %v4649_v5 = vrot.slane %v4648_v11, 1 }
0x31eb   :  { %4737 = vadd.xlane.f32.xlu1 %v4736_v41  ;;  %v6827_v41 = vrot.slane %v6819_v40, %v11053_v55  ;;  %v5237_v17 = vadd.f32 %v10349_v25, %v10137_v61  ;;  %v5238_v27 = vadd.f32 %v5120_v6, %v10092_v32 }
0x31ec   :  { %v6834_v18 = vrot.slane %v6820_v44, %v11053_v55  ;;  %v4650_v56 = vadd.f32 %v4649_v5, %v4648_v11 }
0x31ed   :  { %v6838_v10 = vrot.slane %v6827_v41, %v9114_v52 }
0x31ef   :  { %v6959_v21 = vadd.f32 %v6838_v10, %v10137_v61 }
0x3274   :  { %v4738_v48 = vpop.xlane.xlu1 %4737 }
0x3275   :  { %v4743_v31 = vrot.slane %v4738_v48, %v9114_v52  ;;  %v4747_v4 = vrot.slane %v4738_v48, %v8951_v22  ;;  %v10363_v48 = vrot.slane %v6237_v2, %v11053_v55 }
0x3277   :  { %8681 = vrcp.f32 %v4743_v31  ;;  %v10366_v31 = vrot.slane %v6834_v18, %v9114_v52  ;;  %v6255_v63 = vrot.slane %v10363_v48, %v11053_v55 }
0x3278   :  { %8683 = vrcp.f32 %v4747_v4 }
0x3279   :  { %8685 = vtanh.f32 %v5809_v7  ;;  %v6960_v40 = vadd.f32 %v10366_v31, %v10092_v32 }
0x327a   :  { %8687 = vtanh.f32 %v5810_v34 }
0x327b   :  { %8689 = vtanh.f32 %v5237_v17 }
0x327c   :  { %8691 = vtanh.f32 %v5238_v27 }
0x327d   :  { %8693 = vtanh.f32 %v6959_v21  ;;  %v6845_v21 = vadd.f32 %v6838_v10, %v10081_v36  ;;  %v6248_v10 = vcombine.high %v10363_v48, %v10363_v48 }
0x327e   :  { %8695 = vtanh.f32 %v6960_v40 }
0x3284   :  { %v8682_v14 = vpop.eup %8681 }
0x3285   :  { %v8684_v49 = vpop.eup %8683  ;;  %v4751_v4 = vmul.f32 %v8682_v14, %v8678_v30  ;;  %v4657_v30 = vadd.f32 %v4656_v54, %v4655_v58 }
0x3286   :  { %v4753_v62 = vmul.f32 %v8684_v49, %v8680_v53  ;;  %v8686_v7 = vpop.eup %8685  ;;  %v10377_v53 = vrot.slane %v6255_v63, %v9114_v52  ;;  %v5124_v49 = vadd.f32 %v5120_v6, %v10086_v13 }
0x3287   :  { %4756 = vperm.xlu0 %8265, %v4751_v4   ;;  %v5813_v38 = vmul.f32 %v8686_v7, %v10145_v24  ;;  %v8688_v12 = vpop.eup %8687  ;;  %v4799_v44 = vsel %vm4780_vm6, %v4657_v30, %v4650_v56  ;;  %v5696_v4 = vadd.f32 %v10344_v16, %v10086_v13  ;;  %v6262_v56 = vrot.slane %v6248_v10, %v11053_v55 }
0x3288   :  { %4761 = vperm.xlu1 %8266, %v4753_v62   ;;  %v5814_v34 = vmul.f32 %v8688_v12, %v10145_v24  ;;  %v6387_v41 = vadd.f32 %v10377_v53, %v10137_v61  ;;  %v8690_v1 = vpop.eup %8689  ;;  %v6846_v12 = vadd.f32 %v10366_v31, %v10086_v13 }
0x3289   :  { %v5241_v29 = vmul.f32 %v8690_v1, %v10145_v24  ;;  %v8692_v17 = vpop.eup %8691  ;;  %v6270_v30 = vrot.slane %v6262_v56, %v9114_v52 }
0x328a   :  { %8697 = vtanh.f32 %v6387_v41  ;;  %v5242_v2 = vmul.f32 %v8692_v17, %v10145_v24  ;;  %v8694_v18 = vpop.eup %8693 }
0x328b   :  { %4782 = vrot.lane.b32.xlu0 %v11063_v46, %s8822_s17  ;;  %v6963_v58 = vmul.f32 %v8694_v18, %v10145_v24  ;;  %v8696_v11 = vpop.eup %8695  ;;  %8699 = vtanh.f32 %v5124_v49  ;;  %v6274_v46 = vadd.f32 %v6270_v30, %v10086_v13 }
0x328c   :  { %5817 = vrot.lane.b32.xlu1 %v5813_v38, %s8824_s23  ;;  %v6964_v61 = vmul.f32 %v8696_v11, %v10145_v24  ;;  %8701 = vtanh.f32 %v5696_v4  ;;  %v8793_v4 = vld [vmem:[%s11022_s7 + $0x7] ss:$0 sm:$0xff] }
0x328d   :  { %8703 = vtanh.f32 %v6845_v21 }
0x328e   :  { %8705 = vtanh.f32 %v6274_v46 }
0x328f   :  { %4800 = vrot.lane.b32.xlu0 %v4799_v44, %s8821_s16  ;;  %8707 = vtanh.f32 %v6846_v12 }
0x3290   :  { %5819 = vrot.lane.b32.xlu1 %v5814_v34, %s8824_s23 }
0x3294   :  { %5245 = vrot.lane.b32.xlu1 %v5241_v29, %s8824_s23 }
0x3297   :  { %v8698_v14 = vpop.eup %8697 }
0x3298   :  { %5247 = vrot.lane.b32.xlu1 %v5242_v2, %s8824_s23  ;;  %v6391_v27 = vmul.f32 %v8698_v14, %v10145_v24  ;;  %v8700_v62 = vpop.eup %8699 }
0x3299   :  { %v5128_v5 = vmul.f32 %v8700_v62, %v10100_v23  ;;  %v8702_v54 = vpop.eup %8701 }
0x329a   :  { %v5700_v63 = vmul.f32 %v8702_v54, %v10100_v23  ;;  %v8704_v38 = vpop.eup %8703 }
0x329b   :  { %v5132_v7 = vsel %vm142_vm1, %v5128_v5, 0.0  ;;  %v6849_v40 = vmul.f32 %v8704_v38, %v10100_v23  ;;  %v8706_v31 = vpop.eup %8705 }
0x329c   :  { %6967 = vrot.lane.b32.xlu1 %v6963_v58, %s8824_s23  ;;  %v5704_v6 = vsel %vm142_vm1, %v5700_v63, 0.0  ;;  %v6278_v21 = vmul.f32 %v8793_v4, %v8706_v31 }
0x329d   :  { %v6851_v16 = vsel %vm142_vm1, %v6849_v40, 0.0 }
0x329e   :  { %v6282_v63 = vsel %vm142_vm1, %v6278_v21, 0.0 }
0x32a0   :  { %6969 = vrot.lane.b32.xlu1 %v6964_v61, %s8824_s23 }
0x32a4   :  { %6395 = vrot.lane.b32.xlu1 %v6391_v27, %s8824_s23 }
0x32c8   :  { %5133 = vadd.xlane.f32.xlu1 %v5132_v7 }
0x32cc   :  { %5705 = vadd.xlane.f32.xlu1 %v5704_v6  ;;  %v8708_v6 = vpop.eup %8707 }
0x32cd   :  { %v6850_v46 = vmul.f32 %v8793_v4, %v8708_v6  ;;  %v11064_v6 = vld [vmem:[#allocation15_spill] sm:$0xff] }
0x32d0   :  { %6852 = vadd.xlane.f32.xlu1 %v6851_v16 }
0x3302   :  { %v10413_v34 = vpop.permute.xlu0 %4756 }
0x3303   :  { %v10415_v23 = vpop.permute.xlu1 %4761  ;;  %v4764_v44 = vmul.f32 %v10413_v34, %v11054_v57 }
0x3304   :  { %v4765_v48 = vmul.f32 %v10415_v23, %v9981_v15  ;;  %v4826_v21 = vrot.slane %v10415_v23, %v10251_v28 }
0x3305   :  { %v4766_v41 = vsel %vm4074_vm3, %v4764_v44, 0.0  ;;  %v6854_v44 = vsel %vm142_vm1, %v6850_v46, 0.0 }
0x3306   :  { %v4773_v1 = vsel %vm4074_vm3, %v4765_v48, 0.0  ;;  %v4767_v29 = vrot.slane %v4766_v41, 4  ;;  %v5123_v48 = vadd.f32 %v10349_v25, %v10081_v36  ;;  %v5695_v25 = vadd.f32 %v10330_v9, %v10081_v36 }
0x3307   :  { %v4774_v17 = vrot.slane %v4773_v1, 4  ;;  %v5818_v2 = vpop.permute.xlu1 %5817 }
0x3308   :  { %v4768_v18 = vadd.f32 %v4767_v29, %v4766_v41  ;;  %v5823_v13 = vsel %vm4074_vm3, %v5818_v2, 0.0  ;;  %8709 = vtanh.f32 %v5123_v48 }
0x3309   :  { %v4775_v58 = vadd.f32 %v4774_v17, %v4773_v1  ;;  %5824 = vadd.xlane.f32.xlu1 %v5823_v13 }
0x330a   :  { %v4769_v11 = vrot.slane %v4768_v18, 2 }
0x330b   :  { %v4776_v61 = vrot.slane %v4775_v58, 2  ;;  %v5820_v14 = vpop.permute.xlu1 %5819 }
0x330c   :  { %v4770_v27 = vadd.f32 %v4769_v11, %v4768_v18  ;;  %v5826_v49 = vsel %vm4074_vm3, %v5820_v14, 0.0  ;;  %v6388_v18 = vadd.f32 %v6270_v30, %v10092_v32 }
0x330d   :  { %v4777_v62 = vadd.f32 %v4776_v61, %v4775_v58  ;;  %5827 = vadd.xlane.f32.xlu1 %v5826_v49  ;;  %v6273_v58 = vadd.f32 %v10377_v53, %v10081_v36  ;;  %v4783_v53 = vpop.permute.xlu0 %4782 }
0x330e   :  { %v4771_v5 = vrot.slane %v4770_v27, 1  ;;  %8711 = vtanh.f32 %v6388_v18 }
0x330f   :  { %v5246_v54 = vpop.permute.xlu1 %5245  ;;  %v4778_v7 = vrot.slane %v4777_v62, 1  ;;  %8713 = vtanh.f32 %v5695_v25 }
0x3310   :  { %v4772_v38 = vadd.f32 %v4771_v5, %v4770_v27  ;;  %8715 = vtanh.f32 %v6273_v58  ;;  %v4812_v5 = vrot.slane %v10305_v43, %v10122_v8 }
0x3311   :  { %6283 = vadd.xlane.f32.xlu1 %v6282_v63  ;;  %v4779_v40 = vadd.f32 %v4778_v7, %v4777_v62  ;;  %v4816_v62 = vrot.slane %v10307_v50, %v10122_v8  ;;  %v4801_v7 = vpop.permute.xlu0 %4800 }
0x3313   :  { %v5248_v16 = vpop.permute.xlu1 %5247  ;;  %v4805_v10 = vsel %vm4780_vm6, %v4779_v40, %v4772_v38  ;;  %v4817_v63 = vsel %vm4780_vm6, %v4816_v62, %v4812_v5  ;;  %v4829_v40 = vsel %vm142_vm1, %v4783_v53, %v11064_v6 }
0x3314   :  { %v5254_v56 = vsel %vm4074_vm3, %v5248_v16, 0.0  ;;  %4806 = vrot.lane.b32.xlu0 %v4805_v10, %s8824_s23  ;;  %v4830_v23 = vsel %vm2589_vm14, %v4829_v40, %v4801_v7 }
0x3315   :  { %5255 = vadd.xlane.f32.xlu1 %v5254_v56  ;;  %v8710_v29 = vpop.eup %8709 }
0x3316   :  { %v5127_v17 = vmul.f32 %v8793_v4, %v8710_v29 }
0x3317   :  { %v6968_v12 = vpop.permute.xlu1 %6967 }
0x3318   :  { %v5129_v2 = vsel %vm142_vm1, %v5127_v17, 0.0  ;;  %v6973_v9 = vsel %vm4074_vm3, %v6968_v12, 0.0 }
0x3319   :  { %6855 = vadd.xlane.f32.xlu1 %v6854_v44 }
0x331b   :  { %v6970_v41 = vpop.permute.xlu1 %6969  ;;  %v8712_v13 = vpop.eup %8711 }
0x331c   :  { %v6976_v1 = vsel %vm4074_vm3, %v6970_v41, 0.0  ;;  %v6392_v31 = vmul.f32 %v8712_v13, %v10145_v24  ;;  %v8714_v11 = vpop.eup %8713  ;;  %v5251_v24 = vsel %vm4074_vm3, %v5246_v54, 0.0 }
0x331d   :  { %6977 = vadd.xlane.f32.xlu1 %v6976_v1  ;;  %v5699_v61 = vmul.f32 %v8793_v4, %v8714_v11  ;;  %v8716_v14 = vpop.eup %8715 }
0x331e   :  { %v6277_v32 = vmul.f32 %v8793_v4, %v8716_v14  ;;  %v4822_v4 = vrot.slane %v10413_v34, %v10251_v28 }
0x331f   :  { %v5701_v27 = vsel %vm142_vm1, %v5699_v61, 0.0  ;;  %v6396_v49 = vpop.permute.xlu1 %6395 }
0x3320   :  { %v6279_v30 = vsel %vm142_vm1, %v6277_v32, 0.0  ;;  %v6401_v36 = vsel %vm4074_vm3, %v6396_v49, 0.0  ;;  %v4827_v54 = vsel %vm4780_vm6, %v4826_v21, %v4822_v4 }
0x3321   :  { %v4832_v38 = vsel %vm4251_vm5, %v4817_v63, %v4827_v54 }
0x3322   :  { %v4833_v34 = vsel %vm4253_vm7, %v4832_v38, 0.0 }
0x3333   :  { %5130 = vadd.xlane.f32.xlu0 %v5129_v2 }
0x3349   :  { %6397 = vrot.lane.b32.xlu0 %v6392_v31, %s8824_s23 }
0x3351   :  { %v5134_v48 = vpop.xlane.xlu1 %5133 }
0x3352   :  { %v10477_v25 = vadd.f32 %v5134_v48, %v10111_v0 }
0x3355   :  { %v5706_v41 = vpop.xlane.xlu1 %5705 }
0x3356   :  { %v10506_v53 = vadd.f32 %v5706_v41, %v10111_v0 }
0x3359   :  { %v6853_v1 = vpop.xlane.xlu1 %6852 }
0x335a   :  { %v10522_v7 = vadd.f32 %v6853_v1, %v10114_v19 }
0x3368   :  { %5702 = vadd.xlane.f32.xlu0 %v5701_v27 }
0x336c   :  { %6280 = vadd.xlane.f32.xlu0 %v6279_v30 }
0x3370   :  { %5252 = vadd.xlane.f32.xlu0 %v5251_v24 }
0x3374   :  { %6974 = vadd.xlane.f32.xlu0 %v6973_v9 }
0x3378   :  { %6402 = vadd.xlane.f32.xlu0 %v6401_v36 }
0x3386   :  { %v4807_v16 = vpop.permute.xlu0 %4806 }
0x3387   :  { %v4831_v50 = vsel %vm4249_vm15, %v4830_v23, %v4807_v16 }
0x3388   :  { %v4836_v10 = vcombine.low %v4831_v50, %v4833_v34 }
0x338a   :  { %v4843_v43 = vrot.slane %v4836_v10, %v11053_v55 }
0x338c   :  { %v4844_v56 = vcombine.high %v4843_v43, %v4843_v43  ;;  %v4851_v46 = vrot.slane %v4843_v43, %v11053_v55 }
0x338e   :  { %v4858_v12 = vrot.slane %v4844_v56, %v11053_v55  ;;  %v4859_v44 = vcombine.high %v4851_v46, %v4851_v46 }
0x3390   :  { %4863 = vst.msk [vmem:[#allocation3 + $0x1] ss:$8 sm:$0x3] %vm10270_vm8, %v4858_v12  ;;  %4866 = vst.msk [vmem:[#allocation3 + $0x11] ss:$8 sm:$0x3] %vm10270_vm8, %v4859_v44 }
0x3392   :  { %v5825_v29 = vpop.xlane.xlu1 %5824 }
0x3393   :  { %v10510_v4 = vadd.f32 %v5825_v29, %v10182_v42 }
0x3396   :  { %v5828_v17 = vpop.xlane.xlu1 %5827 }
0x3397   :  { %v10482_v11 = vadd.f32 %v5828_v17, %v10184_v33 }
0x339a   :  { %v6284_v13 = vpop.xlane.xlu1 %6283 }
0x339b   :  { %v10486_v14 = vadd.f32 %v6284_v13, %v10111_v0 }
0x339e   :  { %v5256_v61 = vpop.xlane.xlu1 %5255 }
0x339f   :  { %v10490_v32 = vadd.f32 %v5256_v61, %v10184_v33 }
0x33a2   :  { %v6856_v27 = vpop.xlane.xlu1 %6855 }
0x33a3   :  { %v10494_v30 = vadd.f32 %v6856_v27, %v10111_v0 }
0x33a6   :  { %v6978_v24 = vpop.xlane.xlu1 %6977 }
0x33a7   :  { %v10498_v9 = vadd.f32 %v6978_v24, %v10184_v33 }
0x33bc   :  { %v5131_v2 = vpop.xlane.xlu0 %5130 }
0x33bd   :  { %v10473_v18 = vadd.f32 %v5131_v2, %v10114_v19 }
0x33bf   :  { %5140 = vperm.xlu0 %8265, %v10473_v18  }
0x33c0   :  { %v6398_v31 = vpop.permute.xlu0 %6397 }
0x33c1   :  { %v6404_v58 = vsel %vm4074_vm3, %v6398_v31, 0.0 }
0x33c2   :  { %6405 = vadd.xlane.f32.xlu1 %v6404_v58 }
0x33c3   :  { %5143 = vperm.xlu0 %8265, %v10477_v25  }
0x33c7   :  { %5837 = vperm.xlu0 %8265, %v10482_v11  }
0x33cb   :  { %6293 = vperm.xlu0 %8265, %v10486_v14  }
0x33cf   :  { %5265 = vperm.xlu0 %8265, %v10490_v32  }
0x33d3   :  { %6865 = vperm.xlu0 %8265, %v10494_v30  }
0x33d7   :  { %6987 = vperm.xlu0 %8265, %v10498_v9  }
0x33f1   :  { %v5703_v49 = vpop.xlane.xlu0 %5702 }
0x33f2   :  { %v10502_v36 = vadd.f32 %v5703_v49, %v10114_v19 }
0x33f4   :  { %5712 = vperm.xlu1 %8266, %v10502_v36  }
0x33f5   :  { %v6281_v21 = vpop.xlane.xlu0 %6280 }
0x33f6   :  { %v10514_v62 = vadd.f32 %v6281_v21, %v10114_v19 }
0x33f8   :  { %5715 = vperm.xlu1 %8266, %v10506_v53  }
0x33f9   :  { %v5253_v5 = vpop.xlane.xlu0 %5252 }
0x33fa   :  { %v10518_v54 = vadd.f32 %v5253_v5, %v10182_v42 }
0x33fc   :  { %5834 = vperm.xlu1 %8266, %v10510_v4  }
0x33fd   :  { %v6975_v0 = vpop.xlane.xlu0 %6974 }
0x33fe   :  { %v10526_v63 = vadd.f32 %v6975_v0, %v10182_v42 }
0x3400   :  { %6290 = vperm.xlu1 %8266, %v10514_v62  }
0x3401   :  { %v6403_v38 = vpop.xlane.xlu0 %6402 }
0x3402   :  { %v10530_v6 = vadd.f32 %v6403_v38, %v10182_v42 }
0x3404   :  { %5262 = vperm.xlu1 %8266, %v10518_v54  }
0x3408   :  { %6862 = vperm.xlu1 %8266, %v10522_v7  }
0x340c   :  { %6984 = vperm.xlu1 %8266, %v10526_v63  }
0x3410   :  { %6412 = vperm.xlu1 %8266, %v10530_v6  }
0x343a   :  { %v5141_v40 = vpop.permute.xlu0 %5140 }
0x343b   :  { %v5148_v16 = vrot.slane %v5141_v40, %v10122_v8 }
0x343e   :  { %v5144_v23 = vpop.permute.xlu0 %5143 }
0x343f   :  { %v5152_v19 = vrot.slane %v5144_v23, %v10122_v8 }
0x3441   :  { %v5153_v34 = vsel %vm501_vm2, %v5152_v19, %v5148_v16 }
0x3442   :  { %v5155_v50 = vsel %vm3935_vm0, %v5153_v34, -inf  ;;  %v5838_v42 = vpop.permute.xlu0 %5837 }
0x3443   :  { %5156 = vmax.xlane.f32.xlu1 %v5155_v50  ;;  %v5846_v17 = vrot.slane %v5838_v42, %v10122_v8 }
0x3446   :  { %v6294_v46 = vpop.permute.xlu0 %6293 }
0x3447   :  { %v6302_v61 = vrot.slane %v6294_v46, %v10122_v8 }
0x344a   :  { %v5266_v2 = vpop.permute.xlu0 %5265 }
0x344b   :  { %v6406_v10 = vpop.xlane.xlu1 %6405  ;;  %v5274_v0 = vrot.slane %v5266_v2, %v10122_v8 }
0x344c   :  { %v10538_v43 = vadd.f32 %v6406_v10, %v10184_v33 }
0x344e   :  { %6415 = vperm.xlu0 %8265, %v10538_v43   ;;  %v6866_v49 = vpop.permute.xlu0 %6865 }
0x344f   :  { %v6874_v19 = vrot.slane %v6866_v49, %v10122_v8 }
0x3452   :  { %v6988_v50 = vpop.permute.xlu0 %6987 }
0x3453   :  { %v6996_v46 = vrot.slane %v6988_v50, %v10122_v8 }
0x346f   :  { %v5713_v56 = vpop.permute.xlu1 %5712 }
0x3470   :  { %v5720_v44 = vrot.slane %v5713_v56, %v10122_v8 }
0x3473   :  { %v5716_v12 = vpop.permute.xlu1 %5715 }
0x3474   :  { %v5724_v48 = vrot.slane %v5716_v12, %v10122_v8 }
0x3476   :  { %v5725_v41 = vsel %vm501_vm2, %v5724_v48, %v5720_v44 }
0x3477   :  { %v5835_v1 = vpop.permute.xlu1 %5834  ;;  %v5727_v29 = vsel %vm3935_vm0, %v5725_v41, -inf }
0x3478   :  { %v5842_v33 = vrot.slane %v5835_v1, %v10122_v8  ;;  %5728 = vmax.xlane.f32.xlu0 %v5727_v29 }
0x347a   :  { %v5847_v13 = vsel %vm501_vm2, %v5846_v17, %v5842_v33 }
0x347b   :  { %v6291_v31 = vpop.permute.xlu1 %6290  ;;  %v5849_v58 = vsel %vm4118_vm4, %v5847_v13, -inf }
0x347c   :  { %v6298_v27 = vrot.slane %v6291_v31, %v10122_v8  ;;  %5850 = vmax.xlane.f32.xlu0 %v5849_v58 }
0x347e   :  { %v6303_v24 = vsel %vm501_vm2, %v6302_v61, %v6298_v27 }
0x347f   :  { %v5263_v21 = vpop.permute.xlu1 %5262  ;;  %v6305_v5 = vsel %vm3935_vm0, %v6303_v24, -inf }
0x3480   :  { %v5270_v38 = vrot.slane %v5263_v21, %v10122_v8  ;;  %6306 = vmax.xlane.f32.xlu0 %v6305_v5 }
0x3482   :  { %v5275_v40 = vsel %vm501_vm2, %v5274_v0, %v5270_v38 }
0x3483   :  { %v6863_v23 = vpop.permute.xlu1 %6862  ;;  %v5277_v16 = vsel %vm4118_vm4, %v5275_v40, -inf }
0x3484   :  { %v6870_v34 = vrot.slane %v6863_v23, %v10122_v8  ;;  %5278 = vmax.xlane.f32.xlu1 %v5277_v16 }
0x3486   :  { %v6875_v10 = vsel %vm501_vm2, %v6874_v19, %v6870_v34 }
0x3487   :  { %v6985_v42 = vpop.permute.xlu1 %6984  ;;  %v6877_v56 = vsel %vm3935_vm0, %v6875_v10, -inf }
0x3488   :  { %v6992_v12 = vrot.slane %v6985_v42, %v10122_v8  ;;  %6878 = vmax.xlane.f32.xlu0 %v6877_v56 }
0x348a   :  { %v6997_v44 = vsel %vm501_vm2, %v6996_v46, %v6992_v12 }
0x348b   :  { %v6999_v48 = vsel %vm4118_vm4, %v6997_v44, -inf  ;;  %v6413_v41 = vpop.permute.xlu1 %6412 }
0x348c   :  { %7000 = vmax.xlane.f32.xlu1 %v6999_v48  ;;  %v6420_v29 = vrot.slane %v6413_v41, %v10122_v8 }
0x34c9   :  { %v6416_v1 = vpop.permute.xlu0 %6415 }
0x34ca   :  { %v6424_v17 = vrot.slane %v6416_v1, %v10122_v8 }
0x34cc   :  { %v5157_v33 = vpop.xlane.xlu1 %5156  ;;  %v6425_v2 = vsel %vm501_vm2, %v6424_v17, %v6420_v29 }
0x34cd   :  { %v5162_v13 = vrot.slane %v5157_v33, %v9114_v52  ;;  %v5166_v31 = vrot.slane %v5157_v33, %v8951_v22  ;;  %v6427_v58 = vsel %vm4118_vm4, %v6425_v2, -inf }
0x34ce   :  { %6428 = vmax.xlane.f32.xlu0 %v6427_v58 }
0x34cf   :  { %v5169_v61 = vsub.f32 %v10473_v18, %v5162_v13  ;;  %v5170_v27 = vsub.f32 %v10477_v25, %v5166_v31 }
0x34d1   :  { %v5171_v24 = vmul.f32 1.442695, %v5169_v61  ;;  %v5173_v49 = vmul.f32 1.442695, %v5170_v27 }
0x34d3   :  { %8717 = vpow2.f32 %v5171_v24 }
0x34d4   :  { %8719 = vpow2.f32 %v5173_v49 }
0x34e0   :  { %v8718_v21 = vpop.eup %8717 }
0x34e1   :  { %5178 = vperm.xlu1 %8266, %v8718_v21   ;;  %v10573_v5 = vpop.eup %8719 }
0x34e4   :  { %5181 = vperm.xlu0 %8265, %v10573_v5  }
0x3501   :  { %v5729_v0 = vpop.xlane.xlu0 %5728 }
0x3502   :  { %v5734_v17 = vrot.slane %v5729_v0, %v9114_v52 }
0x3504   :  { %v5741_v2 = vsub.f32 %v10502_v36, %v5734_v17 }
0x3505   :  { %v5851_v38 = vpop.xlane.xlu0 %5850 }
0x3506   :  { %v5743_v58 = vmul.f32 1.442695, %v5741_v2  ;;  %v5856_v61 = vrot.slane %v5851_v38, %v9114_v52  ;;  %v5860_v27 = vrot.slane %v5851_v38, %v8951_v22 }
0x3508   :  { %v5863_v49 = vsub.f32 %v10510_v4, %v5856_v61 }
0x3509   :  { %v6307_v40 = vpop.xlane.xlu0 %6306 }
0x350a   :  { %v6312_v36 = vrot.slane %v6307_v40, %v9114_v52 }
0x350d   :  { %v5279_v23 = vpop.xlane.xlu1 %5278 }
0x350e   :  { %v5284_v4 = vrot.slane %v5279_v23, %v9114_v52 }
0x3511   :  { %v10576_v16 = vpop.xlane.xlu0 %6878 }
0x3515   :  { %v10578_v19 = vpop.xlane.xlu1 %7000 }
0x3516   :  { %v7006_v18 = vrot.slane %v10578_v19, %v9114_v52 }
0x3518   :  { %v7013_v50 = vsub.f32 %v10526_v63, %v7006_v18  ;;  %v5864_v18 = vsub.f32 %v10482_v11, %v5860_v27 }
0x351a   :  { %v7015_v44 = vmul.f32 1.442695, %v7013_v50  ;;  %v5867_v50 = vmul.f32 1.442695, %v5864_v18 }
0x351c   :  { %8721 = vpow2.f32 %v7015_v44 }
0x3529   :  { %v10592_v63 = vpop.eup %8721 }
0x3557   :  { %v10582_v25 = vpop.xlane.xlu0 %6428 }
0x3558   :  { %v6434_v10 = vrot.slane %v10582_v25, %v9114_v52 }
0x355a   :  { %v6441_v48 = vsub.f32 %v10530_v6, %v6434_v10  ;;  %v5738_v6 = vrot.slane %v5729_v0, %v8951_v22  ;;  %v5865_v0 = vmul.f32 1.442695, %v5863_v49  ;;  %v6319_v10 = vsub.f32 %v10514_v62, %v6312_v36 }
0x355c   :  { %v5179_v34 = vpop.permute.xlu1 %5178  ;;  %v6443_v1 = vmul.f32 1.442695, %v6441_v48  ;;  %v5742_v31 = vsub.f32 %v10506_v53, %v5738_v6  ;;  %v6316_v53 = vrot.slane %v6307_v40, %v8951_v22  ;;  %v5291_v40 = vsub.f32 %v10518_v54, %v5284_v4 }
0x355d   :  { %v5186_v56 = vrot.slane %v5179_v34, %v10122_v8  ;;  %v6888_v54 = vrot.slane %v10576_v16, %v8951_v22  ;;  %v7010_v6 = vrot.slane %v10578_v19, %v8951_v22 }
0x355e   :  { %8723 = vpow2.f32 %v6443_v1  ;;  %v5745_v24 = vmul.f32 1.442695, %v5742_v31  ;;  %v6320_v38 = vsub.f32 %v10486_v14, %v6316_v53  ;;  %v5293_v62 = vmul.f32 1.442695, %v5291_v40 }
0x355f   :  { %v5182_v42 = vpop.permute.xlu0 %5181 }
0x3560   :  { %v5190_v46 = vrot.slane %v5182_v42, %v10122_v8 }
0x3562   :  { %v5191_v12 = vsel %vm501_vm2, %v5190_v46, %v5186_v56  ;;  %v6321_v56 = vmul.f32 1.442695, %v6319_v10  ;;  %v6323_v46 = vmul.f32 1.442695, %v6320_v38 }
0x3563   :  { %v5193_v41 = vsel %vm3935_vm0, %v5191_v12, 0.0  ;;  %v5288_v12 = vrot.slane %v5279_v23, %v8951_v22 }
0x3564   :  { %5194 = vadd.xlane.f32.xlu1 %v5193_v41 }
0x3565   :  { %v5292_v14 = vsub.f32 %v10490_v32, %v5288_v12  ;;  %v6892_v32 = vsub.f32 %v10494_v30, %v6888_v54 }
0x3567   :  { %v5295_v41 = vmul.f32 1.442695, %v5292_v14 }
0x356b   :  { %v10595_v29 = vpop.eup %8723 }
0x3575   :  { %7022 = vperm.xlu1 %8266, %v10592_v63  }
0x3579   :  { %6450 = vperm.xlu1 %8266, %v10595_v29  }
0x35ed   :  { %v10599_v33 = vpop.xlane.xlu1 %5194 }
0x35ee   :  { %v5200_v13 = vrot.slane %v10599_v33, %v9114_v52 }
0x35f0   :  { %8725 = vrcp.f32 %v5200_v13  ;;  %v6895_v13 = vmul.f32 1.442695, %v6892_v32 }
0x35f1   :  { %8727 = vpow2.f32 %v5743_v58  ;;  %v7023_v32 = vpop.permute.xlu1 %7022 }
0x35f2   :  { %8729 = vpow2.f32 %v5745_v24 }
0x35f3   :  { %8731 = vpow2.f32 %v5865_v0 }
0x35f4   :  { %8733 = vpow2.f32 %v5867_v50 }
0x35f5   :  { %8735 = vpow2.f32 %v6321_v56 }
0x35f6   :  { %8737 = vpow2.f32 %v6323_v46 }
0x35f7   :  { %8739 = vpow2.f32 %v5293_v62 }
0x35f8   :  { %8741 = vpow2.f32 %v5295_v41 }
0x35fd   :  { %v8726_v34 = vpop.eup %8725 }
0x35fe   :  { %v5208_v42 = vmul.f32 %v8726_v34, %v8718_v21  ;;  %v10615_v11 = vpop.eup %8727  ;;  %v6884_v21 = vrot.slane %v10576_v16, %v9114_v52  ;;  %v7014_v16 = vsub.f32 %v10498_v9, %v7010_v6 }
0x35ff   :  { %v10620_v44 = vpop.eup %8729 }
0x3600   :  { %5213 = vperm.xlu0 %8265, %v5208_v42   ;;  %v10626_v48 = vpop.eup %8731  ;;  %v6891_v23 = vsub.f32 %v10522_v7, %v6884_v21  ;;  %v6438_v7 = vrot.slane %v10582_v25, %v8951_v22  ;;  %v7017_v30 = vmul.f32 1.442695, %v7014_v16 }
0x3601   :  { %v10632_v1 = vpop.eup %8733 }
0x3602   :  { %v6893_v17 = vmul.f32 1.442695, %v6891_v23  ;;  %v10638_v2 = vpop.eup %8735  ;;  %v6442_v58 = vsub.f32 %v10538_v43, %v6438_v7 }
0x3603   :  { %v10644_v31 = vpop.eup %8737 }
0x3604   :  { %5750 = vperm.xlu0 %8265, %v10615_v11   ;;  %8743 = vpow2.f32 %v6893_v17  ;;  %v10648_v19 = vpop.eup %8739  ;;  %v6445_v61 = vmul.f32 1.442695, %v6442_v58 }
0x3605   :  { %8745 = vpow2.f32 %v6895_v13  ;;  %v10651_v27 = vpop.eup %8741 }
0x3606   :  { %8747 = vpow2.f32 %v7017_v30 }
0x3607   :  { %8749 = vpow2.f32 %v6445_v61 }
0x3608   :  { %5753 = vperm.xlu0 %8265, %v10620_v44  }
0x360c   :  { %5872 = vperm.xlu0 %8265, %v10626_v48  }
0x3610   :  { %5875 = vperm.xlu0 %8265, %v10632_v1  }
0x3611   :  { %v10654_v9 = vpop.eup %8743 }
0x3612   :  { %v10657_v25 = vpop.eup %8745 }
0x3613   :  { %v10660_v43 = vpop.eup %8747 }
0x3614   :  { %6328 = vperm.xlu0 %8265, %v10638_v2   ;;  %v10663_v24 = vpop.eup %8749 }
0x3618   :  { %6331 = vperm.xlu0 %8265, %v10644_v31  }
0x361c   :  { %5300 = vperm.xlu0 %8265, %v10648_v19  }
0x3620   :  { %5303 = vperm.xlu0 %8265, %v10651_v27  }
0x3624   :  { %6900 = vperm.xlu0 %8265, %v10654_v9  }
0x3628   :  { %6903 = vperm.xlu0 %8265, %v10657_v25  }
0x362c   :  { %7025 = vperm.xlu0 %8265, %v10660_v43  }
0x3630   :  { %6453 = vperm.xlu0 %8265, %v10663_v24  }
0x367b   :  { %v10666_v49 = vpop.permute.xlu0 %5213 }
0x367f   :  { %v5751_v18 = vpop.permute.xlu0 %5750 }
0x3680   :  { %v5758_v36 = vrot.slane %v5751_v18, %v10122_v8 }
0x3683   :  { %v5754_v0 = vpop.permute.xlu0 %5753 }
0x3684   :  { %v5762_v34 = vrot.slane %v5754_v0, %v10122_v8  ;;  %v7030_v0 = vrot.slane %v7023_v32, %v10122_v8 }
0x3686   :  { %v5763_v50 = vsel %vm501_vm2, %v5762_v34, %v5758_v36 }
0x3687   :  { %v5873_v53 = vpop.permute.xlu0 %5872  ;;  %v5765_v10 = vsel %vm3935_vm0, %v5763_v50, 0.0  ;;  %v6451_v50 = vpop.permute.xlu1 %6450 }
0x3688   :  { %5766 = vadd.xlane.f32.xlu1 %v5765_v10  ;;  %v5880_v62 = vrot.slane %v5873_v53, %v10122_v8  ;;  %v5204_v10 = vrot.slane %v10599_v33, %v8951_v22 }
0x368a   :  { %8751 = vrcp.f32 %v5204_v10 }
0x368b   :  { %v5876_v42 = vpop.permute.xlu0 %5875 }
0x368c   :  { %v5884_v12 = vrot.slane %v5876_v42, %v10122_v8 }
0x368e   :  { %v5885_v23 = vsel %vm501_vm2, %v5884_v12, %v5880_v62 }
0x368f   :  { %v6329_v38 = vpop.permute.xlu0 %6328  ;;  %v5887_v6 = vsel %vm4118_vm4, %v5885_v23, 0.0 }
0x3690   :  { %v6336_v30 = vrot.slane %v6329_v38, %v10122_v8 }
0x3693   :  { %v6332_v56 = vpop.permute.xlu0 %6331 }
0x3694   :  { %v6340_v13 = vrot.slane %v6332_v56, %v10122_v8 }
0x3696   :  { %v6341_v34 = vsel %vm501_vm2, %v6340_v13, %v6336_v30 }
0x3697   :  { %v5301_v4 = vpop.permute.xlu0 %5300  ;;  %v6343_v38 = vsel %vm3935_vm0, %v6341_v34, 0.0 }
0x3698   :  { %v5308_v40 = vrot.slane %v5301_v4, %v10122_v8  ;;  %v6458_v4 = vrot.slane %v6451_v50, %v10122_v8 }
0x369b   :  { %v5304_v46 = vpop.permute.xlu0 %5303 }
0x369c   :  { %v5312_v14 = vrot.slane %v5304_v46, %v10122_v8 }
0x369e   :  { %v5313_v21 = vsel %vm501_vm2, %v5312_v14, %v5308_v40  ;;  %v8752_v14 = vpop.eup %8751 }
0x369f   :  { %v6901_v41 = vpop.permute.xlu0 %6900  ;;  %v5315_v54 = vsel %vm4118_vm4, %v5313_v21, 0.0  ;;  %v5210_v33 = vmul.f32 %v8752_v14, %v10573_v5 }
0x36a0   :  { %5316 = vadd.xlane.f32.xlu0 %v5315_v54  ;;  %v6908_v16 = vrot.slane %v6901_v41, %v10122_v8  ;;  %v5221_v54 = vmul.f32 %v10666_v49, %v9951_v45 }
0x36a2   :  { %v5223_v32 = vsel %vm142_vm1, %v5221_v54, 0.0 }
0x36a3   :  { %v6904_v17 = vpop.permute.xlu0 %6903 }
0x36a4   :  { %v6912_v7 = vrot.slane %v6904_v17, %v10122_v8  ;;  %5888 = vadd.xlane.f32.xlu0 %v5887_v6  ;;  %v5224_v6 = vrot.slane %v5223_v32, 4 }
0x36a6   :  { %v6913_v58 = vsel %vm501_vm2, %v6912_v7, %v6908_v16  ;;  %v5225_v30 = vadd.f32 %v5224_v6, %v5223_v32 }
0x36a7   :  { %v7026_v61 = vpop.permute.xlu0 %7025  ;;  %v6915_v18 = vsel %vm3935_vm0, %v6913_v58, 0.0 }
0x36a8   :  { %v7034_v36 = vrot.slane %v7026_v61, %v10122_v8  ;;  %6916 = vadd.xlane.f32.xlu0 %v6915_v18  ;;  %v5226_v34 = vrot.slane %v5225_v30, 2 }
0x36aa   :  { %v7035_v53 = vsel %vm501_vm2, %v7034_v36, %v7030_v0 }
0x36ab   :  { %v6454_v42 = vpop.permute.xlu0 %6453  ;;  %v7037_v56 = vsel %vm4118_vm4, %v7035_v53, 0.0 }
0x36ac   :  { %v6462_v46 = vrot.slane %v6454_v42, %v10122_v8  ;;  %6344 = vadd.xlane.f32.xlu0 %v6343_v38  ;;  %7038 = vadd.xlane.f32.xlu1 %v7037_v56  ;;  %v5227_v42 = vadd.f32 %v5226_v34, %v5225_v30 }
0x36ae   :  { %v6463_v12 = vsel %vm501_vm2, %v6462_v46, %v6458_v4 }
0x36af   :  { %v6465_v40 = vsel %vm4118_vm4, %v6463_v12, 0.0 }
0x36b0   :  { %6466 = vadd.xlane.f32.xlu1 %v6465_v40 }
0x36c1   :  { %5218 = vperm.xlu1 %8266, %v5210_v33  }
0x3711   :  { %v5767_v23 = vpop.xlane.xlu1 %5766 }
0x3712   :  { %v5772_v61 = vrot.slane %v5767_v23, %v9114_v52  ;;  %v5776_v32 = vrot.slane %v5767_v23, %v8951_v22 }
0x3729   :  { %v5317_v62 = vpop.xlane.xlu0 %5316 }
0x372a   :  { %v5322_v21 = vrot.slane %v5317_v62, %v9114_v52  ;;  %v5326_v41 = vrot.slane %v5317_v62, %v8951_v22 }
0x372c   :  { %8753 = vrcp.f32 %v5322_v21 }
0x372d   :  { %8755 = vrcp.f32 %v5326_v41  ;;  %v5889_v18 = vpop.xlane.xlu0 %5888 }
0x372e   :  { %8757 = vrcp.f32 %v5772_v61  ;;  %v5894_v50 = vrot.slane %v5889_v18, %v9114_v52 }
0x3730   :  { %8759 = vrcp.f32 %v5894_v50 }
0x3731   :  { %v10720_v41 = vpop.xlane.xlu0 %6916  ;;  %8761 = vrcp.f32 %v5776_v32 }
0x3735   :  { %v10704_v17 = vpop.xlane.xlu1 %7038  ;;  %v10722_v54 = vpop.xlane.xlu0 %6344 }
0x3739   :  { %v8754_v13 = vpop.eup %8753  ;;  %v10706_v16 = vpop.xlane.xlu1 %6466 }
0x373a   :  { %v8756_v5 = vpop.eup %8755  ;;  %v5330_v7 = vmul.f32 %v8754_v13, %v10648_v19 }
0x373b   :  { %v5332_v58 = vmul.f32 %v8756_v5, %v10651_v27  ;;  %v5228_v27 = vrot.slane %v5227_v42, 1  ;;  %v8758_v40 = vpop.eup %8757 }
0x373c   :  { %5335 = vperm.xlu0 %8265, %v5330_v7   ;;  %v5780_v33 = vmul.f32 %v8758_v40, %v10615_v11 }
0x373d   :  { %5340 = vperm.xlu1 %8266, %v5332_v58   ;;  %v5219_v0 = vpop.permute.xlu1 %5218  ;;  %v5229_v46 = vadd.f32 %v5228_v27, %v5227_v42  ;;  %v8760_v62 = vpop.eup %8759  ;;  %v5898_v58 = vrot.slane %v5889_v18, %v8951_v22 }
0x373e   :  { %v5222_v36 = vmul.f32 %v5219_v0, %v9956_v26  ;;  %v5902_v21 = vmul.f32 %v8760_v62, %v10626_v48  ;;  %v5391_v6 = vrot.slane %v5219_v0, %v10122_v8  ;;  %v5387_v48 = vrot.slane %v10666_v49, %v10122_v8 }
0x373f   :  { %8763 = vrcp.f32 %v5898_v58 }
0x3740   :  { %v5230_v53 = vsel %vm142_vm1, %v5222_v36, 0.0  ;;  %v5392_v61 = vsel %vm501_vm2, %v5391_v6, %v5387_v48  ;;  %v11065_v6 = vld [vmem:[#allocation17_spill] sm:$0xff] }
0x3741   :  { %v5231_v10 = vrot.slane %v5230_v53, 4 }
0x3743   :  { %v5232_v19 = vadd.f32 %v5231_v10, %v5230_v53 }
0x3745   :  { %v5233_v38 = vrot.slane %v5232_v19, 2 }
0x3747   :  { %v5234_v56 = vadd.f32 %v5233_v38, %v5232_v19 }
0x3749   :  { %v5235_v4 = vrot.slane %v5234_v56, 1 }
0x374b   :  { %v5236_v12 = vadd.f32 %v5235_v4, %v5234_v56 }
0x374d   :  { %v5374_v14 = vsel %vm501_vm2, %v5236_v12, %v5229_v46  ;;  %v8762_v12 = vpop.eup %8761 }
0x374e   :  { %5375 = vrot.lane.b32.xlu1 %v5374_v14, %s8821_s16  ;;  %v5782_v14 = vmul.f32 %v8762_v12, %v10620_v44 }
0x3752   :  { %5785 = vperm.xlu1 %8266, %v5780_v33   ;;  %v8764_v33 = vpop.eup %8763 }
0x3753   :  { %v5904_v62 = vmul.f32 %v8764_v33, %v10632_v1  ;;  %v6922_v33 = vrot.slane %v10720_v41, %v9114_v52 }
0x3756   :  { %5907 = vperm.xlu1 %8266, %v5902_v21  }
0x375a   :  { %5932 = vrot.lane.b32.xlu1 %v9718_v37, %s8822_s17 }
0x37b7   :  { %v5336_v13 = vpop.permute.xlu0 %5335 }
0x37b8   :  { %v5343_v5 = vmul.f32 %v5336_v13, %v11054_v57  ;;  %v5397_v11 = vrot.slane %v5336_v13, %v10251_v28  ;;  %v5341_v7 = vpop.permute.xlu1 %5340  ;;  %v5404_v13 = vsel %vm142_vm1, %v9651_v47, %v11065_v6 }
0x37b9   :  { %v5344_v30 = vmul.f32 %v5341_v7, %v9981_v15  ;;  %v5401_v37 = vrot.slane %v5341_v7, %v10251_v28 }
0x37ba   :  { %v5345_v23 = vsel %vm4074_vm3, %v5343_v5, 0.0 }
0x37bb   :  { %v5346_v0 = vrot.slane %v5345_v23, 4  ;;  %v5352_v36 = vsel %vm4074_vm3, %v5344_v30, 0.0  ;;  %v5402_v34 = vsel %vm501_vm2, %v5401_v37, %v5397_v11 }
0x37bc   :  { %v5353_v50 = vrot.slane %v5352_v36, 4  ;;  %v5407_v53 = vsel %vm4251_vm5, %v5392_v61, %v5402_v34 }
0x37bd   :  { %v5347_v49 = vadd.f32 %v5346_v0, %v5345_v23  ;;  %v5408_v44 = vsel %vm4253_vm7, %v5407_v53, 0.0 }
0x37be   :  { %v5354_v10 = vadd.f32 %v5353_v50, %v5352_v36 }
0x37bf   :  { %v5348_v42 = vrot.slane %v5347_v49, 2 }
0x37c0   :  { %v5355_v19 = vrot.slane %v5354_v10, 2  ;;  %v5376_v21 = vpop.permute.xlu1 %5375 }
0x37c1   :  { %v5349_v38 = vadd.f32 %v5348_v42, %v5347_v49  ;;  %v5405_v5 = vsel %vm2589_vm14, %v5404_v13, %v5376_v21  ;;  %v6350_v49 = vrot.slane %v10722_v54, %v9114_v52 }
0x37c2   :  { %v5356_v27 = vadd.f32 %v5355_v19, %v5354_v10 }
0x37c3   :  { %v5350_v18 = vrot.slane %v5349_v38, 1  ;;  %8765 = vrcp.f32 %v6350_v49  ;;  %v7048_v49 = vrot.slane %v10704_v17, %v8951_v22 }
0x37c4   :  { %v5357_v56 = vrot.slane %v5356_v27, 1 }
0x37c5   :  { %v5351_v4 = vadd.f32 %v5350_v18, %v5349_v38 }
0x37c6   :  { %v5358_v46 = vadd.f32 %v5357_v56, %v5356_v27  ;;  %v6354_v27 = vrot.slane %v10722_v54, %v8951_v22 }
0x37c8   :  { %v5380_v40 = vsel %vm501_vm2, %v5358_v46, %v5351_v4  ;;  %v6472_v4 = vrot.slane %v10706_v16, %v9114_v52  ;;  %8767 = vrcp.f32 %v6354_v27 }
0x37c9   :  { %5381 = vrot.lane.b32.xlu0 %v5380_v40, %s8824_s23 }
0x37ca   :  { %8769 = vrcp.f32 %v6472_v4 }
0x37cb   :  { %8771 = vrcp.f32 %v6922_v33 }
0x37cd   :  { %5790 = vperm.xlu0 %8265, %v5782_v14   ;;  %v5786_v32 = vpop.permute.xlu1 %5785 }
0x37ce   :  { %v5793_v11 = vmul.f32 %v5786_v32, %v9951_v45  ;;  %v5962_v42 = vrot.slane %v5786_v32, %v10122_v8 }
0x37d0   :  { %v5795_v1 = vsel %vm142_vm1, %v5793_v11, 0.0 }
0x37d1   :  { %5912 = vperm.xlu0 %8265, %v5904_v62   ;;  %v5908_v48 = vpop.permute.xlu1 %5907  ;;  %v5796_v0 = vrot.slane %v5795_v1, 4 }
0x37d2   :  { %v5915_v58 = vmul.f32 %v5908_v48, %v11054_v57  ;;  %v5972_v62 = vrot.slane %v5908_v48, %v10251_v28 }
0x37d3   :  { %v5797_v50 = vadd.f32 %v5796_v0, %v5795_v1 }
0x37d4   :  { %v5917_v36 = vsel %vm4074_vm3, %v5915_v58, 0.0 }
0x37d5   :  { %v5918_v53 = vrot.slane %v5917_v36, 4  ;;  %v5798_v18 = vrot.slane %v5797_v50, 2 }
0x37d7   :  { %v5919_v56 = vadd.f32 %v5918_v53, %v5917_v36  ;;  %v5799_v32 = vadd.f32 %v5798_v18, %v5797_v50 }
0x37d9   :  { %v5920_v6 = vrot.slane %v5919_v56, 2  ;;  %v5800_v1 = vrot.slane %v5799_v32, 1 }
0x37db   :  { %v5921_v58 = vadd.f32 %v5920_v6, %v5919_v56  ;;  %v5801_v50 = vadd.f32 %v5800_v1, %v5799_v32 }
0x37dd   :  { %v5922_v36 = vrot.slane %v5921_v58, 1 }
0x383b   :  { %v5382_v7 = vpop.permute.xlu0 %5381 }
0x383c   :  { %v5406_v30 = vsel %vm4249_vm15, %v5405_v5, %v5382_v7  ;;  %v6476_v5 = vrot.slane %v10706_v16, %v8951_v22  ;;  %v7044_v16 = vrot.slane %v10704_v17, %v9114_v52 }
0x383d   :  { %v5411_v37 = vcombine.low %v5406_v30, %v5408_v44 }
0x383e   :  { %8773 = vrcp.f32 %v6476_v5 }
0x383f   :  { %v5418_v23 = vrot.slane %v5411_v37, %v11053_v55  ;;  %v6926_v37 = vrot.slane %v10720_v41, %v8951_v22  ;;  %v8766_v41 = vpop.eup %8765 }
0x3840   :  { %v6358_v27 = vmul.f32 %v8766_v41, %v10638_v2 }
0x3841   :  { %v5419_v61 = vcombine.high %v5418_v23, %v5418_v23  ;;  %v5426_v47 = vrot.slane %v5418_v23, %v11053_v55  ;;  %8775 = vrcp.f32 %v6926_v37 }
0x3842   :  { %8777 = vrcp.f32 %v7044_v16 }
0x3843   :  { %v5433_v34 = vrot.slane %v5419_v61, %v11053_v55  ;;  %5437 = vst.msk [vmem:[#allocation3 + $0x2] ss:$8 sm:$0x3] %vm10270_vm8, %v5426_v47  ;;  %8779 = vrcp.f32 %v7048_v49 }
0x3845   :  { %5440 = vst.msk [vmem:[#allocation3 + $0x12] ss:$8 sm:$0x3] %vm10270_vm8, %v5433_v34 }
0x3848   :  { %v5791_v10 = vpop.permute.xlu0 %5790 }
0x3849   :  { %v5794_v19 = vmul.f32 %v5791_v10, %v9956_v26  ;;  %v5966_v38 = vrot.slane %v5791_v10, %v10122_v8 }
0x384b   :  { %v5802_v46 = vsel %vm142_vm1, %v5794_v19, 0.0  ;;  %v5967_v12 = vsel %vm4780_vm6, %v5966_v38, %v5962_v42  ;;  %v5923_v19 = vadd.f32 %v5922_v36, %v5921_v58  ;;  %v8768_v38 = vpop.eup %8767 }
0x384c   :  { %v5803_v40 = vrot.slane %v5802_v46, 4  ;;  %v5913_v14 = vpop.permute.xlu0 %5912  ;;  %v8770_v18 = vpop.eup %8769  ;;  %v6360_v4 = vmul.f32 %v8768_v38, %v10644_v31 }
0x384d   :  { %v5916_v21 = vmul.f32 %v5913_v14, %v9981_v15  ;;  %v5976_v54 = vrot.slane %v5913_v14, %v10251_v28  ;;  %v8772_v22 = vpop.eup %8771  ;;  %v6480_v17 = vmul.f32 %v8770_v18, %v10595_v29  ;;  %v5933_v31 = vpop.permute.xlu1 %5932 }
0x384e   :  { %v5804_v13 = vadd.f32 %v5803_v40, %v5802_v46  ;;  %v8774_v46 = vpop.eup %8773  ;;  %v6930_v40 = vmul.f32 %v8772_v22, %v10654_v9  ;;  %v5979_v9 = vsel %vm142_vm1, %v5933_v31, %v9706_v59 }
0x384f   :  { %v5924_v11 = vsel %vm4074_vm3, %v5916_v21, 0.0  ;;  %v5977_v7 = vsel %vm4780_vm6, %v5976_v54, %v5972_v62  ;;  %v6482_v14 = vmul.f32 %v8774_v46, %v10663_v24 }
0x3850   :  { %v5805_v30 = vrot.slane %v5804_v13, 2  ;;  %v5925_v44 = vrot.slane %v5924_v11, 4  ;;  %v5982_v48 = vsel %vm4251_vm5, %v5967_v12, %v5977_v7  ;;  %v8776_v12 = vpop.eup %8775 }
0x3851   :  { %v8778_v2 = vpop.eup %8777  ;;  %v6932_v62 = vmul.f32 %v8776_v12, %v10657_v25  ;;  %v5983_v6 = vsel %vm4253_vm7, %v5982_v48, 0.0 }
0x3852   :  { %v5806_v23 = vadd.f32 %v5805_v30, %v5804_v13  ;;  %v5926_v61 = vadd.f32 %v5925_v44, %v5924_v11  ;;  %v7052_v33 = vmul.f32 %v8778_v2, %v10592_v63  ;;  %v8780_v21 = vpop.eup %8779 }
0x3853   :  { %v7054_v29 = vmul.f32 %v8780_v21, %v10660_v43 }
0x3854   :  { %v5807_v47 = vrot.slane %v5806_v23, 1  ;;  %v5927_v0 = vrot.slane %v5926_v61, 2 }
0x3856   :  { %v5928_v34 = vadd.f32 %v5927_v0, %v5926_v61  ;;  %v5808_v53 = vadd.f32 %v5807_v47, %v5806_v23 }
0x3858   :  { %v5929_v10 = vrot.slane %v5928_v34, 1  ;;  %v5949_v42 = vsel %vm4780_vm6, %v5808_v53, %v5801_v50 }
0x3859   :  { %5950 = vrot.lane.b32.xlu0 %v5949_v42, %s8821_s16 }
0x385a   :  { %v5930_v52 = vadd.f32 %v5929_v10, %v5928_v34 }
0x385c   :  { %v5955_v56 = vsel %vm4780_vm6, %v5930_v52, %v5923_v19 }
0x385d   :  { %6363 = vperm.xlu0 %8265, %v6358_v27   ;;  %5956 = vrot.lane.b32.xlu1 %v5955_v56, %s8824_s23 }
0x3861   :  { %6485 = vperm.xlu0 %8265, %v6480_v17   ;;  %6368 = vperm.xlu1 %8266, %v6360_v4  }
0x3865   :  { %6935 = vperm.xlu0 %8265, %v6930_v40   ;;  %6490 = vperm.xlu1 %8266, %v6482_v14  }
0x3869   :  { %7057 = vperm.xlu0 %8265, %v7052_v33   ;;  %6940 = vperm.xlu1 %8266, %v6932_v62  }
0x386d   :  { %7062 = vperm.xlu1 %8266, %v7054_v29  }
0x38cb   :  { %v5951_v54 = vpop.permute.xlu0 %5950 }
0x38cc   :  { %v5980_v24 = vsel %vm2589_vm14, %v5979_v9, %v5951_v54 }
0x38cf   :  { %v5957_v32 = vpop.permute.xlu1 %5956 }
0x38d0   :  { %v5981_v63 = vsel %vm4249_vm15, %v5980_v24, %v5957_v32 }
0x38d1   :  { %v5986_v13 = vcombine.low %v5981_v63, %v5983_v6 }
0x38d3   :  { %v5993_v25 = vrot.slane %v5986_v13, %v11053_v55 }
0x38d5   :  { %v5994_v5 = vcombine.high %v5993_v25, %v5993_v25  ;;  %v6001_v11 = vrot.slane %v5993_v25, %v11053_v55 }
0x38d7   :  { %v6008_v43 = vrot.slane %v5994_v5, %v11053_v55  ;;  %v6009_v7 = vcombine.high %v6001_v11, %v6001_v11 }
0x38d8   :  { %v6364_v30 = vpop.permute.xlu0 %6363 }
0x38d9   :  { %6013 = vst.msk [vmem:[#allocation3 + $0x3] ss:$8 sm:$0x3] %vm10270_vm8, %v6008_v43  ;;  %6016 = vst.msk [vmem:[#allocation3 + $0x13] ss:$8 sm:$0x3] %vm10270_vm8, %v6009_v7  ;;  %v6371_v59 = vmul.f32 %v6364_v30, %v9951_v45  ;;  %v6537_v58 = vrot.slane %v6364_v30, %v10122_v8 }
0x38db   :  { %v6373_v44 = vsel %vm142_vm1, %v6371_v59, 0.0 }
0x38dc   :  { %v6374_v48 = vrot.slane %v6373_v44, 4  ;;  %v6486_v37 = vpop.permute.xlu0 %6485  ;;  %v6369_v1 = vpop.permute.xlu1 %6368 }
0x38dd   :  { %v6493_v23 = vmul.f32 %v6486_v37, %v11054_v57  ;;  %v6372_v61 = vmul.f32 %v6369_v1, %v9956_v26  ;;  %v6541_v16 = vrot.slane %v6369_v1, %v10122_v8  ;;  %v6547_v42 = vrot.slane %v6486_v37, %v10251_v28 }
0x38de   :  { %v6375_v47 = vadd.f32 %v6374_v48, %v6373_v44 }
0x38df   :  { %v6495_v0 = vsel %vm4074_vm3, %v6493_v23, 0.0  ;;  %v6380_v36 = vsel %vm142_vm1, %v6372_v61, 0.0  ;;  %v6542_v34 = vsel %vm501_vm2, %v6541_v16, %v6537_v58 }
0x38e0   :  { %v6376_v50 = vrot.slane %v6375_v47, 2  ;;  %v6496_v53 = vrot.slane %v6495_v0, 4  ;;  %v6381_v49 = vrot.slane %v6380_v36, 4  ;;  %v6936_v41 = vpop.permute.xlu0 %6935  ;;  %v6491_v10 = vpop.permute.xlu1 %6490 }
0x38e1   :  { %v6943_v19 = vmul.f32 %v6936_v41, %v9951_v45  ;;  %v6494_v52 = vmul.f32 %v6491_v10, %v9981_v15  ;;  %v6551_v38 = vrot.slane %v6491_v10, %v10251_v28  ;;  %v7112_v24 = vrot.slane %v6936_v41, %v10122_v8 }
0x38e2   :  { %v6377_v27 = vadd.f32 %v6376_v50, %v6375_v47  ;;  %v6497_v18 = vadd.f32 %v6496_v53, %v6495_v0  ;;  %v6382_v56 = vadd.f32 %v6381_v49, %v6380_v36  ;;  %v102_v53 = vld [vmem:[%s11021_s6 + $0x168] sm:$0xff] }
0x38e3   :  { %v6945_v22 = vsel %vm142_vm1, %v6943_v19, 0.0  ;;  %v6502_v17 = vsel %vm4074_vm3, %v6494_v52, 0.0  ;;  %v6552_v4 = vsel %vm501_vm2, %v6551_v38, %v6547_v42  ;;  %8184 = vmatprep.subr.mxu0 %v102_v53 }
0x38e4   :  { %v6498_v46 = vrot.slane %v6497_v18, 2  ;;  %v6383_v12 = vrot.slane %v6382_v56, 2  ;;  %v6946_v40 = vrot.slane %v6945_v22, 4  ;;  %v10826_v14 = vpop.permute.xlu0 %7057  ;;  %v6941_v2 = vpop.permute.xlu1 %6940  ;;  %v6378_v45 = vrot.slane %v6377_v27, 1  ;;  %8185 = vmatpush3.msra.mxu0 %v102_v53 }
0x38e5   :  { %v6503_v33 = vrot.slane %v6502_v17, 4  ;;  %v7065_v62 = vmul.f32 %v10826_v14, %v11054_v57  ;;  %v6944_v21 = vmul.f32 %v6941_v2, %v9956_v26  ;;  %v7116_v9 = vrot.slane %v6941_v2, %v10122_v8  ;;  %v98_v2 = vld [vmem:[%s11021_s6 + $0x108] sm:$0xff] }
0x38e6   :  { %v6499_v29 = vadd.f32 %v6498_v46, %v6497_v18  ;;  %v6384_v31 = vadd.f32 %v6383_v12, %v6382_v56  ;;  %v6947_v54 = vadd.f32 %v6946_v40, %v6945_v22  ;;  %v6379_v59 = vadd.f32 %v6378_v45, %v6377_v27  ;;  %v101_v22 = vld [vmem:[%s11021_s6 + $0x150] sm:$0xff]  ;;  %v100_v46 = vld [vmem:[%s11021_s6 + $0x138] sm:$0xff] }
0x38e7   :  { %v6504_v32 = vadd.f32 %v6503_v33, %v6502_v17  ;;  %v7067_v6 = vsel %vm4074_vm3, %v7065_v62, 0.0  ;;  %v6952_v63 = vsel %vm142_vm1, %v6944_v21, 0.0  ;;  %v10838_v26 = vsel %vm4780_vm6, %v7116_v9, %v7112_v24  ;;  %8186 = vmatprep.subr.mxu0 %v101_v22  ;;  %v97_v33 = vld [vmem:[%s11021_s6 + $0xf0] sm:$0xff]  ;;  %v96_v62 = vld [vmem:[%s11021_s6 + $0xd8] sm:$0xff]  ;;  %v95_v21 = vld [vmem:[%s11021_s6 + $0xc0] sm:$0xff] }
0x38e8   :  { %v6385_v13 = vrot.slane %v6384_v31, 1  ;;  %v6948_v25 = vrot.slane %v6947_v54, 2  ;;  %v7068_v5 = vrot.slane %v7067_v6, 4  ;;  %v10835_v11 = vpop.permute.xlu1 %7062  ;;  %v6953_v43 = vrot.slane %v6952_v63, 4  ;;  %8187 = vmatpush3.msra.mxu0 %v101_v22  ;;  %v91_v9 = vld [vmem:[%s11021_s6 + $0x60] sm:$0xff]  ;;  %v90_v24 = vld [vmem:[%s11021_s6 + $0x48] sm:$0xff] }
0x38e9   :  { %v6505_v57 = vrot.slane %v6504_v32, 2  ;;  %v7066_v7 = vmul.f32 %v10835_v11, %v9981_v15  ;;  %v6500_v30 = vrot.slane %v6499_v29, 1  ;;  %v10845_v36 = vsel %vm4251_vm5, %v6542_v34, %v6552_v4  ;;  %8188 = vmatprep.subr.mxu0 %v100_v46 }
0x38ea   :  { %v7069_v8 = vadd.f32 %v7068_v5, %v7067_v6  ;;  %v6386_v44 = vadd.f32 %v6385_v13, %v6384_v31  ;;  %v6949_v48 = vadd.f32 %v6948_v25, %v6947_v54  ;;  %v6954_v1 = vadd.f32 %v6953_v43, %v6952_v63  ;;  %8189 = vmatpush3.msra.mxu0 %v100_v46  ;;  %v93_v31 = vld [vmem:[%s11021_s6 + $0x90] sm:$0xff]  ;;  %v92_v54 = vld [vmem:[%s11021_s6 + $0x78] sm:$0xff]  ;;  %v87_v63 = vld [vmem:[%s11021_s6] sm:$0xff] }
0x38eb   :  { %v6506_v37 = vadd.f32 %v6505_v57, %v6504_v32  ;;  %v7074_v58 = vsel %vm4074_vm3, %v7066_v7, 0.0  ;;  %v6501_v10 = vadd.f32 %v6500_v30, %v6499_v29  ;;  %v94_v29 = vld [vmem:[%s11021_s6 + $0xa8] sm:$0xff]  ;;  %v89_v32 = vld [vmem:[%s11021_s6 + $0x30] sm:$0xff]  ;;  %v88_v6 = vld [vmem:[%s11021_s6 + $0x18] sm:$0xff]  ;;  %v7126_v25 = vrot.slane %v10835_v11, %v10251_v28 }
0x38ec   :  { %v7070_v23 = vrot.slane %v7069_v8, 2  ;;  %v7075_v61 = vrot.slane %v7074_v58, 4  ;;  %v6955_v47 = vrot.slane %v6954_v1, 2  ;;  %v6524_v0 = vsel %vm501_vm2, %v6386_v44, %v6379_v59 }
0x38ed   :  { %v6507_v16 = vrot.slane %v6506_v37, 1  ;;  %6525 = vrot.lane.b32.xlu0 %v6524_v0, %s8821_s16  ;;  %v6950_v49 = vrot.slane %v6949_v48, 1  ;;  %v6554_v5 = vsel %vm142_vm1, %v9940_v35, %v9924_v3  ;;  %v7122_v57 = vrot.slane %v10826_v14, %v10251_v28 }
0x38ee   :  { %v7071_v50 = vadd.f32 %v7070_v23, %v7069_v8  ;;  %v7076_v15 = vadd.f32 %v7075_v61, %v7074_v58  ;;  %v6956_v41 = vadd.f32 %v6955_v47, %v6954_v1  ;;  %v6558_v30 = vsel %vm4253_vm7, %v10845_v36, 0.0 }
0x38ef   :  { %v6508_v42 = vadd.f32 %v6507_v16, %v6506_v37  ;;  %v6951_v18 = vadd.f32 %v6950_v49, %v6949_v48  ;;  %v7127_v59 = vsel %vm4780_vm6, %v7126_v25, %v7122_v57  ;;  %v118_v49 = vld [vmem:[%s11021_s6 + $0x170] sm:$0xff] }
0x38f0   :  { %v7077_v19 = vrot.slane %v7076_v15, 2  ;;  %v6957_v52 = vrot.slane %v6956_v41, 1  ;;  %v7072_v34 = vrot.slane %v7071_v50, 1  ;;  %v7132_v3 = vsel %vm4251_vm5, %v10838_v26, %v7127_v59  ;;  %8219 = vmatprep.subr.mxu1 %v118_v49 }
0x38f1   :  { %v6530_v38 = vsel %vm501_vm2, %v6508_v42, %v6501_v10  ;;  %7082 = vrot.lane.b32.xlu0 %v10191_v60, %s8822_s17  ;;  %v99_v60 = vld [vmem:[%s11021_s6 + $0x120] sm:$0xff]  ;;  %v7133_v16 = vsel %vm4253_vm7, %v7132_v3, 0.0  ;;  %v8274_v10 = vld [vmem:[#allocation3] ss:$8 sps:$4 sm:$0xff]   ;;  %8220 = vmatpush3.msra.mxu1 %v118_v49  ;;  %vm7411_vm2 = vcmask 326656  }
0x38f2   :  { %v7078_v27 = vadd.f32 %v7077_v19, %v7076_v15  ;;  %6531 = vrot.lane.b32.xlu1 %v6530_v38, %s8824_s23  ;;  %v6958_v56 = vadd.f32 %v6957_v52, %v6956_v41  ;;  %v7073_v12 = vadd.f32 %v7072_v34, %v7071_v50  ;;  %8190 = vmatprep.subr.mxu0 %v99_v60  ;;  %v8271_v15 = vld [vmem:[#allocation3 + $0x10] ss:$8 sps:$4 sm:$0xff]  }
0x38f3   :  { %8191 = vmatpush3.msra.mxu0 %v99_v60  ;;  %v7201_v41 = vrot.slane %v8271_v15, %v9242_v39  ;;  %v7184_v38 = vrot.slane %v8274_v10, %v9242_v39  ;;  %v113_v60 = vld [vmem:[%s11021_s6 + $0xf8] sm:$0xff] }
0x38f4   :  { %v7079_v17 = vrot.slane %v7078_v27, 1  ;;  %v7099_v4 = vsel %vm4780_vm6, %v6958_v56, %v6951_v18  ;;  %8192 = vmatprep.subr.mxu0 %v98_v2 }
0x38f5   :  { %8193 = vmatpush3.msra.mxu0 %v98_v2  ;;  %v7209_v52 = vcombine.high %v7201_v41, %v7201_v41  ;;  %v7192_v56 = vcombine.high %v7184_v38, %v7184_v38 }
0x38f6   :  { %7100 = vrot.lane.b32.xlu1 %v7099_v4, %s8821_s16  ;;  %v7080_v40 = vadd.f32 %v7079_v17, %v7078_v27  ;;  %8194 = vmatprep.subr.mxu0 %v97_v33  ;;  %v115_v27 = vld [vmem:[%s11021_s6 + $0x128] sm:$0xff]  ;;  %v114_v17 = vld [vmem:[%s11021_s6 + $0x110] sm:$0xff] }
0x38f7   :  { %8195 = vmatpush3.msra.mxu0 %v97_v33  ;;  %v7216_v46 = vcombine.low %v7184_v38, %v7192_v56 }
0x38f8   :  { %v7105_v45 = vsel %vm4780_vm6, %v7080_v40, %v7073_v12  ;;  %8196 = vmatprep.subr.mxu0 %v96_v62  ;;  %vm7414_vm6 = vcmask 375808  }
0x38f9   :  { %7106 = vrot.lane.b32.xlu0 %v7105_v45, %s8824_s23  ;;  %8197 = vmatpush3.msra.mxu0 %v96_v62  ;;  %v7224_v40 = vrot.slane %v7216_v46, %v9242_v39  ;;  %v112_v62 = vld [vmem:[%s11021_s6 + $0xe0] sm:$0xff] }
0x38fa   :  { %8198 = vmatprep.subr.mxu0 %v95_v21 }
0x38fb   :  { %8199 = vmatpush3.msra.mxu0 %v95_v21  ;;  %v111_v21 = vld [vmem:[%s11021_s6 + $0xc8] sm:$0xff] }
0x38fc   :  { %8200 = vmatprep.subr.mxu0 %v94_v29 }
0x38fd   :  { %8201 = vmatpush3.msra.mxu0 %v94_v29  ;;  %v110_v29 = vld [vmem:[%s11021_s6 + $0xb0] sm:$0xff] }
0x38fe   :  { %8202 = vmatprep.subr.mxu0 %v93_v31 }
0x38ff   :  { %8203 = vmatpush3.msra.mxu0 %v93_v31  ;;  %v109_v31 = vld [vmem:[%s11021_s6 + $0x98] sm:$0xff] }
0x3900   :  { %8204 = vmatprep.subr.mxu0 %v92_v54 }
0x3901   :  { %8205 = vmatpush3.msra.mxu0 %v92_v54  ;;  %v108_v54 = vld [vmem:[%s11021_s6 + $0x80] sm:$0xff] }
0x3902   :  { %8206 = vmatprep.subr.mxu0 %v91_v9 }
0x3903   :  { %8207 = vmatpush3.msra.mxu0 %v91_v9  ;;  %v107_v9 = vld [vmem:[%s11021_s6 + $0x68] sm:$0xff] }
0x3904   :  { %8208 = vmatprep.subr.mxu0 %v90_v24 }
0x3905   :  { %8209 = vmatpush3.msra.mxu0 %v90_v24  ;;  %v106_v24 = vld [vmem:[%s11021_s6 + $0x50] sm:$0xff] }
0x3906   :  { %8210 = vmatprep.subr.mxu0 %v89_v32 }
0x3907   :  { %8211 = vmatpush3.msra.mxu0 %v89_v32  ;;  %v105_v32 = vld [vmem:[%s11021_s6 + $0x38] sm:$0xff] }
0x3908   :  { %8212 = vmatprep.subr.mxu0 %v88_v6 }
0x3909   :  { %8213 = vmatpush3.msra.mxu0 %v88_v6  ;;  %v104_v6 = vld [vmem:[%s11021_s6 + $0x20] sm:$0xff] }
0x390a   :  { %8214 = vmatprep.subr.mxu0 %v87_v63 }
0x390b   :  { %8215 = vmatpush3.msra.mxu0 %v87_v63  ;;  %v103_v63 = vld [vmem:[%s11021_s6 + $0x8] sm:$0xff] }
0x395f   :  { %v6526_v13 = vpop.permute.xlu0 %6525 }
0x3960   :  { %v6555_v43 = vsel %vm2589_vm14, %v6554_v5, %v6526_v13  ;;  %v7585_v13 = vld [vmem:[%s11022_s7 + $0x9] ss:$0 sm:$0xff] }
0x3963   :  { %v7083_v48 = vpop.permute.xlu0 %7082 }
0x3964   :  { %v6532_v7 = vpop.permute.xlu1 %6531  ;;  %v7129_v35 = vsel %vm142_vm1, %v7083_v48, %v10170_v51 }
0x3965   :  { %v6556_v8 = vsel %vm4249_vm15, %v6555_v43, %v6532_v7 }
0x3966   :  { %v6561_v44 = vcombine.low %v6556_v8, %v6558_v30  ;;  %v7586_v8 = vld [vmem:[%s11022_s7 + $0xa] ss:$0 sm:$0xff] }
0x3968   :  { %v6568_v11 = vrot.slane %v6561_v44, %v11053_v55  ;;  %v7101_v37 = vpop.permute.xlu1 %7100 }
0x3969   :  { %v7130_v1 = vsel %vm2589_vm14, %v7129_v35, %v7101_v37 }
0x396a   :  { %v6569_v28 = vcombine.high %v6568_v11, %v6568_v11  ;;  %v6576_v14 = vrot.slane %v6568_v11, %v11053_v55 }
0x396b   :  { %v7107_v58 = vpop.permute.xlu0 %7106 }
0x396c   :  { %v6583_v23 = vrot.slane %v6569_v28, %v11053_v55  ;;  %6587 = vst.msk [vmem:[#allocation3 + $0x4] ss:$8 sm:$0x3] %vm10270_vm8, %v6576_v14  ;;  %v7131_v61 = vsel %vm4249_vm15, %v7130_v1, %v7107_v58 }
0x396d   :  { %v7136_v47 = vcombine.low %v7131_v61, %v7133_v16 }
0x396e   :  { %6590 = vst.msk [vmem:[#allocation3 + $0x14] ss:$8 sm:$0x3] %vm10270_vm8, %v6583_v23 }
0x396f   :  { %v7143_v51 = vrot.slane %v7136_v47, %v11053_v55 }
0x3971   :  { %v7144_v26 = vcombine.high %v7143_v51, %v7143_v51  ;;  %v7151_v0 = vrot.slane %v7143_v51, %v11053_v55 }
0x3973   :  { %v7158_v36 = vrot.slane %v7144_v26, %v11053_v55  ;;  %v7159_v50 = vcombine.high %v7151_v0, %v7151_v0  ;;  %v117_v55 = vld [vmem:[%s11021_s6 + $0x158] sm:$0xff] }
0x3974   :  { %8221 = vmatprep.subr.mxu1 %v117_v55 }
0x3975   :  { %7163 = vst.msk [vmem:[#allocation3 + $0x5] ss:$8 sm:$0x3] %vm10270_vm8, %v7158_v36  ;;  %7166 = vst.msk [vmem:[#allocation3 + $0x15] ss:$8 sm:$0x3] %vm10270_vm8, %v7159_v50  ;;  %8222 = vmatpush3.msra.mxu1 %v117_v55 }
0x3976   :  { %8223 = vmatprep.subr.mxu1 %v116_v20 }
0x3977   :  { %8224 = vmatpush3.msra.mxu1 %v116_v20 }
0x3978   :  { %8225 = vmatprep.subr.mxu1 %v115_v27 }
0x3979   :  { %8226 = vmatpush3.msra.mxu1 %v115_v27 }
0x397a   :  { %8227 = vmatprep.subr.mxu1 %v114_v17 }
0x397b   :  { %8228 = vmatpush3.msra.mxu1 %v114_v17 }
0x397c   :  { %v8273_v53 = vld [vmem:[#allocation3 + $0x14] ss:$8 sps:$4 sm:$0x33]   ;;  %v8276_v42 = vld [vmem:[#allocation3 + $0x4] ss:$8 sps:$4 sm:$0x33]   ;;  %8229 = vmatprep.subr.mxu1 %v113_v60 }
0x397d   :  { %v7208_v19 = vrot.slane %v8273_v53, %v9242_v39  ;;  %v7191_v34 = vrot.slane %v8276_v42, %v9242_v39  ;;  %8230 = vmatpush3.msra.mxu1 %v113_v60 }
0x397e   :  { %8231 = vmatprep.subr.mxu1 %v112_v62 }
0x397f   :  { %v7233_v18 = vcombine.low %v7209_v52, %v7208_v19  ;;  %v7217_v22 = vcombine.low %v7191_v34, %v7201_v41  ;;  %8232 = vmatpush3.msra.mxu1 %v112_v62 }
0x3980   :  { %8233 = vmatprep.subr.mxu1 %v111_v21 }
0x3981   :  { %v7240_v4 = vrot.slane %v7233_v18, %v9242_v39  ;;  %v7231_v2 = vrot.slane %v7217_v22, %v9242_v39  ;;  %8234 = vmatpush3.msra.mxu1 %v111_v21 }
0x3982   :  { %8235 = vmatprep.subr.mxu1 %v110_v29 }
0x3983   :  { %v7402_v12 = vcombine.high %v7240_v4, %v7240_v4  ;;  %v7401_v45 = vcombine.high %v7224_v40, %v7231_v2  ;;  %v7232_v33 = vcombine.low %v7224_v40, %v7231_v2  ;;  %8236 = vmatpush3.msra.mxu1 %v110_v29 }
0x3984   :  { %8237 = vmatprep.subr.mxu1 %v109_v31 }
0x3985   :  { %7405 = vrot.lane.b32.xlu0 %v7402_v12, %s8822_s17  ;;  %7403 = vrot.lane.b32.xlu1 %v7401_v45, %s8822_s17 }
0x3986   :  { %8216 = vmatprep.mubr.f32.mxu0 %v7232_v33  ;;  %8238 = vmatpush3.msra.mxu1 %v109_v31 }
0x3987   :  { %8217 = vmatmul.mubr.f32.vlgmr.msra.gmra.mxu0 %v7240_v4  ;;  %8239 = vmatprep.subr.mxu1 %v108_v54 }
0x3988   :  { %8240 = vmatpush3.msra.mxu1 %v108_v54 }
0x3989   :  { %8241 = vmatprep.subr.mxu1 %v107_v9 }
0x398a   :  { %8242 = vmatpush3.msra.mxu1 %v107_v9 }
0x398b   :  { %8243 = vmatprep.subr.mxu1 %v106_v24 }
0x398c   :  { %8244 = vmatpush3.msra.mxu1 %v106_v24 }
0x398d   :  { %8245 = vmatprep.subr.mxu1 %v105_v32 }
0x398e   :  { %8246 = vmatpush3.msra.mxu1 %v105_v32 }
0x398f   :  { %8247 = vmatprep.subr.mxu1 %v104_v6 }
0x3990   :  { %8248 = vmatpush3.msra.mxu1 %v104_v6 }
0x3991   :  { %8249 = vmatprep.subr.mxu1 %v103_v63 }
0x3992   :  { %8250 = vmatpush3.msra.mxu1 %v103_v63 }
0x39f7   :  { %v7406_v48 = vpop.permute.xlu0 %7405  ;;  %v7404_v35 = vpop.permute.xlu1 %7403 }
0x3a47   :  { %v8218_v25 = vpop.f32.mrf.mxu0 }
0x3a48   :  { %v7315_v5 = vadd.f32 %v8218_v25, %v7585_v13 }
0x3a49   :  { %v7309_v57 = vpop.f32.mrf.mxu0 }
0x3a4a   :  { %v7310_v43 = vadd.f32 %v7585_v13, %v7309_v57  ;;  %v7319_v30 = vmax.f32 %v7315_v5, 0.0 }
0x3a4c   :  { %v7318_v7 = vmax.f32 %v7310_v43, 0.0 }
0x3a4e   :  { %8251 = vmatprep.mubr.f32.mxu1 %v7318_v7 }
0x3a4f   :  { %8252 = vmatmul.mubr.f32.vlgmr.msra.gmra.mxu1 %v7319_v30 }
0x3b0f   :  { %v8253_v59 = vpop.f32.mrf.mxu1 }
0x3b10   :  { %v7398_v44 = vadd.f32 %v8253_v59, %v7586_v8 }
0x3b11   :  { %v7392_v11 = vpop.f32.mrf.mxu1 }
0x3b12   :  { %v7410_v37 = vsel %vm142_vm1, %v7398_v44, %v7406_v48  ;;  %v7393_v3 = vadd.f32 %v7586_v8, %v7392_v11 }
0x3b13   :  { %v7413_v28 = vsel %vm7411_vm2, %v7410_v37, %v7406_v48 }
0x3b14   :  { %v7416_v14 = vsel %vm7414_vm6, %v7413_v28, 0.0  ;;  %v7409_v1 = vsel %vm142_vm1, %v7393_v3, %v7404_v35 }
0x3b15   :  { %v7412_v58 = vsel %vm7411_vm2, %v7409_v1, %v7404_v35  ;;  %v7442_v61 = vrot.slane %v7416_v14, %v9242_v39 }
0x3b16   :  { %v7415_v23 = vsel %vm7414_vm6, %v7412_v58, 0.0 }
0x3b17   :  { %v7419_v16 = vcombine.high %v7415_v23, %v7415_v23  ;;  %v7426_v47 = vrot.slane %v7415_v23, %v9242_v39  ;;  %v7443_v0 = vcombine.high %v7442_v61, %v7442_v61 }
0x3b19   :  { %v7433_v51 = vrot.slane %v7419_v16, %v9242_v39  ;;  %v7434_v26 = vcombine.high %v7426_v47, %v7426_v47  ;;  %v7474_v41 = vrot.slane %v7443_v0, %v9242_v39 }
0x3b1b   :  { %v7435_v36 = vcombine.high %v7433_v51, %v7433_v51  ;;  %v7444_v50 = vcombine.low %v7426_v47, %v7434_v26  ;;  %v7458_v53 = vrot.slane %v7433_v51, %v9242_v39 }
0x3b1d   :  { %v7451_v15 = vrot.slane %v7444_v50, %v9242_v39  ;;  %v7460_v49 = vcombine.low %v7435_v36, %v7442_v61 }
0x3b1f   :  { %v7459_v10 = vcombine.low %v7451_v15, %v7458_v53  ;;  %v7467_v55 = vrot.slane %v7460_v49, %v9242_v39 }
0x3b21   :  { %v7475_v42 = vcombine.low %v7467_v55, %v7474_v41  ;;  %7478 = vst [vmem:[%s11023_s8] sm:$0x3f] %v7459_v10 }
0x3b23   :  { %7479 = vst [vmem:[%s11023_s8 + $0x8] sm:$0x3f] %v7475_v42 }
0x3b24   :  { %7484 = vsyncpa [#allocation5], 1 }

</bundles_post_ra>
